<compile_context>
chip_gen: v6e
topology: v6e:2x2x1
jax: 0.10.0
libtpu: 0.0.40
codegen_flags: <defaults>
</compile_context>

<pallas_src>
import functools

import jax
import jax.numpy as jnp
from jax import lax
from jax.experimental import pallas as pl
from jax.experimental.pallas import tpu as pltpu

EPS = 1e-5


# ----------------------------------------------------------------------------
# Conv3d 3x3x3 (padding=1) over the flat halo-padded layout
# + fused per-plane BN sum / sum-of-squares.
# ----------------------------------------------------------------------------
def _conv_kernel(x0_ref, x1_ref, x2_ref, w_ref, b_ref,
                 y_ref, ps_ref, pq_ref, *, W, L):
    # x{0,1,2}_ref : (P_in, Cin)   flat padded planes at depth d-1, d, d+1
    # w_ref        : (3, 3, 3, Cin, Cout)
    # b_ref        : (1, Cout) f32
    # y_ref        : (L, Cout)     raw conv output rows o = h*(W+2)+w
    # ps_ref/pq_ref: (1, Cout)     per-plane sum / sum of squares (valid cols)
    row_pitch = W + 2
    cout = y_ref.shape[-1]
    acc = jnp.zeros((L, cout), jnp.float32)
    for kd, p_ref in enumerate((x0_ref, x1_ref, x2_ref)):
        for kh in range(3):
            for kw in range(3):
                off = kh * row_pitch + kw
                seg = p_ref[off:off + L, :]                 # (L, Cin) bf16
                acc += jnp.dot(seg, w_ref[kd, kh, kw],
                               preferred_element_type=jnp.float32)
    acc = acc + b_ref[...]
    y_ref[...] = acc.astype(y_ref.dtype)

    # BN statistics over the valid columns only (w < W).
    col = lax.broadcasted_iota(jnp.int32, (L, 1), 0) % row_pitch
    am = jnp.where(col < W, acc, 0.0)
    ps_ref[...] = jnp.sum(am, axis=0, keepdims=True)
    pq_ref[...] = jnp.sum(am * am, axis=0, keepdims=True)


def _plane_spec(p_in, cin, kd):
    return pl.BlockSpec((None, None, p_in, cin),
                        lambda n, d: (n, d + kd, 0, 0))


def conv3d_flat(a, w, b, *, H, W):
    # a: (N, D+2, (H+3)*(W+2), Cin) bf16 fully padded flat activation.
    # w: (3, 3, 3, Cin, Cout) f32 ; b: (Cout,) f32
    N, Dp2, P_in, Cin = a.shape
    D = Dp2 - 2
    Cout = w.shape[-1]
    L = H * (W + 2)
    kern = functools.partial(_conv_kernel, W=W, L=L)
    y, ps, pq = pl.pallas_call(
        kern,
        out_shape=(
            jax.ShapeDtypeStruct((N, D, L, Cout), jnp.bfloat16),
            jax.ShapeDtypeStruct((N, D, 1, Cout), jnp.float32),
            jax.ShapeDtypeStruct((N, D, 1, Cout), jnp.float32),
        ),
        grid=(N, D),
        in_specs=[
            _plane_spec(P_in, Cin, 0),
            _plane_spec(P_in, Cin, 1),
            _plane_spec(P_in, Cin, 2),
            pl.BlockSpec((3, 3, 3, Cin, Cout), lambda n, d: (0, 0, 0, 0, 0)),
            pl.BlockSpec((1, Cout), lambda n, d: (0, 0)),
        ],
        out_specs=(
            pl.BlockSpec((None, None, L, Cout), lambda n, d: (n, d, 0, 0)),
            pl.BlockSpec((None, None, 1, Cout), lambda n, d: (n, d, 0, 0)),
            pl.BlockSpec((None, None, 1, Cout), lambda n, d: (n, d, 0, 0)),
        ),
        compiler_params=pltpu.CompilerParams(
            dimension_semantics=("parallel", "parallel"),
            vmem_limit_bytes=64 * 1024 * 1024),
    )(a, a, a, w.astype(jnp.bfloat16), b.reshape(1, Cout).astype(jnp.float32))
    return y, ps, pq


def _bn_scale_shift(psum, pssq, gamma, beta, count):
    # Global (N, D, H, W) batch statistics, biased variance (training mode).
    mean = jnp.sum(psum, axis=(0, 1, 2)) / count
    var = jnp.maximum(jnp.sum(pssq, axis=(0, 1, 2)) / count - mean * mean, 0.0)
    scale = gamma * lax.rsqrt(var + EPS)
    shift = beta - mean * scale
    return scale, shift


# ----------------------------------------------------------------------------
# BN + ReLU, written straight into the padded flat layout of the next conv.
# ----------------------------------------------------------------------------
def _bn_relu_pad_kernel(x_ref, s_ref, t_ref, o_ref, *, W, L, pad_lo, D):
    dd = pl.program_id(1)
    o_ref[...] = jnp.zeros_like(o_ref)          # halo rows / cols / planes = 0

    @pl.when((dd >= 1) & (dd <= D))
    def _():
        x = x_ref[...].astype(jnp.float32)      # (L, C)
        y = jnp.maximum(x * s_ref[...] + t_ref[...], 0.0)
        col = lax.broadcasted_iota(jnp.int32, (L, 1), 0) % (W + 2)
        y = jnp.where(col < W, y, 0.0)          # zero the pad columns
        o_ref[pad_lo:pad_lo + L, :] = y.astype(o_ref.dtype)


def bn_relu_to_padded(y, scale, shift, *, H, W):
    # y: (N, D, H*(W+2), C) raw conv output -> (N, D+2, (H+3)*(W+2), C) bf16
    N, D, L, C = y.shape
    P_in = (H + 3) * (W + 2)
    pad_lo = W + 3
    kern = functools.partial(_bn_relu_pad_kernel, W=W, L=L, pad_lo=pad_lo, D=D)
    return pl.pallas_call(
        kern,
        out_shape=jax.ShapeDtypeStruct((N, D + 2, P_in, C), jnp.bfloat16),
        grid=(N, D + 2),
        in_specs=[
            pl.BlockSpec(
                (None, None, L, C),
                lambda n, dd: (n, jnp.minimum(jnp.maximum(dd - 1, 0), D - 1),
                               0, 0)),
            pl.BlockSpec((1, C), lambda n, dd: (0, 0)),
            pl.BlockSpec((1, C), lambda n, dd: (0, 0)),
        ],
        out_specs=pl.BlockSpec((None, None, P_in, C),
                               lambda n, dd: (n, dd, 0, 0)),
        compiler_params=pltpu.CompilerParams(
            dimension_semantics=("parallel", "parallel")),
    )(y, scale.reshape(1, C), shift.reshape(1, C))


# ----------------------------------------------------------------------------
# Plain BN + ReLU on the flat layout (depth == 3 path: no max-pool).
# ----------------------------------------------------------------------------
def _bn_relu_kernel(x_ref, s_ref, t_ref, o_ref):
    x = x_ref[...].astype(jnp.float32)
    o_ref[...] = jnp.maximum(x * s_ref[...] + t_ref[...], 0.0).astype(o_ref.dtype)


def bn_relu_flat(y, scale, shift, out_dtype):
    N, D, L, C = y.shape
    return pl.pallas_call(
        _bn_relu_kernel,
        out_shape=jax.ShapeDtypeStruct((N, D, L, C), out_dtype),
        grid=(N, D),
        in_specs=[
            pl.BlockSpec((None, None, L, C), lambda n, d: (n, d, 0, 0)),
            pl.BlockSpec((1, C), lambda n, d: (0, 0)),
            pl.BlockSpec((1, C), lambda n, d: (0, 0)),
        ],
        out_specs=pl.BlockSpec((None, None, L, C), lambda n, d: (n, d, 0, 0)),
        compiler_params=pltpu.CompilerParams(
            dimension_semantics=("parallel", "parallel")),
    )(y, scale.reshape(1, C), shift.reshape(1, C))


# ----------------------------------------------------------------------------
# Fused BN + ReLU + MaxPool3d(2).  W-pairs are folded into the lane dimension
# by a free XLA reshape so the in-kernel pooling only touches leading dims and
# static lane halves.
# ----------------------------------------------------------------------------
def _bn_relu_pool_kernel(x_ref, s_ref, t_ref, obp_ref, pool_ref, *, C, Wh):
    x = x_ref[...].astype(jnp.float32)                    # (2, H, Wp2, 2C)
    y = jnp.maximum(x * s_ref[...] + t_ref[...], 0.0)
    obp_ref[...] = y.astype(obp_ref.dtype)

    m = jnp.maximum(y[0], y[1])                           # D-pair  (H, Wp2, 2C)
    hh = m.shape[0] // 2
    mr = m.reshape(hh, 2, m.shape[1], m.shape[2])
    m = jnp.maximum(mr[:, 0], mr[:, 1])                   # H-pair  (H/2, Wp2, 2C)
    m = m[:, :Wh, :]                                      # drop pad-column pair
    pool_ref[...] = jnp.maximum(m[..., :C], m[..., C:]).astype(pool_ref.dtype)


def bn_relu_maxpool(y, scale, shift, *, H, W):
    # y: (N, D, H*(W+2), C) raw conv output.
    N, D, L, C = y.shape
    Wp2 = (W + 2) // 2
    Wh = W // 2
    C2 = 2 * C
    xr = y.reshape(N, D, H, Wp2, C2)                      # free reshape
    s2 = jnp.concatenate([scale, scale]).reshape(1, C2)
    t2 = jnp.concatenate([shift, shift]).reshape(1, C2)
    kern = functools.partial(_bn_relu_pool_kernel, C=C, Wh=Wh)
    obp, pooled = pl.pallas_call(
        kern,
        out_shape=(
            jax.ShapeDtypeStruct((N, D, H, Wp2, C2), jnp.float32),
            jax.ShapeDtypeStruct((N, D // 2, H // 2, Wh, C), jnp.float32),
        ),
        grid=(N, D // 2),
        in_specs=[
            pl.BlockSpec((None, 2, H, Wp2, C2), lambda n, dp: (n, dp, 0, 0, 0)),
            pl.BlockSpec((1, C2), lambda n, dp: (0, 0)),
            pl.BlockSpec((1, C2), lambda n, dp: (0, 0)),
        ],
        out_specs=(
            pl.BlockSpec((None, 2, H, Wp2, C2), lambda n, dp: (n, dp, 0, 0, 0)),
            pl.BlockSpec((None, None, H // 2, Wh, C),
                         lambda n, dp: (n, dp, 0, 0, 0)),
        ),
        compiler_params=pltpu.CompilerParams(
            dimension_semantics=("parallel", "parallel")),
    )(xr, s2, t2)
    return obp, pooled


# ----------------------------------------------------------------------------
# DownTransition forward
# ----------------------------------------------------------------------------
def down_transition(x_ncdhw, params, depth):
    x = jnp.transpose(x_ncdhw, (0, 2, 3, 4, 1))           # NCDHW -> NDHWC
    N, D, H, W, Cin = x.shape
    count = float(N * D * H * W)

    # Single pad of the (small) network input into the flat halo layout.
    xpad = jnp.pad(x.astype(jnp.bfloat16),
                   ((0, 0), (1, 1), (1, 2), (1, 1), (0, 0)))
    a0 = xpad.reshape(N, D + 2, (H + 3) * (W + 2), Cin)

    # LUConv 1
    y1, ps1, pq1 = conv3d_flat(a0, params["w1"], params["b1"], H=H, W=W)
    s1, t1 = _bn_scale_shift(ps1, pq1, params["g1"], params["beta1"], count)
    a1 = bn_relu_to_padded(y1, s1, t1, H=H, W=W)          # conv-2 input, padded

    # LUConv 2
    y2, ps2, pq2 = conv3d_flat(a1, params["w2"], params["b2"], H=H, W=W)
    s2, t2 = _bn_scale_shift(ps2, pq2, params["g2"], params["beta2"], count)

    if depth == 3:
        obp_f = bn_relu_flat(y2, s2, t2, jnp.float32)
        obp = obp_f.reshape(N, D, H, W + 2, -1)[:, :, :, :W, :]
        out = obp
    else:
        obp_p, out = bn_relu_maxpool(y2, s2, t2, H=H, W=W)
        obp = obp_p.reshape(N, D, H, W + 2, -1)[:, :, :, :W, :]

    to_ncdhw = lambda t: jnp.transpose(t, (0, 4, 1, 2, 3))
    return to_ncdhw(out), to_ncdhw(obp)


def init_params(key, in_channel, depth):
    c1 = 32 * 2 ** depth
    c2 = c1 * 2
    ks = jax.random.split(key, 8)

    def conv_w(k, cin, cout):
        scale = 1.0 / jnp.sqrt(cin * 27.0)
        return jax.random.uniform(k, (3, 3, 3, cin, cout), jnp.float32, -scale, scale)

    return dict(
        w1=conv_w(ks[0], in_channel, c1),
        b1=jax.random.uniform(ks[1], (c1,), jnp.float32, -0.1, 0.1),
        g1=1.0 + 0.1 * jax.random.normal(ks[2], (c1,), jnp.float32),
        beta1=0.1 * jax.random.normal(ks[3], (c1,), jnp.float32),
        w2=conv_w(ks[4], c1, c2),
        b2=jax.random.uniform(ks[5], (c2,), jnp.float32, -0.1, 0.1),
        g2=1.0 + 0.1 * jax.random.normal(ks[6], (c2,), jnp.float32),
        beta2=0.1 * jax.random.normal(ks[7], (c2,), jnp.float32),
    )


# Pure-JAX f32 reference (correctness check only).
def _reference(x_ncdhw, params, depth):
    def conv(x, w, b):
        return lax.conv_general_dilated(
            x, w, window_strides=(1, 1, 1), padding="SAME",
            dimension_numbers=("NDHWC", "DHWIO", "NDHWC")) + b

    def bn_relu(x, g, bta):
        m = jnp.mean(x, axis=(0, 1, 2, 3), keepdims=True)
        v = jnp.mean((x - m) ** 2, axis=(0, 1, 2, 3), keepdims=True)
        return jnp.maximum((x - m) * lax.rsqrt(v + EPS) * g + bta, 0.0)

    x = jnp.transpose(x_ncdhw, (0, 2, 3, 4, 1))
    y = bn_relu(conv(x, params["w1"], params["b1"]), params["g1"], params["beta1"])
    y = bn_relu(conv(y, params["w2"], params["b2"]), params["g2"], params["beta2"])
    obp = y
    out = obp if depth == 3 else lax.reduce_window(
        obp, -jnp.inf, lax.max, (1, 2, 2, 2, 1), (1, 2, 2, 2, 1), "VALID")
    t = lambda a: jnp.transpose(a, (0, 4, 1, 2, 3))
    return t(out), t(obp)


if __name__ == "__main__":
    key = jax.random.PRNGKey(0)
    kx, kp = jax.random.split(key)
    in_channel, depth = 4, 0          # ops: 4 -> 32 -> 64 channels, maxpool applied
    N, D, H, W = 2, 8, 8, 8
    x = jax.random.normal(kx, (N, in_channel, D, H, W), jnp.float32)
    params = init_params(kp, in_channel, depth)

    fwd = jax.jit(functools.partial(down_transition, depth=depth))
    out, out_before_pool = fwd(x, params)
    jax.block_until_ready((out, out_before_pool))

    assert out.shape == (N, 64, D // 2, H // 2, W // 2)
    assert out_before_pool.shape == (N, 64, D, H, W)

    ref_out, ref_obp = _reference(x, params, depth)

    # bf16 MXU operands + bf16 inter-layer activations (f32 accumulation) give
    # ~0.5% relative error per conv/BN layer; tolerances sized accordingly.
    def _rms(a):
        return jnp.sqrt(jnp.mean(jnp.square(a)))

    assert _rms(out - ref_out) / _rms(ref_out) < 1e-2
    assert _rms(out_before_pool - ref_obp) / (_rms(ref_obp) + 1e-6) < 1e-2
    assert jnp.allclose(out, ref_out, rtol=2e-2, atol=4e-2)
    assert jnp.allclose(out_before_pool, ref_obp, rtol=2e-2, atol=4e-2)

    print("KERNEL_OK")
</pallas_src>

<mosaic_0001>
module attributes {stable_mosaic.version = 11 : i64} {
  func.func @_conv_kernel(%arg0: i32, %arg1: i32, %arg2: memref<1x1x110x4xbf16, #tpu.memory_space<vmem>>, %arg3: memref<1x1x110x4xbf16, #tpu.memory_space<vmem>>, %arg4: memref<1x1x110x4xbf16, #tpu.memory_space<vmem>>, %arg5: memref<3x3x3x4x32xbf16, #tpu.memory_space<vmem>>, %arg6: memref<1x32xf32, #tpu.memory_space<vmem>>, %arg7: memref<1x1x80x32xbf16, #tpu.memory_space<vmem>>, %arg8: memref<1x1x1x32xf32, #tpu.memory_space<vmem>>, %arg9: memref<1x1x1x32xf32, #tpu.memory_space<vmem>>) attributes {dimension_semantics = [#tpu.dimension_semantics<parallel>, #tpu.dimension_semantics<parallel>], iteration_bounds = array<i64: 2, 8>, scalar_prefetch = 0 : i64, scratch_operands = 0 : i64, tpu.core_type = #tpu.core_type<tc>, window_params = [{transform_indices = @transform_0, window_bounds = array<i64: 1, 1, 110, 4>}, {transform_indices = @transform_1, window_bounds = array<i64: 1, 1, 110, 4>}, {transform_indices = @transform_2, window_bounds = array<i64: 1, 1, 110, 4>}, {pipeline_mode = #tpu.pipeline_mode<synchronous>, transform_indices = @transform_3, window_bounds = array<i64: 3, 3, 3, 4, 32>}, {pipeline_mode = #tpu.pipeline_mode<synchronous>, transform_indices = @transform_4, window_bounds = array<i64: 1, 32>}, {transform_indices = @transform_5, window_bounds = array<i64: 1, 1, 80, 32>}, {transform_indices = @transform_6, window_bounds = array<i64: 1, 1, 1, 32>}, {transform_indices = @transform_7, window_bounds = array<i64: 1, 1, 1, 32>}]} {
    %cst = arith.constant 0.000000e+00 : f32
    %0 = vector.broadcast %cst : f32 to vector<80x32xf32>
    %c0 = arith.constant 0 : index
    %c0_0 = arith.constant 0 : index
    %c0_1 = arith.constant 0 : index
    %c0_2 = arith.constant 0 : index
    %1 = vector.load %arg2[%c0, %c0_0, %c0_1, %c0_2] : memref<1x1x110x4xbf16, #tpu.memory_space<vmem>>, vector<1x1x80x4xbf16>
    %2 = vector.shape_cast %1 : vector<1x1x80x4xbf16> to vector<80x4xbf16>
    %c0_3 = arith.constant 0 : index
    %c0_4 = arith.constant 0 : index
    %c0_5 = arith.constant 0 : index
    %c0_6 = arith.constant 0 : index
    %c0_7 = arith.constant 0 : index
    %3 = vector.load %arg5[%c0_3, %c0_4, %c0_5, %c0_6, %c0_7] : memref<3x3x3x4x32xbf16, #tpu.memory_space<vmem>>, vector<1x1x1x4x32xbf16>
    %4 = vector.shape_cast %3 : vector<1x1x1x4x32xbf16> to vector<4x32xbf16>
    %cst_8 = arith.constant dense<0.000000e+00> : vector<80x32xf32>
    %5 = tpu.matmul %2, %4, %cst_8 {dimension_numbers = #tpu.dot_dimension_numbers<[1], [0], [0], [1], [0, 0, 1, 1], [], []>} : vector<80x4xbf16>, vector<4x32xbf16>, vector<80x32xf32> -> vector<80x32xf32>
    %6 = arith.addf %0, %5 : vector<80x32xf32>
    %c0_9 = arith.constant 0 : index
    %c0_10 = arith.constant 0 : index
    %c1 = arith.constant 1 : index
    %c0_11 = arith.constant 0 : index
    %7 = vector.load %arg2[%c0_9, %c0_10, %c1, %c0_11] : memref<1x1x110x4xbf16, #tpu.memory_space<vmem>>, vector<1x1x80x4xbf16>
    %8 = vector.shape_cast %7 : vector<1x1x80x4xbf16> to vector<80x4xbf16>
    %c0_12 = arith.constant 0 : index
    %c0_13 = arith.constant 0 : index
    %c1_14 = arith.constant 1 : index
    %c0_15 = arith.constant 0 : index
    %c0_16 = arith.constant 0 : index
    %9 = vector.load %arg5[%c0_12, %c0_13, %c1_14, %c0_15, %c0_16] : memref<3x3x3x4x32xbf16, #tpu.memory_space<vmem>>, vector<1x1x1x4x32xbf16>
    %10 = vector.shape_cast %9 : vector<1x1x1x4x32xbf16> to vector<4x32xbf16>
    %cst_17 = arith.constant dense<0.000000e+00> : vector<80x32xf32>
    %11 = tpu.matmul %8, %10, %cst_17 {dimension_numbers = #tpu.dot_dimension_numbers<[1], [0], [0], [1], [0, 0, 1, 1], [], []>} : vector<80x4xbf16>, vector<4x32xbf16>, vector<80x32xf32> -> vector<80x32xf32>
    %12 = arith.addf %6, %11 : vector<80x32xf32>
    %c0_18 = arith.constant 0 : index
    %c0_19 = arith.constant 0 : index
    %c2 = arith.constant 2 : index
    %c0_20 = arith.constant 0 : index
    %13 = vector.load %arg2[%c0_18, %c0_19, %c2, %c0_20] : memref<1x1x110x4xbf16, #tpu.memory_space<vmem>>, vector<1x1x80x4xbf16>
    %14 = vector.shape_cast %13 : vector<1x1x80x4xbf16> to vector<80x4xbf16>
    %c0_21 = arith.constant 0 : index
    %c0_22 = arith.constant 0 : index
    %c2_23 = arith.constant 2 : index
    %c0_24 = arith.constant 0 : index
    %c0_25 = arith.constant 0 : index
    %15 = vector.load %arg5[%c0_21, %c0_22, %c2_23, %c0_24, %c0_25] : memref<3x3x3x4x32xbf16, #tpu.memory_space<vmem>>, vector<1x1x1x4x32xbf16>
    %16 = vector.shape_cast %15 : vector<1x1x1x4x32xbf16> to vector<4x32xbf16>
    %cst_26 = arith.constant dense<0.000000e+00> : vector<80x32xf32>
    %17 = tpu.matmul %14, %16, %cst_26 {dimension_numbers = #tpu.dot_dimension_numbers<[1], [0], [0], [1], [0, 0, 1, 1], [], []>} : vector<80x4xbf16>, vector<4x32xbf16>, vector<80x32xf32> -> vector<80x32xf32>
    %18 = arith.addf %12, %17 : vector<80x32xf32>
    %c0_27 = arith.constant 0 : index
    %c0_28 = arith.constant 0 : index
    %c10 = arith.constant 10 : index
    %c0_29 = arith.constant 0 : index
    %19 = vector.load %arg2[%c0_27, %c0_28, %c10, %c0_29] : memref<1x1x110x4xbf16, #tpu.memory_space<vmem>>, vector<1x1x80x4xbf16>
    %20 = vector.shape_cast %19 : vector<1x1x80x4xbf16> to vector<80x4xbf16>
    %c0_30 = arith.constant 0 : index
    %c1_31 = arith.constant 1 : index
    %c0_32 = arith.constant 0 : index
    %c0_33 = arith.constant 0 : index
    %c0_34 = arith.constant 0 : index
    %21 = vector.load %arg5[%c0_30, %c1_31, %c0_32, %c0_33, %c0_34] : memref<3x3x3x4x32xbf16, #tpu.memory_space<vmem>>, vector<1x1x1x4x32xbf16>
    %22 = vector.shape_cast %21 : vector<1x1x1x4x32xbf16> to vector<4x32xbf16>
    %cst_35 = arith.constant dense<0.000000e+00> : vector<80x32xf32>
    %23 = tpu.matmul %20, %22, %cst_35 {dimension_numbers = #tpu.dot_dimension_numbers<[1], [0], [0], [1], [0, 0, 1, 1], [], []>} : vector<80x4xbf16>, vector<4x32xbf16>, vector<80x32xf32> -> vector<80x32xf32>
    %24 = arith.addf %18, %23 : vector<80x32xf32>
    %c0_36 = arith.constant 0 : index
    %c0_37 = arith.constant 0 : index
    %c11 = arith.constant 11 : index
    %c0_38 = arith.constant 0 : index
    %25 = vector.load %arg2[%c0_36, %c0_37, %c11, %c0_38] : memref<1x1x110x4xbf16, #tpu.memory_space<vmem>>, vector<1x1x80x4xbf16>
    %26 = vector.shape_cast %25 : vector<1x1x80x4xbf16> to vector<80x4xbf16>
    %c0_39 = arith.constant 0 : index
    %c1_40 = arith.constant 1 : index
    %c1_41 = arith.constant 1 : index
    %c0_42 = arith.constant 0 : index
    %c0_43 = arith.constant 0 : index
    %27 = vector.load %arg5[%c0_39, %c1_40, %c1_41, %c0_42, %c0_43] : memref<3x3x3x4x32xbf16, #tpu.memory_space<vmem>>, vector<1x1x1x4x32xbf16>
    %28 = vector.shape_cast %27 : vector<1x1x1x4x32xbf16> to vector<4x32xbf16>
    %cst_44 = arith.constant dense<0.000000e+00> : vector<80x32xf32>
    %29 = tpu.matmul %26, %28, %cst_44 {dimension_numbers = #tpu.dot_dimension_numbers<[1], [0], [0], [1], [0, 0, 1, 1], [], []>} : vector<80x4xbf16>, vector<4x32xbf16>, vector<80x32xf32> -> vector<80x32xf32>
    %30 = arith.addf %24, %29 : vector<80x32xf32>
    %c0_45 = arith.constant 0 : index
    %c0_46 = arith.constant 0 : index
    %c12 = arith.constant 12 : index
    %c0_47 = arith.constant 0 : index
    %31 = vector.load %arg2[%c0_45, %c0_46, %c12, %c0_47] : memref<1x1x110x4xbf16, #tpu.memory_space<vmem>>, vector<1x1x80x4xbf16>
    %32 = vector.shape_cast %31 : vector<1x1x80x4xbf16> to vector<80x4xbf16>
    %c0_48 = arith.constant 0 : index
    %c1_49 = arith.constant 1 : index
    %c2_50 = arith.constant 2 : index
    %c0_51 = arith.constant 0 : index
    %c0_52 = arith.constant 0 : index
    %33 = vector.load %arg5[%c0_48, %c1_49, %c2_50, %c0_51, %c0_52] : memref<3x3x3x4x32xbf16, #tpu.memory_space<vmem>>, vector<1x1x1x4x32xbf16>
    %34 = vector.shape_cast %33 : vector<1x1x1x4x32xbf16> to vector<4x32xbf16>
    %cst_53 = arith.constant dense<0.000000e+00> : vector<80x32xf32>
    %35 = tpu.matmul %32, %34, %cst_53 {dimension_numbers = #tpu.dot_dimension_numbers<[1], [0], [0], [1], [0, 0, 1, 1], [], []>} : vector<80x4xbf16>, vector<4x32xbf16>, vector<80x32xf32> -> vector<80x32xf32>
    %36 = arith.addf %30, %35 : vector<80x32xf32>
    %c0_54 = arith.constant 0 : index
    %c0_55 = arith.constant 0 : index
    %c20 = arith.constant 20 : index
    %c0_56 = arith.constant 0 : index
    %37 = vector.load %arg2[%c0_54, %c0_55, %c20, %c0_56] : memref<1x1x110x4xbf16, #tpu.memory_space<vmem>>, vector<1x1x80x4xbf16>
    %38 = vector.shape_cast %37 : vector<1x1x80x4xbf16> to vector<80x4xbf16>
    %c0_57 = arith.constant 0 : index
    %c2_58 = arith.constant 2 : index
    %c0_59 = arith.constant 0 : index
    %c0_60 = arith.constant 0 : index
    %c0_61 = arith.constant 0 : index
    %39 = vector.load %arg5[%c0_57, %c2_58, %c0_59, %c0_60, %c0_61] : memref<3x3x3x4x32xbf16, #tpu.memory_space<vmem>>, vector<1x1x1x4x32xbf16>
    %40 = vector.shape_cast %39 : vector<1x1x1x4x32xbf16> to vector<4x32xbf16>
    %cst_62 = arith.constant dense<0.000000e+00> : vector<80x32xf32>
    %41 = tpu.matmul %38, %40, %cst_62 {dimension_numbers = #tpu.dot_dimension_numbers<[1], [0], [0], [1], [0, 0, 1, 1], [], []>} : vector<80x4xbf16>, vector<4x32xbf16>, vector<80x32xf32> -> vector<80x32xf32>
    %42 = arith.addf %36, %41 : vector<80x32xf32>
    %c0_63 = arith.constant 0 : index
    %c0_64 = arith.constant 0 : index
    %c21 = arith.constant 21 : index
    %c0_65 = arith.constant 0 : index
    %43 = vector.load %arg2[%c0_63, %c0_64, %c21, %c0_65] : memref<1x1x110x4xbf16, #tpu.memory_space<vmem>>, vector<1x1x80x4xbf16>
    %44 = vector.shape_cast %43 : vector<1x1x80x4xbf16> to vector<80x4xbf16>
    %c0_66 = arith.constant 0 : index
    %c2_67 = arith.constant 2 : index
    %c1_68 = arith.constant 1 : index
    %c0_69 = arith.constant 0 : index
    %c0_70 = arith.constant 0 : index
    %45 = vector.load %arg5[%c0_66, %c2_67, %c1_68, %c0_69, %c0_70] : memref<3x3x3x4x32xbf16, #tpu.memory_space<vmem>>, vector<1x1x1x4x32xbf16>
    %46 = vector.shape_cast %45 : vector<1x1x1x4x32xbf16> to vector<4x32xbf16>
    %cst_71 = arith.constant dense<0.000000e+00> : vector<80x32xf32>
    %47 = tpu.matmul %44, %46, %cst_71 {dimension_numbers = #tpu.dot_dimension_numbers<[1], [0], [0], [1], [0, 0, 1, 1], [], []>} : vector<80x4xbf16>, vector<4x32xbf16>, vector<80x32xf32> -> vector<80x32xf32>
    %48 = arith.addf %42, %47 : vector<80x32xf32>
    %c0_72 = arith.constant 0 : index
    %c0_73 = arith.constant 0 : index
    %c22 = arith.constant 22 : index
    %c0_74 = arith.constant 0 : index
    %49 = vector.load %arg2[%c0_72, %c0_73, %c22, %c0_74] : memref<1x1x110x4xbf16, #tpu.memory_space<vmem>>, vector<1x1x80x4xbf16>
    %50 = vector.shape_cast %49 : vector<1x1x80x4xbf16> to vector<80x4xbf16>
    %c0_75 = arith.constant 0 : index
    %c2_76 = arith.constant 2 : index
    %c2_77 = arith.constant 2 : index
    %c0_78 = arith.constant 0 : index
    %c0_79 = arith.constant 0 : index
    %51 = vector.load %arg5[%c0_75, %c2_76, %c2_77, %c0_78, %c0_79] : memref<3x3x3x4x32xbf16, #tpu.memory_space<vmem>>, vector<1x1x1x4x32xbf16>
    %52 = vector.shape_cast %51 : vector<1x1x1x4x32xbf16> to vector<4x32xbf16>
    %cst_80 = arith.constant dense<0.000000e+00> : vector<80x32xf32>
    %53 = tpu.matmul %50, %52, %cst_80 {dimension_numbers = #tpu.dot_dimension_numbers<[1], [0], [0], [1], [0, 0, 1, 1], [], []>} : vector<80x4xbf16>, vector<4x32xbf16>, vector<80x32xf32> -> vector<80x32xf32>
    %54 = arith.addf %48, %53 : vector<80x32xf32>
    %c0_81 = arith.constant 0 : index
    %c0_82 = arith.constant 0 : index
    %c0_83 = arith.constant 0 : index
    %c0_84 = arith.constant 0 : index
    %55 = vector.load %arg3[%c0_81, %c0_82, %c0_83, %c0_84] : memref<1x1x110x4xbf16, #tpu.memory_space<vmem>>, vector<1x1x80x4xbf16>
    %56 = vector.shape_cast %55 : vector<1x1x80x4xbf16> to vector<80x4xbf16>
    %c1_85 = arith.constant 1 : index
    %c0_86 = arith.constant 0 : index
    %c0_87 = arith.constant 0 : index
    %c0_88 = arith.constant 0 : index
    %c0_89 = arith.constant 0 : index
    %57 = vector.load %arg5[%c1_85, %c0_86, %c0_87, %c0_88, %c0_89] : memref<3x3x3x4x32xbf16, #tpu.memory_space<vmem>>, vector<1x1x1x4x32xbf16>
    %58 = vector.shape_cast %57 : vector<1x1x1x4x32xbf16> to vector<4x32xbf16>
    %cst_90 = arith.constant dense<0.000000e+00> : vector<80x32xf32>
    %59 = tpu.matmul %56, %58, %cst_90 {dimension_numbers = #tpu.dot_dimension_numbers<[1], [0], [0], [1], [0, 0, 1, 1], [], []>} : vector<80x4xbf16>, vector<4x32xbf16>, vector<80x32xf32> -> vector<80x32xf32>
    %60 = arith.addf %54, %59 : vector<80x32xf32>
    %c0_91 = arith.constant 0 : index
    %c0_92 = arith.constant 0 : index
    %c1_93 = arith.constant 1 : index
    %c0_94 = arith.constant 0 : index
    %61 = vector.load %arg3[%c0_91, %c0_92, %c1_93, %c0_94] : memref<1x1x110x4xbf16, #tpu.memory_space<vmem>>, vector<1x1x80x4xbf16>
    %62 = vector.shape_cast %61 : vector<1x1x80x4xbf16> to vector<80x4xbf16>
    %c1_95 = arith.constant 1 : index
    %c0_96 = arith.constant 0 : index
    %c1_97 = arith.constant 1 : index
    %c0_98 = arith.constant 0 : index
    %c0_99 = arith.constant 0 : index
    %63 = vector.load %arg5[%c1_95, %c0_96, %c1_97, %c0_98, %c0_99] : memref<3x3x3x4x32xbf16, #tpu.memory_space<vmem>>, vector<1x1x1x4x32xbf16>
    %64 = vector.shape_cast %63 : vector<1x1x1x4x32xbf16> to vector<4x32xbf16>
    %cst_100 = arith.constant dense<0.000000e+00> : vector<80x32xf32>
    %65 = tpu.matmul %62, %64, %cst_100 {dimension_numbers = #tpu.dot_dimension_numbers<[1], [0], [0], [1], [0, 0, 1, 1], [], []>} : vector<80x4xbf16>, vector<4x32xbf16>, vector<80x32xf32> -> vector<80x32xf32>
    %66 = arith.addf %60, %65 : vector<80x32xf32>
    %c0_101 = arith.constant 0 : index
    %c0_102 = arith.constant 0 : index
    %c2_103 = arith.constant 2 : index
    %c0_104 = arith.constant 0 : index
    %67 = vector.load %arg3[%c0_101, %c0_102, %c2_103, %c0_104] : memref<1x1x110x4xbf16, #tpu.memory_space<vmem>>, vector<1x1x80x4xbf16>
    %68 = vector.shape_cast %67 : vector<1x1x80x4xbf16> to vector<80x4xbf16>
    %c1_105 = arith.constant 1 : index
    %c0_106 = arith.constant 0 : index
    %c2_107 = arith.constant 2 : index
    %c0_108 = arith.constant 0 : index
    %c0_109 = arith.constant 0 : index
    %69 = vector.load %arg5[%c1_105, %c0_106, %c2_107, %c0_108, %c0_109] : memref<3x3x3x4x32xbf16, #tpu.memory_space<vmem>>, vector<1x1x1x4x32xbf16>
    %70 = vector.shape_cast %69 : vector<1x1x1x4x32xbf16> to vector<4x32xbf16>
    %cst_110 = arith.constant dense<0.000000e+00> : vector<80x32xf32>
    %71 = tpu.matmul %68, %70, %cst_110 {dimension_numbers = #tpu.dot_dimension_numbers<[1], [0], [0], [1], [0, 0, 1, 1], [], []>} : vector<80x4xbf16>, vector<4x32xbf16>, vector<80x32xf32> -> vector<80x32xf32>
    %72 = arith.addf %66, %71 : vector<80x32xf32>
    %c0_111 = arith.constant 0 : index
    %c0_112 = arith.constant 0 : index
    %c10_113 = arith.constant 10 : index
    %c0_114 = arith.constant 0 : index
    %73 = vector.load %arg3[%c0_111, %c0_112, %c10_113, %c0_114] : memref<1x1x110x4xbf16, #tpu.memory_space<vmem>>, vector<1x1x80x4xbf16>
    %74 = vector.shape_cast %73 : vector<1x1x80x4xbf16> to vector<80x4xbf16>
    %c1_115 = arith.constant 1 : index
    %c1_116 = arith.constant 1 : index
    %c0_117 = arith.constant 0 : index
    %c0_118 = arith.constant 0 : index
    %c0_119 = arith.constant 0 : index
    %75 = vector.load %arg5[%c1_115, %c1_116, %c0_117, %c0_118, %c0_119] : memref<3x3x3x4x32xbf16, #tpu.memory_space<vmem>>, vector<1x1x1x4x32xbf16>
    %76 = vector.shape_cast %75 : vector<1x1x1x4x32xbf16> to vector<4x32xbf16>
    %cst_120 = arith.constant dense<0.000000e+00> : vector<80x32xf32>
    %77 = tpu.matmul %74, %76, %cst_120 {dimension_numbers = #tpu.dot_dimension_numbers<[1], [0], [0], [1], [0, 0, 1, 1], [], []>} : vector<80x4xbf16>, vector<4x32xbf16>, vector<80x32xf32> -> vector<80x32xf32>
    %78 = arith.addf %72, %77 : vector<80x32xf32>
    %c0_121 = arith.constant 0 : index
    %c0_122 = arith.constant 0 : index
    %c11_123 = arith.constant 11 : index
    %c0_124 = arith.constant 0 : index
    %79 = vector.load %arg3[%c0_121, %c0_122, %c11_123, %c0_124] : memref<1x1x110x4xbf16, #tpu.memory_space<vmem>>, vector<1x1x80x4xbf16>
    %80 = vector.shape_cast %79 : vector<1x1x80x4xbf16> to vector<80x4xbf16>
    %c1_125 = arith.constant 1 : index
    %c1_126 = arith.constant 1 : index
    %c1_127 = arith.constant 1 : index
    %c0_128 = arith.constant 0 : index
    %c0_129 = arith.constant 0 : index
    %81 = vector.load %arg5[%c1_125, %c1_126, %c1_127, %c0_128, %c0_129] : memref<3x3x3x4x32xbf16, #tpu.memory_space<vmem>>, vector<1x1x1x4x32xbf16>
    %82 = vector.shape_cast %81 : vector<1x1x1x4x32xbf16> to vector<4x32xbf16>
    %cst_130 = arith.constant dense<0.000000e+00> : vector<80x32xf32>
    %83 = tpu.matmul %80, %82, %cst_130 {dimension_numbers = #tpu.dot_dimension_numbers<[1], [0], [0], [1], [0, 0, 1, 1], [], []>} : vector<80x4xbf16>, vector<4x32xbf16>, vector<80x32xf32> -> vector<80x32xf32>
    %84 = arith.addf %78, %83 : vector<80x32xf32>
    %c0_131 = arith.constant 0 : index
    %c0_132 = arith.constant 0 : index
    %c12_133 = arith.constant 12 : index
    %c0_134 = arith.constant 0 : index
    %85 = vector.load %arg3[%c0_131, %c0_132, %c12_133, %c0_134] : memref<1x1x110x4xbf16, #tpu.memory_space<vmem>>, vector<1x1x80x4xbf16>
    %86 = vector.shape_cast %85 : vector<1x1x80x4xbf16> to vector<80x4xbf16>
    %c1_135 = arith.constant 1 : index
    %c1_136 = arith.constant 1 : index
    %c2_137 = arith.constant 2 : index
    %c0_138 = arith.constant 0 : index
    %c0_139 = arith.constant 0 : index
    %87 = vector.load %arg5[%c1_135, %c1_136, %c2_137, %c0_138, %c0_139] : memref<3x3x3x4x32xbf16, #tpu.memory_space<vmem>>, vector<1x1x1x4x32xbf16>
    %88 = vector.shape_cast %87 : vector<1x1x1x4x32xbf16> to vector<4x32xbf16>
    %cst_140 = arith.constant dense<0.000000e+00> : vector<80x32xf32>
    %89 = tpu.matmul %86, %88, %cst_140 {dimension_numbers = #tpu.dot_dimension_numbers<[1], [0], [0], [1], [0, 0, 1, 1], [], []>} : vector<80x4xbf16>, vector<4x32xbf16>, vector<80x32xf32> -> vector<80x32xf32>
    %90 = arith.addf %84, %89 : vector<80x32xf32>
    %c0_141 = arith.constant 0 : index
    %c0_142 = arith.constant 0 : index
    %c20_143 = arith.constant 20 : index
    %c0_144 = arith.constant 0 : index
    %91 = vector.load %arg3[%c0_141, %c0_142, %c20_143, %c0_144] : memref<1x1x110x4xbf16, #tpu.memory_space<vmem>>, vector<1x1x80x4xbf16>
    %92 = vector.shape_cast %91 : vector<1x1x80x4xbf16> to vector<80x4xbf16>
    %c1_145 = arith.constant 1 : index
    %c2_146 = arith.constant 2 : index
    %c0_147 = arith.constant 0 : index
    %c0_148 = arith.constant 0 : index
    %c0_149 = arith.constant 0 : index
    %93 = vector.load %arg5[%c1_145, %c2_146, %c0_147, %c0_148, %c0_149] : memref<3x3x3x4x32xbf16, #tpu.memory_space<vmem>>, vector<1x1x1x4x32xbf16>
    %94 = vector.shape_cast %93 : vector<1x1x1x4x32xbf16> to vector<4x32xbf16>
    %cst_150 = arith.constant dense<0.000000e+00> : vector<80x32xf32>
    %95 = tpu.matmul %92, %94, %cst_150 {dimension_numbers = #tpu.dot_dimension_numbers<[1], [0], [0], [1], [0, 0, 1, 1], [], []>} : vector<80x4xbf16>, vector<4x32xbf16>, vector<80x32xf32> -> vector<80x32xf32>
    %96 = arith.addf %90, %95 : vector<80x32xf32>
    %c0_151 = arith.constant 0 : index
    %c0_152 = arith.constant 0 : index
    %c21_153 = arith.constant 21 : index
    %c0_154 = arith.constant 0 : index
    %97 = vector.load %arg3[%c0_151, %c0_152, %c21_153, %c0_154] : memref<1x1x110x4xbf16, #tpu.memory_space<vmem>>, vector<1x1x80x4xbf16>
    %98 = vector.shape_cast %97 : vector<1x1x80x4xbf16> to vector<80x4xbf16>
    %c1_155 = arith.constant 1 : index
    %c2_156 = arith.constant 2 : index
    %c1_157 = arith.constant 1 : index
    %c0_158 = arith.constant 0 : index
    %c0_159 = arith.constant 0 : index
    %99 = vector.load %arg5[%c1_155, %c2_156, %c1_157, %c0_158, %c0_159] : memref<3x3x3x4x32xbf16, #tpu.memory_space<vmem>>, vector<1x1x1x4x32xbf16>
    %100 = vector.shape_cast %99 : vector<1x1x1x4x32xbf16> to vector<4x32xbf16>
    %cst_160 = arith.constant dense<0.000000e+00> : vector<80x32xf32>
    %101 = tpu.matmul %98, %100, %cst_160 {dimension_numbers = #tpu.dot_dimension_numbers<[1], [0], [0], [1], [0, 0, 1, 1], [], []>} : vector<80x4xbf16>, vector<4x32xbf16>, vector<80x32xf32> -> vector<80x32xf32>
    %102 = arith.addf %96, %101 : vector<80x32xf32>
    %c0_161 = arith.constant 0 : index
    %c0_162 = arith.constant 0 : index
    %c22_163 = arith.constant 22 : index
    %c0_164 = arith.constant 0 : index
    %103 = vector.load %arg3[%c0_161, %c0_162, %c22_163, %c0_164] : memref<1x1x110x4xbf16, #tpu.memory_space<vmem>>, vector<1x1x80x4xbf16>
    %104 = vector.shape_cast %103 : vector<1x1x80x4xbf16> to vector<80x4xbf16>
    %c1_165 = arith.constant 1 : index
    %c2_166 = arith.constant 2 : index
    %c2_167 = arith.constant 2 : index
    %c0_168 = arith.constant 0 : index
    %c0_169 = arith.constant 0 : index
    %105 = vector.load %arg5[%c1_165, %c2_166, %c2_167, %c0_168, %c0_169] : memref<3x3x3x4x32xbf16, #tpu.memory_space<vmem>>, vector<1x1x1x4x32xbf16>
    %106 = vector.shape_cast %105 : vector<1x1x1x4x32xbf16> to vector<4x32xbf16>
    %cst_170 = arith.constant dense<0.000000e+00> : vector<80x32xf32>
    %107 = tpu.matmul %104, %106, %cst_170 {dimension_numbers = #tpu.dot_dimension_numbers<[1], [0], [0], [1], [0, 0, 1, 1], [], []>} : vector<80x4xbf16>, vector<4x32xbf16>, vector<80x32xf32> -> vector<80x32xf32>
    %108 = arith.addf %102, %107 : vector<80x32xf32>
    %c0_171 = arith.constant 0 : index
    %c0_172 = arith.constant 0 : index
    %c0_173 = arith.constant 0 : index
    %c0_174 = arith.constant 0 : index
    %109 = vector.load %arg4[%c0_171, %c0_172, %c0_173, %c0_174] : memref<1x1x110x4xbf16, #tpu.memory_space<vmem>>, vector<1x1x80x4xbf16>
    %110 = vector.shape_cast %109 : vector<1x1x80x4xbf16> to vector<80x4xbf16>
    %c2_175 = arith.constant 2 : index
    %c0_176 = arith.constant 0 : index
    %c0_177 = arith.constant 0 : index
    %c0_178 = arith.constant 0 : index
    %c0_179 = arith.constant 0 : index
    %111 = vector.load %arg5[%c2_175, %c0_176, %c0_177, %c0_178, %c0_179] : memref<3x3x3x4x32xbf16, #tpu.memory_space<vmem>>, vector<1x1x1x4x32xbf16>
    %112 = vector.shape_cast %111 : vector<1x1x1x4x32xbf16> to vector<4x32xbf16>
    %cst_180 = arith.constant dense<0.000000e+00> : vector<80x32xf32>
    %113 = tpu.matmul %110, %112, %cst_180 {dimension_numbers = #tpu.dot_dimension_numbers<[1], [0], [0], [1], [0, 0, 1, 1], [], []>} : vector<80x4xbf16>, vector<4x32xbf16>, vector<80x32xf32> -> vector<80x32xf32>
    %114 = arith.addf %108, %113 : vector<80x32xf32>
    %c0_181 = arith.constant 0 : index
    %c0_182 = arith.constant 0 : index
    %c1_183 = arith.constant 1 : index
    %c0_184 = arith.constant 0 : index
    %115 = vector.load %arg4[%c0_181, %c0_182, %c1_183, %c0_184] : memref<1x1x110x4xbf16, #tpu.memory_space<vmem>>, vector<1x1x80x4xbf16>
    %116 = vector.shape_cast %115 : vector<1x1x80x4xbf16> to vector<80x4xbf16>
    %c2_185 = arith.constant 2 : index
    %c0_186 = arith.constant 0 : index
    %c1_187 = arith.constant 1 : index
    %c0_188 = arith.constant 0 : index
    %c0_189 = arith.constant 0 : index
    %117 = vector.load %arg5[%c2_185, %c0_186, %c1_187, %c0_188, %c0_189] : memref<3x3x3x4x32xbf16, #tpu.memory_space<vmem>>, vector<1x1x1x4x32xbf16>
    %118 = vector.shape_cast %117 : vector<1x1x1x4x32xbf16> to vector<4x32xbf16>
    %cst_190 = arith.constant dense<0.000000e+00> : vector<80x32xf32>
    %119 = tpu.matmul %116, %118, %cst_190 {dimension_numbers = #tpu.dot_dimension_numbers<[1], [0], [0], [1], [0, 0, 1, 1], [], []>} : vector<80x4xbf16>, vector<4x32xbf16>, vector<80x32xf32> -> vector<80x32xf32>
    %120 = arith.addf %114, %119 : vector<80x32xf32>
    %c0_191 = arith.constant 0 : index
    %c0_192 = arith.constant 0 : index
    %c2_193 = arith.constant 2 : index
    %c0_194 = arith.constant 0 : index
    %121 = vector.load %arg4[%c0_191, %c0_192, %c2_193, %c0_194] : memref<1x1x110x4xbf16, #tpu.memory_space<vmem>>, vector<1x1x80x4xbf16>
    %122 = vector.shape_cast %121 : vector<1x1x80x4xbf16> to vector<80x4xbf16>
    %c2_195 = arith.constant 2 : index
    %c0_196 = arith.constant 0 : index
    %c2_197 = arith.constant 2 : index
    %c0_198 = arith.constant 0 : index
    %c0_199 = arith.constant 0 : index
    %123 = vector.load %arg5[%c2_195, %c0_196, %c2_197, %c0_198, %c0_199] : memref<3x3x3x4x32xbf16, #tpu.memory_space<vmem>>, vector<1x1x1x4x32xbf16>
    %124 = vector.shape_cast %123 : vector<1x1x1x4x32xbf16> to vector<4x32xbf16>
    %cst_200 = arith.constant dense<0.000000e+00> : vector<80x32xf32>
    %125 = tpu.matmul %122, %124, %cst_200 {dimension_numbers = #tpu.dot_dimension_numbers<[1], [0], [0], [1], [0, 0, 1, 1], [], []>} : vector<80x4xbf16>, vector<4x32xbf16>, vector<80x32xf32> -> vector<80x32xf32>
    %126 = arith.addf %120, %125 : vector<80x32xf32>
    %c0_201 = arith.constant 0 : index
    %c0_202 = arith.constant 0 : index
    %c10_203 = arith.constant 10 : index
    %c0_204 = arith.constant 0 : index
    %127 = vector.load %arg4[%c0_201, %c0_202, %c10_203, %c0_204] : memref<1x1x110x4xbf16, #tpu.memory_space<vmem>>, vector<1x1x80x4xbf16>
    %128 = vector.shape_cast %127 : vector<1x1x80x4xbf16> to vector<80x4xbf16>
    %c2_205 = arith.constant 2 : index
    %c1_206 = arith.constant 1 : index
    %c0_207 = arith.constant 0 : index
    %c0_208 = arith.constant 0 : index
    %c0_209 = arith.constant 0 : index
    %129 = vector.load %arg5[%c2_205, %c1_206, %c0_207, %c0_208, %c0_209] : memref<3x3x3x4x32xbf16, #tpu.memory_space<vmem>>, vector<1x1x1x4x32xbf16>
    %130 = vector.shape_cast %129 : vector<1x1x1x4x32xbf16> to vector<4x32xbf16>
    %cst_210 = arith.constant dense<0.000000e+00> : vector<80x32xf32>
    %131 = tpu.matmul %128, %130, %cst_210 {dimension_numbers = #tpu.dot_dimension_numbers<[1], [0], [0], [1], [0, 0, 1, 1], [], []>} : vector<80x4xbf16>, vector<4x32xbf16>, vector<80x32xf32> -> vector<80x32xf32>
    %132 = arith.addf %126, %131 : vector<80x32xf32>
    %c0_211 = arith.constant 0 : index
    %c0_212 = arith.constant 0 : index
    %c11_213 = arith.constant 11 : index
    %c0_214 = arith.constant 0 : index
    %133 = vector.load %arg4[%c0_211, %c0_212, %c11_213, %c0_214] : memref<1x1x110x4xbf16, #tpu.memory_space<vmem>>, vector<1x1x80x4xbf16>
    %134 = vector.shape_cast %133 : vector<1x1x80x4xbf16> to vector<80x4xbf16>
    %c2_215 = arith.constant 2 : index
    %c1_216 = arith.constant 1 : index
    %c1_217 = arith.constant 1 : index
    %c0_218 = arith.constant 0 : index
    %c0_219 = arith.constant 0 : index
    %135 = vector.load %arg5[%c2_215, %c1_216, %c1_217, %c0_218, %c0_219] : memref<3x3x3x4x32xbf16, #tpu.memory_space<vmem>>, vector<1x1x1x4x32xbf16>
    %136 = vector.shape_cast %135 : vector<1x1x1x4x32xbf16> to vector<4x32xbf16>
    %cst_220 = arith.constant dense<0.000000e+00> : vector<80x32xf32>
    %137 = tpu.matmul %134, %136, %cst_220 {dimension_numbers = #tpu.dot_dimension_numbers<[1], [0], [0], [1], [0, 0, 1, 1], [], []>} : vector<80x4xbf16>, vector<4x32xbf16>, vector<80x32xf32> -> vector<80x32xf32>
    %138 = arith.addf %132, %137 : vector<80x32xf32>
    %c0_221 = arith.constant 0 : index
    %c0_222 = arith.constant 0 : index
    %c12_223 = arith.constant 12 : index
    %c0_224 = arith.constant 0 : index
    %139 = vector.load %arg4[%c0_221, %c0_222, %c12_223, %c0_224] : memref<1x1x110x4xbf16, #tpu.memory_space<vmem>>, vector<1x1x80x4xbf16>
    %140 = vector.shape_cast %139 : vector<1x1x80x4xbf16> to vector<80x4xbf16>
    %c2_225 = arith.constant 2 : index
    %c1_226 = arith.constant 1 : index
    %c2_227 = arith.constant 2 : index
    %c0_228 = arith.constant 0 : index
    %c0_229 = arith.constant 0 : index
    %141 = vector.load %arg5[%c2_225, %c1_226, %c2_227, %c0_228, %c0_229] : memref<3x3x3x4x32xbf16, #tpu.memory_space<vmem>>, vector<1x1x1x4x32xbf16>
    %142 = vector.shape_cast %141 : vector<1x1x1x4x32xbf16> to vector<4x32xbf16>
    %cst_230 = arith.constant dense<0.000000e+00> : vector<80x32xf32>
    %143 = tpu.matmul %140, %142, %cst_230 {dimension_numbers = #tpu.dot_dimension_numbers<[1], [0], [0], [1], [0, 0, 1, 1], [], []>} : vector<80x4xbf16>, vector<4x32xbf16>, vector<80x32xf32> -> vector<80x32xf32>
    %144 = arith.addf %138, %143 : vector<80x32xf32>
    %c0_231 = arith.constant 0 : index
    %c0_232 = arith.constant 0 : index
    %c20_233 = arith.constant 20 : index
    %c0_234 = arith.constant 0 : index
    %145 = vector.load %arg4[%c0_231, %c0_232, %c20_233, %c0_234] : memref<1x1x110x4xbf16, #tpu.memory_space<vmem>>, vector<1x1x80x4xbf16>
    %146 = vector.shape_cast %145 : vector<1x1x80x4xbf16> to vector<80x4xbf16>
    %c2_235 = arith.constant 2 : index
    %c2_236 = arith.constant 2 : index
    %c0_237 = arith.constant 0 : index
    %c0_238 = arith.constant 0 : index
    %c0_239 = arith.constant 0 : index
    %147 = vector.load %arg5[%c2_235, %c2_236, %c0_237, %c0_238, %c0_239] : memref<3x3x3x4x32xbf16, #tpu.memory_space<vmem>>, vector<1x1x1x4x32xbf16>
    %148 = vector.shape_cast %147 : vector<1x1x1x4x32xbf16> to vector<4x32xbf16>
    %cst_240 = arith.constant dense<0.000000e+00> : vector<80x32xf32>
    %149 = tpu.matmul %146, %148, %cst_240 {dimension_numbers = #tpu.dot_dimension_numbers<[1], [0], [0], [1], [0, 0, 1, 1], [], []>} : vector<80x4xbf16>, vector<4x32xbf16>, vector<80x32xf32> -> vector<80x32xf32>
    %150 = arith.addf %144, %149 : vector<80x32xf32>
    %c0_241 = arith.constant 0 : index
    %c0_242 = arith.constant 0 : index
    %c21_243 = arith.constant 21 : index
    %c0_244 = arith.constant 0 : index
    %151 = vector.load %arg4[%c0_241, %c0_242, %c21_243, %c0_244] : memref<1x1x110x4xbf16, #tpu.memory_space<vmem>>, vector<1x1x80x4xbf16>
    %152 = vector.shape_cast %151 : vector<1x1x80x4xbf16> to vector<80x4xbf16>
    %c2_245 = arith.constant 2 : index
    %c2_246 = arith.constant 2 : index
    %c1_247 = arith.constant 1 : index
    %c0_248 = arith.constant 0 : index
    %c0_249 = arith.constant 0 : index
    %153 = vector.load %arg5[%c2_245, %c2_246, %c1_247, %c0_248, %c0_249] : memref<3x3x3x4x32xbf16, #tpu.memory_space<vmem>>, vector<1x1x1x4x32xbf16>
    %154 = vector.shape_cast %153 : vector<1x1x1x4x32xbf16> to vector<4x32xbf16>
    %cst_250 = arith.constant dense<0.000000e+00> : vector<80x32xf32>
    %155 = tpu.matmul %152, %154, %cst_250 {dimension_numbers = #tpu.dot_dimension_numbers<[1], [0], [0], [1], [0, 0, 1, 1], [], []>} : vector<80x4xbf16>, vector<4x32xbf16>, vector<80x32xf32> -> vector<80x32xf32>
    %156 = arith.addf %150, %155 : vector<80x32xf32>
    %c0_251 = arith.constant 0 : index
    %c0_252 = arith.constant 0 : index
    %c22_253 = arith.constant 22 : index
    %c0_254 = arith.constant 0 : index
    %157 = vector.load %arg4[%c0_251, %c0_252, %c22_253, %c0_254] : memref<1x1x110x4xbf16, #tpu.memory_space<vmem>>, vector<1x1x80x4xbf16>
    %158 = vector.shape_cast %157 : vector<1x1x80x4xbf16> to vector<80x4xbf16>
    %c2_255 = arith.constant 2 : index
    %c2_256 = arith.constant 2 : index
    %c2_257 = arith.constant 2 : index
    %c0_258 = arith.constant 0 : index
    %c0_259 = arith.constant 0 : index
    %159 = vector.load %arg5[%c2_255, %c2_256, %c2_257, %c0_258, %c0_259] : memref<3x3x3x4x32xbf16, #tpu.memory_space<vmem>>, vector<1x1x1x4x32xbf16>
    %160 = vector.shape_cast %159 : vector<1x1x1x4x32xbf16> to vector<4x32xbf16>
    %cst_260 = arith.constant dense<0.000000e+00> : vector<80x32xf32>
    %161 = tpu.matmul %158, %160, %cst_260 {dimension_numbers = #tpu.dot_dimension_numbers<[1], [0], [0], [1], [0, 0, 1, 1], [], []>} : vector<80x4xbf16>, vector<4x32xbf16>, vector<80x32xf32> -> vector<80x32xf32>
    %162 = arith.addf %156, %161 : vector<80x32xf32>
    %c0_261 = arith.constant 0 : index
    %c0_262 = arith.constant 0 : index
    %163 = vector.load %arg6[%c0_261, %c0_262] : memref<1x32xf32, #tpu.memory_space<vmem>>, vector<1x32xf32>
    %164 = vector.broadcast %163 : vector<1x32xf32> to vector<80x32xf32>
    %165 = arith.addf %162, %164 : vector<80x32xf32>
    %166 = arith.truncf %165 : vector<80x32xf32> to vector<80x32xbf16>
    %c0_263 = arith.constant 0 : index
    %c0_264 = arith.constant 0 : index
    %c0_265 = arith.constant 0 : index
    %c0_266 = arith.constant 0 : index
    %167 = vector.load %arg7[%c0_263, %c0_264, %c0_265, %c0_266] : memref<1x1x80x32xbf16, #tpu.memory_space<vmem>>, vector<1x1x80x32xbf16>
    %168 = vector.shape_cast %167 : vector<1x1x80x32xbf16> to vector<80x32xbf16>
    %169 = vector.shape_cast %166 : vector<80x32xbf16> to vector<1x1x80x32xbf16>
    tpu.vector_store %arg7[%c0_263, %c0_264, %c0_265, %c0_266], %169 {strides = array<i32>} : memref<1x1x80x32xbf16, #tpu.memory_space<vmem>>, vector<1x1x80x32xbf16>,
    %170 = tpu.iota {dimensions = array<i32: 0>} : vector<80x1xi32>
    %c10_i32 = arith.constant 10 : i32
    %c0_i32 = arith.constant 0 : i32
    %171 = arith.cmpi eq, %c10_i32, %c0_i32 : i32
    %c1_i32 = arith.constant 1 : i32
    %172 = arith.select %171, %c1_i32, %c10_i32 : i32
    %173 = vector.broadcast %172 : i32 to vector<80x1xi32>
    %174 = arith.remsi %170, %173 : vector<80x1xi32>
    %c0_i32_267 = arith.constant 0 : i32
    %175 = vector.broadcast %c0_i32_267 : i32 to vector<80x1xi32>
    %176 = arith.cmpi ne, %174, %175 : vector<80x1xi32>
    %c0_i32_268 = arith.constant 0 : i32
    %177 = vector.broadcast %c0_i32_268 : i32 to vector<80x1xi32>
    %178 = arith.cmpi slt, %174, %177 : vector<80x1xi32>
    %c0_i32_269 = arith.constant 0 : i32
    %179 = arith.cmpi slt, %172, %c0_i32_269 : i32
    %180 = vector.broadcast %179 : i1 to vector<80x1xi1>
    %181 = vector.broadcast %180 : vector<80x1xi1> to vector<80x1xi1>
    %182 = arith.xori %178, %181 : vector<80x1xi1>
    %183 = arith.andi %182, %176 : vector<80x1xi1>
    %184 = vector.broadcast %172 : i32 to vector<80x1xi32>
    %185 = arith.addi %174, %184 : vector<80x1xi32>
    %186 = arith.select %183, %185, %174 : vector<80x1xi1>, vector<80x1xi32>
    %c8_i32 = arith.constant 8 : i32
    %187 = vector.broadcast %c8_i32 : i32 to vector<80x1xi32>
    %188 = arith.cmpi slt, %186, %187 : vector<80x1xi32>
    %cst_270 = arith.constant 0.000000e+00 : f32
    %189 = vector.shape_cast %188 : vector<80x1xi1> to vector<80x1xi1>
    %190 = vector.broadcast %189 : vector<80x1xi1> to vector<80x32xi1>
    %191 = vector.broadcast %cst_270 : f32 to vector<80x32xf32>
    %192 = arith.select %190, %165, %191 : vector<80x32xi1>, vector<80x32xf32>
    %cst_271 = arith.constant dense<0.000000e+00> : vector<32xf32>
    %193 = vector.multi_reduction <add>, %192, %cst_271 [0] : vector<80x32xf32> to vector<32xf32>
    %194 = vector.shape_cast %193 : vector<32xf32> to vector<1x32xf32>
    %c0_272 = arith.constant 0 : index
    %c0_273 = arith.constant 0 : index
    %c0_274 = arith.constant 0 : index
    %c0_275 = arith.constant 0 : index
    %195 = vector.load %arg8[%c0_272, %c0_273, %c0_274, %c0_275] : memref<1x1x1x32xf32, #tpu.memory_space<vmem>>, vector<1x1x1x32xf32>
    %196 = vector.shape_cast %195 : vector<1x1x1x32xf32> to vector<1x32xf32>
    %197 = vector.shape_cast %194 : vector<1x32xf32> to vector<1x1x1x32xf32>
    tpu.vector_store %arg8[%c0_272, %c0_273, %c0_274, %c0_275], %197 {strides = array<i32>} : memref<1x1x1x32xf32, #tpu.memory_space<vmem>>, vector<1x1x1x32xf32>,
    %198 = arith.mulf %192, %192 : vector<80x32xf32>
    %cst_276 = arith.constant dense<0.000000e+00> : vector<32xf32>
    %199 = vector.multi_reduction <add>, %198, %cst_276 [0] : vector<80x32xf32> to vector<32xf32>
    %200 = vector.shape_cast %199 : vector<32xf32> to vector<1x32xf32>
    %c0_277 = arith.constant 0 : index
    %c0_278 = arith.constant 0 : index
    %c0_279 = arith.constant 0 : index
    %c0_280 = arith.constant 0 : index
    %201 = vector.load %arg9[%c0_277, %c0_278, %c0_279, %c0_280] : memref<1x1x1x32xf32, #tpu.memory_space<vmem>>, vector<1x1x1x32xf32>
    %202 = vector.shape_cast %201 : vector<1x1x1x32xf32> to vector<1x32xf32>
    %203 = vector.shape_cast %200 : vector<1x32xf32> to vector<1x1x1x32xf32>
    tpu.vector_store %arg9[%c0_277, %c0_278, %c0_279, %c0_280], %203 {strides = array<i32>} : memref<1x1x1x32xf32, #tpu.memory_space<vmem>>, vector<1x1x1x32xf32>,
    return
  }
  func.func @transform_0(%arg0: i32, %arg1: i32) -> (i32, i32, i32, i32) {
    %c0_i32 = arith.constant 0 : i32
    %0 = arith.addi %arg1, %c0_i32 : i32
    %c0_i32_0 = arith.constant 0 : i32
    %c0_i32_1 = arith.constant 0 : i32
    %c0_i32_2 = arith.constant 0 : i32
    return %arg0, %0, %c0_i32_0, %c0_i32_1 : i32, i32, i32, i32
  }
  func.func @transform_1(%arg0: i32, %arg1: i32) -> (i32, i32, i32, i32) {
    %c1_i32 = arith.constant 1 : i32
    %0 = arith.addi %arg1, %c1_i32 : i32
    %c0_i32 = arith.constant 0 : i32
    %c0_i32_0 = arith.constant 0 : i32
    %c0_i32_1 = arith.constant 0 : i32
    return %arg0, %0, %c0_i32, %c0_i32_0 : i32, i32, i32, i32
  }
  func.func @transform_2(%arg0: i32, %arg1: i32) -> (i32, i32, i32, i32) {
    %c2_i32 = arith.constant 2 : i32
    %0 = arith.addi %arg1, %c2_i32 : i32
    %c0_i32 = arith.constant 0 : i32
    %c0_i32_0 = arith.constant 0 : i32
    %c0_i32_1 = arith.constant 0 : i32
    return %arg0, %0, %c0_i32, %c0_i32_0 : i32, i32, i32, i32
  }
  func.func @transform_3(%arg0: i32, %arg1: i32) -> (i32, i32, i32, i32, i32) {
    %c0_i32 = arith.constant 0 : i32
    %c0_i32_0 = arith.constant 0 : i32
    %c0_i32_1 = arith.constant 0 : i32
    %c0_i32_2 = arith.constant 0 : i32
    %c0_i32_3 = arith.constant 0 : i32
    %c0_i32_4 = arith.constant 0 : i32
    return %c0_i32, %c0_i32_0, %c0_i32_1, %c0_i32_2, %c0_i32_3 : i32, i32, i32, i32, i32
  }
  func.func @transform_4(%arg0: i32, %arg1: i32) -> (i32, i32) {
    %c0_i32 = arith.constant 0 : i32
    %c0_i32_0 = arith.constant 0 : i32
    %c0_i32_1 = arith.constant 0 : i32
    return %c0_i32, %c0_i32_0 : i32, i32
  }
  func.func @transform_5(%arg0: i32, %arg1: i32) -> (i32, i32, i32, i32) {
    %c0_i32 = arith.constant 0 : i32
    %c0_i32_0 = arith.constant 0 : i32
    %c0_i32_1 = arith.constant 0 : i32
    return %arg0, %arg1, %c0_i32, %c0_i32_0 : i32, i32, i32, i32
  }
  func.func @transform_6(%arg0: i32, %arg1: i32) -> (i32, i32, i32, i32) {
    %c0_i32 = arith.constant 0 : i32
    %c0_i32_0 = arith.constant 0 : i32
    %c0_i32_1 = arith.constant 0 : i32
    return %arg0, %arg1, %c0_i32, %c0_i32_0 : i32, i32, i32, i32
  }
  func.func @transform_7(%arg0: i32, %arg1: i32) -> (i32, i32, i32, i32) {
    %c0_i32 = arith.constant 0 : i32
    %c0_i32_0 = arith.constant 0 : i32
    %c0_i32_1 = arith.constant 0 : i32
    return %arg0, %arg1, %c0_i32, %c0_i32_0 : i32, i32, i32, i32
  }
}

module attributes {stable_mosaic.version = 11 : i64} {
  func.func @_bn_relu_pad_kernel(%arg0: i32, %arg1: i32, %arg2: memref<1x1x80x32xbf16, #tpu.memory_space<vmem>>, %arg3: memref<1x32xf32, #tpu.memory_space<vmem>>, %arg4: memref<1x32xf32, #tpu.memory_space<vmem>>, %arg5: memref<1x1x110x32xbf16, #tpu.memory_space<vmem>>) attributes {dimension_semantics = [#tpu.dimension_semantics<parallel>, #tpu.dimension_semantics<parallel>], iteration_bounds = array<i64: 2, 10>, scalar_prefetch = 0 : i64, scratch_operands = 0 : i64, tpu.core_type = #tpu.core_type<tc>, window_params = [{transform_indices = @transform_0, window_bounds = array<i64: 1, 1, 80, 32>}, {pipeline_mode = #tpu.pipeline_mode<synchronous>, transform_indices = @transform_1, window_bounds = array<i64: 1, 32>}, {pipeline_mode = #tpu.pipeline_mode<synchronous>, transform_indices = @transform_2, window_bounds = array<i64: 1, 32>}, {transform_indices = @transform_3, window_bounds = array<i64: 1, 1, 110, 32>}]} {
    %cst = arith.constant 0.000000e+00 : bf16
    %0 = vector.broadcast %cst : bf16 to vector<110x32xbf16>
    %c0 = arith.constant 0 : index
    %c0_0 = arith.constant 0 : index
    %c0_1 = arith.constant 0 : index
    %c0_2 = arith.constant 0 : index
    %1 = vector.load %arg5[%c0, %c0_0, %c0_1, %c0_2] : memref<1x1x110x32xbf16, #tpu.memory_space<vmem>>, vector<1x1x110x32xbf16>
    %2 = vector.shape_cast %1 : vector<1x1x110x32xbf16> to vector<110x32xbf16>
    %3 = vector.shape_cast %0 : vector<110x32xbf16> to vector<1x1x110x32xbf16>
    tpu.vector_store %arg5[%c0, %c0_0, %c0_1, %c0_2], %3 {strides = array<i32>} : memref<1x1x110x32xbf16, #tpu.memory_space<vmem>>, vector<1x1x110x32xbf16>,
    %c1_i32 = arith.constant 1 : i32
    %4 = arith.cmpi sge, %arg1, %c1_i32 : i32
    %c8_i32 = arith.constant 8 : i32
    %5 = arith.cmpi sle, %arg1, %c8_i32 : i32
    %6 = arith.andi %4, %5 : i1
    %7 = arith.extui %6 : i1 to i32
    %c0_i32 = arith.constant 0 : i32
    %8 = arith.cmpi ne, %7, %c0_i32 : i32
    scf.if %8 {
      %c0_3 = arith.constant 0 : index
      %c0_4 = arith.constant 0 : index
      %c0_5 = arith.constant 0 : index
      %c0_6 = arith.constant 0 : index
      %9 = vector.load %arg2[%c0_3, %c0_4, %c0_5, %c0_6] : memref<1x1x80x32xbf16, #tpu.memory_space<vmem>>, vector<1x1x80x32xbf16>
      %10 = vector.shape_cast %9 : vector<1x1x80x32xbf16> to vector<80x32xbf16>
      %11 = arith.extf %10 : vector<80x32xbf16> to vector<80x32xf32>
      %c0_7 = arith.constant 0 : index
      %c0_8 = arith.constant 0 : index
      %12 = vector.load %arg3[%c0_7, %c0_8] : memref<1x32xf32, #tpu.memory_space<vmem>>, vector<1x32xf32>
      %13 = vector.broadcast %12 : vector<1x32xf32> to vector<80x32xf32>
      %14 = arith.mulf %11, %13 : vector<80x32xf32>
      %c0_9 = arith.constant 0 : index
      %c0_10 = arith.constant 0 : index
      %15 = vector.load %arg4[%c0_9, %c0_10] : memref<1x32xf32, #tpu.memory_space<vmem>>, vector<1x32xf32>
      %16 = vector.broadcast %15 : vector<1x32xf32> to vector<80x32xf32>
      %17 = arith.addf %14, %16 : vector<80x32xf32>
      %cst_11 = arith.constant 0.000000e+00 : f32
      %18 = vector.broadcast %cst_11 : f32 to vector<80x32xf32>
      %19 = arith.maximumf %17, %18 : vector<80x32xf32>
      %20 = tpu.iota {dimensions = array<i32: 0>} : vector<80x1xi32>
      %c10_i32 = arith.constant 10 : i32
      %c0_i32_12 = arith.constant 0 : i32
      %21 = arith.cmpi eq, %c10_i32, %c0_i32_12 : i32
      %c1_i32_13 = arith.constant 1 : i32
      %22 = arith.select %21, %c1_i32_13, %c10_i32 : i32
      %23 = vector.broadcast %22 : i32 to vector<80x1xi32>
      %24 = arith.remsi %20, %23 : vector<80x1xi32>
      %c0_i32_14 = arith.constant 0 : i32
      %25 = vector.broadcast %c0_i32_14 : i32 to vector<80x1xi32>
      %26 = arith.cmpi ne, %24, %25 : vector<80x1xi32>
      %c0_i32_15 = arith.constant 0 : i32
      %27 = vector.broadcast %c0_i32_15 : i32 to vector<80x1xi32>
      %28 = arith.cmpi slt, %24, %27 : vector<80x1xi32>
      %c0_i32_16 = arith.constant 0 : i32
      %29 = arith.cmpi slt, %22, %c0_i32_16 : i32
      %30 = vector.broadcast %29 : i1 to vector<80x1xi1>
      %31 = vector.broadcast %30 : vector<80x1xi1> to vector<80x1xi1>
      %32 = arith.xori %28, %31 : vector<80x1xi1>
      %33 = arith.andi %32, %26 : vector<80x1xi1>
      %34 = vector.broadcast %22 : i32 to vector<80x1xi32>
      %35 = arith.addi %24, %34 : vector<80x1xi32>
      %36 = arith.select %33, %35, %24 : vector<80x1xi1>, vector<80x1xi32>
      %c8_i32_17 = arith.constant 8 : i32
      %37 = vector.broadcast %c8_i32_17 : i32 to vector<80x1xi32>
      %38 = arith.cmpi slt, %36, %37 : vector<80x1xi32>
      %cst_18 = arith.constant 0.000000e+00 : f32
      %39 = vector.shape_cast %38 : vector<80x1xi1> to vector<80x1xi1>
      %40 = vector.broadcast %39 : vector<80x1xi1> to vector<80x32xi1>
      %41 = vector.broadcast %cst_18 : f32 to vector<80x32xf32>
      %42 = arith.select %40, %19, %41 : vector<80x32xi1>, vector<80x32xf32>
      %43 = arith.truncf %42 : vector<80x32xf32> to vector<80x32xbf16>
      %c0_19 = arith.constant 0 : index
      %c0_20 = arith.constant 0 : index
      %c11 = arith.constant 11 : index
      %c0_21 = arith.constant 0 : index
      %44 = vector.load %arg5[%c0_19, %c0_20, %c11, %c0_21] : memref<1x1x110x32xbf16, #tpu.memory_space<vmem>>, vector<1x1x80x32xbf16>
      %45 = vector.shape_cast %44 : vector<1x1x80x32xbf16> to vector<80x32xbf16>
      %46 = vector.shape_cast %43 : vector<80x32xbf16> to vector<1x1x80x32xbf16>
      tpu.vector_store %arg5[%c0_19, %c0_20, %c11, %c0_21], %46 {strides = array<i32>} : memref<1x1x110x32xbf16, #tpu.memory_space<vmem>>, vector<1x1x80x32xbf16>,
    } else {
    }
    return
  }
  func.func @transform_0(%arg0: i32, %arg1: i32) -> (i32, i32, i32, i32) {
    %c1_i32 = arith.constant 1 : i32
    %0 = arith.subi %arg1, %c1_i32 : i32
    %c0_i32 = arith.constant 0 : i32
    %1 = arith.maxsi %0, %c0_i32 : i32
    %c7_i32 = arith.constant 7 : i32
    %2 = arith.minsi %1, %c7_i32 : i32
    %c0_i32_0 = arith.constant 0 : i32
    %c0_i32_1 = arith.constant 0 : i32
    %c0_i32_2 = arith.constant 0 : i32
    return %arg0, %2, %c0_i32_0, %c0_i32_1 : i32, i32, i32, i32
  }
  func.func @transform_1(%arg0: i32, %arg1: i32) -> (i32, i32) {
    %c0_i32 = arith.constant 0 : i32
    %c0_i32_0 = arith.constant 0 : i32
    %c0_i32_1 = arith.constant 0 : i32
    return %c0_i32, %c0_i32_0 : i32, i32
  }
  func.func @transform_2(%arg0: i32, %arg1: i32) -> (i32, i32) {
    %c0_i32 = arith.constant 0 : i32
    %c0_i32_0 = arith.constant 0 : i32
    %c0_i32_1 = arith.constant 0 : i32
    return %c0_i32, %c0_i32_0 : i32, i32
  }
  func.func @transform_3(%arg0: i32, %arg1: i32) -> (i32, i32, i32, i32) {
    %c0_i32 = arith.constant 0 : i32
    %c0_i32_0 = arith.constant 0 : i32
    %c0_i32_1 = arith.constant 0 : i32
    return %arg0, %arg1, %c0_i32, %c0_i32_0 : i32, i32, i32, i32
  }
}

module attributes {stable_mosaic.version = 11 : i64} {
  func.func @_conv_kernel(%arg0: i32, %arg1: i32, %arg2: memref<1x1x110x32xbf16, #tpu.memory_space<vmem>>, %arg3: memref<1x1x110x32xbf16, #tpu.memory_space<vmem>>, %arg4: memref<1x1x110x32xbf16, #tpu.memory_space<vmem>>, %arg5: memref<3x3x3x32x64xbf16, #tpu.memory_space<vmem>>, %arg6: memref<1x64xf32, #tpu.memory_space<vmem>>, %arg7: memref<1x1x80x64xbf16, #tpu.memory_space<vmem>>, %arg8: memref<1x1x1x64xf32, #tpu.memory_space<vmem>>, %arg9: memref<1x1x1x64xf32, #tpu.memory_space<vmem>>) attributes {dimension_semantics = [#tpu.dimension_semantics<parallel>, #tpu.dimension_semantics<parallel>], iteration_bounds = array<i64: 2, 8>, scalar_prefetch = 0 : i64, scratch_operands = 0 : i64, tpu.core_type = #tpu.core_type<tc>, window_params = [{transform_indices = @transform_0, window_bounds = array<i64: 1, 1, 110, 32>}, {transform_indices = @transform_1, window_bounds = array<i64: 1, 1, 110, 32>}, {transform_indices = @transform_2, window_bounds = array<i64: 1, 1, 110, 32>}, {pipeline_mode = #tpu.pipeline_mode<synchronous>, transform_indices = @transform_3, window_bounds = array<i64: 3, 3, 3, 32, 64>}, {pipeline_mode = #tpu.pipeline_mode<synchronous>, transform_indices = @transform_4, window_bounds = array<i64: 1, 64>}, {transform_indices = @transform_5, window_bounds = array<i64: 1, 1, 80, 64>}, {transform_indices = @transform_6, window_bounds = array<i64: 1, 1, 1, 64>}, {transform_indices = @transform_7, window_bounds = array<i64: 1, 1, 1, 64>}]} {
    %cst = arith.constant 0.000000e+00 : f32
    %0 = vector.broadcast %cst : f32 to vector<80x64xf32>
    %c0 = arith.constant 0 : index
    %c0_0 = arith.constant 0 : index
    %c0_1 = arith.constant 0 : index
    %c0_2 = arith.constant 0 : index
    %1 = vector.load %arg2[%c0, %c0_0, %c0_1, %c0_2] : memref<1x1x110x32xbf16, #tpu.memory_space<vmem>>, vector<1x1x80x32xbf16>
    %2 = vector.shape_cast %1 : vector<1x1x80x32xbf16> to vector<80x32xbf16>
    %c0_3 = arith.constant 0 : index
    %c0_4 = arith.constant 0 : index
    %c0_5 = arith.constant 0 : index
    %c0_6 = arith.constant 0 : index
    %c0_7 = arith.constant 0 : index
    %3 = vector.load %arg5[%c0_3, %c0_4, %c0_5, %c0_6, %c0_7] : memref<3x3x3x32x64xbf16, #tpu.memory_space<vmem>>, vector<1x1x1x32x64xbf16>
    %4 = vector.shape_cast %3 : vector<1x1x1x32x64xbf16> to vector<32x64xbf16>
    %cst_8 = arith.constant dense<0.000000e+00> : vector<80x64xf32>
    %5 = tpu.matmul %2, %4, %cst_8 {dimension_numbers = #tpu.dot_dimension_numbers<[1], [0], [0], [1], [0, 0, 1, 1], [], []>} : vector<80x32xbf16>, vector<32x64xbf16>, vector<80x64xf32> -> vector<80x64xf32>
    %6 = arith.addf %0, %5 : vector<80x64xf32>
    %c0_9 = arith.constant 0 : index
    %c0_10 = arith.constant 0 : index
    %c1 = arith.constant 1 : index
    %c0_11 = arith.constant 0 : index
    %7 = vector.load %arg2[%c0_9, %c0_10, %c1, %c0_11] : memref<1x1x110x32xbf16, #tpu.memory_space<vmem>>, vector<1x1x80x32xbf16>
    %8 = vector.shape_cast %7 : vector<1x1x80x32xbf16> to vector<80x32xbf16>
    %c0_12 = arith.constant 0 : index
    %c0_13 = arith.constant 0 : index
    %c1_14 = arith.constant 1 : index
    %c0_15 = arith.constant 0 : index
    %c0_16 = arith.constant 0 : index
    %9 = vector.load %arg5[%c0_12, %c0_13, %c1_14, %c0_15, %c0_16] : memref<3x3x3x32x64xbf16, #tpu.memory_space<vmem>>, vector<1x1x1x32x64xbf16>
    %10 = vector.shape_cast %9 : vector<1x1x1x32x64xbf16> to vector<32x64xbf16>
    %cst_17 = arith.constant dense<0.000000e+00> : vector<80x64xf32>
    %11 = tpu.matmul %8, %10, %cst_17 {dimension_numbers = #tpu.dot_dimension_numbers<[1], [0], [0], [1], [0, 0, 1, 1], [], []>} : vector<80x32xbf16>, vector<32x64xbf16>, vector<80x64xf32> -> vector<80x64xf32>
    %12 = arith.addf %6, %11 : vector<80x64xf32>
    %c0_18 = arith.constant 0 : index
    %c0_19 = arith.constant 0 : index
    %c2 = arith.constant 2 : index
    %c0_20 = arith.constant 0 : index
    %13 = vector.load %arg2[%c0_18, %c0_19, %c2, %c0_20] : memref<1x1x110x32xbf16, #tpu.memory_space<vmem>>, vector<1x1x80x32xbf16>
    %14 = vector.shape_cast %13 : vector<1x1x80x32xbf16> to vector<80x32xbf16>
    %c0_21 = arith.constant 0 : index
    %c0_22 = arith.constant 0 : index
    %c2_23 = arith.constant 2 : index
    %c0_24 = arith.constant 0 : index
    %c0_25 = arith.constant 0 : index
    %15 = vector.load %arg5[%c0_21, %c0_22, %c2_23, %c0_24, %c0_25] : memref<3x3x3x32x64xbf16, #tpu.memory_space<vmem>>, vector<1x1x1x32x64xbf16>
    %16 = vector.shape_cast %15 : vector<1x1x1x32x64xbf16> to vector<32x64xbf16>
    %cst_26 = arith.constant dense<0.000000e+00> : vector<80x64xf32>
    %17 = tpu.matmul %14, %16, %cst_26 {dimension_numbers = #tpu.dot_dimension_numbers<[1], [0], [0], [1], [0, 0, 1, 1], [], []>} : vector<80x32xbf16>, vector<32x64xbf16>, vector<80x64xf32> -> vector<80x64xf32>
    %18 = arith.addf %12, %17 : vector<80x64xf32>
    %c0_27 = arith.constant 0 : index
    %c0_28 = arith.constant 0 : index
    %c10 = arith.constant 10 : index
    %c0_29 = arith.constant 0 : index
    %19 = vector.load %arg2[%c0_27, %c0_28, %c10, %c0_29] : memref<1x1x110x32xbf16, #tpu.memory_space<vmem>>, vector<1x1x80x32xbf16>
    %20 = vector.shape_cast %19 : vector<1x1x80x32xbf16> to vector<80x32xbf16>
    %c0_30 = arith.constant 0 : index
    %c1_31 = arith.constant 1 : index
    %c0_32 = arith.constant 0 : index
    %c0_33 = arith.constant 0 : index
    %c0_34 = arith.constant 0 : index
    %21 = vector.load %arg5[%c0_30, %c1_31, %c0_32, %c0_33, %c0_34] : memref<3x3x3x32x64xbf16, #tpu.memory_space<vmem>>, vector<1x1x1x32x64xbf16>
    %22 = vector.shape_cast %21 : vector<1x1x1x32x64xbf16> to vector<32x64xbf16>
    %cst_35 = arith.constant dense<0.000000e+00> : vector<80x64xf32>
    %23 = tpu.matmul %20, %22, %cst_35 {dimension_numbers = #tpu.dot_dimension_numbers<[1], [0], [0], [1], [0, 0, 1, 1], [], []>} : vector<80x32xbf16>, vector<32x64xbf16>, vector<80x64xf32> -> vector<80x64xf32>
    %24 = arith.addf %18, %23 : vector<80x64xf32>
    %c0_36 = arith.constant 0 : index
    %c0_37 = arith.constant 0 : index
    %c11 = arith.constant 11 : index
    %c0_38 = arith.constant 0 : index
    %25 = vector.load %arg2[%c0_36, %c0_37, %c11, %c0_38] : memref<1x1x110x32xbf16, #tpu.memory_space<vmem>>, vector<1x1x80x32xbf16>
    %26 = vector.shape_cast %25 : vector<1x1x80x32xbf16> to vector<80x32xbf16>
    %c0_39 = arith.constant 0 : index
    %c1_40 = arith.constant 1 : index
    %c1_41 = arith.constant 1 : index
    %c0_42 = arith.constant 0 : index
    %c0_43 = arith.constant 0 : index
    %27 = vector.load %arg5[%c0_39, %c1_40, %c1_41, %c0_42, %c0_43] : memref<3x3x3x32x64xbf16, #tpu.memory_space<vmem>>, vector<1x1x1x32x64xbf16>
    %28 = vector.shape_cast %27 : vector<1x1x1x32x64xbf16> to vector<32x64xbf16>
    %cst_44 = arith.constant dense<0.000000e+00> : vector<80x64xf32>
    %29 = tpu.matmul %26, %28, %cst_44 {dimension_numbers = #tpu.dot_dimension_numbers<[1], [0], [0], [1], [0, 0, 1, 1], [], []>} : vector<80x32xbf16>, vector<32x64xbf16>, vector<80x64xf32> -> vector<80x64xf32>
    %30 = arith.addf %24, %29 : vector<80x64xf32>
    %c0_45 = arith.constant 0 : index
    %c0_46 = arith.constant 0 : index
    %c12 = arith.constant 12 : index
    %c0_47 = arith.constant 0 : index
    %31 = vector.load %arg2[%c0_45, %c0_46, %c12, %c0_47] : memref<1x1x110x32xbf16, #tpu.memory_space<vmem>>, vector<1x1x80x32xbf16>
    %32 = vector.shape_cast %31 : vector<1x1x80x32xbf16> to vector<80x32xbf16>
    %c0_48 = arith.constant 0 : index
    %c1_49 = arith.constant 1 : index
    %c2_50 = arith.constant 2 : index
    %c0_51 = arith.constant 0 : index
    %c0_52 = arith.constant 0 : index
    %33 = vector.load %arg5[%c0_48, %c1_49, %c2_50, %c0_51, %c0_52] : memref<3x3x3x32x64xbf16, #tpu.memory_space<vmem>>, vector<1x1x1x32x64xbf16>
    %34 = vector.shape_cast %33 : vector<1x1x1x32x64xbf16> to vector<32x64xbf16>
    %cst_53 = arith.constant dense<0.000000e+00> : vector<80x64xf32>
    %35 = tpu.matmul %32, %34, %cst_53 {dimension_numbers = #tpu.dot_dimension_numbers<[1], [0], [0], [1], [0, 0, 1, 1], [], []>} : vector<80x32xbf16>, vector<32x64xbf16>, vector<80x64xf32> -> vector<80x64xf32>
    %36 = arith.addf %30, %35 : vector<80x64xf32>
    %c0_54 = arith.constant 0 : index
    %c0_55 = arith.constant 0 : index
    %c20 = arith.constant 20 : index
    %c0_56 = arith.constant 0 : index
    %37 = vector.load %arg2[%c0_54, %c0_55, %c20, %c0_56] : memref<1x1x110x32xbf16, #tpu.memory_space<vmem>>, vector<1x1x80x32xbf16>
    %38 = vector.shape_cast %37 : vector<1x1x80x32xbf16> to vector<80x32xbf16>
    %c0_57 = arith.constant 0 : index
    %c2_58 = arith.constant 2 : index
    %c0_59 = arith.constant 0 : index
    %c0_60 = arith.constant 0 : index
    %c0_61 = arith.constant 0 : index
    %39 = vector.load %arg5[%c0_57, %c2_58, %c0_59, %c0_60, %c0_61] : memref<3x3x3x32x64xbf16, #tpu.memory_space<vmem>>, vector<1x1x1x32x64xbf16>
    %40 = vector.shape_cast %39 : vector<1x1x1x32x64xbf16> to vector<32x64xbf16>
    %cst_62 = arith.constant dense<0.000000e+00> : vector<80x64xf32>
    %41 = tpu.matmul %38, %40, %cst_62 {dimension_numbers = #tpu.dot_dimension_numbers<[1], [0], [0], [1], [0, 0, 1, 1], [], []>} : vector<80x32xbf16>, vector<32x64xbf16>, vector<80x64xf32> -> vector<80x64xf32>
    %42 = arith.addf %36, %41 : vector<80x64xf32>
    %c0_63 = arith.constant 0 : index
    %c0_64 = arith.constant 0 : index
    %c21 = arith.constant 21 : index
    %c0_65 = arith.constant 0 : index
    %43 = vector.load %arg2[%c0_63, %c0_64, %c21, %c0_65] : memref<1x1x110x32xbf16, #tpu.memory_space<vmem>>, vector<1x1x80x32xbf16>
    %44 = vector.shape_cast %43 : vector<1x1x80x32xbf16> to vector<80x32xbf16>
    %c0_66 = arith.constant 0 : index
    %c2_67 = arith.constant 2 : index
    %c1_68 = arith.constant 1 : index
    %c0_69 = arith.constant 0 : index
    %c0_70 = arith.constant 0 : index
    %45 = vector.load %arg5[%c0_66, %c2_67, %c1_68, %c0_69, %c0_70] : memref<3x3x3x32x64xbf16, #tpu.memory_space<vmem>>, vector<1x1x1x32x64xbf16>
    %46 = vector.shape_cast %45 : vector<1x1x1x32x64xbf16> to vector<32x64xbf16>
    %cst_71 = arith.constant dense<0.000000e+00> : vector<80x64xf32>
    %47 = tpu.matmul %44, %46, %cst_71 {dimension_numbers = #tpu.dot_dimension_numbers<[1], [0], [0], [1], [0, 0, 1, 1], [], []>} : vector<80x32xbf16>, vector<32x64xbf16>, vector<80x64xf32> -> vector<80x64xf32>
    %48 = arith.addf %42, %47 : vector<80x64xf32>
    %c0_72 = arith.constant 0 : index
    %c0_73 = arith.constant 0 : index
    %c22 = arith.constant 22 : index
    %c0_74 = arith.constant 0 : index
    %49 = vector.load %arg2[%c0_72, %c0_73, %c22, %c0_74] : memref<1x1x110x32xbf16, #tpu.memory_space<vmem>>, vector<1x1x80x32xbf16>
    %50 = vector.shape_cast %49 : vector<1x1x80x32xbf16> to vector<80x32xbf16>
    %c0_75 = arith.constant 0 : index
    %c2_76 = arith.constant 2 : index
    %c2_77 = arith.constant 2 : index
    %c0_78 = arith.constant 0 : index
    %c0_79 = arith.constant 0 : index
    %51 = vector.load %arg5[%c0_75, %c2_76, %c2_77, %c0_78, %c0_79] : memref<3x3x3x32x64xbf16, #tpu.memory_space<vmem>>, vector<1x1x1x32x64xbf16>
    %52 = vector.shape_cast %51 : vector<1x1x1x32x64xbf16> to vector<32x64xbf16>
    %cst_80 = arith.constant dense<0.000000e+00> : vector<80x64xf32>
    %53 = tpu.matmul %50, %52, %cst_80 {dimension_numbers = #tpu.dot_dimension_numbers<[1], [0], [0], [1], [0, 0, 1, 1], [], []>} : vector<80x32xbf16>, vector<32x64xbf16>, vector<80x64xf32> -> vector<80x64xf32>
    %54 = arith.addf %48, %53 : vector<80x64xf32>
    %c0_81 = arith.constant 0 : index
    %c0_82 = arith.constant 0 : index
    %c0_83 = arith.constant 0 : index
    %c0_84 = arith.constant 0 : index
    %55 = vector.load %arg3[%c0_81, %c0_82, %c0_83, %c0_84] : memref<1x1x110x32xbf16, #tpu.memory_space<vmem>>, vector<1x1x80x32xbf16>
    %56 = vector.shape_cast %55 : vector<1x1x80x32xbf16> to vector<80x32xbf16>
    %c1_85 = arith.constant 1 : index
    %c0_86 = arith.constant 0 : index
    %c0_87 = arith.constant 0 : index
    %c0_88 = arith.constant 0 : index
    %c0_89 = arith.constant 0 : index
    %57 = vector.load %arg5[%c1_85, %c0_86, %c0_87, %c0_88, %c0_89] : memref<3x3x3x32x64xbf16, #tpu.memory_space<vmem>>, vector<1x1x1x32x64xbf16>
    %58 = vector.shape_cast %57 : vector<1x1x1x32x64xbf16> to vector<32x64xbf16>
    %cst_90 = arith.constant dense<0.000000e+00> : vector<80x64xf32>
    %59 = tpu.matmul %56, %58, %cst_90 {dimension_numbers = #tpu.dot_dimension_numbers<[1], [0], [0], [1], [0, 0, 1, 1], [], []>} : vector<80x32xbf16>, vector<32x64xbf16>, vector<80x64xf32> -> vector<80x64xf32>
    %60 = arith.addf %54, %59 : vector<80x64xf32>
    %c0_91 = arith.constant 0 : index
    %c0_92 = arith.constant 0 : index
    %c1_93 = arith.constant 1 : index
    %c0_94 = arith.constant 0 : index
    %61 = vector.load %arg3[%c0_91, %c0_92, %c1_93, %c0_94] : memref<1x1x110x32xbf16, #tpu.memory_space<vmem>>, vector<1x1x80x32xbf16>
    %62 = vector.shape_cast %61 : vector<1x1x80x32xbf16> to vector<80x32xbf16>
    %c1_95 = arith.constant 1 : index
    %c0_96 = arith.constant 0 : index
    %c1_97 = arith.constant 1 : index
    %c0_98 = arith.constant 0 : index
    %c0_99 = arith.constant 0 : index
    %63 = vector.load %arg5[%c1_95, %c0_96, %c1_97, %c0_98, %c0_99] : memref<3x3x3x32x64xbf16, #tpu.memory_space<vmem>>, vector<1x1x1x32x64xbf16>
    %64 = vector.shape_cast %63 : vector<1x1x1x32x64xbf16> to vector<32x64xbf16>
    %cst_100 = arith.constant dense<0.000000e+00> : vector<80x64xf32>
    %65 = tpu.matmul %62, %64, %cst_100 {dimension_numbers = #tpu.dot_dimension_numbers<[1], [0], [0], [1], [0, 0, 1, 1], [], []>} : vector<80x32xbf16>, vector<32x64xbf16>, vector<80x64xf32> -> vector<80x64xf32>
    %66 = arith.addf %60, %65 : vector<80x64xf32>
    %c0_101 = arith.constant 0 : index
    %c0_102 = arith.constant 0 : index
    %c2_103 = arith.constant 2 : index
    %c0_104 = arith.constant 0 : index
    %67 = vector.load %arg3[%c0_101, %c0_102, %c2_103, %c0_104] : memref<1x1x110x32xbf16, #tpu.memory_space<vmem>>, vector<1x1x80x32xbf16>
    %68 = vector.shape_cast %67 : vector<1x1x80x32xbf16> to vector<80x32xbf16>
    %c1_105 = arith.constant 1 : index
    %c0_106 = arith.constant 0 : index
    %c2_107 = arith.constant 2 : index
    %c0_108 = arith.constant 0 : index
    %c0_109 = arith.constant 0 : index
    %69 = vector.load %arg5[%c1_105, %c0_106, %c2_107, %c0_108, %c0_109] : memref<3x3x3x32x64xbf16, #tpu.memory_space<vmem>>, vector<1x1x1x32x64xbf16>
    %70 = vector.shape_cast %69 : vector<1x1x1x32x64xbf16> to vector<32x64xbf16>
    %cst_110 = arith.constant dense<0.000000e+00> : vector<80x64xf32>
    %71 = tpu.matmul %68, %70, %cst_110 {dimension_numbers = #tpu.dot_dimension_numbers<[1], [0], [0], [1], [0, 0, 1, 1], [], []>} : vector<80x32xbf16>, vector<32x64xbf16>, vector<80x64xf32> -> vector<80x64xf32>
    %72 = arith.addf %66, %71 : vector<80x64xf32>
    %c0_111 = arith.constant 0 : index
    %c0_112 = arith.constant 0 : index
    %c10_113 = arith.constant 10 : index
    %c0_114 = arith.constant 0 : index
    %73 = vector.load %arg3[%c0_111, %c0_112, %c10_113, %c0_114] : memref<1x1x110x32xbf16, #tpu.memory_space<vmem>>, vector<1x1x80x32xbf16>
    %74 = vector.shape_cast %73 : vector<1x1x80x32xbf16> to vector<80x32xbf16>
    %c1_115 = arith.constant 1 : index
    %c1_116 = arith.constant 1 : index
    %c0_117 = arith.constant 0 : index
    %c0_118 = arith.constant 0 : index
    %c0_119 = arith.constant 0 : index
    %75 = vector.load %arg5[%c1_115, %c1_116, %c0_117, %c0_118, %c0_119] : memref<3x3x3x32x64xbf16, #tpu.memory_space<vmem>>, vector<1x1x1x32x64xbf16>
    %76 = vector.shape_cast %75 : vector<1x1x1x32x64xbf16> to vector<32x64xbf16>
    %cst_120 = arith.constant dense<0.000000e+00> : vector<80x64xf32>
    %77 = tpu.matmul %74, %76, %cst_120 {dimension_numbers = #tpu.dot_dimension_numbers<[1], [0], [0], [1], [0, 0, 1, 1], [], []>} : vector<80x32xbf16>, vector<32x64xbf16>, vector<80x64xf32> -> vector<80x64xf32>
    %78 = arith.addf %72, %77 : vector<80x64xf32>
    %c0_121 = arith.constant 0 : index
    %c0_122 = arith.constant 0 : index
    %c11_123 = arith.constant 11 : index
    %c0_124 = arith.constant 0 : index
    %79 = vector.load %arg3[%c0_121, %c0_122, %c11_123, %c0_124] : memref<1x1x110x32xbf16, #tpu.memory_space<vmem>>, vector<1x1x80x32xbf16>
    %80 = vector.shape_cast %79 : vector<1x1x80x32xbf16> to vector<80x32xbf16>
    %c1_125 = arith.constant 1 : index
    %c1_126 = arith.constant 1 : index
    %c1_127 = arith.constant 1 : index
    %c0_128 = arith.constant 0 : index
    %c0_129 = arith.constant 0 : index
    %81 = vector.load %arg5[%c1_125, %c1_126, %c1_127, %c0_128, %c0_129] : memref<3x3x3x32x64xbf16, #tpu.memory_space<vmem>>, vector<1x1x1x32x64xbf16>
    %82 = vector.shape_cast %81 : vector<1x1x1x32x64xbf16> to vector<32x64xbf16>
    %cst_130 = arith.constant dense<0.000000e+00> : vector<80x64xf32>
    %83 = tpu.matmul %80, %82, %cst_130 {dimension_numbers = #tpu.dot_dimension_numbers<[1], [0], [0], [1], [0, 0, 1, 1], [], []>} : vector<80x32xbf16>, vector<32x64xbf16>, vector<80x64xf32> -> vector<80x64xf32>
    %84 = arith.addf %78, %83 : vector<80x64xf32>
    %c0_131 = arith.constant 0 : index
    %c0_132 = arith.constant 0 : index
    %c12_133 = arith.constant 12 : index
    %c0_134 = arith.constant 0 : index
    %85 = vector.load %arg3[%c0_131, %c0_132, %c12_133, %c0_134] : memref<1x1x110x32xbf16, #tpu.memory_space<vmem>>, vector<1x1x80x32xbf16>
    %86 = vector.shape_cast %85 : vector<1x1x80x32xbf16> to vector<80x32xbf16>
    %c1_135 = arith.constant 1 : index
    %c1_136 = arith.constant 1 : index
    %c2_137 = arith.constant 2 : index
    %c0_138 = arith.constant 0 : index
    %c0_139 = arith.constant 0 : index
    %87 = vector.load %arg5[%c1_135, %c1_136, %c2_137, %c0_138, %c0_139] : memref<3x3x3x32x64xbf16, #tpu.memory_space<vmem>>, vector<1x1x1x32x64xbf16>
    %88 = vector.shape_cast %87 : vector<1x1x1x32x64xbf16> to vector<32x64xbf16>
    %cst_140 = arith.constant dense<0.000000e+00> : vector<80x64xf32>
    %89 = tpu.matmul %86, %88, %cst_140 {dimension_numbers = #tpu.dot_dimension_numbers<[1], [0], [0], [1], [0, 0, 1, 1], [], []>} : vector<80x32xbf16>, vector<32x64xbf16>, vector<80x64xf32> -> vector<80x64xf32>
    %90 = arith.addf %84, %89 : vector<80x64xf32>
    %c0_141 = arith.constant 0 : index
    %c0_142 = arith.constant 0 : index
    %c20_143 = arith.constant 20 : index
    %c0_144 = arith.constant 0 : index
    %91 = vector.load %arg3[%c0_141, %c0_142, %c20_143, %c0_144] : memref<1x1x110x32xbf16, #tpu.memory_space<vmem>>, vector<1x1x80x32xbf16>
    %92 = vector.shape_cast %91 : vector<1x1x80x32xbf16> to vector<80x32xbf16>
    %c1_145 = arith.constant 1 : index
    %c2_146 = arith.constant 2 : index
    %c0_147 = arith.constant 0 : index
    %c0_148 = arith.constant 0 : index
    %c0_149 = arith.constant 0 : index
    %93 = vector.load %arg5[%c1_145, %c2_146, %c0_147, %c0_148, %c0_149] : memref<3x3x3x32x64xbf16, #tpu.memory_space<vmem>>, vector<1x1x1x32x64xbf16>
    %94 = vector.shape_cast %93 : vector<1x1x1x32x64xbf16> to vector<32x64xbf16>
    %cst_150 = arith.constant dense<0.000000e+00> : vector<80x64xf32>
    %95 = tpu.matmul %92, %94, %cst_150 {dimension_numbers = #tpu.dot_dimension_numbers<[1], [0], [0], [1], [0, 0, 1, 1], [], []>} : vector<80x32xbf16>, vector<32x64xbf16>, vector<80x64xf32> -> vector<80x64xf32>
    %96 = arith.addf %90, %95 : vector<80x64xf32>
    %c0_151 = arith.constant 0 : index
    %c0_152 = arith.constant 0 : index
    %c21_153 = arith.constant 21 : index
    %c0_154 = arith.constant 0 : index
    %97 = vector.load %arg3[%c0_151, %c0_152, %c21_153, %c0_154] : memref<1x1x110x32xbf16, #tpu.memory_space<vmem>>, vector<1x1x80x32xbf16>
    %98 = vector.shape_cast %97 : vector<1x1x80x32xbf16> to vector<80x32xbf16>
    %c1_155 = arith.constant 1 : index
    %c2_156 = arith.constant 2 : index
    %c1_157 = arith.constant 1 : index
    %c0_158 = arith.constant 0 : index
    %c0_159 = arith.constant 0 : index
    %99 = vector.load %arg5[%c1_155, %c2_156, %c1_157, %c0_158, %c0_159] : memref<3x3x3x32x64xbf16, #tpu.memory_space<vmem>>, vector<1x1x1x32x64xbf16>
    %100 = vector.shape_cast %99 : vector<1x1x1x32x64xbf16> to vector<32x64xbf16>
    %cst_160 = arith.constant dense<0.000000e+00> : vector<80x64xf32>
    %101 = tpu.matmul %98, %100, %cst_160 {dimension_numbers = #tpu.dot_dimension_numbers<[1], [0], [0], [1], [0, 0, 1, 1], [], []>} : vector<80x32xbf16>, vector<32x64xbf16>, vector<80x64xf32> -> vector<80x64xf32>
    %102 = arith.addf %96, %101 : vector<80x64xf32>
    %c0_161 = arith.constant 0 : index
    %c0_162 = arith.constant 0 : index
    %c22_163 = arith.constant 22 : index
    %c0_164 = arith.constant 0 : index
    %103 = vector.load %arg3[%c0_161, %c0_162, %c22_163, %c0_164] : memref<1x1x110x32xbf16, #tpu.memory_space<vmem>>, vector<1x1x80x32xbf16>
    %104 = vector.shape_cast %103 : vector<1x1x80x32xbf16> to vector<80x32xbf16>
    %c1_165 = arith.constant 1 : index
    %c2_166 = arith.constant 2 : index
    %c2_167 = arith.constant 2 : index
    %c0_168 = arith.constant 0 : index
    %c0_169 = arith.constant 0 : index
    %105 = vector.load %arg5[%c1_165, %c2_166, %c2_167, %c0_168, %c0_169] : memref<3x3x3x32x64xbf16, #tpu.memory_space<vmem>>, vector<1x1x1x32x64xbf16>
    %106 = vector.shape_cast %105 : vector<1x1x1x32x64xbf16> to vector<32x64xbf16>
    %cst_170 = arith.constant dense<0.000000e+00> : vector<80x64xf32>
    %107 = tpu.matmul %104, %106, %cst_170 {dimension_numbers = #tpu.dot_dimension_numbers<[1], [0], [0], [1], [0, 0, 1, 1], [], []>} : vector<80x32xbf16>, vector<32x64xbf16>, vector<80x64xf32> -> vector<80x64xf32>
    %108 = arith.addf %102, %107 : vector<80x64xf32>
    %c0_171 = arith.constant 0 : index
    %c0_172 = arith.constant 0 : index
    %c0_173 = arith.constant 0 : index
    %c0_174 = arith.constant 0 : index
    %109 = vector.load %arg4[%c0_171, %c0_172, %c0_173, %c0_174] : memref<1x1x110x32xbf16, #tpu.memory_space<vmem>>, vector<1x1x80x32xbf16>
    %110 = vector.shape_cast %109 : vector<1x1x80x32xbf16> to vector<80x32xbf16>
    %c2_175 = arith.constant 2 : index
    %c0_176 = arith.constant 0 : index
    %c0_177 = arith.constant 0 : index
    %c0_178 = arith.constant 0 : index
    %c0_179 = arith.constant 0 : index
    %111 = vector.load %arg5[%c2_175, %c0_176, %c0_177, %c0_178, %c0_179] : memref<3x3x3x32x64xbf16, #tpu.memory_space<vmem>>, vector<1x1x1x32x64xbf16>
    %112 = vector.shape_cast %111 : vector<1x1x1x32x64xbf16> to vector<32x64xbf16>
    %cst_180 = arith.constant dense<0.000000e+00> : vector<80x64xf32>
    %113 = tpu.matmul %110, %112, %cst_180 {dimension_numbers = #tpu.dot_dimension_numbers<[1], [0], [0], [1], [0, 0, 1, 1], [], []>} : vector<80x32xbf16>, vector<32x64xbf16>, vector<80x64xf32> -> vector<80x64xf32>
    %114 = arith.addf %108, %113 : vector<80x64xf32>
    %c0_181 = arith.constant 0 : index
    %c0_182 = arith.constant 0 : index
    %c1_183 = arith.constant 1 : index
    %c0_184 = arith.constant 0 : index
    %115 = vector.load %arg4[%c0_181, %c0_182, %c1_183, %c0_184] : memref<1x1x110x32xbf16, #tpu.memory_space<vmem>>, vector<1x1x80x32xbf16>
    %116 = vector.shape_cast %115 : vector<1x1x80x32xbf16> to vector<80x32xbf16>
    %c2_185 = arith.constant 2 : index
    %c0_186 = arith.constant 0 : index
    %c1_187 = arith.constant 1 : index
    %c0_188 = arith.constant 0 : index
    %c0_189 = arith.constant 0 : index
    %117 = vector.load %arg5[%c2_185, %c0_186, %c1_187, %c0_188, %c0_189] : memref<3x3x3x32x64xbf16, #tpu.memory_space<vmem>>, vector<1x1x1x32x64xbf16>
    %118 = vector.shape_cast %117 : vector<1x1x1x32x64xbf16> to vector<32x64xbf16>
    %cst_190 = arith.constant dense<0.000000e+00> : vector<80x64xf32>
    %119 = tpu.matmul %116, %118, %cst_190 {dimension_numbers = #tpu.dot_dimension_numbers<[1], [0], [0], [1], [0, 0, 1, 1], [], []>} : vector<80x32xbf16>, vector<32x64xbf16>, vector<80x64xf32> -> vector<80x64xf32>
    %120 = arith.addf %114, %119 : vector<80x64xf32>
    %c0_191 = arith.constant 0 : index
    %c0_192 = arith.constant 0 : index
    %c2_193 = arith.constant 2 : index
    %c0_194 = arith.constant 0 : index
    %121 = vector.load %arg4[%c0_191, %c0_192, %c2_193, %c0_194] : memref<1x1x110x32xbf16, #tpu.memory_space<vmem>>, vector<1x1x80x32xbf16>
    %122 = vector.shape_cast %121 : vector<1x1x80x32xbf16> to vector<80x32xbf16>
    %c2_195 = arith.constant 2 : index
    %c0_196 = arith.constant 0 : index
    %c2_197 = arith.constant 2 : index
    %c0_198 = arith.constant 0 : index
    %c0_199 = arith.constant 0 : index
    %123 = vector.load %arg5[%c2_195, %c0_196, %c2_197, %c0_198, %c0_199] : memref<3x3x3x32x64xbf16, #tpu.memory_space<vmem>>, vector<1x1x1x32x64xbf16>
    %124 = vector.shape_cast %123 : vector<1x1x1x32x64xbf16> to vector<32x64xbf16>
    %cst_200 = arith.constant dense<0.000000e+00> : vector<80x64xf32>
    %125 = tpu.matmul %122, %124, %cst_200 {dimension_numbers = #tpu.dot_dimension_numbers<[1], [0], [0], [1], [0, 0, 1, 1], [], []>} : vector<80x32xbf16>, vector<32x64xbf16>, vector<80x64xf32> -> vector<80x64xf32>
    %126 = arith.addf %120, %125 : vector<80x64xf32>
    %c0_201 = arith.constant 0 : index
    %c0_202 = arith.constant 0 : index
    %c10_203 = arith.constant 10 : index
    %c0_204 = arith.constant 0 : index
    %127 = vector.load %arg4[%c0_201, %c0_202, %c10_203, %c0_204] : memref<1x1x110x32xbf16, #tpu.memory_space<vmem>>, vector<1x1x80x32xbf16>
    %128 = vector.shape_cast %127 : vector<1x1x80x32xbf16> to vector<80x32xbf16>
    %c2_205 = arith.constant 2 : index
    %c1_206 = arith.constant 1 : index
    %c0_207 = arith.constant 0 : index
    %c0_208 = arith.constant 0 : index
    %c0_209 = arith.constant 0 : index
    %129 = vector.load %arg5[%c2_205, %c1_206, %c0_207, %c0_208, %c0_209] : memref<3x3x3x32x64xbf16, #tpu.memory_space<vmem>>, vector<1x1x1x32x64xbf16>
    %130 = vector.shape_cast %129 : vector<1x1x1x32x64xbf16> to vector<32x64xbf16>
    %cst_210 = arith.constant dense<0.000000e+00> : vector<80x64xf32>
    %131 = tpu.matmul %128, %130, %cst_210 {dimension_numbers = #tpu.dot_dimension_numbers<[1], [0], [0], [1], [0, 0, 1, 1], [], []>} : vector<80x32xbf16>, vector<32x64xbf16>, vector<80x64xf32> -> vector<80x64xf32>
    %132 = arith.addf %126, %131 : vector<80x64xf32>
    %c0_211 = arith.constant 0 : index
    %c0_212 = arith.constant 0 : index
    %c11_213 = arith.constant 11 : index
    %c0_214 = arith.constant 0 : index
    %133 = vector.load %arg4[%c0_211, %c0_212, %c11_213, %c0_214] : memref<1x1x110x32xbf16, #tpu.memory_space<vmem>>, vector<1x1x80x32xbf16>
    %134 = vector.shape_cast %133 : vector<1x1x80x32xbf16> to vector<80x32xbf16>
    %c2_215 = arith.constant 2 : index
    %c1_216 = arith.constant 1 : index
    %c1_217 = arith.constant 1 : index
    %c0_218 = arith.constant 0 : index
    %c0_219 = arith.constant 0 : index
    %135 = vector.load %arg5[%c2_215, %c1_216, %c1_217, %c0_218, %c0_219] : memref<3x3x3x32x64xbf16, #tpu.memory_space<vmem>>, vector<1x1x1x32x64xbf16>
    %136 = vector.shape_cast %135 : vector<1x1x1x32x64xbf16> to vector<32x64xbf16>
    %cst_220 = arith.constant dense<0.000000e+00> : vector<80x64xf32>
    %137 = tpu.matmul %134, %136, %cst_220 {dimension_numbers = #tpu.dot_dimension_numbers<[1], [0], [0], [1], [0, 0, 1, 1], [], []>} : vector<80x32xbf16>, vector<32x64xbf16>, vector<80x64xf32> -> vector<80x64xf32>
    %138 = arith.addf %132, %137 : vector<80x64xf32>
    %c0_221 = arith.constant 0 : index
    %c0_222 = arith.constant 0 : index
    %c12_223 = arith.constant 12 : index
    %c0_224 = arith.constant 0 : index
    %139 = vector.load %arg4[%c0_221, %c0_222, %c12_223, %c0_224] : memref<1x1x110x32xbf16, #tpu.memory_space<vmem>>, vector<1x1x80x32xbf16>
    %140 = vector.shape_cast %139 : vector<1x1x80x32xbf16> to vector<80x32xbf16>
    %c2_225 = arith.constant 2 : index
    %c1_226 = arith.constant 1 : index
    %c2_227 = arith.constant 2 : index
    %c0_228 = arith.constant 0 : index
    %c0_229 = arith.constant 0 : index
    %141 = vector.load %arg5[%c2_225, %c1_226, %c2_227, %c0_228, %c0_229] : memref<3x3x3x32x64xbf16, #tpu.memory_space<vmem>>, vector<1x1x1x32x64xbf16>
    %142 = vector.shape_cast %141 : vector<1x1x1x32x64xbf16> to vector<32x64xbf16>
    %cst_230 = arith.constant dense<0.000000e+00> : vector<80x64xf32>
    %143 = tpu.matmul %140, %142, %cst_230 {dimension_numbers = #tpu.dot_dimension_numbers<[1], [0], [0], [1], [0, 0, 1, 1], [], []>} : vector<80x32xbf16>, vector<32x64xbf16>, vector<80x64xf32> -> vector<80x64xf32>
    %144 = arith.addf %138, %143 : vector<80x64xf32>
    %c0_231 = arith.constant 0 : index
    %c0_232 = arith.constant 0 : index
    %c20_233 = arith.constant 20 : index
    %c0_234 = arith.constant 0 : index
    %145 = vector.load %arg4[%c0_231, %c0_232, %c20_233, %c0_234] : memref<1x1x110x32xbf16, #tpu.memory_space<vmem>>, vector<1x1x80x32xbf16>
    %146 = vector.shape_cast %145 : vector<1x1x80x32xbf16> to vector<80x32xbf16>
    %c2_235 = arith.constant 2 : index
    %c2_236 = arith.constant 2 : index
    %c0_237 = arith.constant 0 : index
    %c0_238 = arith.constant 0 : index
    %c0_239 = arith.constant 0 : index
    %147 = vector.load %arg5[%c2_235, %c2_236, %c0_237, %c0_238, %c0_239] : memref<3x3x3x32x64xbf16, #tpu.memory_space<vmem>>, vector<1x1x1x32x64xbf16>
    %148 = vector.shape_cast %147 : vector<1x1x1x32x64xbf16> to vector<32x64xbf16>
    %cst_240 = arith.constant dense<0.000000e+00> : vector<80x64xf32>
    %149 = tpu.matmul %146, %148, %cst_240 {dimension_numbers = #tpu.dot_dimension_numbers<[1], [0], [0], [1], [0, 0, 1, 1], [], []>} : vector<80x32xbf16>, vector<32x64xbf16>, vector<80x64xf32> -> vector<80x64xf32>
    %150 = arith.addf %144, %149 : vector<80x64xf32>
    %c0_241 = arith.constant 0 : index
    %c0_242 = arith.constant 0 : index
    %c21_243 = arith.constant 21 : index
    %c0_244 = arith.constant 0 : index
    %151 = vector.load %arg4[%c0_241, %c0_242, %c21_243, %c0_244] : memref<1x1x110x32xbf16, #tpu.memory_space<vmem>>, vector<1x1x80x32xbf16>
    %152 = vector.shape_cast %151 : vector<1x1x80x32xbf16> to vector<80x32xbf16>
    %c2_245 = arith.constant 2 : index
    %c2_246 = arith.constant 2 : index
    %c1_247 = arith.constant 1 : index
    %c0_248 = arith.constant 0 : index
    %c0_249 = arith.constant 0 : index
    %153 = vector.load %arg5[%c2_245, %c2_246, %c1_247, %c0_248, %c0_249] : memref<3x3x3x32x64xbf16, #tpu.memory_space<vmem>>, vector<1x1x1x32x64xbf16>
    %154 = vector.shape_cast %153 : vector<1x1x1x32x64xbf16> to vector<32x64xbf16>
    %cst_250 = arith.constant dense<0.000000e+00> : vector<80x64xf32>
    %155 = tpu.matmul %152, %154, %cst_250 {dimension_numbers = #tpu.dot_dimension_numbers<[1], [0], [0], [1], [0, 0, 1, 1], [], []>} : vector<80x32xbf16>, vector<32x64xbf16>, vector<80x64xf32> -> vector<80x64xf32>
    %156 = arith.addf %150, %155 : vector<80x64xf32>
    %c0_251 = arith.constant 0 : index
    %c0_252 = arith.constant 0 : index
    %c22_253 = arith.constant 22 : index
    %c0_254 = arith.constant 0 : index
    %157 = vector.load %arg4[%c0_251, %c0_252, %c22_253, %c0_254] : memref<1x1x110x32xbf16, #tpu.memory_space<vmem>>, vector<1x1x80x32xbf16>
    %158 = vector.shape_cast %157 : vector<1x1x80x32xbf16> to vector<80x32xbf16>
    %c2_255 = arith.constant 2 : index
    %c2_256 = arith.constant 2 : index
    %c2_257 = arith.constant 2 : index
    %c0_258 = arith.constant 0 : index
    %c0_259 = arith.constant 0 : index
    %159 = vector.load %arg5[%c2_255, %c2_256, %c2_257, %c0_258, %c0_259] : memref<3x3x3x32x64xbf16, #tpu.memory_space<vmem>>, vector<1x1x1x32x64xbf16>
    %160 = vector.shape_cast %159 : vector<1x1x1x32x64xbf16> to vector<32x64xbf16>
    %cst_260 = arith.constant dense<0.000000e+00> : vector<80x64xf32>
    %161 = tpu.matmul %158, %160, %cst_260 {dimension_numbers = #tpu.dot_dimension_numbers<[1], [0], [0], [1], [0, 0, 1, 1], [], []>} : vector<80x32xbf16>, vector<32x64xbf16>, vector<80x64xf32> -> vector<80x64xf32>
    %162 = arith.addf %156, %161 : vector<80x64xf32>
    %c0_261 = arith.constant 0 : index
    %c0_262 = arith.constant 0 : index
    %163 = vector.load %arg6[%c0_261, %c0_262] : memref<1x64xf32, #tpu.memory_space<vmem>>, vector<1x64xf32>
    %164 = vector.broadcast %163 : vector<1x64xf32> to vector<80x64xf32>
    %165 = arith.addf %162, %164 : vector<80x64xf32>
    %166 = arith.truncf %165 : vector<80x64xf32> to vector<80x64xbf16>
    %c0_263 = arith.constant 0 : index
    %c0_264 = arith.constant 0 : index
    %c0_265 = arith.constant 0 : index
    %c0_266 = arith.constant 0 : index
    %167 = vector.load %arg7[%c0_263, %c0_264, %c0_265, %c0_266] : memref<1x1x80x64xbf16, #tpu.memory_space<vmem>>, vector<1x1x80x64xbf16>
    %168 = vector.shape_cast %167 : vector<1x1x80x64xbf16> to vector<80x64xbf16>
    %169 = vector.shape_cast %166 : vector<80x64xbf16> to vector<1x1x80x64xbf16>
    tpu.vector_store %arg7[%c0_263, %c0_264, %c0_265, %c0_266], %169 {strides = array<i32>} : memref<1x1x80x64xbf16, #tpu.memory_space<vmem>>, vector<1x1x80x64xbf16>,
    %170 = tpu.iota {dimensions = array<i32: 0>} : vector<80x1xi32>
    %c10_i32 = arith.constant 10 : i32
    %c0_i32 = arith.constant 0 : i32
    %171 = arith.cmpi eq, %c10_i32, %c0_i32 : i32
    %c1_i32 = arith.constant 1 : i32
    %172 = arith.select %171, %c1_i32, %c10_i32 : i32
    %173 = vector.broadcast %172 : i32 to vector<80x1xi32>
    %174 = arith.remsi %170, %173 : vector<80x1xi32>
    %c0_i32_267 = arith.constant 0 : i32
    %175 = vector.broadcast %c0_i32_267 : i32 to vector<80x1xi32>
    %176 = arith.cmpi ne, %174, %175 : vector<80x1xi32>
    %c0_i32_268 = arith.constant 0 : i32
    %177 = vector.broadcast %c0_i32_268 : i32 to vector<80x1xi32>
    %178 = arith.cmpi slt, %174, %177 : vector<80x1xi32>
    %c0_i32_269 = arith.constant 0 : i32
    %179 = arith.cmpi slt, %172, %c0_i32_269 : i32
    %180 = vector.broadcast %179 : i1 to vector<80x1xi1>
    %181 = vector.broadcast %180 : vector<80x1xi1> to vector<80x1xi1>
    %182 = arith.xori %178, %181 : vector<80x1xi1>
    %183 = arith.andi %182, %176 : vector<80x1xi1>
    %184 = vector.broadcast %172 : i32 to vector<80x1xi32>
    %185 = arith.addi %174, %184 : vector<80x1xi32>
    %186 = arith.select %183, %185, %174 : vector<80x1xi1>, vector<80x1xi32>
    %c8_i32 = arith.constant 8 : i32
    %187 = vector.broadcast %c8_i32 : i32 to vector<80x1xi32>
    %188 = arith.cmpi slt, %186, %187 : vector<80x1xi32>
    %cst_270 = arith.constant 0.000000e+00 : f32
    %189 = vector.shape_cast %188 : vector<80x1xi1> to vector<80x1xi1>
    %190 = vector.broadcast %189 : vector<80x1xi1> to vector<80x64xi1>
    %191 = vector.broadcast %cst_270 : f32 to vector<80x64xf32>
    %192 = arith.select %190, %165, %191 : vector<80x64xi1>, vector<80x64xf32>
    %cst_271 = arith.constant dense<0.000000e+00> : vector<64xf32>
    %193 = vector.multi_reduction <add>, %192, %cst_271 [0] : vector<80x64xf32> to vector<64xf32>
    %194 = vector.shape_cast %193 : vector<64xf32> to vector<1x64xf32>
    %c0_272 = arith.constant 0 : index
    %c0_273 = arith.constant 0 : index
    %c0_274 = arith.constant 0 : index
    %c0_275 = arith.constant 0 : index
    %195 = vector.load %arg8[%c0_272, %c0_273, %c0_274, %c0_275] : memref<1x1x1x64xf32, #tpu.memory_space<vmem>>, vector<1x1x1x64xf32>
    %196 = vector.shape_cast %195 : vector<1x1x1x64xf32> to vector<1x64xf32>
    %197 = vector.shape_cast %194 : vector<1x64xf32> to vector<1x1x1x64xf32>
    tpu.vector_store %arg8[%c0_272, %c0_273, %c0_274, %c0_275], %197 {strides = array<i32>} : memref<1x1x1x64xf32, #tpu.memory_space<vmem>>, vector<1x1x1x64xf32>,
    %198 = arith.mulf %192, %192 : vector<80x64xf32>
    %cst_276 = arith.constant dense<0.000000e+00> : vector<64xf32>
    %199 = vector.multi_reduction <add>, %198, %cst_276 [0] : vector<80x64xf32> to vector<64xf32>
    %200 = vector.shape_cast %199 : vector<64xf32> to vector<1x64xf32>
    %c0_277 = arith.constant 0 : index
    %c0_278 = arith.constant 0 : index
    %c0_279 = arith.constant 0 : index
    %c0_280 = arith.constant 0 : index
    %201 = vector.load %arg9[%c0_277, %c0_278, %c0_279, %c0_280] : memref<1x1x1x64xf32, #tpu.memory_space<vmem>>, vector<1x1x1x64xf32>
    %202 = vector.shape_cast %201 : vector<1x1x1x64xf32> to vector<1x64xf32>
    %203 = vector.shape_cast %200 : vector<1x64xf32> to vector<1x1x1x64xf32>
    tpu.vector_store %arg9[%c0_277, %c0_278, %c0_279, %c0_280], %203 {strides = array<i32>} : memref<1x1x1x64xf32, #tpu.memory_space<vmem>>, vector<1x1x1x64xf32>,
    return
  }
  func.func @transform_0(%arg0: i32, %arg1: i32) -> (i32, i32, i32, i32) {
    %c0_i32 = arith.constant 0 : i32
    %0 = arith.addi %arg1, %c0_i32 : i32
    %c0_i32_0 = arith.constant 0 : i32
    %c0_i32_1 = arith.constant 0 : i32
    %c0_i32_2 = arith.constant 0 : i32
    return %arg0, %0, %c0_i32_0, %c0_i32_1 : i32, i32, i32, i32
  }
  func.func @transform_1(%arg0: i32, %arg1: i32) -> (i32, i32, i32, i32) {
    %c1_i32 = arith.constant 1 : i32
    %0 = arith.addi %arg1, %c1_i32 : i32
    %c0_i32 = arith.constant 0 : i32
    %c0_i32_0 = arith.constant 0 : i32
    %c0_i32_1 = arith.constant 0 : i32
    return %arg0, %0, %c0_i32, %c0_i32_0 : i32, i32, i32, i32
  }
  func.func @transform_2(%arg0: i32, %arg1: i32) -> (i32, i32, i32, i32) {
    %c2_i32 = arith.constant 2 : i32
    %0 = arith.addi %arg1, %c2_i32 : i32
    %c0_i32 = arith.constant 0 : i32
    %c0_i32_0 = arith.constant 0 : i32
    %c0_i32_1 = arith.constant 0 : i32
    return %arg0, %0, %c0_i32, %c0_i32_0 : i32, i32, i32, i32
  }
  func.func @transform_3(%arg0: i32, %arg1: i32) -> (i32, i32, i32, i32, i32) {
    %c0_i32 = arith.constant 0 : i32
    %c0_i32_0 = arith.constant 0 : i32
    %c0_i32_1 = arith.constant 0 : i32
    %c0_i32_2 = arith.constant 0 : i32
    %c0_i32_3 = arith.constant 0 : i32
    %c0_i32_4 = arith.constant 0 : i32
    return %c0_i32, %c0_i32_0, %c0_i32_1, %c0_i32_2, %c0_i32_3 : i32, i32, i32, i32, i32
  }
  func.func @transform_4(%arg0: i32, %arg1: i32) -> (i32, i32) {
    %c0_i32 = arith.constant 0 : i32
    %c0_i32_0 = arith.constant 0 : i32
    %c0_i32_1 = arith.constant 0 : i32
    return %c0_i32, %c0_i32_0 : i32, i32
  }
  func.func @transform_5(%arg0: i32, %arg1: i32) -> (i32, i32, i32, i32) {
    %c0_i32 = arith.constant 0 : i32
    %c0_i32_0 = arith.constant 0 : i32
    %c0_i32_1 = arith.constant 0 : i32
    return %arg0, %arg1, %c0_i32, %c0_i32_0 : i32, i32, i32, i32
  }
  func.func @transform_6(%arg0: i32, %arg1: i32) -> (i32, i32, i32, i32) {
    %c0_i32 = arith.constant 0 : i32
    %c0_i32_0 = arith.constant 0 : i32
    %c0_i32_1 = arith.constant 0 : i32
    return %arg0, %arg1, %c0_i32, %c0_i32_0 : i32, i32, i32, i32
  }
  func.func @transform_7(%arg0: i32, %arg1: i32) -> (i32, i32, i32, i32) {
    %c0_i32 = arith.constant 0 : i32
    %c0_i32_0 = arith.constant 0 : i32
    %c0_i32_1 = arith.constant 0 : i32
    return %arg0, %arg1, %c0_i32, %c0_i32_0 : i32, i32, i32, i32
  }
}

module attributes {stable_mosaic.version = 11 : i64} {
  func.func @_bn_relu_pool_kernel(%arg0: i32, %arg1: i32, %arg2: memref<1x2x8x5x128xbf16, #tpu.memory_space<vmem>>, %arg3: memref<1x128xf32, #tpu.memory_space<vmem>>, %arg4: memref<1x128xf32, #tpu.memory_space<vmem>>, %arg5: memref<1x2x8x5x128xf32, #tpu.memory_space<vmem>>, %arg6: memref<1x1x4x4x64xf32, #tpu.memory_space<vmem>>) attributes {dimension_semantics = [#tpu.dimension_semantics<parallel>, #tpu.dimension_semantics<parallel>], iteration_bounds = array<i64: 2, 4>, scalar_prefetch = 0 : i64, scratch_operands = 0 : i64, tpu.core_type = #tpu.core_type<tc>, window_params = [{transform_indices = @transform_0, window_bounds = array<i64: 1, 2, 8, 5, 128>}, {pipeline_mode = #tpu.pipeline_mode<synchronous>, transform_indices = @transform_1, window_bounds = array<i64: 1, 128>}, {pipeline_mode = #tpu.pipeline_mode<synchronous>, transform_indices = @transform_2, window_bounds = array<i64: 1, 128>}, {transform_indices = @transform_3, window_bounds = array<i64: 1, 2, 8, 5, 128>}, {transform_indices = @transform_4, window_bounds = array<i64: 1, 1, 4, 4, 64>}]} {
    %c0 = arith.constant 0 : index
    %c0_0 = arith.constant 0 : index
    %c0_1 = arith.constant 0 : index
    %c0_2 = arith.constant 0 : index
    %c0_3 = arith.constant 0 : index
    %0 = vector.load %arg2[%c0, %c0_0, %c0_1, %c0_2, %c0_3] : memref<1x2x8x5x128xbf16, #tpu.memory_space<vmem>>, vector<1x2x8x5x128xbf16>
    %1 = vector.shape_cast %0 : vector<1x2x8x5x128xbf16> to vector<2x8x5x128xbf16>
    %2 = arith.extf %1 : vector<2x8x5x128xbf16> to vector<2x8x5x128xf32>
    %c0_4 = arith.constant 0 : index
    %c0_5 = arith.constant 0 : index
    %3 = vector.load %arg3[%c0_4, %c0_5] : memref<1x128xf32, #tpu.memory_space<vmem>>, vector<1x128xf32>
    %4 = vector.shape_cast %3 : vector<1x128xf32> to vector<1x1x1x128xf32>
    %5 = vector.broadcast %4 : vector<1x1x1x128xf32> to vector<2x8x5x128xf32>
    %6 = arith.mulf %2, %5 : vector<2x8x5x128xf32>
    %c0_6 = arith.constant 0 : index
    %c0_7 = arith.constant 0 : index
    %7 = vector.load %arg4[%c0_6, %c0_7] : memref<1x128xf32, #tpu.memory_space<vmem>>, vector<1x128xf32>
    %8 = vector.shape_cast %7 : vector<1x128xf32> to vector<1x1x1x128xf32>
    %9 = vector.broadcast %8 : vector<1x1x1x128xf32> to vector<2x8x5x128xf32>
    %10 = arith.addf %6, %9 : vector<2x8x5x128xf32>
    %cst = arith.constant 0.000000e+00 : f32
    %11 = vector.broadcast %cst : f32 to vector<2x8x5x128xf32>
    %12 = arith.maximumf %10, %11 : vector<2x8x5x128xf32>
    %c0_8 = arith.constant 0 : index
    %c0_9 = arith.constant 0 : index
    %c0_10 = arith.constant 0 : index
    %c0_11 = arith.constant 0 : index
    %c0_12 = arith.constant 0 : index
    %13 = vector.load %arg5[%c0_8, %c0_9, %c0_10, %c0_11, %c0_12] : memref<1x2x8x5x128xf32, #tpu.memory_space<vmem>>, vector<1x2x8x5x128xf32>
    %14 = vector.shape_cast %13 : vector<1x2x8x5x128xf32> to vector<2x8x5x128xf32>
    %15 = vector.shape_cast %12 : vector<2x8x5x128xf32> to vector<1x2x8x5x128xf32>
    tpu.vector_store %arg5[%c0_8, %c0_9, %c0_10, %c0_11, %c0_12], %15 {strides = array<i32>} : memref<1x2x8x5x128xf32, #tpu.memory_space<vmem>>, vector<1x2x8x5x128xf32>,
    %16 = vector.extract_strided_slice %12 {offsets = [0, 0, 0, 0], sizes = [1, 8, 5, 128], strides = [1, 1, 1, 1]} : vector<2x8x5x128xf32> to vector<1x8x5x128xf32>
    %17 = vector.shape_cast %16 : vector<1x8x5x128xf32> to vector<8x5x128xf32>
    %18 = vector.extract_strided_slice %12 {offsets = [1, 0, 0, 0], sizes = [1, 8, 5, 128], strides = [1, 1, 1, 1]} : vector<2x8x5x128xf32> to vector<1x8x5x128xf32>
    %19 = vector.shape_cast %18 : vector<1x8x5x128xf32> to vector<8x5x128xf32>
    %20 = arith.maximumf %17, %19 : vector<8x5x128xf32>
    %21 = vector.shape_cast %20 : vector<8x5x128xf32> to vector<4x2x5x128xf32>
    %22 = vector.extract_strided_slice %21 {offsets = [0, 0, 0, 0], sizes = [4, 1, 5, 128], strides = [1, 1, 1, 1]} : vector<4x2x5x128xf32> to vector<4x1x5x128xf32>
    %23 = vector.shape_cast %22 : vector<4x1x5x128xf32> to vector<4x5x128xf32>
    %24 = vector.extract_strided_slice %21 {offsets = [0, 1, 0, 0], sizes = [4, 1, 5, 128], strides = [1, 1, 1, 1]} : vector<4x2x5x128xf32> to vector<4x1x5x128xf32>
    %25 = vector.shape_cast %24 : vector<4x1x5x128xf32> to vector<4x5x128xf32>
    %26 = arith.maximumf %23, %25 : vector<4x5x128xf32>
    %27 = vector.extract_strided_slice %26 {offsets = [0, 0, 0], sizes = [4, 4, 128], strides = [1, 1, 1]} : vector<4x5x128xf32> to vector<4x4x128xf32>
    %28 = vector.extract_strided_slice %27 {offsets = [0, 0, 0], sizes = [4, 4, 64], strides = [1, 1, 1]} : vector<4x4x128xf32> to vector<4x4x64xf32>
    %29 = vector.extract_strided_slice %27 {offsets = [0, 0, 64], sizes = [4, 4, 64], strides = [1, 1, 1]} : vector<4x4x128xf32> to vector<4x4x64xf32>
    %30 = arith.maximumf %28, %29 : vector<4x4x64xf32>
    %c0_13 = arith.constant 0 : index
    %c0_14 = arith.constant 0 : index
    %c0_15 = arith.constant 0 : index
    %c0_16 = arith.constant 0 : index
    %c0_17 = arith.constant 0 : index
    %31 = vector.load %arg6[%c0_13, %c0_14, %c0_15, %c0_16, %c0_17] : memref<1x1x4x4x64xf32, #tpu.memory_space<vmem>>, vector<1x1x4x4x64xf32>
    %32 = vector.shape_cast %31 : vector<1x1x4x4x64xf32> to vector<4x4x64xf32>
    %33 = vector.shape_cast %30 : vector<4x4x64xf32> to vector<1x1x4x4x64xf32>
    tpu.vector_store %arg6[%c0_13, %c0_14, %c0_15, %c0_16, %c0_17], %33 {strides = array<i32>} : memref<1x1x4x4x64xf32, #tpu.memory_space<vmem>>, vector<1x1x4x4x64xf32>,
    return
  }
  func.func @transform_0(%arg0: i32, %arg1: i32) -> (i32, i32, i32, i32, i32) {
    %c0_i32 = arith.constant 0 : i32
    %c0_i32_0 = arith.constant 0 : i32
    %c0_i32_1 = arith.constant 0 : i32
    %c0_i32_2 = arith.constant 0 : i32
    return %arg0, %arg1, %c0_i32, %c0_i32_0, %c0_i32_1 : i32, i32, i32, i32, i32
  }
  func.func @transform_1(%arg0: i32, %arg1: i32) -> (i32, i32) {
    %c0_i32 = arith.constant 0 : i32
    %c0_i32_0 = arith.constant 0 : i32
    %c0_i32_1 = arith.constant 0 : i32
    return %c0_i32, %c0_i32_0 : i32, i32
  }
  func.func @transform_2(%arg0: i32, %arg1: i32) -> (i32, i32) {
    %c0_i32 = arith.constant 0 : i32
    %c0_i32_0 = arith.constant 0 : i32
    %c0_i32_1 = arith.constant 0 : i32
    return %c0_i32, %c0_i32_0 : i32, i32
  }
  func.func @transform_3(%arg0: i32, %arg1: i32) -> (i32, i32, i32, i32, i32) {
    %c0_i32 = arith.constant 0 : i32
    %c0_i32_0 = arith.constant 0 : i32
    %c0_i32_1 = arith.constant 0 : i32
    %c0_i32_2 = arith.constant 0 : i32
    return %arg0, %arg1, %c0_i32, %c0_i32_0, %c0_i32_1 : i32, i32, i32, i32, i32
  }
  func.func @transform_4(%arg0: i32, %arg1: i32) -> (i32, i32, i32, i32, i32) {
    %c0_i32 = arith.constant 0 : i32
    %c0_i32_0 = arith.constant 0 : i32
    %c0_i32_1 = arith.constant 0 : i32
    %c0_i32_2 = arith.constant 0 : i32
    return %arg0, %arg1, %c0_i32, %c0_i32_0, %c0_i32_1 : i32, i32, i32, i32, i32
  }
}

</mosaic_0001>

<bundles_post_ra>
// kernel: down_transition.5
= control target key start
LH: loop header
LB: loop body
LE: loop exit
PB: predicated region body
PF: predicated region fallthrough
CT: control target
= control target key end

     0   :  { %s1003_s12 = smov 0   ;;  %s1005_s13 = smov 0   ;;  %s1276_s0 = inlined_call_operand.vmem [shape: bf16[2,8,80,32], index: 0, kind: input, shape index: {}]   ;;  %s1277_s1 = inlined_call_operand.vmem [shape: f32[1,32], index: 1, kind: input, shape index: {}]   ;;  %s1278_s2 = inlined_call_operand.vmem [shape: f32[1,32], index: 2, kind: input, shape index: {}]   ;;  %s1279_s3 = inlined_call_operand.vmem [shape: bf16[2,10,110,32], index: 3, kind: output, shape index: {}]  }
   0x1   :  { %s1007_s14 = smov 0   ;;  %s1009_s15 = smov 0  }
   0x2   :  { %s1011_s16 = smov 0  }
   0x3 LB: > { %s22_s17 = sadd.s32 1, %s972_s14  ;;  %s25_s18 = sadd.s32 1, %s976_s15  ;;  %s980_s16 = sphi %s1011_s16, %s13_s16   ;;  %s976_s15 = sphi %s1009_s15, %s1290_s15   ;;  %s972_s14 = sphi %s1007_s14, %s1289_s14   ;;  %s968_s13 = sphi %s1005_s13, %s1288_s13   ;;  %s964_s12 = sphi %s1003_s12, %s1287_s12  }
   0x4   : > { %p23_p0 = scmp.ge.s32.totalorder %s22_s17, 10  ;;  %p814_p1 = scmp.ge.s32.totalorder %s980_s16, 1 }
   0x5   : > { %p177_p2 = scmp.lt.s32.totalorder %s980_s16, 21 }
   0x6   : > { %s1292_s17 = smov (%p23_p0, %s22_s17), 0  ;;  %s1294_s18 = smov (!%p23_p0, %s25_s18), %s976_s15 }
   0x7   : > { %p178_p3 = pnand %p814_p1, %p177_p2  ;;  %p27_p4 = scmp.ge.s32.totalorder %s1294_s18, 2 }
   0x8   : > { %s815_s19 = sadd.s32 (!%p178_p3), 4294967295, %s964_s12  ;;  %p219_p5 = scmp.lt.s32.totalorder (!%p178_p3), %s968_s13, 1 }
   0x9   : > { %s1296_s18 = smov (%p27_p4, %s1294_s18), 0  ;;  %181 = sbr.rel (%p178_p3) target bundleno = 102 (0x66), region = 32 }
   0xa   : > { %p215_p6 = scmp.gt.s32.totalorder (!%p178_p3), %s815_s19, 0  ;;  %p816_p7 = scmp.lt.s32.totalorder (!%p178_p3), %s815_s19, 7 }
   0xb   : > { %p235_p8 = scmp.lt.s32.totalorder (!%p178_p3), %s964_s12, 9  ;;  %p259_p10 = scmp.ge.s32.totalorder (!%p178_p3), %s964_s12, 1 }
   0xc   : > { %p260_p11 = scmp.le.s32.totalorder (!%p178_p3), %s964_s12, 8 }
   0xe   : > { %s1298_s13 = smov (!%p219_p5, %s968_s13), 1  ;;  %s1300_s19 = smov (!%p215_p6, %s815_s19), 0  ;;  %vm243_vm0 = vcmask 257024   ;;  %vm257_vm1 = vcmask 256000   ;;  %v982_v0 = vmov 0  }
   0xf   : > { %s878_s20 = smul.u32 80, %s1298_s13  ;;  %s1302_s19 = smov (!%p816_p7, %s1300_s19), 7 }
  0x10   : > { %s236_s21 = scalar_select %p235_p8, %s964_s12, 9 }
  0x11   : > { %p221_p9 = scmp.lt.s32.totalorder %s1302_s19, 7  ;;  %s880_s22 = smul.u32 140, %s1298_s13 }
  0x12   : > { %s879_s23 = smul.u32 14, %s236_s21  ;;  %p1045_p12 = pnand %p260_p11, %p259_p10 }
  0x13   : > { %s1304_s19 = smov (!%p221_p9, %s1302_s19), 7 }
  0x14   : > { %s239_s24 = sadd.s32 %s880_s22, %s879_s23  ;;  %s877_s25 = smul.u32 10, %s1304_s19 }
  0x15   : > { %s822_s26 = sshll.u32 %s239_s24, 2 }
  0x16   : > { %s1043_s29 = scalar_lea.vmem %s1279_s3, %s822_s26  ;;  %s225_s4 = sadd.s32 %s878_s20, %s877_s25 }
  0x17   : > { %244 = vst.msk [vmem:[%s1043_s29] sm:$0xf] %vm243_vm0, %v982_v0  ;;  %245 = vst.msk [vmem:[%s1043_s29 + $0x4] sm:$0xf] %vm243_vm0, %v982_v0  ;;  %s821_s5 = sshll.u32 %s225_s4, 2 }
  0x18   : > { %246 = vst.msk [vmem:[%s1043_s29 + $0x8] sm:$0xf] %vm243_vm0, %v982_v0  ;;  %247 = vst.msk [vmem:[%s1043_s29 + $0xc] sm:$0xf] %vm243_vm0, %v982_v0  ;;  %s1080_s8 = scalar_lea.vmem %s1276_s0, %s821_s5 }
  0x19   : > { %248 = vst.msk [vmem:[%s1043_s29 + $0x10] sm:$0xf] %vm243_vm0, %v982_v0  ;;  %249 = vst.msk [vmem:[%s1043_s29 + $0x14] sm:$0xf] %vm243_vm0, %v982_v0 }
  0x1a   : > { %250 = vst.msk [vmem:[%s1043_s29 + $0x18] sm:$0xf] %vm243_vm0, %v982_v0  ;;  %251 = vst.msk [vmem:[%s1043_s29 + $0x1c] sm:$0xf] %vm243_vm0, %v982_v0  ;;  %264 = sbr.rel (%p1045_p12) target bundleno = 102 (0x66), region = 36 }
  0x1b   : > { %252 = vst.msk [vmem:[%s1043_s29 + $0x20] sm:$0xf] %vm243_vm0, %v982_v0  ;;  %253 = vst.msk [vmem:[%s1043_s29 + $0x24] sm:$0xf] %vm243_vm0, %v982_v0 }
  0x1c   : > { %254 = vst.msk [vmem:[%s1043_s29 + $0x28] sm:$0xf] %vm243_vm0, %v982_v0  ;;  %255 = vst.msk [vmem:[%s1043_s29 + $0x2c] sm:$0xf] %vm243_vm0, %v982_v0 }
  0x1d   : > { %256 = vst.msk [vmem:[%s1043_s29 + $0x30] sm:$0xf] %vm243_vm0, %v982_v0 }
  0x1e   : > { %258 = vst.msk [vmem:[%s1043_s29 + $0x34] sm:$0x7] %vm257_vm1, %v982_v0 }
  0x1f   : > { %v854_v1 = vld [vmem:[%s1080_s8] sm:$0xff]   ;;  %v329_v3 = vlaneseq  ;;  %v873_v8 = vld [vmem:[%s1080_s8 + $0x8] sm:$0xff]   ;;  %v874_v21 = vld [vmem:[%s1080_s8 + $0x10] sm:$0xff]   ;;  %vm683_vm2 = vcmask 257025   ;;  %vm684_vm3 = vsmask.f32 7942 }
  0x20   : > { %v1088_v2 = vld [vmem:[%s1277_s1] ss:$0 sm:$0xff]  ;;  %v855_v4 = vunpack.c.l.bf16 %v854_v1  ;;  %v856_v5 = vunpack.c.h.bf16 %v854_v1  ;;  %v859_v11 = vunpack.c.l.bf16 %v873_v8  ;;  %v860_v12 = vunpack.c.h.bf16 %v873_v8  ;;  %v1145_v49 = vld [vmem:[%s1080_s8 + $0x18] sm:$0xff]  }
  0x21   : > { %v1093_v6 = vld [vmem:[%s1278_s2] ss:$0 sm:$0xff]  ;;  %v1095_v7 = vshrl.u32 %v329_v3, 7  ;;  %v863_v31 = vunpack.c.l.bf16 %v874_v21  ;;  %v864_v35 = vunpack.c.h.bf16 %v874_v21  ;;  %vm570_vm7 = vsmask.f32 1280 }
  0x22   : > { %v292_v9 = vmul.f32 %v855_v4, %v1088_v2  ;;  %v293_v10 = vmul.f32 %v856_v5, %v1088_v2  ;;  %v294_v19 = vmul.f32 %v859_v11, %v1088_v2  ;;  %v295_v20 = vmul.f32 %v860_v12, %v1088_v2 }
  0x23   : > { %v1101_v13 = vmul.u32.u64.low 3435973837, %v1095_v7  ;;  %v1102_v14 = vmul.u32.u64.high 3435973837, %v1095_v7, %v1101_v13  ;;  %v331_v15 = vadd.s32 8, %v1095_v7  ;;  %v332_v16 = vadd.s32 16, %v1095_v7 }
  0x24   : > { %v309_v17 = vadd.f32 %v1093_v6, %v292_v9  ;;  %v1108_v18 = vadd.f32 %v1093_v6, %v293_v10  ;;  %v1120_v27 = vadd.f32 %v1093_v6, %v294_v19  ;;  %v1123_v28 = vadd.f32 %v1093_v6, %v295_v20 }
  0x25   : > { %v1113_v22 = vmul.u32.u64.low 3435973837, %v331_v15  ;;  %v1114_v23 = vmul.u32.u64.high 3435973837, %v331_v15, %v1113_v22  ;;  %v1116_v24 = vmul.u32.u64.low 3435973837, %v332_v16  ;;  %v1117_v25 = vmul.u32.u64.high 3435973837, %v332_v16, %v1116_v24 }
  0x26   : > { %v319_v26 = vmax.f32 %v309_v17, 0.0  ;;  %v346_v29 = vshrl.u32 %v1102_v14, 3  ;;  %v333_v30 = vadd.s32 24, %v1095_v7  ;;  %v334_v32 = vadd.s32 32, %v1095_v7 }
  0x27   : > { %v320_v33 = vmax.f32 %v1108_v18, 0.0  ;;  %v321_v34 = vmax.f32 %v1120_v27, 0.0  ;;  %v1131_v36 = vadd.s32 40, %v1095_v7  ;;  %v357_v38 = vshrl.u32 %v1114_v23, 3  ;;  %v686_v23 = vld [vmem:[%s1043_s29 + $0x4] sm:$0xe] }
  0x28   : > { %v347_v37 = vmul.u32 10, %v346_v29  ;;  %v368_v39 = vshrl.u32 %v1117_v25, 3  ;;  %v296_v40 = vmul.f32 %v863_v31, %v1088_v2  ;;  %v322_v48 = vmax.f32 %v1123_v28, 0.0 }
  0x29   : > { %v1136_v41 = vmul.u32.u64.low 3435973837, %v333_v30  ;;  %v1137_v42 = vmul.u32.u64.high 3435973837, %v333_v30, %v1136_v41  ;;  %v1139_v43 = vmul.u32.u64.low 3435973837, %v334_v32  ;;  %v1140_v44 = vmul.u32.u64.high 3435973837, %v334_v32, %v1139_v43 }
  0x2a   : > { %v348_v45 = vsub.s32 %v1095_v7, %v347_v37  ;;  %v358_v46 = vmul.u32 10, %v357_v38  ;;  %v369_v47 = vmul.u32 10, %v368_v39  ;;  %v1148_v50 = vadd.f32 %v1093_v6, %v296_v40 }
  0x2b   : > { %v1151_v51 = vmul.f32 %v864_v35, %v1088_v2  ;;  %v1154_v52 = vmul.u32.u64.low 3435973837, %v1131_v36  ;;  %v1155_v53 = vmul.u32.u64.high 3435973837, %v1131_v36, %v1154_v52  ;;  %vm571_vm8 = vsmask.f32 5392 }
  0x2c   : > { %vm450_vm4 = vcmp.ne.s32.totalorder %v348_v45, 0  ;;  %vm460_vm5 = vcmp.lt.s32.totalorder %v348_v45, 0  ;;  %v480_v54 = vadd.s32 10, %v348_v45  ;;  %v359_v55 = vsub.s32 %v331_v15, %v358_v46 }
  0x2d   : > { %vm470_vm6 = vmand %vm460_vm5, %vm450_vm4  ;;  %v370_v56 = vsub.s32 %v332_v16, %v369_v47  ;;  %v379_v57 = vshrl.u32 %v1137_v42, 3  ;;  %v390_v58 = vshrl.u32 %v1140_v44, 3  ;;  %v867_v59 = vunpack.c.l.bf16 %v1145_v49 }
  0x2e   : > { %v490_v60 = vsel %vm470_vm6, %v480_v54, %v348_v45  ;;  %vm451_vm9 = vcmp.ne.s32.totalorder %v359_v55, 0  ;;  %vm461_vm10 = vcmp.lt.s32.totalorder %v359_v55, 0  ;;  %v481_v61 = vadd.s32 10, %v359_v55 }
  0x2f   : > { %vm500_vm11 = vcmp.lt.s32.totalorder %v490_v60, 8  ;;  %vm471_vm12 = vmand %vm461_vm10, %vm451_vm9  ;;  %vm452_vm13 = vcmp.ne.s32.totalorder %v370_v56, 0  ;;  %vm462_vm14 = vcmp.lt.s32.totalorder %v370_v56, 0  ;;  %v482_v62 = vadd.s32 10, %v370_v56 }
  0x30   : > { %v530_v63 = vsel %vm500_vm11, %v319_v26, 0.0  ;;  %v491_v0 = vsel %vm471_vm12, %v481_v61, %v359_v55  ;;  %vm472_vm15 = vmand %vm462_vm14, %vm452_vm13  ;;  %v380_v1 = vmul.u32 10, %v379_v57  ;;  %v391_v3 = vmul.u32 10, %v390_v58 }
  0x31   : > { %v843_v4 = vpack.c.bf16 %v530_v63, %v530_v63  ;;  %vm501_vm1 = vcmp.lt.s32.totalorder %v491_v0, 8  ;;  %v492_v5 = vsel %vm472_vm15, %v482_v62, %v370_v56  ;;  %v323_v8 = vmax.f32 %v1148_v50, 0.0  ;;  %vm1163_vm10 = vmand %vm683_vm2, %vm684_vm3 }
  0x32   : > { %v531_v9 = vsel %vm501_vm1, %v320_v33, 0.0  ;;  %vm502_vm4 = vcmp.lt.s32.totalorder %v492_v5, 8  ;;  %v381_v10 = vsub.s32 %v333_v30, %v380_v1  ;;  %v392_v11 = vsub.s32 %v334_v32, %v391_v3  ;;  %vm1170_vm13 = vmor %vm570_vm7, %vm571_vm8  ;;  %v876_v3 = vld [vmem:[%s1080_s8 + $0x20] sm:$0xff]  }
  0x33   : > { %v574_v12 = vshrl.u32 %v843_v4, 16  ;;  %v577_v13 = vshll.u32 %v843_v4, 16  ;;  %v844_v14 = vpack.c.bf16 %v531_v9, %v531_v9  ;;  %v532_v15 = vsel %vm502_vm4, %v321_v34, 0.0 }
  0x34   : > { %v845_v16 = vpack.c.bf16 %v532_v15, %v532_v15  ;;  %vm453_vm5 = vcmp.ne.s32.totalorder %v381_v10, 0  ;;  %vm463_vm6 = vcmp.lt.s32.totalorder %v381_v10, 0  ;;  %v483_v17 = vadd.s32 10, %v381_v10 }
  0x35   : > { %v576_v18 = vrot.slane %v574_v12, 6  ;;  %v579_v19 = vrot.slane %v577_v13, 7  ;;  %v583_v20 = vshrl.u32 %v844_v14, 16  ;;  %v586_v21 = vshll.u32 %v844_v14, 16  ;;  %vm473_vm9 = vmand %vm463_vm6, %vm453_vm5 }
  0x36   : > { %v593_v24 = vshrl.u32 %v845_v16, 16  ;;  %v596_v25 = vshll.u32 %v845_v16, 16  ;;  %v493_v26 = vsel %vm473_vm9, %v483_v17, %v381_v10  ;;  %vm454_vm11 = vcmp.ne.s32.totalorder %v392_v11, 0 }
  0x37   : > { %v580_v27 = vor.u32 %v579_v19, %v576_v18  ;;  %v585_v29 = vrot.slane %v583_v20, 6  ;;  %v588_v30 = vrot.slane %v586_v21, 7  ;;  %vm503_vm12 = vcmp.lt.s32.totalorder %v493_v26, 8 }
  0x38   : > { %v595_v32 = vrot.slane %v593_v24, 6  ;;  %v598_v33 = vrot.slane %v596_v25, 7  ;;  %v533_v34 = vsel %vm503_vm12, %v322_v48, 0.0  ;;  %vm464_vm2 = vcmp.lt.s32.totalorder %v392_v11, 0 }
  0x39   : > { %v687_v35 = vsel %vm1163_vm10, %v580_v27, %v686_v23  ;;  %v581_v37 = vrot.slane %v580_v27, 4  ;;  %v589_v38 = vor.u32 %v588_v30, %v585_v29  ;;  %v846_v39 = vpack.c.bf16 %v533_v34, %v533_v34  ;;  %vm1179_vm3 = vmand %vm464_vm2, %vm454_vm11 }
  0x3a   : > { %688 = vst [vmem:[%s1043_s29 + $0x4] sm:$0xe] %v687_v35  ;;  %v599_v41 = vor.u32 %v598_v33, %v595_v32  ;;  %v484_v42 = vadd.s32 10, %v392_v11  ;;  %v314_v28 = vadd.f32 %v1093_v6, %v1151_v51  ;;  %v401_v43 = vshrl.u32 %v1155_v53, 3 }
  0x3b   : > { %v590_v44 = vsel %vm1170_vm13, %v581_v37, %v589_v38  ;;  %v591_v45 = vrot.slane %v589_v38, 4  ;;  %v603_v46 = vshrl.u32 %v846_v39, 16  ;;  %v606_v47 = vshll.u32 %v846_v39, 16 }
  0x3c   : > { %689 = vst.msk [vmem:[%s1043_s29 + $0x8] sm:$0xf] %vm243_vm0, %v590_v44  ;;  %v601_v48 = vrot.slane %v599_v41, 4  ;;  %v494_v50 = vsel %vm1179_vm3, %v484_v42, %v392_v11  ;;  %v402_v52 = vmul.u32 10, %v401_v43  ;;  %v324_v56 = vmax.f32 %v314_v28, 0.0 }
  0x3d   : > { %v600_v54 = vsel %vm1170_vm13, %v591_v45, %v599_v41  ;;  %v605_v55 = vrot.slane %v603_v46, 6  ;;  %v608_v51 = vrot.slane %v606_v47, 7  ;;  %vm504_vm8 = vcmp.lt.s32.totalorder %v494_v50, 8 }
  0x3e   : > { %690 = vst.msk [vmem:[%s1043_s29 + $0xc] sm:$0xf] %vm243_vm0, %v600_v54  ;;  %v534_v53 = vsel %vm504_vm8, %v323_v8, 0.0  ;;  %v403_v57 = vsub.s32 %v1131_v36, %v402_v52  ;;  %v336_v58 = vadd.s32 48, %v1095_v7  ;;  %v298_v62 = vmul.f32 %v867_v59, %v1088_v2 }
  0x3f   : > { %v609_v60 = vor.u32 %v608_v51, %v605_v55  ;;  %v847_v61 = vpack.c.bf16 %v534_v53, %v534_v53  ;;  %v868_v63 = vunpack.c.h.bf16 %v1145_v49  ;;  %v337_v1 = vadd.s32 56, %v1095_v7 }
  0x40   : > { %vm455_vm14 = vcmp.ne.s32.totalorder %v403_v57, 0  ;;  %vm465_vm15 = vcmp.lt.s32.totalorder %v403_v57, 0  ;;  %v485_v0 = vadd.s32 10, %v403_v57  ;;  %v871_v13 = vunpack.c.l.bf16 %v876_v3 }
  0x41   : > { %v610_v36 = vsel %vm1170_vm13, %v601_v48, %v609_v60  ;;  %v611_v4 = vrot.slane %v609_v60, 4  ;;  %v613_v5 = vshrl.u32 %v847_v61, 16  ;;  %v616_v8 = vshll.u32 %v847_v61, 16  ;;  %vm475_vm1 = vmand %vm465_vm15, %vm455_vm14 }
  0x42   : > { %691 = vst.msk [vmem:[%s1043_s29 + $0x10] sm:$0xf] %vm243_vm0, %v610_v36  ;;  %v495_v9 = vsel %vm475_vm1, %v485_v0, %v403_v57  ;;  %v1209_v10 = vmul.u32.u64.low 3435973837, %v336_v58  ;;  %v1210_v59 = vmul.u32.u64.high 3435973837, %v336_v58, %v1209_v10  ;;  %v299_v49 = vmul.f32 %v868_v63, %v1088_v2 }
  0x43   : > { %v615_v11 = vrot.slane %v613_v5, 6  ;;  %v618_v12 = vrot.slane %v616_v8, 7  ;;  %vm505_vm4 = vcmp.lt.s32.totalorder %v495_v9, 8  ;;  %v338_v19 = vadd.s32 64, %v1095_v7 }
  0x44   : > { %v535_v14 = vsel %vm505_vm4, %v324_v56, 0.0  ;;  %v1213_v15 = vmul.u32.u64.low 3435973837, %v337_v1  ;;  %v1214_v16 = vmul.u32.u64.high 3435973837, %v337_v1, %v1213_v15  ;;  %v315_v20 = vadd.f32 %v1093_v6, %v298_v62 }
  0x45   : > { %v619_v17 = vor.u32 %v618_v12, %v615_v11  ;;  %v848_v18 = vpack.c.bf16 %v535_v14, %v535_v14  ;;  %v412_v21 = vshrl.u32 %v1210_v59, 3  ;;  %v316_v22 = vadd.f32 %v1093_v6, %v299_v49 }
  0x46   : > { %v300_v23 = vmul.f32 %v871_v13, %v1088_v2  ;;  %v339_v27 = vadd.s32 72, %v1095_v7  ;;  %v423_v32 = vshrl.u32 %v1214_v16, 3  ;;  %v872_v33 = vunpack.c.h.bf16 %v876_v3 }
  0x47   : > { %v620_v24 = vsel %vm1170_vm13, %v611_v4, %v619_v17  ;;  %v623_v25 = vshrl.u32 %v848_v18, 16  ;;  %v626_v26 = vshll.u32 %v848_v18, 16  ;;  %v621_v29 = vrot.slane %v619_v17, 4 }
  0x48   : > { %692 = vst.msk [vmem:[%s1043_s29 + $0x14] sm:$0xf] %vm243_vm0, %v620_v24  ;;  %v413_v30 = vmul.u32 10, %v412_v21  ;;  %v1227_v37 = vmul.u32.u64.low 3435973837, %v338_v19  ;;  %v1228_v38 = vmul.u32.u64.high 3435973837, %v338_v19, %v1227_v37  ;;  %v325_v39 = vmax.f32 %v315_v20, 0.0 }
  0x49   : > { %v625_v34 = vrot.slane %v623_v25, 6  ;;  %v628_v35 = vrot.slane %v626_v26, 7  ;;  %v424_v41 = vmul.u32 10, %v423_v32  ;;  %v326_v28 = vmax.f32 %v316_v22, 0.0 }
  0x4a   : > { %v414_v40 = vsub.s32 %v336_v58, %v413_v30  ;;  %v1230_v43 = vmul.u32.u64.low 3435973837, %v339_v27  ;;  %v1231_v7 = vmul.u32.u64.high 3435973837, %v339_v27, %v1230_v43  ;;  %v317_v47 = vadd.f32 %v1093_v6, %v300_v23 }
  0x4b   : > { %v629_v42 = vor.u32 %v628_v35, %v625_v34  ;;  %v425_v45 = vsub.s32 %v337_v1, %v424_v41  ;;  %v434_v48 = vshrl.u32 %v1228_v38, 3  ;;  %v301_v50 = vmul.f32 %v872_v33, %v1088_v2 }
  0x4c   : > { %vm456_vm5 = vcmp.ne.s32.totalorder %v414_v40, 0  ;;  %vm466_vm6 = vcmp.lt.s32.totalorder %v414_v40, 0  ;;  %v486_v44 = vadd.s32 10, %v414_v40  ;;  %v445_v51 = vshrl.u32 %v1231_v7, 3 }
  0x4d   : > { %v630_v46 = vsel %vm1170_vm13, %v621_v29, %v629_v42  ;;  %vm476_vm9 = vmand %vm466_vm6, %vm456_vm5  ;;  %vm457_vm10 = vcmp.ne.s32.totalorder %v425_v45, 0  ;;  %vm467_vm11 = vcmp.lt.s32.totalorder %v425_v45, 0  ;;  %v487_v54 = vadd.s32 10, %v425_v45 }
  0x4e   : > { %693 = vst.msk [vmem:[%s1043_s29 + $0x18] sm:$0xf] %vm243_vm0, %v630_v46  ;;  %v496_v52 = vsel %vm476_vm9, %v486_v44, %v414_v40  ;;  %vm477_vm2 = vmand %vm467_vm11, %vm457_vm10  ;;  %v435_v55 = vmul.u32 10, %v434_v48  ;;  %v446_v60 = vmul.u32 10, %v445_v51  ;;  %v327_v62 = vmax.f32 %v317_v47, 0.0 }
  0x4f   : > { %vm506_vm12 = vcmp.lt.s32.totalorder %v496_v52, 8  ;;  %v497_v56 = vsel %vm477_vm2, %v487_v54, %v425_v45  ;;  %v318_v2 = vadd.f32 %v1093_v6, %v301_v50  ;;  %v631_v3 = vrot.slane %v629_v42, 4 }
  0x50   : > { %v536_v53 = vsel %vm506_vm12, %v325_v39, 0.0  ;;  %vm507_vm3 = vcmp.lt.s32.totalorder %v497_v56, 8  ;;  %v436_v58 = vsub.s32 %v338_v19, %v435_v55  ;;  %v447_v4 = vsub.s32 %v339_v27, %v446_v60  ;;  %v700_v39 = vld [vmem:[%s1043_s29 + $0x2c] sm:$0x3] }
  0x51   : > { %v849_v57 = vpack.c.bf16 %v536_v53, %v536_v53  ;;  %v537_v61 = vsel %vm507_vm3, %v326_v28, 0.0  ;;  %v328_v14 = vmax.f32 %v318_v2, 0.0  ;;  %vm698_vm10 = vcmask 254976  }
  0x52   : > { %v850_v1 = vpack.c.bf16 %v537_v61, %v537_v61  ;;  %vm458_vm8 = vcmp.ne.s32.totalorder %v436_v58, 0  ;;  %vm468_vm14 = vcmp.lt.s32.totalorder %v436_v58, 0  ;;  %v488_v36 = vadd.s32 10, %v436_v58  ;;  %vm699_vm11 = vmand %vm698_vm10, %vm570_vm7 }
  0x53   : > { %v633_v63 = vshrl.u32 %v849_v57, 16  ;;  %v636_v0 = vshll.u32 %v849_v57, 16  ;;  %vm478_vm15 = vmand %vm468_vm14, %vm458_vm8  ;;  %vm459_vm1 = vcmp.ne.s32.totalorder %v447_v4, 0  ;;  %vm469_vm4 = vcmp.lt.s32.totalorder %v447_v4, 0 }
  0x54   : > { %v643_v9 = vshrl.u32 %v850_v1, 16  ;;  %v646_v10 = vshll.u32 %v850_v1, 16  ;;  %v498_v59 = vsel %vm478_vm15, %v488_v36, %v436_v58  ;;  %v489_v49 = vadd.s32 10, %v447_v4  ;;  %vm479_vm6 = vmand %vm469_vm4, %vm459_vm1 }
  0x55   : > { %v635_v5 = vrot.slane %v633_v63, 6  ;;  %v638_v8 = vrot.slane %v636_v0, 7  ;;  %vm508_vm5 = vcmp.lt.s32.totalorder %v498_v59, 8 }
  0x56   : > { %v645_v6 = vrot.slane %v643_v9, 6  ;;  %v648_v12 = vrot.slane %v646_v10, 7  ;;  %v538_v13 = vsel %vm508_vm5, %v327_v62, 0.0  ;;  %v499_v15 = vsel %vm479_vm6, %v489_v49, %v447_v4 }
  0x57   : > { %v639_v11 = vor.u32 %v638_v8, %v635_v5  ;;  %v851_v19 = vpack.c.bf16 %v538_v13, %v538_v13  ;;  %vm509_vm9 = vcmp.lt.s32.totalorder %v499_v15, 8 }
  0x58   : > { %v649_v18 = vor.u32 %v648_v12, %v645_v6  ;;  %v539_v23 = vsel %vm509_vm9, %v328_v14, 0.0 }
  0x59   : > { %v640_v16 = vsel %vm1170_vm13, %v631_v3, %v639_v11  ;;  %v641_v17 = vrot.slane %v639_v11, 4  ;;  %v653_v21 = vshrl.u32 %v851_v19, 16  ;;  %v656_v22 = vshll.u32 %v851_v19, 16 }
  0x5a   : > { %694 = vst.msk [vmem:[%s1043_s29 + $0x1c] sm:$0xf] %vm243_vm0, %v640_v16  ;;  %v651_v24 = vrot.slane %v649_v18, 4  ;;  %v852_v27 = vpack.c.bf16 %v539_v23, %v539_v23 }
  0x5b   : > { %v650_v20 = vsel %vm1170_vm13, %v641_v17, %v649_v18  ;;  %v655_v25 = vrot.slane %v653_v21, 6  ;;  %v658_v26 = vrot.slane %v656_v22, 7 }
  0x5c   : > { %695 = vst.msk [vmem:[%s1043_s29 + $0x20] sm:$0xf] %vm243_vm0, %v650_v20  ;;  %v663_v30 = vshrl.u32 %v852_v27, 16  ;;  %v666_v32 = vshll.u32 %v852_v27, 16 }
  0x5d   : > { %v659_v29 = vor.u32 %v658_v26, %v655_v25 }
  0x5e   : > { %v665_v35 = vrot.slane %v663_v30, 6  ;;  %v668_v37 = vrot.slane %v666_v32, 7 }
  0x5f   : > { %v660_v33 = vsel %vm1170_vm13, %v651_v24, %v659_v29  ;;  %v661_v34 = vrot.slane %v659_v29, 4 }
  0x60   : > { %696 = vst.msk [vmem:[%s1043_s29 + $0x24] sm:$0xf] %vm243_vm0, %v660_v33  ;;  %v669_v38 = vor.u32 %v668_v37, %v665_v35 }
  0x62   : > { %v670_v40 = vsel %vm1170_vm13, %v661_v34, %v669_v38  ;;  %v671_v41 = vrot.slane %v669_v38, 4 }
  0x63   : > { %697 = vst.msk [vmem:[%s1043_s29 + $0x28] sm:$0xf] %vm243_vm0, %v670_v40 }
  0x64   : > { %v701_v42 = vsel %vm699_vm11, %v671_v41, %v700_v39 }
  0x65   : > { %702 = vst [vmem:[%s1043_s29 + $0x2c] sm:$0x3] %v701_v42 }
  0x66 PF: > { %s13_s16 = sadd.s32 1, %s980_s16   ;;  %s1287_s12 = smov %s972_s14 }
  0x67   : > { %p10_p13 = scmp.ge.s32.totalorder %s13_s16, 22   ;;  %s1288_s13 = smov %s976_s15 }
  0x68   : > { %s1289_s14 = smov %s1292_s17  ;;  %s1290_s15 = smov %s1296_s18 }
  0x69   :  { %12 = sbr.rel (!%p10_p13) target bundleno = 3 (0x3), region = 66 }

// kernel: down_transition.7
= control target key start
LH: loop header
LB: loop body
LE: loop exit
PB: predicated region body
PF: predicated region fallthrough
CT: control target
= control target key end

     0   :  { %10 = vsyncpa [#allocation3], 0  ;;  %s1009_s0 = inlined_call_operand.vmem [shape: bf16[2,8,8,5,128], index: 0, kind: input, shape index: {}]   ;;  %s1010_s1 = inlined_call_operand.vmem [shape: f32[1,128], index: 1, kind: input, shape index: {}]   ;;  %s1011_s2 = inlined_call_operand.vmem [shape: f32[1,128], index: 2, kind: input, shape index: {}]   ;;  %s1012_s3 = inlined_call_operand.vmem [shape: f32[2,8,8,5,128], index: 3, kind: output, shape index: {0}]   ;;  %s1013_s4 = inlined_call_operand.hbm [shape: f32[2,4,4,4,64], index: 4, kind: output, shape index: {1}]  }
   0x1   :  { %12 = vsyncpa [#allocation3 + $0x1], 0  ;;  %s776_s15 = smov 0   ;;  %s778_s16 = smov 0  }
   0x2   :  { %s780_s17 = smov 0   ;;  %s782_s18 = smov 0  }
   0x3   :  { %s784_s19 = smov 0   ;;  %s786_s20 = smov 0  }
   0x4   :  { %s788_s21 = smov 0   ;;  %s790_s22 = smov 0  }
   0x5 LB: > { %s559_s23 = sadd.s32 4294967295, %s746_s22   ;;  %s560_s24 = sadd.s32 4294967294, %s746_s22   ;;  %s746_s22 = sphi %s790_s22, %s18_s22   ;;  %s742_s21 = sphi %s788_s21, %s1022_s21   ;;  %s738_s20 = sphi %s786_s20, %s1021_s20   ;;  %s734_s19 = sphi %s784_s19, %s1020_s19   ;;  %s730_s18 = sphi %s782_s18, %s1019_s18   ;;  %s726_s17 = sphi %s780_s17, %s1018_s17   ;;  %s722_s16 = sphi %s778_s16, %s1017_s16   ;;  %s718_s15 = sphi %s776_s15, %s1016_s15  }
   0x6   : > { %s27_s25 = sadd.s32 1, %s738_s20  ;;  %s30_s26 = sadd.s32 1, %s742_s21 }
   0x7   : > { %p28_p0 = scmp.ge.s32.totalorder %s27_s25, 4  ;;  %p147_p1 = scmp.ne.s32.totalorder %s726_s17, %s722_s16 }
   0x8   : > { %p148_p2 = scmp.eq.s32.totalorder %s559_s23, 7  ;;  %p153_p5 = scmp.ne.s32.totalorder %s722_s16, %s718_s15 }
   0x9   : > { %s1024_s25 = smov (%p28_p0, %s27_s25), 0  ;;  %s1026_s26 = smov (!%p28_p0, %s30_s26), %s742_s21 }
   0xa   : > { %s133_s27 = ssub.s32 %s738_s20, %s1024_s25  ;;  %p827_p3 = por %p148_p2, %p147_p1 }
   0xb   : > { %p32_p4 = scmp.ge.s32.totalorder %s1026_s26, 2  ;;  %p154_p6 = scmp.eq.s32.totalorder %s560_s24, 7 }
   0xc   : > { %p563_p7 = scmp.ge.s32.totalorder %s746_s22, 1  ;;  %p192_p9 = scmp.lt.s32.totalorder %s746_s22, 9 }
   0xd   : > { %s1028_s26 = smov (%p32_p4, %s1026_s26), 0  ;;  %p836_p8 = por %p154_p6, %p153_p5 }
   0xe   : > { %s132_s30 = ssub.s32 %s742_s21, %s1028_s26  ;;  %s137_s5 = sadd.s32 1, %s726_s17 }
   0xf   : > { %s134_s6 = sor.u32 %s133_s27, %s132_s30  ;;  %p193_p10 = pnand %p563_p7, %p192_p9 }
  0x10   : > { %p135_p11 = scmp.eq.s32.totalorder %s134_s6, 0  ;;  %s565_s8 = sshll.u32 (!%p193_p10), %s730_s18, 1 }
  0x11   : > { %196 = sbr.rel (%p193_p10) target bundleno = 185 (0xb9), region = 32  ;;  %p234_p12 = scmp.lt.s32.totalorder (!%p193_p10), %s734_s19, 1 }
  0x12   : > { %s845_s7 = scalar_select %p135_p11, %s726_s17, %s137_s5  }
  0x13   : > { %p236_p13 = scmp.lt.s32.totalorder (!%p193_p10), %s565_s8, 7  ;;  %s577_s27 = sshll.u32 (!%p193_p10), %s734_s19, 4 }
  0x16   : > { %s235_s9 = scalar_select %p234_p12, %s734_s19, 1  ;;  %v861_v0 = vld [vmem:[%s1010_s1] ss:$0 sm:$0xff]  ;;  %vm397_vm0 = vcmask 519168  }
  0x17   : > { %s1030_s8 = smov (!%p236_p13, %s565_s8), 7  ;;  %v872_v11 = vld [vmem:[%s1011_s2] ss:$0 sm:$0xff] }
  0x18   : > { %s567_s10 = sshll.u32 %s235_s9, 6  ;;  %s566_s11 = sshll.u32 %s1030_s8, 3 }
  0x19   : > { %s850_s12 = sadd.s32 %s567_s10, %s566_s11 }
  0x1a   : > { %s568_s13 = sshll.u32 %s850_s12, 2  ;;  %s572_s8 = sshll.u32 %s850_s12, 3 }
  0x1b   : > { %s856_s24 = scalar_lea.vmem %s1009_s0, %s568_s13  ;;  %s890_s11 = scalar_lea.vmem %s1012_s3, %s572_s8 }
  0x1c   : > { %v259_v1 = vld [vmem:[%s856_s24 + $0x10] sm:$0x7]  ;;  %v260_v2 = vld [vmem:[%s856_s24 + $0x14] sm:$0x7]  ;;  %v255_v8 = vld [vmem:[%s856_s24] sm:$0x7] }
  0x1d   : > { %v267_v3 = vld [vmem:[%s856_s24 + $0x30] sm:$0x7]  ;;  %v268_v4 = vld [vmem:[%s856_s24 + $0x34] sm:$0x7]  ;;  %v275_v5 = vunpack.c.l.bf16 %v259_v1  ;;  %v276_v6 = vunpack.c.l.bf16 %v260_v2  ;;  %v256_v9 = vld [vmem:[%s856_s24 + $0x4] sm:$0x7]  ;;  %v271_v14 = vunpack.c.l.bf16 %v255_v8 }
  0x1e   : > { %v283_v7 = vunpack.c.l.bf16 %v267_v3  ;;  %v284_v10 = vunpack.c.l.bf16 %v268_v4  ;;  %v263_v12 = vld [vmem:[%s856_s24 + $0x20] sm:$0x7]  ;;  %v264_v13 = vld [vmem:[%s856_s24 + $0x24] sm:$0x7]  ;;  %v272_v15 = vunpack.c.l.bf16 %v256_v9  ;;  %v261_v32 = vld [vmem:[%s856_s24 + $0x18] sm:$0x7] }
  0x1f   : > { %v298_v16 = vmul.f32 %v861_v0, %v275_v5  ;;  %v299_v17 = vmul.f32 %v861_v0, %v276_v6  ;;  %v279_v19 = vunpack.c.l.bf16 %v263_v12  ;;  %v280_v21 = vunpack.c.l.bf16 %v264_v13  ;;  %v262_v33 = vld [vmem:[%s856_s24 + $0x1c] sm:$0x7]  ;;  %v269_v34 = vld [vmem:[%s856_s24 + $0x38] sm:$0x7]  ;;  %v257_v44 = vld [vmem:[%s856_s24 + $0x8] sm:$0x7] }
  0x20   : > { %v306_v18 = vmul.f32 %v861_v0, %v283_v7  ;;  %v307_v20 = vmul.f32 %v861_v0, %v284_v10  ;;  %v294_v22 = vmul.f32 %v861_v0, %v271_v14  ;;  %v295_v23 = vmul.f32 %v861_v0, %v272_v15  ;;  %v270_v39 = vld [vmem:[%s856_s24 + $0x3c] sm:$0x7]  ;;  %v258_v53 = vld [vmem:[%s856_s24 + $0xc] sm:$0x7]  ;;  %v265_v54 = vld [vmem:[%s856_s24 + $0x28] sm:$0x7] }
  0x21   : > { %v321_v24 = vadd.f32 %v872_v11, %v298_v16  ;;  %v322_v25 = vadd.f32 %v872_v11, %v299_v17  ;;  %v302_v27 = vmul.f32 %v861_v0, %v279_v19  ;;  %v303_v29 = vmul.f32 %v861_v0, %v280_v21  ;;  %v266_v58 = vld [vmem:[%s856_s24 + $0x2c] sm:$0x7]  ;;  %s748_s12 = smov 64   ;;  %s230_s13 = sand.u32 1, %s722_s16  }
  0x22   : > { %v329_v26 = vadd.f32 %v872_v11, %v306_v18  ;;  %v330_v28 = vadd.f32 %v872_v11, %v307_v20  ;;  %v317_v30 = vadd.f32 %v872_v11, %v294_v22  ;;  %v318_v31 = vadd.f32 %v872_v11, %v295_v23  ;;  %s564_s14 = sshll.u32 %s230_s13, 4  ;;  %s576_s24 = sshll.u32 %s730_s18, 2 }
  0x23   : > { %v337_v35 = vmax.f32 %v321_v24, 0.0  ;;  %v338_v36 = vmax.f32 %v322_v25, 0.0  ;;  %v325_v38 = vadd.f32 %v872_v11, %v302_v27  ;;  %v326_v41 = vadd.f32 %v872_v11, %v303_v29  ;;  %s232_s23 = scalar_lea.vmem [#allocation2], %s564_s14  ;;  %s429_s30 = sadd.s32 %s577_s27, %s576_s24 }
  0x24   : > { %v345_v37 = vmax.f32 %v329_v26, 0.0  ;;  %v346_v40 = vmax.f32 %v330_v28, 0.0  ;;  %v333_v42 = vmax.f32 %v317_v30, 0.0  ;;  %v334_v43 = vmax.f32 %v318_v31, 0.0  ;;  %s432_s5 = sshll.u32 %s232_s23, 4  ;;  %s578_s6 = sshll.u32 %s429_s30, 6  ;;  %s948_s5 = int_to_ptr.vmem [resolvable:$true] %s432_s5 }
  0x25   : > { %354 = vst [vmem:[%s890_s11 + $0x28] sm:$0x1f] %v338_v36  ;;  %353 = vst [vmem:[%s890_s11 + $0x20] sm:$0x1f] %v337_v35  ;;  %v341_v46 = vmax.f32 %v325_v38, 0.0  ;;  %v277_v47 = vunpack.c.l.bf16 %v261_v32  ;;  %v278_v48 = vunpack.c.l.bf16 %v262_v33  ;;  %v342_v50 = vmax.f32 %v326_v41, 0.0  ;;  %s953_s19 = scalar_lea.hbm %s1013_s4, %s578_s6 }
  0x26   : > { %361 = vst [vmem:[%s890_s11 + $0x60] sm:$0x1f] %v345_v37  ;;  %v369_v45 = vmax.f32 %v337_v35, %v345_v37  ;;  %362 = vst [vmem:[%s890_s11 + $0x68] sm:$0x1f] %v346_v40  ;;  %v370_v49 = vmax.f32 %v338_v36, %v346_v40  ;;  %v285_v51 = vunpack.c.l.bf16 %v269_v34  ;;  %v286_v52 = vunpack.c.l.bf16 %v270_v39  ;;  %s956_s9 = scalar_lea.sflag [#allocation3], %s230_s13  ;;  %s654_s10 = scalar_lea.vmem %s948_s5, 256 }
  0x27   : > { %350 = vst [vmem:[%s890_s11 + $0x8] sm:$0x1f] %v334_v43  ;;  %349 = vst [vmem:[%s890_s11] sm:$0x1f] %v333_v42  ;;  %v365_v55 = vmax.f32 %v333_v42, %v341_v46  ;;  %v300_v56 = vmul.f32 %v861_v0, %v277_v47  ;;  %v301_v57 = vmul.f32 %v861_v0, %v278_v48  ;;  %v273_v59 = vunpack.c.l.bf16 %v257_v44  ;;  %p655_p0 = scmp.ne.s32.totalorder %s948_s5, %s654_s10 }
  0x28   : > { %357 = vst [vmem:[%s890_s11 + $0x40] sm:$0x1f] %v341_v46  ;;  %v375_v60 = vmax.f32 %v369_v45, %v370_v49  ;;  %358 = vst [vmem:[%s890_s11 + $0x48] sm:$0x1f] %v342_v50  ;;  %v366_v61 = vmax.f32 %v334_v43, %v342_v50  ;;  %v308_v62 = vmul.f32 %v861_v0, %v285_v51  ;;  %v274_v3 = vunpack.c.l.bf16 %v258_v53 }
  0x29   : > { %v309_v63 = vmul.f32 %v861_v0, %v286_v52  ;;  %v323_v1 = vadd.f32 %v872_v11, %v300_v56  ;;  %v324_v2 = vadd.f32 %v872_v11, %v301_v57  ;;  %v281_v4 = vunpack.c.l.bf16 %v265_v54  ;;  %p656_p1 = pnand %p655_p0, %p827_p3 }
  0x2a   : > { %385 = vrot.lane.b32.xlu1 %v375_v60, %s748_s12  ;;  %v373_v5 = vmax.f32 %v365_v55, %v366_v61  ;;  %v331_v6 = vadd.f32 %v872_v11, %v308_v62  ;;  %v282_v8 = vunpack.c.l.bf16 %v266_v58  ;;  %v296_v12 = vmul.f32 %v861_v0, %v273_v59 }
  0x2b   : > { %v332_v7 = vadd.f32 %v872_v11, %v309_v63  ;;  %v339_v9 = vmax.f32 %v323_v1, 0.0  ;;  %v340_v10 = vmax.f32 %v324_v2, 0.0  ;;  %v297_v13 = vmul.f32 %v861_v0, %v274_v3  ;;  %p657_p2 = pneg %p656_p1 }
  0x2c   : > { %381 = vrot.lane.b32.xlu0 %v373_v5, %s748_s12  ;;  %v347_v14 = vmax.f32 %v331_v6, 0.0  ;;  %v304_v16 = vmul.f32 %v861_v0, %v281_v4  ;;  %v305_v17 = vmul.f32 %v861_v0, %v282_v8  ;;  %v319_v18 = vadd.f32 %v872_v11, %v296_v12 }
  0x2d   : > { %v348_v15 = vmax.f32 %v332_v7, 0.0  ;;  %355 = vst [vmem:[%s890_s11 + $0x30] sm:$0x1f] %v339_v9  ;;  %356 = vst [vmem:[%s890_s11 + $0x38] sm:$0x1f] %v340_v10  ;;  %v320_v19 = vadd.f32 %v872_v11, %v297_v13 }
  0x2e   : > { %363 = vst [vmem:[%s890_s11 + $0x70] sm:$0x1f] %v347_v14  ;;  %v371_v20 = vmax.f32 %v339_v9, %v347_v14  ;;  %v327_v22 = vadd.f32 %v872_v11, %v304_v16  ;;  %v328_v23 = vadd.f32 %v872_v11, %v305_v17  ;;  %v335_v0 = vmax.f32 %v319_v18, 0.0 }
  0x2f   : > { %364 = vst [vmem:[%s890_s11 + $0x78] sm:$0x1f] %v348_v15  ;;  %v372_v21 = vmax.f32 %v340_v10, %v348_v15  ;;  %v336_v24 = vmax.f32 %v320_v19, 0.0 }
  0x30   : > { %v343_v26 = vmax.f32 %v327_v22, 0.0  ;;  %v344_v27 = vmax.f32 %v328_v23, 0.0  ;;  %351 = vst [vmem:[%s890_s11 + $0x10] sm:$0x1f] %v335_v0 }
  0x31   : > { %v376_v25 = vmax.f32 %v371_v20, %v372_v21  ;;  %352 = vst [vmem:[%s890_s11 + $0x18] sm:$0x1f] %v336_v24 }
  0x32   : > { %359 = vst [vmem:[%s890_s11 + $0x50] sm:$0x1f] %v343_v26  ;;  %360 = vst [vmem:[%s890_s11 + $0x58] sm:$0x1f] %v344_v27  ;;  %v367_v28 = vmax.f32 %v335_v0, %v343_v26  ;;  %v368_v29 = vmax.f32 %v336_v24, %v344_v27  ;;  %s749_s11 = smov [#allocation2]  }
  0x33   : > { %387 = vrot.lane.b32.xlu1 %v376_v25, %s748_s12  ;;  %s658_s14 = sshll.u32 %s749_s11, 4  ;;  %s659_s14 = int_to_ptr.vmem [resolvable:$false] %s658_s14 }
  0x34   : > { %v374_v30 = vmax.f32 %v367_v28, %v368_v29  ;;  %s660_s24 = scalar_lea.vmem %s659_s14, 512  ;;  %p661_p4 = scmp.lt.s32.totalorder %s948_s5, %s659_s14 }
  0x35   : > { %p662_p5 = scmp.lt.s32.totalorder %s660_s24, %s654_s10 }
  0x36   : > { %383 = vrot.lane.b32.xlu0 %v374_v30, %s748_s12 }
  0x37   : > { %p663_p6 = por %p662_p5, %p661_p4 }
  0x39   : > { %p664_p7 = pnand %p663_p6, %p657_p2 }
  0x9c   : > { %v386_v11 = vpop.permute.xlu1 %385 }
  0x9d   : > { %v395_v31 = vmax.f32 %v375_v60, %v386_v11 }
  0x9e   : > { %v382_v32 = vpop.permute.xlu0 %381 }
  0x9f   : > { %400 = vst.msk [vmem:[%s232_s23 + $0x8] sm:$0xf] %vm397_vm0, %v395_v31  ;;  %v393_v33 = vmax.f32 %v373_v5, %v382_v32 }
  0xa1   : > { %398 = vst.msk [vmem:[%s232_s23] sm:$0xf] %vm397_vm0, %v393_v33 }
  0xa5   : > { %v388_v34 = vpop.permute.xlu1 %387 }
  0xa6   : > { %v396_v35 = vmax.f32 %v376_v25, %v388_v34 }
  0xa8   : > { %401 = vst.msk [vmem:[%s232_s23 + $0xc] sm:$0xf] %vm397_vm0, %v396_v35  ;;  %v384_v36 = vpop.permute.xlu0 %383 }
  0xa9   : > { %v394_v37 = vmax.f32 %v374_v30, %v384_v36 }
  0xab   : > { %399 = vst.msk [vmem:[%s232_s23 + $0x4] sm:$0xf] %vm397_vm0, %v394_v37 }
  0xac   : > { %667 = shalt.err (!%p664_p7)
}
  0xad   : > { %s668_s13 = scalar_lea.hbm %s953_s19, 256  ;;  %s672_s30 = scalar_lea.hbm %s1013_s4, 2048 }
  0xae   : > { %p669_p9 = scmp.ne.s32.totalorder %s953_s19, %s668_s13  ;;  %p673_p12 = scmp.lt.s32.totalorder %s953_s19, %s1013_s4 }
  0xaf   : > { %p674_p13 = scmp.lt.s32.totalorder %s672_s30, %s668_s13 }
  0xb0   : > { %p670_p10 = pnand %p669_p9, %p827_p3 }
  0xb1   : > { %p675_p0 = por %p674_p13, %p673_p12 }
  0xb2   : > { %p671_p11 = pneg %p670_p10 }
  0xb4   : > { %p676_p1 = pnand %p675_p0, %p671_p11 }
  0xb6   : > { %679 = shalt.err (!%p676_p1)
}
  0xb7   : > { %s750_s18 = smov 4  }
  0xb8   : > { %581 = dma.vmem_to_hbm [thread:$0]  (%p827_p3), %s948_s5, 256, %s953_s19, %s956_s9, %s748_s12, %s748_s12, %s750_s18  }
  0xb9 PF: > { %p587_p2 = scmp.ge.s32.totalorder %s746_s22, 2  ;;  %s460_s10 = sand.u32 1, %s718_s15  }
  0xba   : > { %s461_s11 = scalar_lea.sflag [#allocation3], %s460_s10 }
  0xbb   : > { %p584_p4 = pnand %p587_p2, %p836_p8 }
  0xbd   : > { %p585_p5 = pneg %p584_p4 }
  0xbf   : > { %713 = dma.done.wait (%p585_p5), %s461_s11, 256  }
  0xc0   : > { %715 = vsyncadd (%p585_p5), %s461_s11, 4294967040  ;;  %s18_s22 = sadd.s32 1, %s746_s22   ;;  %s1016_s15 = smov %s722_s16 }
  0xc1   : > { %p15_p6 = scmp.ge.s32.totalorder %s18_s22, 10   ;;  %s1017_s16 = smov %s726_s17 }
  0xc2   : > { %s1018_s17 = smov %s845_s7  ;;  %s1019_s18 = smov %s738_s20 }
  0xc3   : > { %s1020_s19 = smov %s742_s21  ;;  %s1021_s20 = smov %s1024_s25 }
  0xc4   : > { %s1022_s21 = smov %s1028_s26  ;;  %17 = sbr.rel (!%p15_p6) target bundleno = 5 (0x5), region = 79 }
  0xc9   :  { %466 = vsyncpa [#allocation3], 1 }
  0xca   :  { %468 = vsyncpa [#allocation3 + $0x1], 1 }

// kernel: down_transition.4
= control target key start
LH: loop header
LB: loop body
LE: loop exit
PB: predicated region body
PF: predicated region fallthrough
CT: control target
= control target key end

     0   :  { %s6117_s24 = smov 0   ;;  %s6119_s25 = smov 0   ;;  %s7935_s0 = inlined_call_operand.vmem [shape: bf16[2,10,110,4], index: 0, kind: input, shape index: {}, may-alias: {0,1,2}]   ;;  %s7936_s1 = inlined_call_operand.vmem [shape: bf16[2,10,110,4], index: 1, kind: input, shape index: {}, may-alias: {0,1,2}]   ;;  %s7937_s2 = inlined_call_operand.vmem [shape: bf16[2,10,110,4], index: 2, kind: input, shape index: {}, may-alias: {0,1,2}]   ;;  %s7938_s3 = inlined_call_operand.vmem [shape: bf16[3,3,3,4,32], index: 3, kind: input, shape index: {}]   ;;  %s7939_s4 = inlined_call_operand.vmem [shape: f32[1,32], index: 4, kind: input, shape index: {}]   ;;  %s7940_s5 = inlined_call_operand.vmem [shape: bf16[2,8,80,32], index: 5, kind: output, shape index: {0}]   ;;  %s7941_s6 = inlined_call_operand.vmem [shape: f32[2,8,1,32], index: 6, kind: output, shape index: {1}]   ;;  %s7942_s7 = inlined_call_operand.vmem [shape: f32[2,8,1,32], index: 7, kind: output, shape index: {2}]  }
   0x1   :  { %s6121_s26 = smov 0   ;;  %s6123_s27 = smov 0  }
   0x2   :  { %s6125_s28 = smov 0  }
   0x3 LB: > { %s27_s29 = sadd.s32 1, %s6065_s26  ;;  %s30_s30 = sadd.s32 1, %s6069_s27  ;;  %s6073_s28 = sphi %s6125_s28, %s18_s28   ;;  %s6069_s27 = sphi %s6123_s27, %s7983_s27   ;;  %s6065_s26 = sphi %s6121_s26, %s7982_s26   ;;  %s6061_s25 = sphi %s6119_s25, %s7981_s25   ;;  %s6057_s24 = sphi %s6117_s24, %s7980_s24  }
   0x4   : > { %p28_p0 = scmp.ge.s32.totalorder %s27_s29, 8  ;;  %p4860_p1 = scmp.ge.s32.totalorder %s6073_s28, 1 }
   0x5   : > { %p306_p2 = scmp.lt.s32.totalorder %s6073_s28, 17 }
   0x6   : > { %s7985_s29 = smov (%p28_p0, %s27_s29), 0  ;;  %s7987_s30 = smov (!%p28_p0, %s30_s30), %s6069_s27 }
   0x7   : > { %p307_p3 = pnand %p4860_p1, %p306_p2  ;;  %p32_p4 = scmp.ge.s32.totalorder %s7987_s30, 2 }
   0x8   : > { %p380_p5 = scmp.lt.s32.totalorder (!%p307_p3), %s6061_s25, 1  ;;  %p382_p6 = scmp.lt.s32.totalorder (!%p307_p3), %s6057_s24, 9 }
   0x9   : > { %s7989_s30 = smov (%p32_p4, %s7987_s30), 0  ;;  %310 = sbr.rel (%p307_p3) target bundleno = 788 (0x314), region = 40 }
   0xa   : > { %s389_s18 = sadd.s32 (!%p307_p3), 1, %s6057_s24  ;;  %p413_p9 = scmp.lt.s32.totalorder (!%p307_p3), %s6057_s24, 7 }
   0xb   : > { %p6217_p7 = scmp.lt.s32.totalorder (!%p307_p3), %s389_s18, 9 }
   0xe   : > { %v4867_v0 = vld [vmem:[%s7938_s3 + $0x2] sm:$0x3]  ;;  %vm538_vm0 = vcmask 1041408   ;;  %v6075_v1 = vmov 0.0   ;;  %s7991_s25 = smov (!%p380_p5, %s6061_s25), 1  ;;  %vm6076_vm1 = vmmov 0  }
   0xf   : > { %5292 = vmatprep.subr.bf16.mxu0 %v6075_v1  ;;  %5886 = vmatprep.subr.bf16.mxu1 %v6075_v1  ;;  %v540_v2 = vsel %vm538_vm0, %v4867_v0, 0  ;;  %s383_s10 = scalar_select %p382_p6, %s6057_s24, 9  ;;  %vm477_vm2 = vsmask.f32 7424  ;;  %v4884_v17 = vld [vmem:[%s7938_s3 + $0x4] sm:$0x3] }
  0x10   : > { %5293 = vmatpush3.bf16.msra.mxu0 %v540_v2  ;;  %5887 = vmatpush3.bf16.msra.mxu1 %v540_v2  ;;  %s6165_s11 = smul.u32 140, %s7991_s25  ;;  %vm522_vm3 = vcmask 31744   ;;  %v445_v19 = vld [vmem:[%s7938_s3] sm:$0x3]  ;;  %v735_v26 = vsel %vm538_vm0, %v4884_v17, 0  ;;  %s7993_s18 = smov (!%p6217_p7, %s389_s18), 9 }
  0x11   : > { %5294 = vmatprep.mubr.msk.bf16.mxu0 %vm6076_vm1, %v6075_v1  ;;  %5306 = vmatprep.mubr.msk.bf16.mxu1 %vm6076_vm1, %v6075_v1  ;;  %s5888_s12 = smul.u32 14, %s383_s10  ;;  %v626_v31 = vsel %vm538_vm0, %v445_v19, 0  ;;  %v4891_v43 = vld [vmem:[%s7938_s3 + $0x6] sm:$0x3]  ;;  %vm707_vm4 = vcmask 1046528   ;;  %vm1140_vm6 = vcmask 1045504  }
  0x12   : > { %5336 = vmatprep.subr.bf16.mxu0 %v6075_v1  ;;  %5314 = vmatprep.subr.bf16.mxu1 %v6075_v1  ;;  %s5890_s8 = smul.u32 14, %s7993_s18  ;;  %v888_v45 = vsel %vm538_vm0, %v4891_v43, 0  ;;  %v4903_v48 = vld [vmem:[%s7938_s3 + $0x8] sm:$0x3]  ;;  %vm979_vm5 = vsmask.f32 6400 }
  0x13   : > { %s386_s13 = sadd.s32 %s6165_s11, %s5888_s12  ;;  %v1049_v50 = vsel %vm538_vm0, %v4903_v48, 0  ;;  %v4917_v19 = vld [vmem:[%s7938_s3 + $0xc] sm:$0x3]  ;;  %vm1412_vm7 = vsmask.f32 5376  ;;  %vm1573_vm8 = vcmask 1044480  }
  0x14   : > { %s4861_s14 = sshll.u32 %s386_s13, 2  ;;  %s396_s9 = sadd.s32 %s5890_s8, %s6165_s11 }
  0x15   : > { %s6172_s17 = scalar_lea.vmem %s7935_s0, %s4861_s14  ;;  %s4862_s13 = sshll.u32 %s396_s9, 2 }
  0x16   : > { %v435_v3 = vld [vmem:[%s6172_s17] sm:$0xf]  ;;  %v6176_v4 = vld [vmem:[%s6172_s17 + $0x4] sm:$0xf]  ;;  %v6182_v6 = vld [vmem:[%s6172_s17 + $0x8] sm:$0xff]   ;;  %s400_s14 = sadd.s32 2, %s6057_s24  ;;  %s6260_s18 = scalar_lea.vmem %s7936_s1, %s4862_s13 }
  0x17   : > { %v6179_v5 = vcombine.low %v435_v3, %v6176_v4  ;;  %v486_v9 = vshll.u32 %v6182_v6, 16  ;;  %v6188_v10 = vld [vmem:[%s6172_s17 + $0x18] sm:$0xff]   ;;  %v6191_v11 = vld [vmem:[%s6172_s17 + $0x20] sm:$0xff]   ;;  %v6195_v12 = vld [vmem:[%s6172_s17 + $0x10] sm:$0xff]   ;;  %v490_v22 = vshrl.u32 %v6182_v6, 16  ;;  %v709_v47 = vrot.slane %v6182_v6, 1 }
  0x18   : > { %v502_v15 = vshll.u32 %v6188_v10, 16  ;;  %v506_v16 = vshrl.u32 %v6188_v10, 16  ;;  %v510_v18 = vshll.u32 %v6191_v11, 16  ;;  %v494_v23 = vshll.u32 %v6195_v12, 16  ;;  %v701_v41 = vld [vmem:[%s6172_s17] sm:$0xe] }
  0x19   : > { %v479_v7 = vshrl.u32 %v6179_v5, 16  ;;  %v481_v8 = vshll.u32 %v6179_v5, 16  ;;  %v488_v14 = vrot.slane %v486_v9, 1  ;;  %v6209_v24 = vld [vmem:[%s6172_s17 + $0x28] ss:$0 sps:$4 sm:$0x11]   ;;  %v4885_v44 = vcombine.low %v701_v41, %v6176_v4 }
  0x1a   : > { %v504_v21 = vrot.slane %v502_v15, 1  ;;  %v512_v25 = vrot.slane %v510_v18, 1  ;;  %v514_v29 = vshrl.u32 %v6191_v11, 16  ;;  %v518_v30 = vshll.u32 %v6209_v24, 16  ;;  %p403_p8 = scmp.lt.s32.totalorder %s400_s14, 9  ;;  %v6304_v58 = vld [vmem:[%s6172_s17 + $0xc] sm:$0xff]  }
  0x1b   : > { %v483_v13 = vrot.slane %v481_v8, 1  ;;  %v492_v33 = vor.u32 %v490_v22, %v488_v14  ;;  %v496_v34 = vrot.slane %v494_v23, 1  ;;  %v498_v38 = vshrl.u32 %v6195_v12, 16  ;;  %v820_v54 = vld [vmem:[%s6172_s17 + $0x4] sm:$0xe]  ;;  %s7997_s24 = smov (!%p413_p9, %s6057_s24), 7 }
  0x1c   : > { %v508_v28 = vor.u32 %v506_v16, %v504_v21  ;;  %v516_v35 = vor.u32 %v514_v29, %v512_v25  ;;  %v520_v36 = vrot.slane %v518_v30, 1  ;;  %v708_v46 = vrot.slane %v4885_v44, 1  ;;  %s7995_s14 = smov (!%p403_p8, %s400_s14), 9  ;;  %v6294_v56 = vld [vmem:[%s6172_s17 + $0x8] sm:$0xf]  ;;  %s5892_s10 = smul.u32 10, %s7997_s24 }
  0x1d   : > { %v484_v20 = vor.u32 %v483_v13, %v479_v7  ;;  %v497_v37 = vsel %vm477_vm2, %v492_v33, %v496_v34  ;;  %v500_v40 = vor.u32 %v498_v38, %v496_v34  ;;  %v711_v51 = vrot.slane %v6195_v12, 1  ;;  %s5891_s21 = smul.u32 14, %s7995_s14  ;;  %v6366_v34 = vld [vmem:[%s6172_s17 + $0x24] sm:$0xff]   ;;  %v5968_v44 = vld [vmem:[%s6172_s17 + $0x2c] ss:$0 sps:$4 sm:$0x11]  }
  0x1e   : > { %v513_v32 = vsel %vm477_vm2, %v508_v28, %v512_v25  ;;  %v521_v39 = vsel %vm477_vm2, %v516_v35, %v520_v36  ;;  %v710_v49 = vsel %vm707_vm4, %v708_v46, %v709_v47  ;;  %v713_v53 = vrot.slane %v6188_v10, 1  ;;  %v6351_v25 = vld [vmem:[%s6172_s17 + $0x1c] sm:$0xff]  }
  0x1f   : > { %v489_v27 = vsel %vm477_vm2, %v484_v20, %v488_v14  ;;  %5307 = vmatmul.mubr.msk.bf16.vlgmr.msra.gmra.mxu1 %vm522_vm3, %v513_v32  ;;  %v505_v42 = vsel %vm477_vm2, %v500_v40, %v504_v21  ;;  %v712_v52 = vsel %vm707_vm4, %v709_v47, %v711_v51  ;;  %s407_s22 = sadd.s32 %s5891_s21, %s6165_s11  ;;  %v715_v57 = vrot.slane %v6191_v11, 1  ;;  %s4865_s21 = sshll.u32 %s7991_s25, 3 }
  0x20   : > { %5295 = vmatmul.mubr.msk.bf16.vlgmr.msra.gmra.mxu0 %vm522_vm3, %v489_v27  ;;  %5315 = vmatpush3.bf16.msra.mxu1 %v626_v31  ;;  %s4863_s23 = sshll.u32 %s407_s22, 2  ;;  %v714_v55 = vsel %vm707_vm4, %v711_v51, %v713_v53  ;;  %v4892_v59 = vcombine.low %v820_v54, %v6294_v56  ;;  %v989_v61 = vshrl.u32 %v6304_v58, 16  ;;  %v992_v0 = vshll.u32 %v6304_v58, 16  ;;  %s425_s22 = sadd.s32 %s4865_s21, %s7997_s24 }
  0x21   : > { %5337 = vmatpush3.bf16.msra.mxu0 %v735_v26  ;;  %5298 = vmatprep.mubr.msk.bf16.mxu0 %vm6076_vm1, %v6075_v1  ;;  %s6299_s9 = scalar_lea.vmem %s7937_s2, %s4863_s23  ;;  %v716_v62 = vsel %vm707_vm4, %v713_v53, %v715_v57  ;;  %v717_v2 = vrot.slane %v6209_v24, 1  ;;  %v862_v4 = vrot.slane %v6304_v58, 1  ;;  %v1321_v23 = vsel %vm538_vm0, %v4917_v19, 0  ;;  %v6458_v19 = vld [vmem:[%s6172_s17 + $0x28] sm:$0xff]  }
  0x22   : > { %5380 = vmatprep.subr.bf16.mxu0 %v6075_v1  ;;  %5310 = vmatprep.mubr.msk.bf16.mxu1 %vm6076_vm1, %v6075_v1  ;;  %v981_v60 = vshrl.u32 %v4892_v59, 16  ;;  %v984_v63 = vshll.u32 %v4892_v59, 16  ;;  %v861_v3 = vrot.slane %v4892_v59, 1  ;;  %v991_v7 = vrot.slane %v989_v61, 1  ;;  %v6401_v59 = vld [vmem:[%s6172_s17 + $0xc] sm:$0xf] }
  0x23   : > { %5358 = vmatprep.subr.bf16.mxu1 %v6075_v1  ;;  %v994_v9 = vrot.slane %v992_v0, 2  ;;  %v1007_v27 = vshrl.u32 %v6351_v25, 16  ;;  %v1010_v28 = vshll.u32 %v6351_v25, 16  ;;  %v866_v29 = vrot.slane %v6351_v25, 1  ;;  %v6412_v0 = vld [vmem:[%s6172_s17 + $0x10] sm:$0xff]  }
  0x24   : > { %v986_v8 = vrot.slane %v984_v63, 2  ;;  %v1016_v36 = vshrl.u32 %v6366_v34, 16  ;;  %v868_v38 = vrot.slane %v6366_v34, 1  ;;  %v870_v48 = vrot.slane %v5968_v44, 1 }
  0x25   : > { %v995_v15 = vor.u32 %v994_v9, %v991_v7  ;;  %v1009_v31 = vrot.slane %v1007_v27, 1  ;;  %v1012_v32 = vrot.slane %v1010_v28, 2  ;;  %v1142_v61 = vrot.slane %v6304_v58, 2  ;;  %v5976_v28 = vld [vmem:[%s6172_s17 + $0x30] ss:$0 sps:$4 sm:$0x33]  }
  0x26   : > { %v1018_v40 = vrot.slane %v1016_v36, 1  ;;  %v869_v43 = vsel %vm707_vm4, %v866_v29, %v868_v38  ;;  %v871_v53 = vsel %vm707_vm4, %v868_v38, %v870_v48  ;;  %v1575_v48 = vrot.slane %v6412_v0, 3 }
  0x27   : > { %5311 = vmatmul.mubr.msk.bf16.gmra.mxu1 %vm522_vm3, %v521_v39  ;;  %v1013_v35 = vor.u32 %v1012_v32, %v1009_v31 }
  0x28   : > { %5299 = vmatmul.mubr.msk.bf16.gmra.mxu0 %vm522_vm3, %v497_v37  ;;  %5316 = vmatprep.mubr.msk.bf16.mxu1 %vm6076_vm1, %v6075_v1  ;;  %v1019_v37 = vshll.u32 %v6366_v34, 16 }
  0x29   : > { %5302 = vmatprep.mubr.msk.bf16.mxu0 %vm6076_vm1, %v6075_v1 }
  0x2a   : > { %v1021_v41 = vrot.slane %v1019_v37, 2 }
  0x2f   : > { %5317 = vmatmul.mubr.msk.bf16.vlgmr.msra.gmra.mxu1 %vm522_vm3, %v6179_v5  ;;  %v4910_v5 = vld [vmem:[%s7938_s3 + $0xa] sm:$0x3] }
  0x30   : > { %5303 = vmatmul.mubr.msk.bf16.gmra.mxu0 %vm522_vm3, %v505_v42  ;;  %5359 = vmatpush3.bf16.msra.mxu1 %v888_v45  ;;  %v1168_v13 = vsel %vm538_vm0, %v4910_v5, 0  ;;  %v6379_v42 = vld [vmem:[%s6172_s17 + $0x2c] ss:$0 sps:$4 sm:$0x33]   ;;  %v1022_v45 = vor.u32 %v1021_v41, %v1018_v40  ;;  %v4943_v41 = vld [vmem:[%s7938_s3 + $0x12] sm:$0x3] }
  0x31   : > { %5338 = vmatprep.mubr.msk.bf16.mxu0 %vm6076_vm1, %v6075_v1  ;;  %5320 = vmatprep.mubr.msk.bf16.mxu1 %vm6076_vm1, %v6075_v1  ;;  %v1025_v46 = vshrl.u32 %v6379_v42, 16  ;;  %v1028_v47 = vshll.u32 %v6379_v42, 16 }
  0x32   : > { %5402 = vmatprep.subr.bf16.mxu1 %v6075_v1 }
  0x33   : > { %v1027_v51 = vrot.slane %v1025_v46, 1  ;;  %v1739_v46 = vsel %vm538_vm0, %v4943_v41, 0 }
  0x37   : > { %5321 = vmatmul.mubr.msk.bf16.gmra.mxu1 %vm522_vm3, %v6182_v6  ;;  %v983_v6 = vrot.slane %v981_v60, 1 }
  0x38   : > { %5339 = vmatmul.mubr.msk.bf16.vlgmr.msra.gmra.mxu0 %vm522_vm3, %v710_v49  ;;  %5324 = vmatprep.mubr.msk.bf16.mxu1 %vm6076_vm1, %v6075_v1  ;;  %v1134_v49 = vld [vmem:[%s6172_s17 + $0x4] sm:$0xc] }
  0x39   : > { %5381 = vmatpush3.bf16.msra.mxu0 %v1049_v50  ;;  %5342 = vmatprep.mubr.msk.bf16.mxu0 %vm6076_vm1, %v6075_v1  ;;  %v987_v14 = vor.u32 %v986_v8, %v983_v6  ;;  %v1023_v50 = vsel %vm979_vm5, %v1013_v35, %v1022_v45  ;;  %v4911_v54 = vcombine.low %v1134_v49, %v6294_v56  ;;  %v4936_v6 = vld [vmem:[%s7938_s3 + $0x10] sm:$0x3]  ;;  %v6430_v8 = vld [vmem:[%s6172_s17 + $0x18] sm:$0xff]  }
  0x3a   : > { %5424 = vmatprep.subr.bf16.mxu0 %v6075_v1  ;;  %v1601_v9 = vsel %vm538_vm0, %v4936_v6, 0  ;;  %v1431_v38 = vshrl.u32 %v6430_v8, 16 }
  0x3b   : > { %v996_v20 = vsel %vm979_vm5, %v987_v14, %v995_v15  ;;  %v1141_v60 = vrot.slane %v4911_v54, 2  ;;  %v6445_v14 = vld [vmem:[%s6172_s17 + $0x20] sm:$0xff]  }
  0x3c   : > { %v1433_v44 = vrot.slane %v1431_v38, 2 }
  0x3f   : > { %5325 = vmatmul.mubr.msk.bf16.gmra.mxu1 %vm522_vm3, %v6195_v12  ;;  %v6330_v12 = vld [vmem:[%s6172_s17 + $0x14] sm:$0xff]  }
  0x40   : > { %5343 = vmatmul.mubr.msk.bf16.gmra.mxu0 %vm522_vm3, %v712_v52  ;;  %5328 = vmatprep.mubr.msk.bf16.mxu1 %vm6076_vm1, %v6075_v1  ;;  %v998_v16 = vshrl.u32 %v6330_v12, 16  ;;  %v1001_v17 = vshll.u32 %v6330_v12, 16  ;;  %v864_v18 = vrot.slane %v6330_v12, 1  ;;  %v1030_v52 = vrot.slane %v1028_v47, 2 }
  0x41   : > { %5346 = vmatprep.mubr.msk.bf16.mxu0 %vm6076_vm1, %v6075_v1  ;;  %v1144_v5 = vrot.slane %v6330_v12, 2  ;;  %v1297_v12 = vrot.slane %v6430_v8, 2 }
  0x42   : > { %v1000_v21 = vrot.slane %v998_v16, 1  ;;  %v1003_v22 = vrot.slane %v1001_v17, 2  ;;  %v865_v24 = vsel %vm707_vm4, %v862_v4, %v864_v18  ;;  %v867_v33 = vsel %vm707_vm4, %v864_v18, %v866_v29 }
  0x43   : > { %v1299_v16 = vrot.slane %v6445_v14, 2  ;;  %v1148_v17 = vrot.slane %v6366_v34, 2  ;;  %v1303_v34 = vrot.slane %v5976_v28, 2 }
  0x44   : > { %v1004_v26 = vor.u32 %v1003_v22, %v1000_v21  ;;  %v1301_v21 = vrot.slane %v6458_v19, 2  ;;  %v1150_v22 = vrot.slane %v6379_v42, 2 }
  0x45   : > { %v1300_v18 = vsel %vm1140_vm6, %v1297_v12, %v1299_v16 }
  0x46   : > { %v1005_v30 = vsel %vm979_vm5, %v995_v15, %v1004_v26  ;;  %v1014_v39 = vsel %vm979_vm5, %v1004_v26, %v1013_v35  ;;  %v1425_v26 = vshll.u32 %v6412_v0, 16  ;;  %v1302_v27 = vsel %vm1140_vm6, %v1299_v16, %v1301_v21  ;;  %v1567_v35 = vld [vmem:[%s6172_s17 + $0x8] sm:$0x8] }
  0x47   : > { %5329 = vmatmul.mubr.msk.bf16.gmra.mxu1 %vm522_vm3, %v6188_v10  ;;  %v718_v10 = vsel %vm707_vm4, %v715_v57, %v717_v2  ;;  %v1253_v57 = vld [vmem:[%s6172_s17 + $0x8] sm:$0xc]  ;;  %v1143_v2 = vsel %vm1140_vm6, %v1141_v60, %v1142_v61  ;;  %v1151_v29 = vsel %vm1140_vm6, %v1148_v17, %v1150_v22  ;;  %v1304_v40 = vsel %vm1140_vm6, %v1301_v21, %v1303_v34 }
  0x48   : > { %5347 = vmatmul.mubr.msk.bf16.gmra.mxu0 %vm522_vm3, %v714_v55  ;;  %5332 = vmatprep.mubr.msk.bf16.mxu1 %vm6076_vm1, %v6075_v1  ;;  %v1031_v55 = vor.u32 %v1030_v52, %v1027_v51  ;;  %v4918_v63 = vcombine.low %v1253_v57, %v6401_v59  ;;  %v4937_v42 = vcombine.low %v1567_v35, %v6401_v59  ;;  %v1440_v51 = vshrl.u32 %v6445_v14, 16 }
  0x49   : > { %5350 = vmatprep.mubr.msk.bf16.mxu0 %vm6076_vm1, %v6075_v1  ;;  %v1443_v52 = vshll.u32 %v6445_v14, 16  ;;  %v1577_v60 = vrot.slane %v6430_v8, 3 }
  0x4a   : > { %v1032_v56 = vsel %vm979_vm5, %v1022_v45, %v1031_v55  ;;  %v1294_v58 = vrot.slane %v4918_v63, 2  ;;  %v1574_v47 = vrot.slane %v4937_v42, 3  ;;  %v1442_v57 = vrot.slane %v1440_v51, 2 }
  0x4b   : > { %v1445_v59 = vrot.slane %v1443_v52, 3 }
  0x4f   : > { %5333 = vmatmul.mubr.msk.bf16.gmra.mxu1 %vm522_vm3, %v6191_v11  ;;  %v863_v11 = vsel %vm707_vm4, %v861_v3, %v862_v4  ;;  %v1295_v4 = vrot.slane %v6412_v0, 2 }
  0x50   : > { %5351 = vmatmul.mubr.msk.bf16.gmra.mxu0 %vm522_vm3, %v716_v62  ;;  %5360 = vmatprep.mubr.msk.bf16.mxu1 %vm6076_vm1, %v6075_v1  ;;  %v4929_v62 = vld [vmem:[%s7938_s3 + $0xe] sm:$0x3] }
  0x51   : > { %5354 = vmatprep.mubr.msk.bf16.mxu0 %vm6076_vm1, %v6075_v1  ;;  %v1482_v3 = vsel %vm538_vm0, %v4929_v62, 0  ;;  %v1296_v7 = vsel %vm1140_vm6, %v1294_v58, %v1295_v4  ;;  %v1452_v62 = vshll.u32 %v6458_v19, 16  ;;  %v5978_v58 = vld [vmem:[%s6172_s17 + $0x30] ss:$0 sps:$4 sm:$0x77]   ;;  %s426_s17 = scalar_lea.vmem %s7941_s6, %s425_s22 }
  0x52   : > { %v1458_v6 = vshrl.u32 %v5978_v58, 16 }
  0x57   : > { %5361 = vmatmul.mubr.msk.bf16.vlgmr.msra.gmra.mxu1 %vm522_vm3, %v863_v11  ;;  %v1146_v11 = vrot.slane %v6351_v25, 2  ;;  %v1422_v25 = vshrl.u32 %v6412_v0, 16 }
  0x58   : > { %5355 = vmatmul.mubr.msk.bf16.gmra.mxu0 %vm522_vm3, %v718_v10  ;;  %5403 = vmatpush3.bf16.msra.mxu1 %v1168_v13  ;;  %v1145_v10 = vsel %vm1140_vm6, %v1142_v61, %v1144_v5  ;;  %v1298_v13 = vsel %vm1140_vm6, %v1295_v4, %v1297_v12  ;;  %v1446_v61 = vor.u32 %v1445_v59, %v1442_v57  ;;  %v1579_v4 = vrot.slane %v6445_v14, 3  ;;  %v6535_v14 = vld [vmem:[%s6260_s18 + $0x4] sm:$0xf] }
  0x59   : > { %5382 = vmatprep.mubr.msk.bf16.mxu0 %vm6076_vm1, %v6075_v1  ;;  %5364 = vmatprep.mubr.msk.bf16.mxu1 %vm6076_vm1, %v6075_v1  ;;  %v1147_v15 = vsel %vm1140_vm6, %v1144_v5, %v1146_v11  ;;  %v1424_v32 = vrot.slane %v1422_v25, 2 }
  0x5a   : > { %5446 = vmatprep.subr.bf16.mxu1 %v6075_v1 }
  0x5f   : > { %5365 = vmatmul.mubr.msk.bf16.gmra.mxu1 %vm522_vm3, %v865_v24  ;;  %v1417_v24 = vshll.u32 %v4918_v63, 16 }
  0x60   : > { %5383 = vmatmul.mubr.msk.bf16.vlgmr.msra.gmra.mxu0 %vm522_vm3, %v996_v20  ;;  %5368 = vmatprep.mubr.msk.bf16.mxu1 %vm6076_vm1, %v6075_v1  ;;  %v1149_v20 = vsel %vm1140_vm6, %v1146_v11, %v1148_v17  ;;  %v1581_v11 = vrot.slane %v6458_v19, 3 }
  0x61   : > { %5425 = vmatpush3.bf16.msra.mxu0 %v1321_v23  ;;  %5386 = vmatprep.mubr.msk.bf16.mxu0 %vm6076_vm1, %v6075_v1  ;;  %v1414_v23 = vshrl.u32 %v4918_v63, 16  ;;  %v1419_v31 = vrot.slane %v1417_v24, 3  ;;  %v1578_v63 = vsel %vm1573_vm8, %v1575_v48, %v1577_v60 }
  0x62   : > { %5468 = vmatprep.subr.bf16.mxu0 %v6075_v1  ;;  %v1582_v16 = vsel %vm1573_vm8, %v1579_v4, %v1581_v11 }
  0x67   : > { %5369 = vmatmul.mubr.msk.bf16.gmra.mxu1 %vm522_vm3, %v867_v33  ;;  %v1427_v33 = vrot.slane %v1425_v26, 3 }
  0x68   : > { %5387 = vmatmul.mubr.msk.bf16.gmra.mxu0 %vm522_vm3, %v1005_v30  ;;  %5372 = vmatprep.mubr.msk.bf16.mxu1 %vm6076_vm1, %v6075_v1  ;;  %v1416_v30 = vrot.slane %v1414_v23, 2  ;;  %v4966_v23 = vld [vmem:[%s7938_s3 + $0x16] sm:$0x3] }
  0x69   : > { %5390 = vmatprep.mubr.msk.bf16.mxu0 %vm6076_vm1, %v6075_v1  ;;  %v1428_v37 = vor.u32 %v1427_v33, %v1424_v32  ;;  %v2043_v28 = vsel %vm538_vm0, %v4966_v23, 0  ;;  %v4973_v32 = vld [vmem:[%s7938_s3 + $0x18] sm:$0x3] }
  0x6a   : > { %v1420_v36 = vor.u32 %v1419_v31, %v1416_v30  ;;  %v6562_v31 = vld [vmem:[%s6260_s18 + $0x10] sm:$0xff]  }
  0x6b   : > { %v1881_v35 = vshll.u32 %v6562_v31, 16  ;;  %v1885_v42 = vshrl.u32 %v6562_v31, 16 }
  0x6f   : > { %5373 = vmatmul.mubr.msk.bf16.gmra.mxu1 %vm522_vm3, %v869_v43  ;;  %v1429_v43 = vsel %vm1412_vm7, %v1420_v36, %v1428_v37  ;;  %v5980_v36 = vld [vmem:[%s6260_s18 + $0x8] sm:$0xff]  }
  0x70   : > { %5391 = vmatmul.mubr.msk.bf16.gmra.mxu0 %vm522_vm3, %v1014_v39  ;;  %5376 = vmatprep.mubr.msk.bf16.mxu1 %vm6076_vm1, %v6075_v1  ;;  %v1434_v39 = vshll.u32 %v6430_v8, 16  ;;  %v1580_v8 = vsel %vm1573_vm8, %v1577_v60, %v1579_v4  ;;  %v5985_v60 = vld [vmem:[%s6260_s18 + $0x18] sm:$0xff]  }
  0x71   : > { %5394 = vmatprep.mubr.msk.bf16.mxu0 %vm6076_vm1, %v6075_v1 }
  0x72   : > { %v1436_v45 = vrot.slane %v1434_v39, 3  ;;  %v1883_v39 = vrot.slane %v1881_v35, 1 }
  0x74   : > { %v1437_v49 = vor.u32 %v1436_v45, %v1433_v44  ;;  %v5983_v44 = vld [vmem:[%s6260_s18 + $0x10] sm:$0xff]  }
  0x76   : > { %v1438_v55 = vsel %vm1412_vm7, %v1428_v37, %v1437_v49  ;;  %v1447_v0 = vsel %vm1412_vm7, %v1437_v49, %v1446_v61  ;;  %v2196_v37 = vsel %vm538_vm0, %v4973_v32, 0 }
  0x77   : > { %5377 = vmatmul.mubr.msk.bf16.gmra.mxu1 %vm522_vm3, %v871_v53  ;;  %v1576_v53 = vsel %vm1573_vm8, %v1574_v47, %v1575_v48  ;;  %v6594_v48 = vld [vmem:[%s6260_s18 + $0x20] sm:$0xff]  }
  0x78   : > { %5395 = vmatmul.mubr.msk.bf16.gmra.mxu0 %vm522_vm3, %v1023_v50  ;;  %5404 = vmatprep.mubr.msk.bf16.mxu1 %vm6076_vm1, %v6075_v1  ;;  %v4954_v50 = vld [vmem:[%s7938_s3 + $0x14] sm:$0x3] }
  0x79   : > { %5398 = vmatprep.mubr.msk.bf16.mxu0 %vm6076_vm1, %v6075_v1  ;;  %v1925_v54 = vsel %vm538_vm0, %v4954_v50, 0 }
  0x7f   : > { %5405 = vmatmul.mubr.msk.bf16.vlgmr.msra.gmra.mxu1 %vm522_vm3, %v1143_v2 }
  0x80   : > { %5399 = vmatmul.mubr.msk.bf16.gmra.mxu0 %vm522_vm3, %v1032_v56  ;;  %5447 = vmatpush3.bf16.msra.mxu1 %v1482_v3  ;;  %v1449_v56 = vshrl.u32 %v6458_v19, 16  ;;  %v1454_v3 = vrot.slane %v1452_v62, 3  ;;  %v1583_v19 = vrot.slane %v5978_v58, 3 }
  0x81   : > { %5426 = vmatprep.mubr.msk.bf16.mxu0 %vm6076_vm1, %v6075_v1  ;;  %5408 = vmatprep.mubr.msk.bf16.mxu1 %vm6076_vm1, %v6075_v1 }
  0x82   : > { %5490 = vmatprep.subr.bf16.mxu1 %v6075_v1  ;;  %v1451_v2 = vrot.slane %v1449_v56, 2  ;;  %v1584_v22 = vsel %vm1573_vm8, %v1581_v11, %v1583_v19 }
  0x84   : > { %v1455_v5 = vor.u32 %v1454_v3, %v1451_v2 }
  0x87   : > { %5409 = vmatmul.mubr.msk.bf16.gmra.mxu1 %vm522_vm3, %v1145_v10  ;;  %v1460_v10 = vrot.slane %v1458_v6, 2 }
  0x88   : > { %5427 = vmatmul.mubr.msk.bf16.vlgmr.msra.gmra.mxu0 %vm522_vm3, %v1296_v7  ;;  %5412 = vmatprep.mubr.msk.bf16.mxu1 %vm6076_vm1, %v6075_v1  ;;  %v1461_v7 = vshll.u32 %v5978_v58, 16 }
  0x89   : > { %5469 = vmatpush3.bf16.msra.mxu0 %v1601_v9  ;;  %5430 = vmatprep.mubr.msk.bf16.mxu0 %vm6076_vm1, %v6075_v1  ;;  %v1456_v9 = vsel %vm1412_vm7, %v1446_v61, %v1455_v5 }
  0x8a   : > { %5512 = vmatprep.subr.bf16.mxu0 %v6075_v1  ;;  %v1463_v12 = vrot.slane %v1461_v7, 3  ;;  %v1901_v7 = vshrl.u32 %v6594_v48, 16 }
  0x8f   : > { %5413 = vmatmul.mubr.msk.bf16.gmra.mxu1 %vm522_vm3, %v1147_v15  ;;  %v1464_v15 = vor.u32 %v1463_v12, %v1460_v10  ;;  %v5987_v12 = vld [vmem:[%s6260_s18 + $0x20] sm:$0xff]  }
  0x90   : > { %5431 = vmatmul.mubr.msk.bf16.gmra.mxu0 %vm522_vm3, %v1298_v13  ;;  %5416 = vmatprep.mubr.msk.bf16.mxu1 %vm6076_vm1, %v6075_v1  ;;  %v1824_v13 = vld [vmem:[%s6260_s18] sm:$0xf] }
  0x91   : > { %5434 = vmatprep.mubr.msk.bf16.mxu0 %vm6076_vm1, %v6075_v1  ;;  %v4955_v17 = vcombine.low %v1824_v13, %v6535_v14 }
  0x93   : > { %v1868_v21 = vshll.u32 %v4955_v17, 16  ;;  %v1866_v24 = vshrl.u32 %v4955_v17, 16 }
  0x95   : > { %v1870_v25 = vrot.slane %v1868_v21, 1  ;;  %v2128_v21 = vld [vmem:[%s6260_s18 + $0x4] sm:$0xe] }
  0x97   : > { %5417 = vmatmul.mubr.msk.bf16.gmra.mxu1 %vm522_vm3, %v1149_v20  ;;  %v6546_v20 = vld [vmem:[%s6260_s18 + $0x8] sm:$0xff]  }
  0x98   : > { %5435 = vmatmul.mubr.msk.bf16.gmra.mxu0 %vm522_vm3, %v1300_v18  ;;  %5420 = vmatprep.mubr.msk.bf16.mxu1 %vm6076_vm1, %v6075_v1  ;;  %v1465_v18 = vsel %vm1412_vm7, %v1455_v5, %v1464_v15  ;;  %v1873_v26 = vshll.u32 %v6546_v20, 16  ;;  %v1877_v34 = vshrl.u32 %v6546_v20, 16  ;;  %v2010_v5 = vld [vmem:[%s6260_s18] sm:$0xe] }
  0x99   : > { %5438 = vmatprep.mubr.msk.bf16.mxu0 %vm6076_vm1, %v6075_v1  ;;  %v4967_v11 = vcombine.low %v2010_v5, %v6535_v14 }
  0x9a   : > { %v1875_v30 = vrot.slane %v1873_v26, 1 }
  0x9b   : > { %v2016_v14 = vrot.slane %v4967_v11, 1 }
  0x9c   : > { %v1879_v38 = vor.u32 %v1877_v34, %v1875_v30 }
  0x9e   : > { %v1884_v41 = vsel %vm477_vm2, %v1879_v38, %v1883_v39 }
  0x9f   : > { %5421 = vmatmul.mubr.msk.bf16.gmra.mxu1 %vm522_vm3, %v1151_v29  ;;  %v1871_v29 = vor.u32 %v1870_v25, %v1866_v24  ;;  %v2017_v24 = vrot.slane %v6546_v20, 1 }
  0xa0   : > { %5439 = vmatmul.mubr.msk.bf16.gmra.mxu0 %vm522_vm3, %v1302_v27  ;;  %5448 = vmatprep.mubr.msk.bf16.mxu1 %vm6076_vm1, %v6075_v1  ;;  %v5979_v27 = vld [vmem:[%s6260_s18] sm:$0xff]  }
  0xa1   : > { %5442 = vmatprep.mubr.msk.bf16.mxu0 %vm6076_vm1, %v6075_v1  ;;  %v1876_v33 = vsel %vm477_vm2, %v1871_v29, %v1875_v30  ;;  %v6645_v30 = vld [vmem:[%s6260_s18 + $0xc] sm:$0xff]   ;;  %v2018_v35 = vsel %vm707_vm4, %v2016_v14, %v2017_v24 }
  0xa7   : > { %5449 = vmatmul.mubr.msk.bf16.vlgmr.msra.gmra.mxu1 %vm522_vm3, %v1429_v43 }
  0xa8   : > { %5443 = vmatmul.mubr.msk.bf16.gmra.mxu0 %vm522_vm3, %v1304_v40  ;;  %5491 = vmatpush3.bf16.msra.mxu1 %v1739_v46  ;;  %v6580_v40 = vld [vmem:[%s6260_s18 + $0x18] sm:$0xff]   ;;  %v1887_v46 = vor.u32 %v1885_v42, %v1883_v39 }
  0xa9   : > { %5470 = vmatprep.mubr.msk.bf16.mxu0 %vm6076_vm1, %v6075_v1  ;;  %5452 = vmatprep.mubr.msk.bf16.mxu1 %vm6076_vm1, %v6075_v1  ;;  %v1889_v43 = vshll.u32 %v6580_v40, 16  ;;  %v2021_v5 = vrot.slane %v6580_v40, 1 }
  0xaa   : > { %5534 = vmatprep.subr.bf16.mxu1 %v6075_v1 }
  0xab   : > { %v1891_v47 = vrot.slane %v1889_v43, 1 }
  0xaf   : > { %5453 = vmatmul.mubr.msk.bf16.gmra.mxu1 %vm522_vm3, %v1438_v55  ;;  %v1897_v55 = vshll.u32 %v6594_v48, 16 }
  0xb0   : > { %5471 = vmatmul.mubr.msk.bf16.vlgmr.msra.gmra.mxu0 %vm522_vm3, %v1576_v53  ;;  %5456 = vmatprep.mubr.msk.bf16.mxu1 %vm6076_vm1, %v6075_v1  ;;  %v1892_v53 = vsel %vm477_vm2, %v1887_v46, %v1891_v47  ;;  %v4992_v46 = vld [vmem:[%s7938_s3 + $0x1c] sm:$0x3] }
  0xb1   : > { %5513 = vmatpush3.bf16.msra.mxu0 %v1925_v54  ;;  %5474 = vmatprep.mubr.msk.bf16.mxu0 %vm6076_vm1, %v6075_v1  ;;  %v1893_v54 = vshrl.u32 %v6580_v40, 16 }
  0xb2   : > { %5556 = vmatprep.subr.bf16.mxu0 %v6075_v1 }
  0xb3   : > { %v1895_v62 = vor.u32 %v1893_v54, %v1891_v47 }
  0xb7   : > { %5457 = vmatmul.mubr.msk.bf16.gmra.mxu1 %vm522_vm3, %v1447_v0  ;;  %v6611_v0 = vld [vmem:[%s6260_s18 + $0x28] ss:$0 sps:$4 sm:$0x11]  }
  0xb8   : > { %5475 = vmatmul.mubr.msk.bf16.gmra.mxu0 %vm522_vm3, %v1578_v63  ;;  %5460 = vmatprep.mubr.msk.bf16.mxu1 %vm6076_vm1, %v6075_v1  ;;  %v1899_v63 = vrot.slane %v1897_v55, 1 }
  0xb9   : > { %5478 = vmatprep.mubr.msk.bf16.mxu0 %vm6076_vm1, %v6075_v1 }
  0xba   : > { %v1900_v6 = vsel %vm477_vm2, %v1895_v62, %v1899_v63 }
  0xbf   : > { %5461 = vmatmul.mubr.msk.bf16.gmra.mxu1 %vm522_vm3, %v1456_v9 }
  0xc0   : > { %5479 = vmatmul.mubr.msk.bf16.gmra.mxu0 %vm522_vm3, %v1580_v8  ;;  %5464 = vmatprep.mubr.msk.bf16.mxu1 %vm6076_vm1, %v6075_v1  ;;  %v1905_v8 = vshll.u32 %v6611_v0, 16 }
  0xc1   : > { %5482 = vmatprep.mubr.msk.bf16.mxu0 %vm6076_vm1, %v6075_v1 }
  0xc2   : > { %v1907_v17 = vrot.slane %v1905_v8, 1 }
  0xc7   : > { %5465 = vmatmul.mubr.msk.bf16.gmra.mxu1 %vm522_vm3, %v1465_v18 }
  0xc8   : > { %5483 = vmatmul.mubr.msk.bf16.gmra.mxu0 %vm522_vm3, %v1582_v16  ;;  %5492 = vmatprep.mubr.msk.bf16.mxu1 %vm6076_vm1, %v6075_v1  ;;  %v1903_v16 = vor.u32 %v1901_v7, %v1899_v63 }
  0xc9   : > { %5486 = vmatprep.mubr.msk.bf16.mxu0 %vm6076_vm1, %v6075_v1 }
  0xcf   : > { %5493 = vmatmul.mubr.msk.bf16.vlgmr.msra.gmra.mxu1 %vm522_vm3, %v5979_v27  ;;  %v1908_v27 = vsel %vm477_vm2, %v1903_v16, %v1907_v17 }
  0xd0   : > { %5487 = vmatmul.mubr.msk.bf16.gmra.mxu0 %vm522_vm3, %v1584_v22  ;;  %5535 = vmatpush3.bf16.msra.mxu1 %v2043_v28  ;;  %v6632_v22 = vld [vmem:[%s6260_s18 + $0x8] sm:$0xf]  ;;  %v4985_v28 = vld [vmem:[%s7938_s3 + $0x1a] sm:$0x3] }
  0xd1   : > { %5514 = vmatprep.mubr.msk.bf16.mxu0 %vm6076_vm1, %v6075_v1  ;;  %5496 = vmatprep.mubr.msk.bf16.mxu1 %vm6076_vm1, %v6075_v1  ;;  %v6642_v29 = vcombine.low %v2128_v21, %v6632_v22 }
  0xd2   : > { %5578 = vmatprep.subr.bf16.mxu1 %v6075_v1 }
  0xd3   : > { %v2169_v39 = vrot.slane %v6642_v29, 1 }
  0xd7   : > { %5497 = vmatmul.mubr.msk.bf16.gmra.mxu1 %vm522_vm3, %v5980_v36 }
  0xd8   : > { %5515 = vmatmul.mubr.msk.bf16.vlgmr.msra.gmra.mxu0 %vm522_vm3, %v1876_v33  ;;  %5500 = vmatprep.mubr.msk.bf16.mxu1 %vm6076_vm1, %v6075_v1 }
  0xd9   : > { %5557 = vmatpush3.bf16.msra.mxu0 %v2196_v37  ;;  %5518 = vmatprep.mubr.msk.bf16.mxu0 %vm6076_vm1, %v6075_v1  ;;  %v2356_v37 = vsel %vm538_vm0, %v4985_v28, 0 }
  0xda   : > { %5600 = vmatprep.subr.bf16.mxu0 %v6075_v1 }
  0xdf   : > { %v6596_v49 = vpop.f32.mrf.mxu1  ;;  %5501 = vmatmul.mubr.msk.bf16.gmra.mxu1 %vm522_vm3, %v5983_v44 }
  0xe0   : > { %v576_v45 = vpop.f32.mrf.mxu0  ;;  %5519 = vmatmul.mubr.msk.bf16.gmra.mxu0 %vm522_vm3, %v1884_v41  ;;  %5504 = vmatprep.mubr.msk.bf16.mxu1 %vm6076_vm1, %v6075_v1  ;;  %v2170_v41 = vrot.slane %v6645_v30, 1 }
  0xe1   : > { %5522 = vmatprep.mubr.msk.bf16.mxu0 %vm6076_vm1, %v6075_v1  ;;  %v5308_v51 = vpop.f32.mrf.mxu1 }
  0xe2   : > { %v5296_v50 = vpop.f32.mrf.mxu0 }
  0xe3   : > { %v6604_v57 = vpop.f32.mrf.mxu1 }
  0xe4   : > { %v579_v52 = vpop.f32.mrf.mxu0 }
  0xe5   : > { %v5309_v61 = vpop.f32.mrf.mxu1 }
  0xe6   : > { %v5297_v59 = vpop.f32.mrf.mxu0 }
  0xe7   : > { %v6613_v2 = vpop.f32.mrf.mxu1  ;;  %5505 = vmatmul.mubr.msk.bf16.gmra.mxu1 %vm522_vm3, %v5985_v60  ;;  %v2474_v59 = vsel %vm538_vm0, %v4992_v46, 0  ;;  %v2299_v46 = vshll.u32 %v6645_v30, 16 }
  0xe8   : > { %v584_v56 = vpop.f32.mrf.mxu0  ;;  %5523 = vmatmul.mubr.msk.bf16.gmra.mxu0 %vm522_vm3, %v1892_v53  ;;  %5508 = vmatprep.mubr.msk.bf16.mxu1 %vm6076_vm1, %v6075_v1  ;;  %v6668_v53 = vld [vmem:[%s6260_s18 + $0x14] sm:$0xff]  }
  0xe9   : > { %5526 = vmatprep.mubr.msk.bf16.mxu0 %vm6076_vm1, %v6075_v1  ;;  %v5312_v58 = vpop.f32.mrf.mxu1  ;;  %v2172_v63 = vrot.slane %v6668_v53, 1 }
  0xea   : > { %v5300_v3 = vpop.f32.mrf.mxu0 }
  0xeb   : > { %v6622_v9 = vpop.f32.mrf.mxu1 }
  0xec   : > { %v587_v4 = vpop.f32.mrf.mxu0 }
  0xed   : > { %v5313_v13 = vpop.f32.mrf.mxu1 }
  0xee   : > { %v5301_v10 = vpop.f32.mrf.mxu0 }
  0xef   : > { %v662_v18 = vpop.f32.mrf.mxu1  ;;  %5509 = vmatmul.mubr.msk.bf16.gmra.mxu1 %vm522_vm3, %v5987_v12  ;;  %v2173_v10 = vsel %vm707_vm4, %v2170_v41, %v2172_v63  ;;  %v6687_v12 = vld [vmem:[%s6260_s18 + $0x1c] sm:$0xff]  }
  0xf0   : > { %v592_v15 = vpop.f32.mrf.mxu0  ;;  %5527 = vmatmul.mubr.msk.bf16.gmra.mxu0 %vm522_vm3, %v1900_v6  ;;  %v663_v23 = vadd.f32 %v662_v18, %v576_v45  ;;  %5536 = vmatprep.mubr.msk.bf16.mxu1 %vm6076_vm1, %v6075_v1  ;;  %v2019_v45 = vrot.slane %v6562_v31, 1  ;;  %v2174_v40 = vrot.slane %v6687_v12, 1 }
  0xf1   : > { %5530 = vmatprep.mubr.msk.bf16.mxu0 %vm6076_vm1, %v6075_v1  ;;  %v5318_v25 = vpop.f32.mrf.mxu1 }
  0xf2   : > { %v5304_v19 = vpop.f32.mrf.mxu0  ;;  %v2020_v31 = vsel %vm707_vm4, %v2017_v24, %v2019_v45  ;;  %v2022_v17 = vsel %vm707_vm4, %v2019_v45, %v2021_v5  ;;  %v2023_v24 = vrot.slane %v6594_v48, 1  ;;  %v2175_v28 = vsel %vm707_vm4, %v2172_v63, %v2174_v40 }
  0xf3   : > { %v665_v32 = vpop.f32.mrf.mxu1  ;;  %v2296_v45 = vshrl.u32 %v6645_v30, 16 }
  0xf4   : > { %v595_v26 = vpop.f32.mrf.mxu0  ;;  %v666_v34 = vadd.f32 %v665_v32, %v579_v52  ;;  %v2171_v52 = vsel %vm707_vm4, %v2169_v39, %v2170_v41  ;;  %v6705_v32 = vld [vmem:[%s6260_s18 + $0x24] sm:$0xff]  }
  0xf5   : > { %v5319_v36 = vpop.f32.mrf.mxu1  ;;  %v2176_v48 = vrot.slane %v6705_v32, 1 }
  0xf6   : > { %v5305_v33 = vpop.f32.mrf.mxu0  ;;  %v2024_v36 = vsel %vm707_vm4, %v2021_v5, %v2023_v24 }
  0xf7   : > { %v670_v42 = vpop.f32.mrf.mxu1  ;;  %5537 = vmatmul.mubr.msk.bf16.vlgmr.msra.gmra.mxu1 %vm522_vm3, %v2018_v35 }
  0xf8   : > { %v771_v20 = vpop.f32.mrf.mxu0  ;;  %5531 = vmatmul.mubr.msk.bf16.gmra.mxu0 %vm522_vm3, %v1908_v27  ;;  %v671_v44 = vadd.f32 %v670_v42, %v584_v56  ;;  %5579 = vmatpush3.bf16.msra.mxu1 %v2356_v37  ;;  %v2291_v42 = vshll.u32 %v6642_v29, 16 }
  0xf9   : > { %v6650_v38 = vadd.f32 %v771_v20, %v663_v23  ;;  %5558 = vmatprep.mubr.msk.bf16.mxu0 %vm6076_vm1, %v6075_v1  ;;  %5540 = vmatprep.mubr.msk.bf16.mxu1 %vm6076_vm1, %v6075_v1  ;;  %v5322_v47 = vpop.f32.mrf.mxu1 }
  0xfa   : > { %v5340_v43 = vpop.f32.mrf.mxu0  ;;  %5622 = vmatprep.subr.bf16.mxu1 %v6075_v1 }
  0xfb   : > { %v673_v54 = vpop.f32.mrf.mxu1 }
  0xfc   : > { %v774_v50 = vpop.f32.mrf.mxu0  ;;  %v674_v60 = vadd.f32 %v673_v54, %v587_v4  ;;  %v2177_v54 = vsel %vm707_vm4, %v2174_v40, %v2176_v48 }
  0xfd   : > { %v6664_v51 = vadd.f32 %v774_v50, %v666_v34  ;;  %v5323_v61 = vpop.f32.mrf.mxu1 }
  0xfe   : > { %v5341_v55 = vpop.f32.mrf.mxu0  ;;  %v2298_v61 = vrot.slane %v2296_v45, 1 }
  0xff   : > { %v678_v3 = vpop.f32.mrf.mxu1  ;;  %5541 = vmatmul.mubr.msk.bf16.gmra.mxu1 %vm522_vm3, %v2020_v31  ;;  %v5996_v55 = vld [vmem:[%s6260_s18 + $0x2c] ss:$0 sps:$4 sm:$0x11]  }
 0x100   : > { %v779_v56 = vpop.f32.mrf.mxu0  ;;  %5559 = vmatmul.mubr.msk.bf16.vlgmr.msra.gmra.mxu0 %vm522_vm3, %v2171_v52  ;;  %v679_v4 = vadd.f32 %v678_v3, %v592_v15  ;;  %5544 = vmatprep.mubr.msk.bf16.mxu1 %vm6076_vm1, %v6075_v1 }
 0x101   : > { %v6673_v62 = vadd.f32 %v779_v56, %v671_v44  ;;  %5601 = vmatpush3.bf16.msra.mxu0 %v2474_v59  ;;  %5562 = vmatprep.mubr.msk.bf16.mxu0 %vm6076_vm1, %v6075_v1  ;;  %v5326_v6 = vpop.f32.mrf.mxu1  ;;  %v2025_v44 = vrot.slane %v6611_v0, 1  ;;  %v2301_v56 = vrot.slane %v2299_v46, 2 }
 0x102   : > { %v5344_v58 = vpop.f32.mrf.mxu0  ;;  %5644 = vmatprep.subr.bf16.mxu0 %v6075_v1 }
 0x103   : > { %v681_v11 = vpop.f32.mrf.mxu1  ;;  %v2026_v0 = vsel %vm707_vm4, %v2023_v24, %v2025_v44 }
 0x104   : > { %v782_v7 = vpop.f32.mrf.mxu0  ;;  %v682_v16 = vadd.f32 %v681_v11, %v595_v26  ;;  %v2302_v11 = vor.u32 %v2301_v56, %v2298_v61 }
 0x105   : > { %v6683_v8 = vadd.f32 %v782_v7, %v674_v60  ;;  %v5327_v18 = vpop.f32.mrf.mxu1 }
 0x106   : > { %v5345_v13 = vpop.f32.mrf.mxu0 }
 0x107   : > { %v686_v21 = vpop.f32.mrf.mxu1  ;;  %5545 = vmatmul.mubr.msk.bf16.gmra.mxu1 %vm522_vm3, %v2022_v17  ;;  %v2305_v13 = vshrl.u32 %v6668_v53, 16 }
 0x108   : > { %v787_v15 = vpop.f32.mrf.mxu0  ;;  %5563 = vmatmul.mubr.msk.bf16.gmra.mxu0 %vm522_vm3, %v2173_v10  ;;  %v687_v14 = vadd.f32 %v686_v21, %v6596_v49  ;;  %5548 = vmatprep.mubr.msk.bf16.mxu1 %vm6076_vm1, %v6075_v1  ;;  %v4999_v21 = vld [vmem:[%s7938_s3 + $0x1e] sm:$0x3] }
 0x109   : > { %v6691_v19 = vadd.f32 %v787_v15, %v679_v4  ;;  %5566 = vmatprep.mubr.msk.bf16.mxu0 %vm6076_vm1, %v6075_v1  ;;  %v5330_v25 = vpop.f32.mrf.mxu1  ;;  %v2178_v4 = vrot.slane %v5996_v55, 1 }
 0x10a   : > { %v5348_v23 = vpop.f32.mrf.mxu0 }
 0x10b   : > { %v689_v33 = vpop.f32.mrf.mxu1  ;;  %v2179_v40 = vsel %vm707_vm4, %v2176_v48, %v2178_v4 }
 0x10c   : > { %v790_v26 = vpop.f32.mrf.mxu0  ;;  %v690_v35 = vadd.f32 %v689_v33, %v6604_v57  ;;  %v2288_v57 = vshrl.u32 %v6642_v29, 16 }
 0x10d   : > { %v6701_v27 = vadd.f32 %v790_v26, %v682_v16  ;;  %v5331_v49 = vpop.f32.mrf.mxu1  ;;  %v2308_v16 = vshll.u32 %v6668_v53, 16  ;;  %v2307_v26 = vrot.slane %v2305_v13, 1 }
 0x10e   : > { %v5349_v34 = vpop.f32.mrf.mxu0  ;;  %v2290_v60 = vrot.slane %v2288_v57, 1  ;;  %v2448_v49 = vrot.slane %v6645_v30, 2  ;;  %v2314_v57 = vshrl.u32 %v6687_v12, 16 }
 0x10f   : > { %v694_v39 = vpop.f32.mrf.mxu1  ;;  %5549 = vmatmul.mubr.msk.bf16.gmra.mxu1 %vm522_vm3, %v2024_v36 }
 0x110   : > { %v795_v20 = vpop.f32.mrf.mxu0  ;;  %5567 = vmatmul.mubr.msk.bf16.gmra.mxu0 %vm522_vm3, %v2175_v28  ;;  %v695_v43 = vadd.f32 %v694_v39, %v6613_v2  ;;  %5552 = vmatprep.mubr.msk.bf16.mxu1 %vm6076_vm1, %v6075_v1  ;;  %v2293_v2 = vrot.slane %v2291_v42, 2  ;;  %v2310_v28 = vrot.slane %v2308_v16, 2  ;;  %v2317_v42 = vshll.u32 %v6687_v12, 16  ;;  %v6793_v16 = vld [vmem:[%s6260_s18 + $0x2c] ss:$0 sps:$4 sm:$0x33]  }
 0x111   : > { %v6710_v37 = vadd.f32 %v795_v20, %v687_v14  ;;  %5570 = vmatprep.mubr.msk.bf16.mxu0 %vm6076_vm1, %v6075_v1  ;;  %v5334_v47 = vpop.f32.mrf.mxu1  ;;  %v2316_v55 = vrot.slane %v2314_v57, 1 }
 0x112   : > { %v5352_v41 = vpop.f32.mrf.mxu0  ;;  %v2294_v7 = vor.u32 %v2293_v2, %v2290_v60  ;;  %v2311_v39 = vor.u32 %v2310_v28, %v2307_v26 }
 0x113   : > { %v697_v59 = vpop.f32.mrf.mxu1  ;;  %v5011_v41 = vld [vmem:[%s7938_s3 + $0x20] sm:$0x3] }
 0x114   : > { %v798_v50 = vpop.f32.mrf.mxu0  ;;  %v698_v31 = vadd.f32 %v697_v59, %v6622_v9  ;;  %v2441_v9 = vld [vmem:[%s6260_s18 + $0x4] sm:$0xc]  ;;  %v2303_v25 = vsel %vm979_vm5, %v2294_v7, %v2302_v11  ;;  %v2787_v47 = vsel %vm538_vm0, %v5011_v41, 0  ;;  %v2319_v59 = vrot.slane %v2317_v42, 2 }
 0x115   : > { %v6724_v52 = vadd.f32 %v798_v50, %v690_v35  ;;  %v5335_v63 = vpop.f32.mrf.mxu1  ;;  %v2627_v35 = vsel %vm538_vm0, %v4999_v21, 0  ;;  %v2452_v21 = vrot.slane %v6687_v12, 2  ;;  %v2454_v41 = vrot.slane %v6705_v32, 2 }
 0x116   : > { %v5353_v29 = vpop.f32.mrf.mxu0  ;;  %v2320_v56 = vor.u32 %v2319_v59, %v2316_v55  ;;  %v2323_v63 = vshrl.u32 %v6705_v32, 16 }
 0x117   : > { %v924_v5 = vpop.f32.mrf.mxu1  ;;  %5553 = vmatmul.mubr.msk.bf16.gmra.mxu1 %vm522_vm3, %v2026_v0 }
 0x118   : > { %v803_v3 = vpop.f32.mrf.mxu0  ;;  %5571 = vmatmul.mubr.msk.bf16.gmra.mxu0 %vm522_vm3, %v2177_v54  ;;  %v963_v10 = vadd.f32 %v924_v5, %v6650_v38  ;;  %5580 = vmatprep.mubr.msk.bf16.mxu1 %vm6076_vm1, %v6075_v1  ;;  %v4993_v38 = vcombine.low %v2441_v9, %v6632_v22  ;;  %v2312_v54 = vsel %vm979_vm5, %v2302_v11, %v2311_v39  ;;  %v2325_v11 = vrot.slane %v2323_v63, 1 }
 0x119   : > { %v6731_v58 = vadd.f32 %v803_v3, %v695_v43  ;;  %5574 = vmatprep.mubr.msk.bf16.mxu0 %vm6076_vm1, %v6075_v1  ;;  %v5362_v17 = vpop.f32.mrf.mxu1  ;;  %v2326_v3 = vshll.u32 %v6705_v32, 16  ;;  %v2455_v32 = vsel %vm1140_vm6, %v2452_v21, %v2454_v41 }
 0x11a   : > { %v5356_v6 = vpop.f32.mrf.mxu0  ;;  %v2447_v22 = vrot.slane %v4993_v38, 2 }
 0x11b   : > { %v927_v23 = vpop.f32.mrf.mxu1  ;;  %v2328_v13 = vrot.slane %v2326_v3, 2 }
 0x11c   : > { %v806_v18 = vpop.f32.mrf.mxu0  ;;  %v964_v24 = vadd.f32 %v927_v23, %v6664_v51 }
 0x11d   : > { %v6742_v15 = vadd.f32 %v806_v18, %v698_v31  ;;  %v5363_v33 = vpop.f32.mrf.mxu1  ;;  %v2450_v31 = vrot.slane %v6668_v53, 2 }
 0x11e   : > { %v5357_v14 = vpop.f32.mrf.mxu0 }
 0x11f   : > { %v932_v20 = vpop.f32.mrf.mxu1  ;;  %5581 = vmatmul.mubr.msk.bf16.vlgmr.msra.gmra.mxu1 %vm522_vm3, %v2303_v25  ;;  %v2451_v6 = vsel %vm1140_vm6, %v2448_v49, %v2450_v31  ;;  %v2329_v14 = vor.u32 %v2328_v13, %v2325_v11  ;;  %v2335_v25 = vshll.u32 %v6793_v16, 16  ;;  %v2453_v12 = vsel %vm1140_vm6, %v2450_v31, %v2452_v21 }
 0x120   : > { %v1085_v34 = vpop.f32.mrf.mxu0  ;;  %5575 = vmatmul.mubr.msk.bf16.gmra.mxu0 %vm522_vm3, %v2179_v40  ;;  %v965_v48 = vadd.f32 %v932_v20, %v6673_v62  ;;  %5623 = vmatpush3.bf16.msra.mxu1 %v2627_v35  ;;  %v2449_v62 = vsel %vm1140_vm6, %v2447_v22, %v2448_v49 }
 0x121   : > { %v6753_v36 = vadd.f32 %v1085_v34, %v963_v10  ;;  %5602 = vmatprep.mubr.msk.bf16.mxu0 %vm6076_vm1, %v6075_v1  ;;  %5584 = vmatprep.mubr.msk.bf16.mxu1 %vm6076_vm1, %v6075_v1  ;;  %v5366_v30 = vpop.f32.mrf.mxu1  ;;  %v2337_v20 = vrot.slane %v2335_v25, 2 }
 0x122   : > { %v5384_v51 = vpop.f32.mrf.mxu0  ;;  %5666 = vmatprep.subr.bf16.mxu1 %v6075_v1 }
 0x123   : > { %v935_v45 = vpop.f32.mrf.mxu1 }
 0x124   : > { %v1088_v43 = vpop.f32.mrf.mxu0  ;;  %v966_v50 = vadd.f32 %v935_v45, %v6683_v8 }
 0x125   : > { %v6768_v44 = vadd.f32 %v1088_v43, %v964_v24  ;;  %v5367_v29 = vpop.f32.mrf.mxu1  ;;  %v2332_v24 = vshrl.u32 %v6793_v16, 16  ;;  %v2559_v43 = vld [vmem:[%s6260_s18 + $0x8] sm:$0xc] }
 0x126   : > { %v5385_v46 = vpop.f32.mrf.mxu0  ;;  %v6833_v29 = vld [vmem:[%s6260_s18 + $0x10] sm:$0xff]  }
 0x127   : > { %v940_v0 = vpop.f32.mrf.mxu1  ;;  %5585 = vmatmul.mubr.msk.bf16.gmra.mxu1 %vm522_vm3, %v2312_v54  ;;  %v2334_v49 = vrot.slane %v2332_v24, 1  ;;  %v2727_v63 = vshrl.u32 %v6833_v29, 16 }
 0x128   : > { %v1093_v60 = vpop.f32.mrf.mxu0  ;;  %5603 = vmatmul.mubr.msk.bf16.vlgmr.msra.gmra.mxu0 %vm522_vm3, %v2449_v62  ;;  %v967_v61 = vadd.f32 %v940_v0, %v6691_v19  ;;  %5588 = vmatprep.mubr.msk.bf16.mxu1 %vm6076_vm1, %v6075_v1  ;;  %v2321_v19 = vsel %vm979_vm5, %v2311_v39, %v2320_v56  ;;  %v6824_v62 = vld [vmem:[%s6260_s18 + $0xc] sm:$0xf] }
 0x129   : > { %v6775_v2 = vadd.f32 %v1093_v60, %v965_v48  ;;  %5645 = vmatpush3.bf16.msra.mxu0 %v2787_v47  ;;  %5606 = vmatprep.mubr.msk.bf16.mxu0 %vm6076_vm1, %v6075_v1  ;;  %v5370_v4 = vpop.f32.mrf.mxu1  ;;  %v2338_v30 = vor.u32 %v2337_v20, %v2334_v49  ;;  %v5000_v55 = vcombine.low %v2559_v43, %v6824_v62 }
 0x12a   : > { %v5388_v8 = vpop.f32.mrf.mxu0  ;;  %5688 = vmatprep.subr.bf16.mxu0 %v6075_v1 }
 0x12b   : > { %v943_v7 = vpop.f32.mrf.mxu1  ;;  %v2719_v0 = vshrl.u32 %v5000_v55, 16  ;;  %v2722_v8 = vshll.u32 %v5000_v55, 16 }
 0x12c   : > { %v1096_v5 = vpop.f32.mrf.mxu0  ;;  %v968_v10 = vadd.f32 %v943_v7, %v6701_v27  ;;  %v2601_v7 = vrot.slane %v6833_v29, 2 }
 0x12d   : > { %v6787_v53 = vadd.f32 %v1096_v5, %v966_v50  ;;  %v5371_v17 = vpop.f32.mrf.mxu1  ;;  %v2724_v11 = vrot.slane %v2722_v8, 3 }
 0x12e   : > { %v5389_v9 = vpop.f32.mrf.mxu0  ;;  %v5018_v17 = vld [vmem:[%s7938_s3 + $0x22] sm:$0x3] }
 0x12f   : > { %v948_v38 = vpop.f32.mrf.mxu1  ;;  %5589 = vmatmul.mubr.msk.bf16.gmra.mxu1 %vm522_vm3, %v2321_v19  ;;  %v2721_v19 = vrot.slane %v2719_v0, 2 }
 0x130   : > { %v1101_v18 = vpop.f32.mrf.mxu0  ;;  %5607 = vmatmul.mubr.msk.bf16.gmra.mxu0 %vm522_vm3, %v2451_v6  ;;  %v969_v23 = vadd.f32 %v948_v38, %v6710_v37  ;;  %5592 = vmatprep.mubr.msk.bf16.mxu1 %vm6076_vm1, %v6075_v1  ;;  %v2330_v37 = vsel %vm979_vm5, %v2320_v56, %v2329_v14  ;;  %v2456_v56 = vrot.slane %v6793_v16, 2  ;;  %v2600_v6 = vrot.slane %v5000_v55, 2 }
 0x131   : > { %v6796_v40 = vadd.f32 %v1101_v18, %v967_v61  ;;  %5610 = vmatprep.mubr.msk.bf16.mxu0 %vm6076_vm1, %v6075_v1  ;;  %v5374_v26 = vpop.f32.mrf.mxu1 }
 0x132   : > { %v5392_v27 = vpop.f32.mrf.mxu0  ;;  %v2457_v16 = vsel %vm1140_vm6, %v2454_v41, %v2456_v56  ;;  %v2905_v26 = vsel %vm538_vm0, %v5018_v17, 0 }
 0x133   : > { %v951_v34 = vpop.f32.mrf.mxu1 }
 0x134   : > { %v1104_v28 = vpop.f32.mrf.mxu0  ;;  %v970_v22 = vadd.f32 %v951_v34, %v6724_v52 }
 0x135   : > { %v6807_v33 = vadd.f32 %v1104_v28, %v968_v10  ;;  %v5375_v51 = vpop.f32.mrf.mxu1  ;;  %v2725_v28 = vor.u32 %v2724_v11, %v2721_v19 }
 0x136   : > { %v5393_v35 = vpop.f32.mrf.mxu0  ;;  %v5025_v51 = vld [vmem:[%s7938_s3 + $0x24] sm:$0x3] }
 0x137   : > { %v956_v57 = vpop.f32.mrf.mxu1  ;;  %5593 = vmatmul.mubr.msk.bf16.gmra.mxu1 %vm522_vm3, %v2330_v37 }
 0x138   : > { %v1109_v48 = vpop.f32.mrf.mxu0  ;;  %5611 = vmatmul.mubr.msk.bf16.gmra.mxu0 %vm522_vm3, %v2453_v12  ;;  %v971_v42 = vadd.f32 %v956_v57, %v6731_v58  ;;  %5596 = vmatprep.mubr.msk.bf16.mxu1 %vm6076_vm1, %v6075_v1  ;;  %v2339_v58 = vsel %vm979_vm5, %v2329_v14, %v2338_v30  ;;  %v6857_v14 = vld [vmem:[%s6260_s18 + $0x18] sm:$0xff]  }
 0x139   : > { %v6813_v39 = vadd.f32 %v1109_v48, %v969_v23  ;;  %5614 = vmatprep.mubr.msk.bf16.mxu0 %vm6076_vm1, %v6075_v1  ;;  %v5378_v45 = vpop.f32.mrf.mxu1  ;;  %v2602_v23 = vsel %vm1140_vm6, %v2600_v6, %v2601_v7  ;;  %v2736_v35 = vshrl.u32 %v6857_v14, 16  ;;  %v2603_v20 = vrot.slane %v6857_v14, 2 }
 0x13a   : > { %v5396_v52 = vpop.f32.mrf.mxu0  ;;  %v3043_v45 = vsel %vm538_vm0, %v5025_v51, 0 }
 0x13b   : > { %v959_v50 = vpop.f32.mrf.mxu1 }
 0x13c   : > { %v1112_v46 = vpop.f32.mrf.mxu0  ;;  %v972_v59 = vadd.f32 %v959_v50, %v6742_v15  ;;  %v2730_v15 = vshll.u32 %v6833_v29, 16  ;;  %v6883_v50 = vld [vmem:[%s6260_s18 + $0x20] sm:$0xff]  }
 0x13d   : > { %v6826_v47 = vadd.f32 %v1112_v46, %v970_v22  ;;  %v5379_v60 = vpop.f32.mrf.mxu1  ;;  %v2605_v56 = vrot.slane %v6883_v50, 2 }
 0x13e   : > { %v5397_v54 = vpop.f32.mrf.mxu0  ;;  %v2732_v18 = vrot.slane %v2730_v15, 3  ;;  %v2745_v60 = vshrl.u32 %v6883_v50, 16 }
 0x13f   : > { %v1204_v3 = vpop.f32.mrf.mxu1  ;;  %5597 = vmatmul.mubr.msk.bf16.gmra.mxu1 %vm522_vm3, %v2339_v58  ;;  %v2606_v19 = vsel %vm1140_vm6, %v2603_v20, %v2605_v56 }
 0x140   : > { %v1117_v31 = vpop.f32.mrf.mxu0  ;;  %5615 = vmatmul.mubr.msk.bf16.gmra.mxu0 %vm522_vm3, %v2455_v32  ;;  %v1243_v5 = vadd.f32 %v1204_v3, %v6753_v36  ;;  %5624 = vmatprep.mubr.msk.bf16.mxu1 %vm6076_vm1, %v6075_v1  ;;  %v2729_v36 = vrot.slane %v2727_v63, 2  ;;  %v2604_v32 = vsel %vm1140_vm6, %v2601_v7, %v2603_v20  ;;  %v6004_v20 = vld [vmem:[%s6260_s18 + $0x30] ss:$0 sps:$4 sm:$0x33]  }
 0x141   : > { %v6836_v61 = vadd.f32 %v1117_v31, %v971_v42  ;;  %5618 = vmatprep.mubr.msk.bf16.mxu0 %vm6076_vm1, %v6075_v1  ;;  %v5406_v9 = vpop.f32.mrf.mxu1  ;;  %v2748_v31 = vshll.u32 %v6883_v50, 16 }
 0x142   : > { %v5400_v4 = vpop.f32.mrf.mxu0  ;;  %v2733_v34 = vor.u32 %v2732_v18, %v2729_v36 }
 0x143   : > { %v1207_v21 = vpop.f32.mrf.mxu1  ;;  %v2750_v6 = vrot.slane %v2748_v31, 3 }
 0x144   : > { %v1120_v10 = vpop.f32.mrf.mxu0  ;;  %v1244_v27 = vadd.f32 %v1207_v21, %v6768_v44  ;;  %v2739_v44 = vshll.u32 %v6857_v14, 16  ;;  %v2734_v52 = vsel %vm1412_vm7, %v2725_v28, %v2733_v34 }
 0x145   : > { %v6848_v13 = vadd.f32 %v1120_v10, %v972_v59  ;;  %v5407_v24 = vpop.f32.mrf.mxu1 }
 0x146   : > { %v5401_v38 = vpop.f32.mrf.mxu0  ;;  %v2741_v42 = vrot.slane %v2739_v44, 3  ;;  %v6922_v44 = vld [vmem:[%s6260_s18 + $0x30] ss:$0 sps:$4 sm:$0x77]  }
 0x147   : > { %v1212_v22 = vpop.f32.mrf.mxu1  ;;  %5625 = vmatmul.mubr.msk.bf16.vlgmr.msra.gmra.mxu1 %vm522_vm3, %v2602_v23 }
 0x148   : > { %v1357_v25 = vpop.f32.mrf.mxu0  ;;  %5619 = vmatmul.mubr.msk.bf16.gmra.mxu0 %vm522_vm3, %v2457_v16  ;;  %v1245_v49 = vadd.f32 %v1212_v22, %v6775_v2  ;;  %5667 = vmatpush3.bf16.msra.mxu1 %v2905_v26  ;;  %v2738_v2 = vrot.slane %v2736_v35, 2 }
 0x149   : > { %v6861_v12 = vadd.f32 %v1357_v25, %v1243_v5  ;;  %5646 = vmatprep.mubr.msk.bf16.mxu0 %vm6076_vm1, %v6075_v1  ;;  %5628 = vmatprep.mubr.msk.bf16.mxu1 %vm6076_vm1, %v6075_v1  ;;  %v5410_v48 = vpop.f32.mrf.mxu1  ;;  %v2747_v5 = vrot.slane %v2745_v60, 2 }
 0x14a   : > { %v5428_v37 = vpop.f32.mrf.mxu0  ;;  %5710 = vmatprep.subr.bf16.mxu1 %v6075_v1  ;;  %v2742_v58 = vor.u32 %v2741_v42, %v2738_v2  ;;  %v2763_v2 = vshrl.u32 %v6922_v44, 16  ;;  %v2766_v42 = vshll.u32 %v6922_v44, 16 }
 0x14b   : > { %v1215_v30 = vpop.f32.mrf.mxu1  ;;  %v2751_v36 = vor.u32 %v2750_v6, %v2747_v5 }
 0x14c   : > { %v1360_v41 = vpop.f32.mrf.mxu0  ;;  %v1246_v46 = vadd.f32 %v1215_v30, %v6787_v53  ;;  %v2743_v4 = vsel %vm1412_vm7, %v2733_v34, %v2742_v58  ;;  %v2765_v60 = vrot.slane %v2763_v2, 2  ;;  %v2768_v31 = vrot.slane %v2766_v42, 3 }
 0x14d   : > { %v6876_v57 = vadd.f32 %v1360_v41, %v1244_v27  ;;  %v5411_v54 = vpop.f32.mrf.mxu1  ;;  %v2752_v28 = vsel %vm1412_vm7, %v2742_v58, %v2751_v36 }
 0x14e   : > { %v5429_v43 = vpop.f32.mrf.mxu0  ;;  %v2872_v54 = vld [vmem:[%s6260_s18 + $0x8] sm:$0x8]  ;;  %v2769_v5 = vor.u32 %v2768_v31, %v2765_v60 }
 0x14f   : > { %v1220_v53 = vpop.f32.mrf.mxu1  ;;  %5629 = vmatmul.mubr.msk.bf16.gmra.mxu1 %vm522_vm3, %v2604_v32 }
 0x150   : > { %v1365_v55 = vpop.f32.mrf.mxu0  ;;  %5647 = vmatmul.mubr.msk.bf16.vlgmr.msra.gmra.mxu0 %vm522_vm3, %v2734_v52  ;;  %v1247_v8 = vadd.f32 %v1220_v53, %v6796_v40  ;;  %5632 = vmatprep.mubr.msk.bf16.mxu1 %vm6076_vm1, %v6075_v1  ;;  %v6904_v40 = vld [vmem:[%s6260_s18 + $0x28] sm:$0xff]  }
 0x151   : > { %v6886_v59 = vadd.f32 %v1365_v55, %v1245_v49  ;;  %5689 = vmatpush3.bf16.msra.mxu0 %v3043_v45  ;;  %5650 = vmatprep.mubr.msk.bf16.mxu0 %vm6076_vm1, %v6075_v1  ;;  %v5414_v63 = vpop.f32.mrf.mxu1  ;;  %v2754_v18 = vshrl.u32 %v6904_v40, 16  ;;  %v2757_v21 = vshll.u32 %v6904_v40, 16  ;;  %v2607_v23 = vrot.slane %v6904_v40, 2 }
 0x152   : > { %v5432_v0 = vpop.f32.mrf.mxu0  ;;  %5732 = vmatprep.subr.bf16.mxu0 %v6075_v1  ;;  %v2609_v45 = vrot.slane %v6004_v20, 2 }
 0x153   : > { %v1223_v7 = vpop.f32.mrf.mxu1  ;;  %v2756_v34 = vrot.slane %v2754_v18, 2  ;;  %v2759_v35 = vrot.slane %v2757_v21, 3 }
 0x154   : > { %v1368_v15 = vpop.f32.mrf.mxu0  ;;  %v1248_v10 = vadd.f32 %v1223_v7, %v6807_v33 }
 0x155   : > { %v6898_v3 = vadd.f32 %v1368_v15, %v1246_v46  ;;  %v5415_v11 = vpop.f32.mrf.mxu1  ;;  %v2760_v52 = vor.u32 %v2759_v35, %v2756_v34  ;;  %v5048_v34 = vld [vmem:[%s7938_s3 + $0x28] sm:$0x3] }
 0x156   : > { %v5433_v9 = vpop.f32.mrf.mxu0 }
 0x157   : > { %v1228_v33 = vpop.f32.mrf.mxu1  ;;  %5633 = vmatmul.mubr.msk.bf16.gmra.mxu1 %vm522_vm3, %v2606_v19  ;;  %v2761_v58 = vsel %vm1412_vm7, %v2751_v36, %v2760_v52  ;;  %v2879_v9 = vrot.slane %v6833_v29, 3  ;;  %v5036_v36 = vld [vmem:[%s7938_s3 + $0x26] sm:$0x3] }
 0x158   : > { %v1373_v16 = vpop.f32.mrf.mxu0  ;;  %5651 = vmatmul.mubr.msk.bf16.gmra.mxu0 %vm522_vm3, %v2743_v4  ;;  %v1249_v27 = vadd.f32 %v1228_v33, %v6813_v39  ;;  %5636 = vmatprep.mubr.msk.bf16.mxu1 %vm6076_vm1, %v6075_v1  ;;  %v2608_v39 = vsel %vm1140_vm6, %v2605_v56, %v2607_v23  ;;  %v2610_v56 = vsel %vm1140_vm6, %v2607_v23, %v2609_v45  ;;  %v3229_v29 = vsel %vm538_vm0, %v5036_v36, 0 }
 0x159   : > { %v6907_v17 = vadd.f32 %v1373_v16, %v1247_v8  ;;  %5654 = vmatprep.mubr.msk.bf16.mxu0 %vm6076_vm1, %v6075_v1  ;;  %v5418_v24 = vpop.f32.mrf.mxu1  ;;  %v2770_v16 = vsel %vm1412_vm7, %v2760_v52, %v2769_v5  ;;  %v3128_v5 = vld [vmem:[%s6299_s9] sm:$0xf] }
 0x15a   : > { %v5436_v38 = vpop.f32.mrf.mxu0 }
 0x15b   : > { %v1231_v22 = vpop.f32.mrf.mxu1 }
 0x15c   : > { %v1376_v25 = vpop.f32.mrf.mxu0  ;;  %v1250_v49 = vadd.f32 %v1231_v22, %v6826_v47 }
 0x15d   : > { %v6918_v26 = vadd.f32 %v1376_v25, %v1248_v10  ;;  %v5419_v51 = vpop.f32.mrf.mxu1 }
 0x15e   : > { %v5437_v37 = vpop.f32.mrf.mxu0 }
 0x15f   : > { %v1236_v30 = vpop.f32.mrf.mxu1  ;;  %5637 = vmatmul.mubr.msk.bf16.gmra.mxu1 %vm522_vm3, %v2608_v39  ;;  %v6007_v37 = vld [vmem:[%s6299_s9] sm:$0xff]  }
 0x160   : > { %v1381_v48 = vpop.f32.mrf.mxu0  ;;  %5655 = vmatmul.mubr.msk.bf16.gmra.mxu0 %vm522_vm3, %v2752_v28  ;;  %v1251_v43 = vadd.f32 %v1236_v30, %v6836_v61  ;;  %5640 = vmatprep.mubr.msk.bf16.mxu1 %vm6076_vm1, %v6075_v1  ;;  %v5019_v61 = vcombine.low %v2872_v54, %v6824_v62  ;;  %v2881_v28 = vrot.slane %v6857_v14, 3 }
 0x161   : > { %v6928_v41 = vadd.f32 %v1381_v48, %v1249_v27  ;;  %5658 = vmatprep.mubr.msk.bf16.mxu0 %vm6076_vm1, %v6075_v1  ;;  %v5422_v46 = vpop.f32.mrf.mxu1 }
 0x162   : > { %v5440_v47 = vpop.f32.mrf.mxu0  ;;  %v2878_v62 = vrot.slane %v5019_v61, 3  ;;  %v2882_v48 = vsel %vm1573_vm8, %v2879_v9, %v2881_v28  ;;  %v6008_v46 = vld [vmem:[%s6299_s9 + $0x8] sm:$0xff]  }
 0x163   : > { %v1239_v53 = vpop.f32.mrf.mxu1  ;;  %v2883_v47 = vrot.slane %v6883_v50, 3 }
 0x164   : > { %v1384_v32 = vpop.f32.mrf.mxu0  ;;  %v1252_v8 = vadd.f32 %v1239_v53, %v6848_v13  ;;  %v2880_v33 = vsel %vm1573_vm8, %v2878_v62, %v2879_v9 }
 0x165   : > { %v6939_v55 = vadd.f32 %v1384_v32, %v1250_v49  ;;  %v5423_v63 = vpop.f32.mrf.mxu1  ;;  %v2884_v31 = vsel %vm1573_vm8, %v2881_v28, %v2883_v47 }
 0x166   : > { %v5441_v0 = vpop.f32.mrf.mxu0 }
 0x167   : > { %v1518_v6 = vpop.f32.mrf.mxu1  ;;  %5641 = vmatmul.mubr.msk.bf16.gmra.mxu1 %vm522_vm3, %v2610_v56 }
 0x168   : > { %v1389_v15 = vpop.f32.mrf.mxu0  ;;  %5659 = vmatmul.mubr.msk.bf16.gmra.mxu0 %vm522_vm3, %v2761_v58  ;;  %v1557_v13 = vadd.f32 %v1518_v6, %v6861_v12  ;;  %5668 = vmatprep.mubr.msk.bf16.mxu1 %vm6076_vm1, %v6075_v1  ;;  %v7013_v6 = vld [vmem:[%s6299_s9 + $0x4] sm:$0xf] }
 0x169   : > { %v6946_v4 = vadd.f32 %v1389_v15, %v1251_v43  ;;  %5662 = vmatprep.mubr.msk.bf16.mxu0 %vm6076_vm1, %v6075_v1  ;;  %v5450_v10 = vpop.f32.mrf.mxu1  ;;  %v6009_v15 = vld [vmem:[%s6299_s9 + $0x10] sm:$0xff]  }
 0x16a   : > { %v5444_v7 = vpop.f32.mrf.mxu0  ;;  %v5037_v10 = vcombine.low %v3128_v5, %v7013_v6 }
 0x16b   : > { %v1521_v18 = vpop.f32.mrf.mxu1 }
 0x16c   : > { %v1392_v19 = vpop.f32.mrf.mxu0  ;;  %v1558_v12 = vadd.f32 %v1521_v18, %v6876_v57 }
 0x16d   : > { %v6955_v11 = vadd.f32 %v1392_v19, %v1252_v8  ;;  %v5451_v38 = vpop.f32.mrf.mxu1 }
 0x16e   : > { %v5445_v21 = vpop.f32.mrf.mxu0 }
 0x16f   : > { %v1526_v24 = vpop.f32.mrf.mxu1  ;;  %5669 = vmatmul.mubr.msk.bf16.vlgmr.msra.gmra.mxu1 %vm522_vm3, %v2880_v33  ;;  %v3172_v33 = vshll.u32 %v5037_v10, 16 }
 0x170   : > { %v1637_v27 = vpop.f32.mrf.mxu0  ;;  %5663 = vmatmul.mubr.msk.bf16.gmra.mxu0 %vm522_vm3, %v2770_v16  ;;  %v1559_v57 = vadd.f32 %v1526_v24, %v6886_v59  ;;  %5711 = vmatpush3.bf16.msra.mxu1 %v3229_v29  ;;  %v3347_v59 = vsel %vm538_vm0, %v5048_v34, 0  ;;  %v6010_v29 = vld [vmem:[%s6299_s9 + $0x18] sm:$0xff]   ;;  %v3170_v34 = vshrl.u32 %v5037_v10, 16 }
 0x171   : > { %v6965_v23 = vadd.f32 %v1637_v27, %v1557_v13  ;;  %5690 = vmatprep.mubr.msk.bf16.mxu0 %vm6076_vm1, %v6075_v1  ;;  %5672 = vmatprep.mubr.msk.bf16.mxu1 %vm6076_vm1, %v6075_v1  ;;  %v5454_v35 = vpop.f32.mrf.mxu1 }
 0x172   : > { %v5472_v25 = vpop.f32.mrf.mxu0  ;;  %5754 = vmatprep.subr.bf16.mxu1 %v6075_v1 }
 0x173   : > { %v1529_v39 = vpop.f32.mrf.mxu1 }
 0x174   : > { %v1640_v22 = vpop.f32.mrf.mxu0  ;;  %v1560_v51 = vadd.f32 %v1529_v39, %v6898_v3 }
 0x175   : > { %v6979_v49 = vadd.f32 %v1640_v22, %v1558_v12  ;;  %v5455_v14 = vpop.f32.mrf.mxu1  ;;  %v7031_v12 = vld [vmem:[%s6299_s9 + $0x8] sm:$0xff]  }
 0x176   : > { %v5473_v20 = vpop.f32.mrf.mxu0  ;;  %v3177_v35 = vshll.u32 %v7031_v12, 16 }
 0x177   : > { %v1534_v42 = vpop.f32.mrf.mxu1  ;;  %5673 = vmatmul.mubr.msk.bf16.gmra.mxu1 %vm522_vm3, %v2882_v48 }
 0x178   : > { %v1645_v52 = vpop.f32.mrf.mxu0  ;;  %5691 = vmatmul.mubr.msk.bf16.vlgmr.msra.gmra.mxu0 %vm522_vm3, %v6007_v37  ;;  %v1561_v3 = vadd.f32 %v1534_v42, %v6907_v17  ;;  %5676 = vmatprep.mubr.msk.bf16.mxu1 %vm6076_vm1, %v6075_v1  ;;  %v3179_v14 = vrot.slane %v3177_v35, 1 }
 0x179   : > { %v6985_v2 = vadd.f32 %v1645_v52, %v1559_v57  ;;  %5733 = vmatpush3.bf16.msra.mxu0 %v3347_v59  ;;  %5694 = vmatprep.mubr.msk.bf16.mxu0 %vm6076_vm1, %v6075_v1  ;;  %v5458_v43 = vpop.f32.mrf.mxu1  ;;  %v7050_v52 = vld [vmem:[%s6299_s9 + $0x10] sm:$0xff]  }
 0x17a   : > { %v5476_v30 = vpop.f32.mrf.mxu0  ;;  %5776 = vmatprep.subr.bf16.mxu0 %v6075_v1  ;;  %v5055_v43 = vld [vmem:[%s7938_s3 + $0x2a] sm:$0x3] }
 0x17b   : > { %v1537_v54 = vpop.f32.mrf.mxu1 }
 0x17c   : > { %v1648_v45 = vpop.f32.mrf.mxu0  ;;  %v1562_v60 = vadd.f32 %v1537_v54, %v6918_v26  ;;  %v2885_v26 = vrot.slane %v6904_v40, 3 }
 0x17d   : > { %v6996_v32 = vadd.f32 %v1648_v45, %v1560_v51  ;;  %v5459_v17 = vpop.f32.mrf.mxu1 }
 0x17e   : > { %v5477_v58 = vpop.f32.mrf.mxu0 }
 0x17f   : > { %v1542_v50 = vpop.f32.mrf.mxu1  ;;  %5677 = vmatmul.mubr.msk.bf16.gmra.mxu1 %vm522_vm3, %v2884_v31  ;;  %v3185_v31 = vshll.u32 %v7050_v52, 16 }
 0x180   : > { %v1653_v53 = vpop.f32.mrf.mxu0  ;;  %5695 = vmatmul.mubr.msk.bf16.gmra.mxu0 %vm522_vm3, %v6008_v46  ;;  %v1563_v56 = vadd.f32 %v1542_v50, %v6928_v41  ;;  %5680 = vmatprep.mubr.msk.bf16.mxu1 %vm6076_vm1, %v6075_v1  ;;  %v2886_v41 = vsel %vm1573_vm8, %v2883_v47, %v2885_v26  ;;  %v3500_v50 = vsel %vm538_vm0, %v5055_v43, 0 }
 0x181   : > { %v7001_v0 = vadd.f32 %v1653_v53, %v1561_v3  ;;  %5698 = vmatprep.mubr.msk.bf16.mxu0 %vm6076_vm1, %v6075_v1  ;;  %v5462_v61 = vpop.f32.mrf.mxu1  ;;  %v6011_v3 = vld [vmem:[%s6299_s9 + $0x20] sm:$0xff]   ;;  %v3187_v5 = vrot.slane %v3185_v31, 1 }
 0x182   : > { %v5480_v8 = vpop.f32.mrf.mxu0 }
 0x183   : > { %v1545_v13 = vpop.f32.mrf.mxu1 }
 0x184   : > { %v1656_v63 = vpop.f32.mrf.mxu0  ;;  %v1564_v9 = vadd.f32 %v1545_v13, %v6939_v55  ;;  %v2887_v55 = vrot.slane %v6922_v44, 3  ;;  %v7078_v13 = vld [vmem:[%s6299_s9 + $0x18] sm:$0xff]  }
 0x185   : > { %v7015_v7 = vadd.f32 %v1656_v63, %v1562_v60  ;;  %v5463_v19 = vpop.f32.mrf.mxu1  ;;  %v3181_v60 = vshrl.u32 %v7031_v12, 16 }
 0x186   : > { %v5481_v62 = vpop.f32.mrf.mxu0  ;;  %v2888_v28 = vsel %vm1573_vm8, %v2885_v26, %v2887_v55  ;;  %v3189_v55 = vshrl.u32 %v7050_v52, 16 }
 0x187   : > { %v1550_v36 = vpop.f32.mrf.mxu1  ;;  %5681 = vmatmul.mubr.msk.bf16.gmra.mxu1 %vm522_vm3, %v2886_v41 }
 0x188   : > { %v1661_v40 = vpop.f32.mrf.mxu0  ;;  %5699 = vmatmul.mubr.msk.bf16.gmra.mxu0 %vm522_vm3, %v6009_v15  ;;  %v1565_v21 = vadd.f32 %v1550_v36, %v6946_v4  ;;  %5684 = vmatprep.mubr.msk.bf16.mxu1 %vm6076_vm1, %v6075_v1  ;;  %v3174_v4 = vrot.slane %v3172_v33, 1  ;;  %v3183_v15 = vor.u32 %v3181_v60, %v3179_v14 }
 0x189   : > { %v7021_v16 = vadd.f32 %v1661_v40, %v1563_v56  ;;  %5702 = vmatprep.mubr.msk.bf16.mxu0 %vm6076_vm1, %v6075_v1  ;;  %v5466_v38 = vpop.f32.mrf.mxu1 }
 0x18a   : > { %v5484_v18 = vpop.f32.mrf.mxu0  ;;  %v3175_v48 = vor.u32 %v3174_v4, %v3170_v34 }
 0x18b   : > { %v1553_v25 = vpop.f32.mrf.mxu1  ;;  %v3188_v18 = vsel %vm477_vm2, %v3183_v15, %v3187_v5 }
 0x18c   : > { %v1664_v27 = vpop.f32.mrf.mxu0  ;;  %v1566_v44 = vadd.f32 %v1553_v25, %v6955_v11  ;;  %v3314_v11 = vld [vmem:[%s6299_s9] sm:$0xe]  ;;  %v3180_v58 = vsel %vm477_vm2, %v3175_v48, %v3179_v14 }
 0x18d   : > { %v7034_v24 = vadd.f32 %v1664_v27, %v1564_v9  ;;  %v5467_v22 = vpop.f32.mrf.mxu1  ;;  %v5049_v45 = vcombine.low %v3314_v11, %v7013_v6  ;;  %v5067_v6 = vld [vmem:[%s7938_s3 + $0x2c] sm:$0x3]  ;;  %v3323_v27 = vrot.slane %v7050_v52, 1 }
 0x18e   : > { %v5485_v57 = vpop.f32.mrf.mxu0  ;;  %v3660_v40 = vsel %vm538_vm0, %v5067_v6, 0 }
 0x18f   : > { %v1775_v20 = vpop.f32.mrf.mxu1  ;;  %5685 = vmatmul.mubr.msk.bf16.gmra.mxu1 %vm522_vm3, %v2888_v28  ;;  %v3320_v56 = vrot.slane %v5049_v45, 1  ;;  %v3191_v57 = vor.u32 %v3189_v55, %v3187_v5 }
 0x190   : > { %v1669_v37 = vpop.f32.mrf.mxu0  ;;  %5703 = vmatmul.mubr.msk.bf16.gmra.mxu0 %vm522_vm3, %v6010_v29  ;;  %v1814_v51 = vadd.f32 %v1775_v20, %v6965_v23  ;;  %5712 = vmatprep.mubr.msk.bf16.mxu1 %vm6076_vm1, %v6075_v1 }
 0x191   : > { %v7040_v39 = vadd.f32 %v1669_v37, %v1565_v21  ;;  %5706 = vmatprep.mubr.msk.bf16.mxu0 %vm6076_vm1, %v6075_v1  ;;  %v5494_v42 = vpop.f32.mrf.mxu1  ;;  %v3193_v21 = vshll.u32 %v7078_v13, 16 }
 0x192   : > { %v5488_v59 = vpop.f32.mrf.mxu0  ;;  %v3325_v42 = vrot.slane %v7078_v13, 1 }
 0x193   : > { %v1778_v46 = vpop.f32.mrf.mxu1  ;;  %v3195_v28 = vrot.slane %v3193_v21, 1 }
 0x194   : > { %v1672_v30 = vpop.f32.mrf.mxu0  ;;  %v1815_v54 = vadd.f32 %v1778_v46, %v6979_v49  ;;  %v3321_v49 = vrot.slane %v7031_v12, 1  ;;  %v6018_v46 = vld [vmem:[%s6299_s9 + $0x28] ss:$0 sps:$4 sm:$0x11]   ;;  %v3326_v60 = vsel %vm707_vm4, %v3323_v27, %v3325_v42 }
 0x195   : > { %v7053_v47 = vadd.f32 %v1672_v30, %v1566_v44  ;;  %v5495_v17 = vpop.f32.mrf.mxu1  ;;  %v7101_v44 = vld [vmem:[%s6299_s9 + $0x20] sm:$0xff]   ;;  %v3196_v11 = vsel %vm477_vm2, %v3191_v57, %v3195_v28  ;;  %v3329_v57 = vrot.slane %v6018_v46, 1 }
 0x196   : > { %v5489_v23 = vpop.f32.mrf.mxu0  ;;  %v3324_v22 = vsel %vm707_vm4, %v3321_v49, %v3323_v27 }
 0x197   : > { %v1783_v26 = vpop.f32.mrf.mxu1  ;;  %5713 = vmatmul.mubr.msk.bf16.vlgmr.msra.gmra.mxu1 %vm522_vm3, %v3180_v58 }
 0x198   : > { %v1961_v53 = vpop.f32.mrf.mxu0  ;;  %5707 = vmatmul.mubr.msk.bf16.gmra.mxu0 %vm522_vm3, %v6011_v3  ;;  %v1816_v63 = vadd.f32 %v1783_v26, %v6985_v2  ;;  %5755 = vmatpush3.bf16.msra.mxu1 %v3500_v50  ;;  %v3322_v2 = vsel %vm707_vm4, %v3320_v56, %v3321_v49  ;;  %v3209_v56 = vshll.u32 %v6018_v46, 16 }
 0x199   : > { %v7065_v8 = vadd.f32 %v1961_v53, %v1814_v51  ;;  %5734 = vmatprep.mubr.msk.bf16.mxu0 %vm6076_vm1, %v6075_v1  ;;  %5716 = vmatprep.mubr.msk.bf16.mxu1 %vm6076_vm1, %v6075_v1  ;;  %v5498_v62 = vpop.f32.mrf.mxu1  ;;  %v3201_v51 = vshll.u32 %v7101_v44, 16 }
 0x19a   : > { %v5516_v61 = vpop.f32.mrf.mxu0  ;;  %5798 = vmatprep.subr.bf16.mxu1 %v6075_v1  ;;  %v3432_v62 = vld [vmem:[%s6299_s9 + $0x4] sm:$0xe] }
 0x19b   : > { %v1786_v10 = vpop.f32.mrf.mxu1  ;;  %v3203_v45 = vrot.slane %v3201_v51, 1 }
 0x19c   : > { %v1964_v9 = vpop.f32.mrf.mxu0  ;;  %v1817_v36 = vadd.f32 %v1786_v10, %v6996_v32 }
 0x19d   : > { %v7081_v41 = vadd.f32 %v1964_v9, %v1815_v54  ;;  %v5499_v12 = vpop.f32.mrf.mxu1  ;;  %v7139_v9 = vld [vmem:[%s6299_s9 + $0x8] sm:$0xf] }
 0x19e   : > { %v5517_v19 = vpop.f32.mrf.mxu0  ;;  %v5056_v55 = vcombine.low %v3432_v62, %v7139_v9  ;;  %v7148_v12 = vld [vmem:[%s6299_s9 + $0xc] sm:$0xff]  }
 0x19f   : > { %v1791_v32 = vpop.f32.mrf.mxu1  ;;  %5717 = vmatmul.mubr.msk.bf16.gmra.mxu1 %vm522_vm3, %v3188_v18 }
 0x1a0   : > { %v1969_v33 = vpop.f32.mrf.mxu0  ;;  %5735 = vmatmul.mubr.msk.bf16.vlgmr.msra.gmra.mxu0 %vm522_vm3, %v3322_v2  ;;  %v1818_v25 = vadd.f32 %v1791_v32, %v7001_v0  ;;  %5720 = vmatprep.mubr.msk.bf16.mxu1 %vm6076_vm1, %v6075_v1  ;;  %v3197_v0 = vshrl.u32 %v7078_v13, 16  ;;  %v3211_v13 = vrot.slane %v3209_v56, 1  ;;  %v3592_v32 = vshrl.u32 %v5056_v55, 16 }
 0x1a1   : > { %v7090_v38 = vadd.f32 %v1969_v33, %v1816_v63  ;;  %5777 = vmatpush3.bf16.msra.mxu0 %v3660_v40  ;;  %5738 = vmatprep.mubr.msk.bf16.mxu0 %vm6076_vm1, %v6075_v1  ;;  %v5502_v34 = vpop.f32.mrf.mxu1  ;;  %v3327_v63 = vrot.slane %v7101_v44, 1 }
 0x1a2   : > { %v5520_v29 = vpop.f32.mrf.mxu0  ;;  %5820 = vmatprep.subr.bf16.mxu0 %v6075_v1  ;;  %v3199_v43 = vor.u32 %v3197_v0, %v3195_v28  ;;  %v3600_v28 = vshrl.u32 %v7148_v12, 16 }
 0x1a3   : > { %v1794_v37 = vpop.f32.mrf.mxu1  ;;  %v3328_v40 = vsel %vm707_vm4, %v3325_v42, %v3327_v63  ;;  %v3595_v29 = vshll.u32 %v5056_v55, 16 }
 0x1a4   : > { %v1972_v4 = vpop.f32.mrf.mxu0  ;;  %v1819_v59 = vadd.f32 %v1794_v37, %v7015_v7  ;;  %v3204_v50 = vsel %vm477_vm2, %v3199_v43, %v3203_v45  ;;  %v3474_v37 = vrot.slane %v7148_v12, 1 }
 0x1a5   : > { %v7103_v35 = vadd.f32 %v1972_v4, %v1817_v36  ;;  %v5503_v48 = vpop.f32.mrf.mxu1  ;;  %v3597_v0 = vrot.slane %v3595_v29, 2 }
 0x1a6   : > { %v5521_v20 = vpop.f32.mrf.mxu0  ;;  %v3330_v48 = vsel %vm707_vm4, %v3327_v63, %v3329_v57 }
 0x1a7   : > { %v1799_v30 = vpop.f32.mrf.mxu1  ;;  %5721 = vmatmul.mubr.msk.bf16.gmra.mxu1 %vm522_vm3, %v3196_v11  ;;  %v3594_v11 = vrot.slane %v3592_v32, 1 }
 0x1a8   : > { %v1977_v14 = vpop.f32.mrf.mxu0  ;;  %5739 = vmatmul.mubr.msk.bf16.gmra.mxu0 %vm522_vm3, %v3324_v22  ;;  %v1820_v3 = vadd.f32 %v1799_v30, %v7021_v16  ;;  %5724 = vmatprep.mubr.msk.bf16.mxu1 %vm6076_vm1, %v6075_v1  ;;  %v3205_v16 = vshrl.u32 %v7101_v44, 16  ;;  %v3473_v22 = vrot.slane %v5056_v55, 1 }
 0x1a9   : > { %v7111_v52 = vadd.f32 %v1977_v14, %v1818_v25  ;;  %5742 = vmatprep.mubr.msk.bf16.mxu0 %vm6076_vm1, %v6075_v1  ;;  %v5506_v23 = vpop.f32.mrf.mxu1  ;;  %v5074_v14 = vld [vmem:[%s7938_s3 + $0x2e] sm:$0x3] }
 0x1aa   : > { %v5524_v7 = vpop.f32.mrf.mxu0  ;;  %v3207_v6 = vor.u32 %v3205_v16, %v3203_v45  ;;  %v3475_v43 = vsel %vm707_vm4, %v3473_v22, %v3474_v37  ;;  %v7171_v45 = vld [vmem:[%s6299_s9 + $0x14] sm:$0xff]  }
 0x1ab   : > { %v1802_v31 = vpop.f32.mrf.mxu1 }
 0x1ac   : > { %v1980_v54 = vpop.f32.mrf.mxu0  ;;  %v1821_v53 = vadd.f32 %v1802_v31, %v7034_v24  ;;  %v3212_v21 = vsel %vm477_vm2, %v3207_v6, %v3211_v13  ;;  %vm4351_vm2 = vcmask 257024  }
 0x1ad   : > { %v7121_v58 = vadd.f32 %v1980_v54, %v1819_v59  ;;  %v5507_v49 = vpop.f32.mrf.mxu1  ;;  %v3778_v54 = vsel %vm538_vm0, %v5074_v14, 0 }
 0x1ae   : > { %v5525_v17 = vpop.f32.mrf.mxu0  ;;  %v3476_v49 = vrot.slane %v7171_v45, 1 }
 0x1af   : > { %v1807_v15 = vpop.f32.mrf.mxu1  ;;  %5725 = vmatmul.mubr.msk.bf16.gmra.mxu1 %vm522_vm3, %v3204_v50 }
 0x1b0   : > { %v1985_v26 = vpop.f32.mrf.mxu0  ;;  %5743 = vmatmul.mubr.msk.bf16.gmra.mxu0 %vm522_vm3, %v3326_v60  ;;  %v1822_v5 = vadd.f32 %v1807_v15, %v7040_v39  ;;  %5728 = vmatprep.mubr.msk.bf16.mxu1 %vm6076_vm1, %v6075_v1  ;;  %v3598_v60 = vor.u32 %v3597_v0, %v3594_v11 }
 0x1b1   : > { %v7128_v61 = vadd.f32 %v1985_v26, %v1820_v3  ;;  %5746 = vmatprep.mubr.msk.bf16.mxu0 %vm6076_vm1, %v6075_v1  ;;  %v5510_v2 = vpop.f32.mrf.mxu1  ;;  %v5081_v26 = vld [vmem:[%s7938_s3 + $0x30] sm:$0x3] }
 0x1b2   : > { %v5528_v24 = vpop.f32.mrf.mxu0  ;;  %v3931_v2 = vsel %vm538_vm0, %v5081_v26, 0 }
 0x1b3   : > { %v1810_v36 = vpop.f32.mrf.mxu1 }
 0x1b4   : > { %v1988_v10 = vpop.f32.mrf.mxu0  ;;  %v1823_v39 = vadd.f32 %v1810_v36, %v7053_v47  ;;  %v3603_v47 = vshll.u32 %v7148_v12, 16  ;;  %v7197_v36 = vld [vmem:[%s6299_s9 + $0x1c] sm:$0xff]  }
 0x1b5   : > { %v7141_v19 = vadd.f32 %v1988_v10, %v1821_v53  ;;  %v5511_v33 = vpop.f32.mrf.mxu1  ;;  %v3609_v53 = vshrl.u32 %v7171_v45, 16  ;;  %v3478_v57 = vrot.slane %v7197_v36, 1 }
 0x1b6   : > { %v5529_v18 = vpop.f32.mrf.mxu0  ;;  %v3605_v42 = vrot.slane %v3603_v47, 2  ;;  %v3618_v33 = vshrl.u32 %v7197_v36, 16 }
 0x1b7   : > { %v2079_v44 = vpop.f32.mrf.mxu1  ;;  %5729 = vmatmul.mubr.msk.bf16.gmra.mxu1 %vm522_vm3, %v3212_v21  ;;  %v3479_v11 = vsel %vm707_vm4, %v3476_v49, %v3478_v57 }
 0x1b8   : > { %v1993_v27 = vpop.f32.mrf.mxu0  ;;  %5747 = vmatmul.mubr.msk.bf16.gmra.mxu0 %vm522_vm3, %v3328_v40  ;;  %v2118_v4 = vadd.f32 %v2079_v44, %v7065_v8  ;;  %5756 = vmatprep.mubr.msk.bf16.mxu1 %vm6076_vm1, %v6075_v1  ;;  %v3602_v8 = vrot.slane %v3600_v28, 1  ;;  %v3477_v40 = vsel %vm707_vm4, %v3474_v37, %v3476_v49  ;;  %v6024_v49 = vld [vmem:[%s6299_s9 + $0x2c] ss:$0 sps:$4 sm:$0x11]  }
 0x1b9   : > { %v7151_v25 = vadd.f32 %v1993_v27, %v1822_v5  ;;  %5750 = vmatprep.mubr.msk.bf16.mxu0 %vm6076_vm1, %v6075_v1  ;;  %v5538_v20 = vpop.f32.mrf.mxu1  ;;  %v3621_v27 = vshll.u32 %v7197_v36, 16 }
 0x1ba   : > { %v5532_v34 = vpop.f32.mrf.mxu0  ;;  %v3606_v17 = vor.u32 %v3605_v42, %v3602_v8 }
 0x1bb   : > { %v2082_v30 = vpop.f32.mrf.mxu1  ;;  %v3623_v22 = vrot.slane %v3621_v27, 2 }
 0x1bc   : > { %v1996_v59 = vpop.f32.mrf.mxu0  ;;  %v2119_v3 = vadd.f32 %v2082_v30, %v7081_v41  ;;  %v3612_v41 = vshll.u32 %v7171_v45, 16  ;;  %v3607_v5 = vsel %vm979_vm5, %v3598_v60, %v3606_v17 }
 0x1bd   : > { %v7162_v51 = vadd.f32 %v1996_v59, %v1823_v39  ;;  %v5539_v46 = vpop.f32.mrf.mxu1 }
 0x1be   : > { %v5533_v7 = vpop.f32.mrf.mxu0  ;;  %v3614_v6 = vrot.slane %v3612_v41, 2  ;;  %v7236_v41 = vld [vmem:[%s6299_s9 + $0x2c] ss:$0 sps:$4 sm:$0x33]  }
 0x1bf   : > { %v2087_v50 = vpop.f32.mrf.mxu1  ;;  %5757 = vmatmul.mubr.msk.bf16.vlgmr.msra.gmra.mxu1 %vm522_vm3, %v3475_v43 }
 0x1c0   : > { %v2232_v23 = vpop.f32.mrf.mxu0  ;;  %5751 = vmatmul.mubr.msk.bf16.gmra.mxu0 %vm522_vm3, %v3330_v48  ;;  %v2120_v56 = vadd.f32 %v2087_v50, %v7090_v38  ;;  %5799 = vmatpush3.bf16.msra.mxu1 %v3778_v54  ;;  %v3611_v38 = vrot.slane %v3609_v53, 1 }
 0x1c1   : > { %v7175_v31 = vadd.f32 %v2232_v23, %v2118_v4  ;;  %5778 = vmatprep.mubr.msk.bf16.mxu0 %vm6076_vm1, %v6075_v1  ;;  %5760 = vmatprep.mubr.msk.bf16.mxu1 %vm6076_vm1, %v6075_v1  ;;  %v5542_v63 = vpop.f32.mrf.mxu1  ;;  %v3620_v4 = vrot.slane %v3618_v33, 1 }
 0x1c2   : > { %v5560_v16 = vpop.f32.mrf.mxu0  ;;  %5842 = vmatprep.subr.bf16.mxu1 %v6075_v1  ;;  %v3615_v21 = vor.u32 %v3614_v6, %v3611_v38  ;;  %v3636_v38 = vshrl.u32 %v7236_v41, 16  ;;  %v3639_v6 = vshll.u32 %v7236_v41, 16 }
 0x1c3   : > { %v2090_v13 = vpop.f32.mrf.mxu1  ;;  %v3624_v8 = vor.u32 %v3623_v22, %v3620_v4 }
 0x1c4   : > { %v2235_v15 = vpop.f32.mrf.mxu0  ;;  %v2121_v10 = vadd.f32 %v2090_v13, %v7103_v35  ;;  %v3616_v34 = vsel %vm979_vm5, %v3606_v17, %v3615_v21  ;;  %v3638_v33 = vrot.slane %v3636_v38, 1  ;;  %v3641_v27 = vrot.slane %v3639_v6, 2  ;;  %v7307_v6 = vld [vmem:[%s6299_s9 + $0x18] sm:$0xff]  }
 0x1c5   : > { %v7190_v24 = vadd.f32 %v2235_v15, %v2119_v3  ;;  %v5543_v18 = vpop.f32.mrf.mxu1  ;;  %v3625_v60 = vsel %vm979_vm5, %v3615_v21, %v3624_v8 }
 0x1c6   : > { %v5561_v62 = vpop.f32.mrf.mxu0  ;;  %v3745_v18 = vld [vmem:[%s6299_s9 + $0x4] sm:$0xc]  ;;  %v3642_v4 = vor.u32 %v3641_v27, %v3638_v33  ;;  %v3756_v27 = vrot.slane %v7197_v36, 2 }
 0x1c7   : > { %v2095_v35 = vpop.f32.mrf.mxu1  ;;  %5761 = vmatmul.mubr.msk.bf16.gmra.mxu1 %vm522_vm3, %v3477_v40 }
 0x1c8   : > { %v2240_v55 = vpop.f32.mrf.mxu0  ;;  %5779 = vmatmul.mubr.msk.bf16.vlgmr.msra.gmra.mxu0 %vm522_vm3, %v3607_v5  ;;  %v2122_v29 = vadd.f32 %v2095_v35, %v7111_v52  ;;  %5764 = vmatprep.mubr.msk.bf16.mxu1 %vm6076_vm1, %v6075_v1  ;;  %v7218_v52 = vld [vmem:[%s6299_s9 + $0x24] sm:$0xff]  }
 0x1c9   : > { %v7200_v39 = vadd.f32 %v2240_v55, %v2120_v56  ;;  %5821 = vmatpush3.bf16.msra.mxu0 %v3931_v2  ;;  %5782 = vmatprep.mubr.msk.bf16.mxu0 %vm6076_vm1, %v6075_v1  ;;  %v5546_v28 = vpop.f32.mrf.mxu1  ;;  %v3627_v42 = vshrl.u32 %v7218_v52, 16  ;;  %v3630_v30 = vshll.u32 %v7218_v52, 16  ;;  %v3480_v43 = vrot.slane %v7218_v52, 1 }
 0x1ca   : > { %v5564_v32 = vpop.f32.mrf.mxu0  ;;  %5864 = vmatprep.subr.bf16.mxu0 %v6075_v1  ;;  %v3482_v2 = vrot.slane %v6024_v49, 1  ;;  %v5100_v49 = vld [vmem:[%s7938_s3 + $0x34] sm:$0x3] }
 0x1cb   : > { %v2098_v37 = vpop.f32.mrf.mxu1  ;;  %v3629_v17 = vrot.slane %v3627_v42, 1  ;;  %v3632_v53 = vrot.slane %v3630_v30, 2  ;;  %v5093_v30 = vld [vmem:[%s7938_s3 + $0x32] sm:$0x3] }
 0x1cc   : > { %v2243_v47 = vpop.f32.mrf.mxu0  ;;  %v2123_v59 = vadd.f32 %v2098_v37, %v7121_v58 }
 0x1cd   : > { %v7212_v44 = vadd.f32 %v2243_v47, %v2121_v10  ;;  %v5547_v0 = vpop.f32.mrf.mxu1  ;;  %v3633_v5 = vor.u32 %v3632_v53, %v3629_v17 }
 0x1ce   : > { %v5565_v20 = vpop.f32.mrf.mxu0 }
 0x1cf   : > { %v2103_v58 = vpop.f32.mrf.mxu1  ;;  %5765 = vmatmul.mubr.msk.bf16.gmra.mxu1 %vm522_vm3, %v3479_v11  ;;  %v3634_v21 = vsel %vm979_vm5, %v3624_v8, %v3633_v5  ;;  %v7267_v20 = vld [vmem:[%s6299_s9 + $0xc] sm:$0xf]  ;;  %v3752_v11 = vrot.slane %v7148_v12, 2  ;;  %v3643_v42 = vsel %vm979_vm5, %v3633_v5, %v3642_v4 }
 0x1d0   : > { %v2248_v48 = vpop.f32.mrf.mxu0  ;;  %5783 = vmatmul.mubr.msk.bf16.gmra.mxu0 %vm522_vm3, %v3616_v34  ;;  %v2124_v3 = vadd.f32 %v2103_v58, %v7128_v61  ;;  %5768 = vmatprep.mubr.msk.bf16.mxu1 %vm6076_vm1, %v6075_v1  ;;  %v3481_v61 = vsel %vm707_vm4, %v3478_v57, %v3480_v43  ;;  %v5075_v57 = vcombine.low %v3745_v18, %v7139_v9  ;;  %v3907_v18 = vrot.slane %v7307_v6, 2 }
 0x1d1   : > { %v7221_v14 = vadd.f32 %v2248_v48, %v2122_v29  ;;  %5786 = vmatprep.mubr.msk.bf16.mxu0 %vm6076_vm1, %v6075_v1  ;;  %v5550_v46 = vpop.f32.mrf.mxu1 }
 0x1d2   : > { %v5568_v7 = vpop.f32.mrf.mxu0 }
 0x1d3   : > { %v2106_v50 = vpop.f32.mrf.mxu1 }
 0x1d4   : > { %v2251_v23 = vpop.f32.mrf.mxu0  ;;  %v2125_v56 = vadd.f32 %v2106_v50, %v7141_v19 }
 0x1d5   : > { %v7232_v54 = vadd.f32 %v2251_v23, %v2123_v59  ;;  %v5551_v26 = vpop.f32.mrf.mxu1  ;;  %v3751_v59 = vrot.slane %v5075_v57, 2  ;;  %v7327_v57 = vld [vmem:[%s6299_s9 + $0x20] sm:$0xff]  }
 0x1d6   : > { %v5569_v16 = vpop.f32.mrf.mxu0 }
 0x1d7   : > { %v2111_v13 = vpop.f32.mrf.mxu1  ;;  %5769 = vmatmul.mubr.msk.bf16.gmra.mxu1 %vm522_vm3, %v3481_v61  ;;  %v3753_v12 = vsel %vm1140_vm6, %v3751_v59, %v3752_v11  ;;  %v3754_v61 = vrot.slane %v7171_v45, 2 }
 0x1d8   : > { %v2256_v63 = vpop.f32.mrf.mxu0  ;;  %5787 = vmatmul.mubr.msk.bf16.gmra.mxu0 %vm522_vm3, %v3625_v60  ;;  %v2126_v62 = vadd.f32 %v2111_v13, %v7151_v25  ;;  %5772 = vmatprep.mubr.msk.bf16.mxu1 %vm6076_vm1, %v6075_v1  ;;  %v3483_v25 = vsel %vm707_vm4, %v3480_v43, %v3482_v2  ;;  %v4091_v60 = vsel %vm538_vm0, %v5093_v30, 0 }
 0x1d9   : > { %v7242_v15 = vadd.f32 %v2256_v63, %v2124_v3  ;;  %5790 = vmatprep.mubr.msk.bf16.mxu0 %vm6076_vm1, %v6075_v1  ;;  %v5554_v10 = vpop.f32.mrf.mxu1  ;;  %v3755_v45 = vsel %vm1140_vm6, %v3752_v11, %v3754_v61  ;;  %v3758_v11 = vrot.slane %v7218_v52, 2 }
 0x1da   : > { %v5572_v19 = vpop.f32.mrf.mxu0 }
 0x1db   : > { %v2114_v35 = vpop.f32.mrf.mxu1  ;;  %v4209_v19 = vsel %vm538_vm0, %v5100_v49, 0 }
 0x1dc   : > { %v2259_v40 = vpop.f32.mrf.mxu0  ;;  %v2127_v29 = vadd.f32 %v2114_v35, %v7162_v51  ;;  %v3863_v51 = vld [vmem:[%s6299_s9 + $0x8] sm:$0xc] }
 0x1dd   : > { %v7253_v55 = vadd.f32 %v2259_v40, %v2125_v56  ;;  %v5555_v28 = vpop.f32.mrf.mxu1  ;;  %v7280_v58 = vcombine.low %v3863_v51, %v7267_v20  ;;  %v3909_v51 = vrot.slane %v7327_v57, 2 }
 0x1de   : > { %v5573_v32 = vpop.f32.mrf.mxu0 }
 0x1df   : > { %v2392_v22 = vpop.f32.mrf.mxu1  ;;  %5773 = vmatmul.mubr.msk.bf16.gmra.mxu1 %vm522_vm3, %v3483_v25  ;;  %v3904_v53 = vrot.slane %v7280_v58, 2  ;;  %v3910_v30 = vsel %vm1140_vm6, %v3907_v18, %v3909_v51 }
 0x1e0   : > { %v2264_v47 = vpop.f32.mrf.mxu0  ;;  %5791 = vmatmul.mubr.msk.bf16.gmra.mxu0 %vm522_vm3, %v3634_v21  ;;  %v2431_v9 = vadd.f32 %v2392_v22, %v7175_v31  ;;  %5800 = vmatprep.mubr.msk.bf16.mxu1 %vm6076_vm1, %v6075_v1  ;;  %v7283_v31 = vld [vmem:[%s6299_s9 + $0x10] sm:$0xff]   ;;  %v3757_v22 = vsel %vm1140_vm6, %v3754_v61, %v3756_v27 }
 0x1e1   : > { %v7260_v34 = vadd.f32 %v2264_v47, %v2126_v62  ;;  %5794 = vmatprep.mubr.msk.bf16.mxu0 %vm6076_vm1, %v6075_v1  ;;  %v5582_v0 = vpop.f32.mrf.mxu1  ;;  %v3905_v50 = vrot.slane %v7283_v31, 2  ;;  %v4031_v61 = vshrl.u32 %v7283_v31, 16  ;;  %v4034_v49 = vshll.u32 %v7283_v31, 16 }
 0x1e2   : > { %v5576_v37 = vpop.f32.mrf.mxu0 }
 0x1e3   : > { %v2395_v7 = vpop.f32.mrf.mxu1  ;;  %v3906_v38 = vsel %vm1140_vm6, %v3904_v53, %v3905_v50  ;;  %v3908_v25 = vsel %vm1140_vm6, %v3905_v50, %v3907_v18 }
 0x1e4   : > { %v2267_v48 = vpop.f32.mrf.mxu0  ;;  %v2432_v43 = vadd.f32 %v2395_v7, %v7190_v24  ;;  %v7346_v7 = vld [vmem:[%s6299_s9 + $0x28] sm:$0xff]  }
 0x1e5   : > { %v7273_v8 = vadd.f32 %v2267_v48, %v2127_v29  ;;  %v5583_v46 = vpop.f32.mrf.mxu1  ;;  %v3911_v52 = vrot.slane %v7346_v7, 2 }
 0x1e6   : > { %v5577_v3 = vpop.f32.mrf.mxu0  ;;  %v3759_v46 = vsel %vm1140_vm6, %v3756_v27, %v3758_v11 }
 0x1e7   : > { %v2400_v16 = vpop.f32.mrf.mxu1  ;;  %5801 = vmatmul.mubr.msk.bf16.vlgmr.msra.gmra.mxu1 %vm522_vm3, %v3753_v12 }
 0x1e8   : > { %v2510_v23 = vpop.f32.mrf.mxu0  ;;  %5795 = vmatmul.mubr.msk.bf16.gmra.mxu0 %vm522_vm3, %v3643_v42  ;;  %v2433_v56 = vadd.f32 %v2400_v16, %v7200_v39  ;;  %5843 = vmatpush3.bf16.msra.mxu1 %v4091_v60  ;;  %v4026_v16 = vshll.u32 %v7280_v58, 16 }
 0x1e9   : > { %v7289_v17 = vadd.f32 %v2510_v23, %v2431_v9  ;;  %5822 = vmatprep.mubr.msk.bf16.mxu0 %vm6076_vm1, %v6075_v1  ;;  %5804 = vmatprep.mubr.msk.bf16.mxu1 %vm6076_vm1, %v6075_v1  ;;  %v5586_v26 = vpop.f32.mrf.mxu1 }
 0x1ea   : > { %v5604_v24 = vpop.f32.mrf.mxu0 }
 0x1eb   : > { %v2403_v13 = vpop.f32.mrf.mxu1 }
 0x1ec   : > { %v2513_v63 = vpop.f32.mrf.mxu0  ;;  %v2434_v62 = vadd.f32 %v2403_v13, %v7212_v44  ;;  %v3912_v13 = vsel %vm1140_vm6, %v3909_v51, %v3911_v52 }
 0x1ed   : > { %v7303_v5 = vadd.f32 %v2513_v63, %v2432_v43  ;;  %v5587_v2 = vpop.f32.mrf.mxu1 }
 0x1ee   : > { %v5605_v39 = vpop.f32.mrf.mxu0  ;;  %v4033_v2 = vrot.slane %v4031_v61, 2 }
 0x1ef   : > { %v2408_v21 = vpop.f32.mrf.mxu1  ;;  %5805 = vmatmul.mubr.msk.bf16.gmra.mxu1 %vm522_vm3, %v3755_v45  ;;  %v6032_v39 = vld [vmem:[%s6299_s9 + $0x30] ss:$0 sps:$4 sm:$0x33]  }
 0x1f0   : > { %v2518_v10 = vpop.f32.mrf.mxu0  ;;  %5823 = vmatmul.mubr.msk.bf16.vlgmr.msra.gmra.mxu0 %vm522_vm3, %v3906_v38  ;;  %v2435_v44 = vadd.f32 %v2408_v21, %v7221_v14  ;;  %5808 = vmatprep.mubr.msk.bf16.mxu1 %vm6076_vm1, %v6075_v1 }
 0x1f1   : > { %v7313_v40 = vadd.f32 %v2518_v10, %v2433_v56  ;;  %5865 = vmatpush3.bf16.msra.mxu0 %v4209_v19  ;;  %5826 = vmatprep.mubr.msk.bf16.mxu0 %vm6076_vm1, %v6075_v1  ;;  %v5590_v35 = vpop.f32.mrf.mxu1  ;;  %v3760_v56 = vrot.slane %v7236_v41, 2  ;;  %v4036_v10 = vrot.slane %v4034_v49, 3 }
 0x1f2   : > { %v5608_v33 = vpop.f32.mrf.mxu0 }
 0x1f3   : > { %v2411_v28 = vpop.f32.mrf.mxu1  ;;  %v3761_v41 = vsel %vm1140_vm6, %v3758_v11, %v3760_v56 }
 0x1f4   : > { %v2521_v32 = vpop.f32.mrf.mxu0  ;;  %v2436_v4 = vadd.f32 %v2411_v28, %v7232_v54  ;;  %v4037_v28 = vor.u32 %v4036_v10, %v4033_v2 }
 0x1f5   : > { %v7323_v29 = vadd.f32 %v2521_v32, %v2434_v62  ;;  %v5591_v14 = vpop.f32.mrf.mxu1 }
 0x1f6   : > { %v5609_v47 = vpop.f32.mrf.mxu0 }
 0x1f7   : > { %v2416_v9 = vpop.f32.mrf.mxu1  ;;  %5809 = vmatmul.mubr.msk.bf16.gmra.mxu1 %vm522_vm3, %v3757_v22  ;;  %v4040_v47 = vshrl.u32 %v7307_v6, 16 }
 0x1f8   : > { %v2526_v37 = vpop.f32.mrf.mxu0  ;;  %5827 = vmatmul.mubr.msk.bf16.gmra.mxu0 %vm522_vm3, %v3908_v25  ;;  %v2437_v54 = vadd.f32 %v2416_v9, %v7242_v15  ;;  %5812 = vmatprep.mubr.msk.bf16.mxu1 %vm6076_vm1, %v6075_v1 }
 0x1f9   : > { %v7332_v36 = vadd.f32 %v2526_v37, %v2435_v44  ;;  %5830 = vmatprep.mubr.msk.bf16.mxu0 %vm6076_vm1, %v6075_v1  ;;  %v5594_v0 = vpop.f32.mrf.mxu1  ;;  %v3913_v44 = vrot.slane %v6032_v39, 2 }
 0x1fa   : > { %v5612_v59 = vpop.f32.mrf.mxu0  ;;  %v4042_v0 = vrot.slane %v4040_v47, 2 }
 0x1fb   : > { %v2419_v3 = vpop.f32.mrf.mxu1  ;;  %v3914_v51 = vsel %vm1140_vm6, %v3911_v52, %v3913_v44  ;;  %v4049_v52 = vshrl.u32 %v7327_v57, 16 }
 0x1fc   : > { %v2529_v48 = vpop.f32.mrf.mxu0  ;;  %v2438_v12 = vadd.f32 %v2419_v3, %v7253_v55  ;;  %v4023_v55 = vshrl.u32 %v7280_v58, 16 }
 0x1fd   : > { %v7342_v42 = vadd.f32 %v2529_v48, %v2436_v4  ;;  %v5595_v15 = vpop.f32.mrf.mxu1  ;;  %v4043_v4 = vshll.u32 %v7307_v6, 16  ;;  %v4051_v49 = vrot.slane %v4049_v52, 2 }
 0x1fe   : > { %v5613_v43 = vpop.f32.mrf.mxu0  ;;  %v4025_v62 = vrot.slane %v4023_v55, 2 }
 0x1ff   : > { %v2424_v53 = vpop.f32.mrf.mxu1  ;;  %5813 = vmatmul.mubr.msk.bf16.gmra.mxu1 %vm522_vm3, %v3759_v46  ;;  %v4045_v48 = vrot.slane %v4043_v4, 3  ;;  %v4187_v4 = vrot.slane %v7327_v57, 3 }
 0x200   : > { %v2534_v23 = vpop.f32.mrf.mxu0  ;;  %5831 = vmatmul.mubr.msk.bf16.gmra.mxu0 %vm522_vm3, %v3910_v30  ;;  %v2439_v24 = vadd.f32 %v2424_v53, %v7260_v34  ;;  %5816 = vmatprep.mubr.msk.bf16.mxu1 %vm6076_vm1, %v6075_v1  ;;  %v4028_v34 = vrot.slane %v4026_v16, 3  ;;  %v4052_v53 = vshll.u32 %v7327_v57, 16 }
 0x201   : > { %v7351_v60 = vadd.f32 %v2534_v23, %v2437_v54  ;;  %5834 = vmatprep.mubr.msk.bf16.mxu0 %vm6076_vm1, %v6075_v1  ;;  %v5598_v26 = vpop.f32.mrf.mxu1  ;;  %v4046_v23 = vor.u32 %v4045_v48, %v4042_v0 }
 0x202   : > { %v5616_v50 = vpop.f32.mrf.mxu0  ;;  %v4029_v32 = vor.u32 %v4028_v34, %v4025_v62  ;;  %v4054_v26 = vrot.slane %v4052_v53, 3 }
 0x203   : > { %v2427_v19 = vpop.f32.mrf.mxu1 }
 0x204   : > { %v2537_v63 = vpop.f32.mrf.mxu0  ;;  %v2440_v45 = vadd.f32 %v2427_v19, %v7273_v8  ;;  %v4176_v8 = vld [vmem:[%s6299_s9 + $0x8] sm:$0x8]  ;;  %v4038_v11 = vsel %vm1412_vm7, %v4029_v32, %v4037_v28  ;;  %v4185_v19 = vrot.slane %v7307_v6, 3  ;;  %v4055_v34 = vor.u32 %v4054_v26, %v4051_v49 }
 0x205   : > { %v7365_v38 = vadd.f32 %v2537_v63, %v2438_v12  ;;  %v5599_v18 = vpop.f32.mrf.mxu1  ;;  %v5101_v9 = vcombine.low %v4176_v8, %v7267_v20  ;;  %v4183_v20 = vrot.slane %v7283_v31, 3  ;;  %v6034_v8 = vld [vmem:[%s6299_s9 + $0x30] ss:$0 sps:$4 sm:$0x77]   ;;  %s5893_s9 = smul.u32 80, %s7991_s25 }
 0x206   : > { %v5617_v58 = vpop.f32.mrf.mxu0  ;;  %v4188_v0 = vsel %vm1573_vm8, %v4185_v19, %v4187_v4 }
 0x207   : > { %v2663_v27 = vpop.f32.mrf.mxu1  ;;  %5817 = vmatmul.mubr.msk.bf16.gmra.mxu1 %vm522_vm3, %v3761_v41  ;;  %v4182_v12 = vrot.slane %v5101_v9, 3  ;;  %v4061_v41 = vshll.u32 %v7346_v7, 16  ;;  %v4186_v6 = vsel %vm1573_vm8, %v4183_v20, %v4185_v19  ;;  %v4067_v9 = vshrl.u32 %v6034_v8, 16  ;;  %s7629_s12 = sadd.s32 %s5893_s9, %s5892_s10  ;;  %s433_s9 = scalar_lea.vmem %s7942_s7, %s425_s22 }
 0x208   : > { %v2542_v21 = vpop.f32.mrf.mxu0  ;;  %5835 = vmatmul.mubr.msk.bf16.gmra.mxu0 %vm522_vm3, %v3912_v13  ;;  %v2702_v25 = vadd.f32 %v2663_v27, %v7289_v17  ;;  %5844 = vmatprep.mubr.msk.bf16.mxu1 %vm6076_vm1, %v6075_v1  ;;  %s4864_s15 = sshll.u32 %s7629_s12, 2 }
 0x209   : > { %v7372_v33 = vadd.f32 %v2542_v21, %v2439_v24  ;;  %5838 = vmatprep.mubr.msk.bf16.mxu0 %vm6076_vm1, %v6075_v1  ;;  %v5626_v22 = vpop.f32.mrf.mxu1  ;;  %v4184_v31 = vsel %vm1573_vm8, %v4182_v12, %v4183_v20  ;;  %v4063_v32 = vrot.slane %v4061_v41, 3  ;;  %v4069_v12 = vrot.slane %v4067_v9, 2  ;;  %s7710_s20 = scalar_lea.vmem %s7940_s5, %s4864_s15 }
 0x20a   : > { %v5620_v35 = vpop.f32.mrf.mxu0 }
 0x20b   : > { %v2666_v59 = vpop.f32.mrf.mxu1 }
 0x20c   : > { %v2545_v14 = vpop.f32.mrf.mxu0  ;;  %v2703_v17 = vadd.f32 %v2666_v59, %v7303_v5  ;;  %v4070_v59 = vshll.u32 %v6034_v8, 16 }
 0x20d   : > { %v7383_v37 = vadd.f32 %v2545_v14, %v2440_v45  ;;  %v5627_v30 = vpop.f32.mrf.mxu1  ;;  %v4058_v45 = vshrl.u32 %v7346_v7, 16 }
 0x20e   : > { %v5621_v54 = vpop.f32.mrf.mxu0 }
 0x20f   : > { %v2671_v46 = vpop.f32.mrf.mxu1  ;;  %5845 = vmatmul.mubr.msk.bf16.vlgmr.msra.gmra.mxu1 %vm522_vm3, %v4038_v11  ;;  %v4060_v35 = vrot.slane %v4058_v45, 2 }
 0x210   : > { %v2823_v3 = vpop.f32.mrf.mxu0  ;;  %5839 = vmatmul.mubr.msk.bf16.gmra.mxu0 %vm522_vm3, %v3914_v51  ;;  %v2704_v15 = vadd.f32 %v2671_v46, %v7313_v40  ;;  %5848 = vmatprep.mubr.msk.bf16.mxu1 %vm6076_vm1, %v6075_v1  ;;  %v4047_v40 = vsel %vm1412_vm7, %v4037_v28, %v4046_v23 }
 0x211   : > { %v7390_v43 = vadd.f32 %v2823_v3, %v2702_v25  ;;  %5866 = vmatprep.mubr.msk.bf16.mxu0 %vm6076_vm1, %v6075_v1  ;;  %v5630_v50 = vpop.f32.mrf.mxu1  ;;  %v4064_v51 = vor.u32 %v4063_v32, %v4060_v35 }
 0x212   : > { %v5648_v5 = vpop.f32.mrf.mxu0 }
 0x213   : > { %v2674_v24 = vpop.f32.mrf.mxu1  ;;  %v4065_v3 = vsel %vm1412_vm7, %v4055_v34, %v4064_v51 }
 0x214   : > { %v2826_v55 = vpop.f32.mrf.mxu0  ;;  %v2705_v61 = vadd.f32 %v2674_v24, %v7323_v29 }
 0x215   : > { %v7401_v16 = vadd.f32 %v2826_v55, %v2703_v17  ;;  %v5631_v63 = vpop.f32.mrf.mxu1 }
 0x216   : > { %v5649_v56 = vpop.f32.mrf.mxu0  ;;  %v4191_v63 = vrot.slane %v6034_v8, 3 }
 0x217   : > { %v2679_v58 = vpop.f32.mrf.mxu1  ;;  %5849 = vmatmul.mubr.msk.bf16.gmra.mxu1 %vm522_vm3, %v4047_v40 }
 0x218   : > { %v2831_v13 = vpop.f32.mrf.mxu0  ;;  %5867 = vmatmul.mubr.msk.bf16.vlgmr.msra.gmra.mxu0 %vm522_vm3, %v4184_v31  ;;  %v2706_v29 = vadd.f32 %v2679_v58, %v7332_v36  ;;  %5852 = vmatprep.mubr.msk.bf16.mxu1 %vm6076_vm1, %v6075_v1  ;;  %v4056_v36 = vsel %vm1412_vm7, %v4046_v23, %v4055_v34 }
 0x219   : > { %v7407_v39 = vadd.f32 %v2831_v13, %v2704_v15  ;;  %5870 = vmatprep.mubr.msk.bf16.mxu0 %vm6076_vm1, %v6075_v1  ;;  %v5634_v2 = vpop.f32.mrf.mxu1  ;;  %v4189_v15 = vrot.slane %v7346_v7, 3 }
 0x21a   : > { %v5652_v62 = vpop.f32.mrf.mxu0 }
 0x21b   : > { %v2682_v21 = vpop.f32.mrf.mxu1  ;;  %v4190_v24 = vsel %vm1573_vm8, %v4187_v4, %v4189_v15  ;;  %v4192_v34 = vsel %vm1573_vm8, %v4189_v15, %v4191_v63 }
 0x21c   : > { %v2834_v10 = vpop.f32.mrf.mxu0  ;;  %v2707_v27 = vadd.f32 %v2682_v21, %v7342_v42 }
 0x21d   : > { %v7418_v18 = vadd.f32 %v2834_v10, %v2705_v61  ;;  %v5635_v25 = vpop.f32.mrf.mxu1 }
 0x21e   : > { %v5653_v44 = vpop.f32.mrf.mxu0 }
 0x21f   : > { %v2687_v22 = vpop.f32.mrf.mxu1  ;;  %5853 = vmatmul.mubr.msk.bf16.gmra.mxu1 %vm522_vm3, %v4056_v36 }
 0x220   : > { %v2839_v28 = vpop.f32.mrf.mxu0  ;;  %5871 = vmatmul.mubr.msk.bf16.gmra.mxu0 %vm522_vm3, %v4186_v6  ;;  %v2708_v14 = vadd.f32 %v2687_v22, %v7351_v60  ;;  %5856 = vmatprep.mubr.msk.bf16.mxu1 %vm6076_vm1, %v6075_v1  ;;  %v4072_v60 = vrot.slane %v4070_v59, 3 }
 0x221   : > { %v7425_v47 = vadd.f32 %v2839_v28, %v2706_v29  ;;  %5874 = vmatprep.mubr.msk.bf16.mxu0 %vm6076_vm1, %v6075_v1  ;;  %v5638_v54 = vpop.f32.mrf.mxu1 }
 0x222   : > { %v5656_v42 = vpop.f32.mrf.mxu0  ;;  %v4073_v53 = vor.u32 %v4072_v60, %v4069_v12 }
 0x223   : > { %v2690_v48 = vpop.f32.mrf.mxu1 }
 0x224   : > { %v2842_v17 = vpop.f32.mrf.mxu0  ;;  %v2709_v30 = vadd.f32 %v2690_v48, %v7365_v38  ;;  %v4074_v7 = vsel %vm1412_vm7, %v4064_v51, %v4073_v53 }
 0x225   : > { %v7434_v11 = vadd.f32 %v2842_v17, %v2707_v27  ;;  %v5639_v20 = vpop.f32.mrf.mxu1 }
 0x226   : > { %v5657_v57 = vpop.f32.mrf.mxu0 }
 0x227   : > { %v2695_v23 = vpop.f32.mrf.mxu1  ;;  %5857 = vmatmul.mubr.msk.bf16.gmra.mxu1 %vm522_vm3, %v4065_v3 }
 0x228   : > { %v2847_v46 = vpop.f32.mrf.mxu0  ;;  %5875 = vmatmul.mubr.msk.bf16.gmra.mxu0 %vm522_vm3, %v4188_v0  ;;  %v2710_v38 = vadd.f32 %v2695_v23, %v7372_v33  ;;  %5860 = vmatprep.mubr.msk.bf16.mxu1 %vm6076_vm1, %v6075_v1 }
 0x229   : > { %v7440_v5 = vadd.f32 %v2847_v46, %v2708_v14  ;;  %5878 = vmatprep.mubr.msk.bf16.mxu0 %vm6076_vm1, %v6075_v1  ;;  %v5642_v50 = vpop.f32.mrf.mxu1 }
 0x22a   : > { %v5660_v52 = vpop.f32.mrf.mxu0 }
 0x22b   : > { %v2698_v56 = vpop.f32.mrf.mxu1 }
 0x22c   : > { %v2850_v55 = vpop.f32.mrf.mxu0  ;;  %v2711_v40 = vadd.f32 %v2698_v56, %v7383_v37 }
 0x22d   : > { %v2869_v31 = vadd.f32 %v2850_v55, %v2709_v30  ;;  %v5643_v49 = vpop.f32.mrf.mxu1 }
 0x22e   : > { %v5661_v61 = vpop.f32.mrf.mxu0 }
 0x22f   : > { %v2941_v13 = vpop.f32.mrf.mxu1  ;;  %5861 = vmatmul.mubr.msk.bf16.gmra.mxu1 %vm522_vm3, %v4074_v7 }
 0x230   : > { %v2855_v26 = vpop.f32.mrf.mxu0  ;;  %5879 = vmatmul.mubr.msk.bf16.gmra.mxu0 %vm522_vm3, %v4190_v24  ;;  %v2980_v58 = vadd.f32 %v2941_v13, %v7390_v43 }
 0x231   : > { %v2870_v33 = vadd.f32 %v2855_v26, %v2710_v38  ;;  %5882 = vmatprep.mubr.msk.bf16.mxu0 %vm6076_vm1, %v6075_v1  ;;  %v5670_v62 = vpop.f32.mrf.mxu1 }
 0x232   : > { %v5664_v19 = vpop.f32.mrf.mxu0 }
 0x233   : > { %v2944_v45 = vpop.f32.mrf.mxu1 }
 0x234   : > { %v2858_v29 = vpop.f32.mrf.mxu0  ;;  %v2981_v2 = vadd.f32 %v2944_v45, %v7401_v16 }
 0x235   : > { %v2871_v37 = vadd.f32 %v2858_v29, %v2711_v40  ;;  %v5671_v10 = vpop.f32.mrf.mxu1 }
 0x236   : > { %v5665_v41 = vpop.f32.mrf.mxu0 }
 0x237   : > { %v2949_v21 = vpop.f32.mrf.mxu1 }
 0x238   : > { %v3079_v6 = vpop.f32.mrf.mxu0  ;;  %5883 = vmatmul.mubr.msk.bf16.gmra.mxu0 %vm522_vm3, %v4192_v34  ;;  %v2982_v27 = vadd.f32 %v2949_v21, %v7407_v39 }
 0x239   : > { %v3118_v1 = vadd.f32 %v3079_v6, %v2980_v58  ;;  %v5674_v36 = vpop.f32.mrf.mxu1 }
 0x23a   : > { %v5692_v44 = vpop.f32.mrf.mxu0 }
 0x23b   : > { %v2952_v32 = vpop.f32.mrf.mxu1 }
 0x23c   : > { %v3082_v43 = vpop.f32.mrf.mxu0  ;;  %v2983_v25 = vadd.f32 %v2952_v32, %v7418_v18 }
 0x23d   : > { %v3119_v35 = vadd.f32 %v3082_v43, %v2981_v2  ;;  %v5675_v28 = vpop.f32.mrf.mxu1 }
 0x23e   : > { %v5693_v8 = vpop.f32.mrf.mxu0 }
 0x23f   : > { %v2957_v16 = vpop.f32.mrf.mxu1 }
 0x240   : > { %v3087_v4 = vpop.f32.mrf.mxu0  ;;  %v2984_v14 = vadd.f32 %v2957_v16, %v7425_v47 }
 0x241   : > { %v3120_v22 = vadd.f32 %v3087_v4, %v2982_v27  ;;  %v5678_v51 = vpop.f32.mrf.mxu1 }
 0x242   : > { %v5696_v42 = vpop.f32.mrf.mxu0 }
 0x243   : > { %v2960_v54 = vpop.f32.mrf.mxu1 }
 0x244   : > { %v3090_v9 = vpop.f32.mrf.mxu0  ;;  %v2985_v39 = vadd.f32 %v2960_v54, %v7434_v11 }
 0x245   : > { %v3121_v59 = vadd.f32 %v3090_v9, %v2983_v25  ;;  %v5679_v0 = vpop.f32.mrf.mxu1 }
 0x246   : > { %v5697_v17 = vpop.f32.mrf.mxu0 }
 0x247   : > { %v2965_v30 = vpop.f32.mrf.mxu1 }
 0x248   : > { %v3095_v48 = vpop.f32.mrf.mxu0  ;;  %v2986_v18 = vadd.f32 %v2965_v30, %v7440_v5 }
 0x249   : > { %v3122_v57 = vadd.f32 %v3095_v48, %v2984_v14  ;;  %v5682_v12 = vpop.f32.mrf.mxu1 }
 0x24a   : > { %v5700_v3 = vpop.f32.mrf.mxu0 }
 0x24b   : > { %v2968_v46 = vpop.f32.mrf.mxu1 }
 0x24c   : > { %v3098_v60 = vpop.f32.mrf.mxu0  ;;  %v2987_v47 = vadd.f32 %v2968_v46, %v2869_v31 }
 0x24d   : > { %v3123_v20 = vadd.f32 %v3098_v60, %v2985_v39  ;;  %v5683_v23 = vpop.f32.mrf.mxu1 }
 0x24e   : > { %v5701_v15 = vpop.f32.mrf.mxu0 }
 0x24f   : > { %v2973_v53 = vpop.f32.mrf.mxu1 }
 0x250   : > { %v3103_v52 = vpop.f32.mrf.mxu0  ;;  %v2988_v55 = vadd.f32 %v2973_v53, %v2870_v33 }
 0x251   : > { %v3124_v38 = vadd.f32 %v3103_v52, %v2986_v18  ;;  %v5686_v11 = vpop.f32.mrf.mxu1 }
 0x252   : > { %v5704_v50 = vpop.f32.mrf.mxu0 }
 0x253   : > { %v2976_v61 = vpop.f32.mrf.mxu1 }
 0x254   : > { %v3106_v24 = vpop.f32.mrf.mxu0  ;;  %v2989_v7 = vadd.f32 %v2976_v61, %v2871_v37 }
 0x255   : > { %v3125_v56 = vadd.f32 %v3106_v24, %v2987_v47  ;;  %v5687_v49 = vpop.f32.mrf.mxu1 }
 0x256   : > { %v5705_v40 = vpop.f32.mrf.mxu0 }
 0x257   : > { %v3265_v63 = vpop.f32.mrf.mxu1 }
 0x258   : > { %v3111_v5 = vpop.f32.mrf.mxu0  ;;  %v3304_v19 = vadd.f32 %v3265_v63, %v3118_v1 }
 0x259   : > { %v3126_v26 = vadd.f32 %v3111_v5, %v2988_v55  ;;  %v5714_v58 = vpop.f32.mrf.mxu1 }
 0x25a   : > { %v5708_v13 = vpop.f32.mrf.mxu0 }
 0x25b   : > { %v3268_v29 = vpop.f32.mrf.mxu1 }
 0x25c   : > { %v3114_v31 = vpop.f32.mrf.mxu0  ;;  %v3305_v45 = vadd.f32 %v3268_v29, %v3119_v35 }
 0x25d   : > { %v3127_v62 = vadd.f32 %v3114_v31, %v2989_v7  ;;  %v5715_v41 = vpop.f32.mrf.mxu1 }
 0x25e   : > { %v5709_v34 = vpop.f32.mrf.mxu0 }
 0x25f   : > { %v3273_v10 = vpop.f32.mrf.mxu1 }
 0x260   : > { %v3383_v33 = vpop.f32.mrf.mxu0  ;;  %v3306_v21 = vadd.f32 %v3273_v10, %v3120_v22 }
 0x261   : > { %v3422_v2 = vadd.f32 %v3383_v33, %v3304_v19  ;;  %v5718_v44 = vpop.f32.mrf.mxu1 }
 0x262   : > { %v5736_v6 = vpop.f32.mrf.mxu0 }
 0x263   : > { %v3276_v36 = vpop.f32.mrf.mxu1 }
 0x264   : > { %v3386_v37 = vpop.f32.mrf.mxu0  ;;  %v3307_v32 = vadd.f32 %v3276_v36, %v3121_v59 }
 0x265   : > { %v3423_v27 = vadd.f32 %v3386_v37, %v3305_v45  ;;  %v5719_v8 = vpop.f32.mrf.mxu1 }
 0x266   : > { %v5737_v43 = vpop.f32.mrf.mxu0 }
 0x267   : > { %v3281_v28 = vpop.f32.mrf.mxu1 }
 0x268   : > { %v3391_v1 = vpop.f32.mrf.mxu0  ;;  %v3308_v16 = vadd.f32 %v3281_v28, %v3122_v57 }
 0x269   : > { %v3424_v25 = vadd.f32 %v3391_v1, %v3306_v21  ;;  %v5722_v42 = vpop.f32.mrf.mxu1 }
 0x26a   : > { %v5740_v4 = vpop.f32.mrf.mxu0 }
 0x26b   : > { %v3284_v51 = vpop.f32.mrf.mxu1 }
 0x26c   : > { %v3394_v35 = vpop.f32.mrf.mxu0  ;;  %v3309_v54 = vadd.f32 %v3284_v51, %v3123_v20 }
 0x26d   : > { %v3425_v14 = vadd.f32 %v3394_v35, %v3307_v32  ;;  %v5723_v17 = vpop.f32.mrf.mxu1 }
 0x26e   : > { %v5741_v9 = vpop.f32.mrf.mxu0 }
 0x26f   : > { %v3289_v0 = vpop.f32.mrf.mxu1 }
 0x270   : > { %v3399_v22 = vpop.f32.mrf.mxu0  ;;  %v3310_v30 = vadd.f32 %v3289_v0, %v3124_v38 }
 0x271   : > { %v3426_v39 = vadd.f32 %v3399_v22, %v3308_v16  ;;  %v5726_v3 = vpop.f32.mrf.mxu1 }
 0x272   : > { %v5744_v48 = vpop.f32.mrf.mxu0 }
 0x273   : > { %v3292_v12 = vpop.f32.mrf.mxu1 }
 0x274   : > { %v3402_v59 = vpop.f32.mrf.mxu0  ;;  %v3311_v46 = vadd.f32 %v3292_v12, %v3125_v56 }
 0x275   : > { %v3427_v18 = vadd.f32 %v3402_v59, %v3309_v54  ;;  %v5727_v15 = vpop.f32.mrf.mxu1 }
 0x276   : > { %v5745_v60 = vpop.f32.mrf.mxu0 }
 0x277   : > { %v3297_v23 = vpop.f32.mrf.mxu1 }
 0x278   : > { %v3407_v57 = vpop.f32.mrf.mxu0  ;;  %v3312_v53 = vadd.f32 %v3297_v23, %v3126_v26 }
 0x279   : > { %v3428_v47 = vadd.f32 %v3407_v57, %v3310_v30  ;;  %v5730_v50 = vpop.f32.mrf.mxu1 }
 0x27a   : > { %v5748_v52 = vpop.f32.mrf.mxu0 }
 0x27b   : > { %v3300_v11 = vpop.f32.mrf.mxu1 }
 0x27c   : > { %v3410_v20 = vpop.f32.mrf.mxu0  ;;  %v3313_v61 = vadd.f32 %v3300_v11, %v3127_v62 }
 0x27d   : > { %v3429_v55 = vadd.f32 %v3410_v20, %v3311_v46  ;;  %v5731_v40 = vpop.f32.mrf.mxu1 }
 0x27e   : > { %v5749_v24 = vpop.f32.mrf.mxu0 }
 0x27f   : > { %v3536_v49 = vpop.f32.mrf.mxu1 }
 0x280   : > { %v3415_v38 = vpop.f32.mrf.mxu0  ;;  %v3575_v63 = vadd.f32 %v3536_v49, %v3422_v2 }
 0x281   : > { %v3430_v7 = vadd.f32 %v3415_v38, %v3312_v53  ;;  %v5758_v13 = vpop.f32.mrf.mxu1 }
 0x282   : > { %v5752_v5 = vpop.f32.mrf.mxu0  ;;  %v4362_v13 = vlaneseq }
 0x283   : > { %v3539_v58 = vpop.f32.mrf.mxu1 }
 0x284   : > { %v3418_v56 = vpop.f32.mrf.mxu0  ;;  %v3576_v29 = vadd.f32 %v3539_v58, %v3423_v27 }
 0x285   : > { %v3431_v19 = vadd.f32 %v3418_v56, %v3313_v61  ;;  %v5759_v34 = vpop.f32.mrf.mxu1 }
 0x286   : > { %v5753_v31 = vpop.f32.mrf.mxu0 }
 0x287   : > { %v3544_v41 = vpop.f32.mrf.mxu1 }
 0x288   : > { %v3696_v26 = vpop.f32.mrf.mxu0  ;;  %v3577_v10 = vadd.f32 %v3544_v41, %v3424_v25 }
 0x289   : > { %v7465_v45 = vadd.f32 %v3696_v26, %v3575_v63  ;;  %v5762_v62 = vpop.f32.mrf.mxu1 }
 0x28a   : > { %v5780_v33 = vpop.f32.mrf.mxu0 }
 0x28b   : > { %v3547_v44 = vpop.f32.mrf.mxu1 }
 0x28c   : > { %v3699_v6 = vpop.f32.mrf.mxu0  ;;  %v3578_v2 = vadd.f32 %v3547_v44, %v3425_v14 }
 0x28d   : > { %v7467_v21 = vadd.f32 %v3699_v6, %v3576_v29  ;;  %v5763_v36 = vpop.f32.mrf.mxu1  ;;  %v7493_v29 = vshrl.u32 %v4362_v13, 7 }
 0x28e   : > { %v5781_v37 = vpop.f32.mrf.mxu0 }
 0x28f   : > { %v3552_v8 = vpop.f32.mrf.mxu1  ;;  %v4364_v37 = vadd.s32 8, %v7493_v29 }
 0x290   : > { %v3704_v43 = vpop.f32.mrf.mxu0  ;;  %v3579_v1 = vadd.f32 %v3552_v8, %v3426_v39 }
 0x291   : > { %v7469_v32 = vadd.f32 %v3704_v43, %v3577_v10  ;;  %v5766_v28 = vpop.f32.mrf.mxu1  ;;  %v7500_v10 = vmul.u32.u64.low 3435973837, %v7493_v29  ;;  %v7501_v62 = vmul.u32.u64.high 3435973837, %v7493_v29, %v7500_v10  ;;  %v4365_v43 = vadd.s32 16, %v7493_v29 }
 0x292   : > { %v5784_v27 = vpop.f32.mrf.mxu0 }
 0x293   : > { %v3555_v42 = vpop.f32.mrf.mxu1 }
 0x294   : > { %v3707_v4 = vpop.f32.mrf.mxu0  ;;  %v3580_v35 = vadd.f32 %v3555_v42, %v3427_v18 }
 0x295   : > { %v7471_v16 = vadd.f32 %v3707_v4, %v3578_v2  ;;  %v5767_v51 = vpop.f32.mrf.mxu1  ;;  %v7512_v28 = vmul.u32.u64.low 3435973837, %v4364_v37  ;;  %v7513_v4 = vmul.u32.u64.high 3435973837, %v4364_v37, %v7512_v28 }
 0x296   : > { %v5785_v25 = vpop.f32.mrf.mxu0 }
 0x297   : > { %v3560_v17 = vpop.f32.mrf.mxu1 }
 0x298   : > { %v3712_v9 = vpop.f32.mrf.mxu0  ;;  %v3581_v22 = vadd.f32 %v3560_v17, %v3428_v47  ;;  %v4379_v17 = vshrl.u32 %v7501_v62, 3 }
 0x299   : > { %v7473_v54 = vadd.f32 %v3712_v9, %v3579_v1  ;;  %v5770_v0 = vpop.f32.mrf.mxu1  ;;  %v4366_v1 = vadd.s32 24, %v7493_v29  ;;  %v4367_v9 = vadd.s32 32, %v7493_v29 }
 0x29a   : > { %v5788_v14 = vpop.f32.mrf.mxu0 }
 0x29b   : > { %v3563_v3 = vpop.f32.mrf.mxu1 }
 0x29c   : > { %v3715_v48 = vpop.f32.mrf.mxu0  ;;  %v3582_v59 = vadd.f32 %v3563_v3, %v3429_v55  ;;  %v7528_v3 = vadd.s32 40, %v7493_v29 }
 0x29d   : > { %v7475_v30 = vadd.f32 %v3715_v48, %v3580_v35  ;;  %v5771_v12 = vpop.f32.mrf.mxu1  ;;  %v7517_v35 = vmul.u32.u64.low 3435973837, %v4365_v43  ;;  %v7518_v51 = vmul.u32.u64.high 3435973837, %v4365_v43, %v7517_v35 }
 0x29e   : > { %v5789_v39 = vpop.f32.mrf.mxu0  ;;  %v7524_v0 = vmul.u32.u64.low 3435973837, %v4366_v1  ;;  %v7525_v48 = vmul.u32.u64.high 3435973837, %v4366_v1, %v7524_v0 }
 0x29f   : > { %v3568_v15 = vpop.f32.mrf.mxu1 }
 0x2a0   : > { %v3720_v60 = vpop.f32.mrf.mxu0  ;;  %v3583_v57 = vadd.f32 %v3568_v15, %v3430_v7  ;;  %v4380_v15 = vmul.u32 10, %v4379_v17 }
 0x2a1   : > { %v7477_v46 = vadd.f32 %v3720_v60, %v3581_v22  ;;  %v5774_v23 = vpop.f32.mrf.mxu1  ;;  %v7532_v12 = vmul.u32.u64.low 3435973837, %v4367_v9  ;;  %v7533_v60 = vmul.u32.u64.high 3435973837, %v4367_v9, %v7532_v12 }
 0x2a2   : > { %v5792_v18 = vpop.f32.mrf.mxu0 }
 0x2a3   : > { %v3571_v50 = vpop.f32.mrf.mxu1 }
 0x2a4   : > { %v3723_v52 = vpop.f32.mrf.mxu0  ;;  %v3584_v20 = vadd.f32 %v3571_v50, %v3431_v19  ;;  %v4390_v50 = vshrl.u32 %v7513_v4, 3 }
 0x2a5   : > { %v7479_v53 = vadd.f32 %v3723_v52, %v3582_v59  ;;  %v5775_v11 = vpop.f32.mrf.mxu1  ;;  %v7538_v23 = vmul.u32.u64.low 3435973837, %v7528_v3  ;;  %v7539_v52 = vmul.u32.u64.high 3435973837, %v7528_v3, %v7538_v23 }
 0x2a6   : > { %v5793_v47 = vpop.f32.mrf.mxu0  ;;  %v4401_v11 = vshrl.u32 %v7518_v51, 3  ;;  %v4391_v13 = vmul.u32 10, %v4390_v50 }
 0x2a7   : > { %v7483_v40 = vpop.f32.mrf.mxu1  ;;  %v4434_v28 = vshrl.u32 %v7539_v52, 3 }
 0x2a8   : > { %v3728_v24 = vpop.f32.mrf.mxu0  ;;  %v3853_v52 = vadd.f32 %v7483_v40, %v7465_v45 }
 0x2a9   : > { %v7481_v61 = vadd.f32 %v3728_v24, %v3583_v57  ;;  %v5802_v38 = vpop.f32.mrf.mxu1  ;;  %v7546_v24 = vadd.s32 48, %v7493_v29 }
 0x2aa   : > { %v5796_v55 = vpop.f32.mrf.mxu0 }
 0x2ab   : > { %v7487_v63 = vpop.f32.mrf.mxu1  ;;  %v7549_v55 = vsub.s32 %v7493_v29, %v4380_v15  ;;  %v7559_v10 = vmul.u32.u64.low 3435973837, %v7546_v24  ;;  %v7560_v62 = vmul.u32.u64.high 3435973837, %v7546_v24, %v7559_v10 }
 0x2ac   : > { %v3731_v49 = vpop.f32.mrf.mxu0  ;;  %v3854_v10 = vadd.f32 %v7487_v63, %v7467_v21  ;;  %v7662_v21 = vld [vmem:[%s7939_s4] ss:$0 sm:$0xff] }
 0x2ad   : > { %v7485_v5 = vadd.f32 %v3731_v49, %v3584_v20  ;;  %v5803_v56 = vpop.f32.mrf.mxu1  ;;  %vm4483_vm9 = vcmp.ne.s32.totalorder %v7549_v55, 0  ;;  %vm4493_vm10 = vcmp.lt.s32.totalorder %v7549_v55, 0  ;;  %v4513_v4 = vadd.s32 10, %v7549_v55 }
 0x2ae   : > { %v5797_v7 = vpop.f32.mrf.mxu0  ;;  %vm7577_vm11 = vmand %vm4493_vm10, %vm4483_vm9 }
 0x2af   : > { %v7491_v31 = vpop.f32.mrf.mxu1  ;;  %v4412_v7 = vshrl.u32 %v7525_v48, 3  ;;  %v7584_v48 = vadd.s32 56, %v7493_v29  ;;  %v4523_v15 = vsel %vm7577_vm11, %v4513_v4, %v7549_v55 }
 0x2b0   : > { %v7489_v58 = vpop.f32.mrf.mxu0  ;;  %vm7644_vm7 = vcmp.lt.s32.totalorder %v4523_v15, 8 }
 0x2b1   : > { %v5806_v34 = vpop.f32.mrf.mxu1  ;;  %v4006_v45 = vadd.f32 %v7489_v58, %v3853_v52  ;;  %v3855_v52 = vadd.f32 %v7491_v31, %v7469_v32 }
 0x2b2   : > { %v5824_v19 = vpop.f32.mrf.mxu0  ;;  %v4402_v34 = vmul.u32 10, %v4401_v11 }
 0x2b3   : > { %v7497_v41 = vpop.f32.mrf.mxu1 }
 0x2b4   : > { %v7495_v26 = vpop.f32.mrf.mxu0 }
 0x2b5   : > { %v5807_v6 = vpop.f32.mrf.mxu1 }
 0x2b6   : > { %v5825_v33 = vpop.f32.mrf.mxu0 }
 0x2b7   : > { %v7506_v2 = vpop.f32.mrf.mxu1  ;;  %v4423_v33 = vshrl.u32 %v7533_v60, 3  ;;  %v4435_v60 = vmul.u32 10, %v4434_v28 }
 0x2b8   : > { %v7503_v44 = vpop.f32.mrf.mxu0 }
 0x2b9   : > { %v5810_v8 = vpop.f32.mrf.mxu1  ;;  %v4424_v0 = vmul.u32 10, %v4423_v33 }
 0x2ba   : > { %v5828_v36 = vpop.f32.mrf.mxu0  ;;  %v4413_v8 = vmul.u32 10, %v4412_v7 }
 0x2bb   : > { %v7515_v42 = vpop.f32.mrf.mxu1  ;;  %v7598_v23 = vsub.s32 %v4367_v9, %v4424_v0  ;;  %v7613_v9 = vsub.s32 %v7528_v3, %v4435_v60  ;;  %v4007_v0 = vadd.f32 %v7495_v26, %v3854_v10 }
 0x2bc   : > { %v7509_v27 = vpop.f32.mrf.mxu0  ;;  %v7588_v12 = vsub.s32 %v4366_v1, %v4413_v8  ;;  %v4445_v1 = vshrl.u32 %v7560_v62, 3 }
 0x2bd   : > { %v5811_v14 = vpop.f32.mrf.mxu1  ;;  %vm4487_vm5 = vcmp.ne.s32.totalorder %v7598_v23, 0  ;;  %vm4497_vm6 = vcmp.lt.s32.totalorder %v7598_v23, 0  ;;  %v7657_v28 = vadd.s32 10, %v7598_v23  ;;  %vm4488_vm9 = vcmp.ne.s32.totalorder %v7613_v9, 0 }
 0x2be   : > { %v5829_v25 = vpop.f32.mrf.mxu0  ;;  %v7581_v14 = vsub.s32 %v4365_v43, %v4402_v34  ;;  %vm4486_vm0 = vcmp.ne.s32.totalorder %v7588_v12, 0  ;;  %vm4496_vm1 = vcmp.lt.s32.totalorder %v7588_v12, 0  ;;  %v4516_v34 = vadd.s32 10, %v7588_v12  ;;  %vm7682_vm11 = vmand %vm4497_vm6, %vm4487_vm5 }
 0x2bf   : > { %v7530_v39 = vpop.f32.mrf.mxu1  ;;  %v7568_v25 = vsub.s32 %v4364_v37, %v4391_v13  ;;  %v4446_v33 = vmul.u32 10, %v4445_v1  ;;  %vm7652_vm8 = vmand %vm4496_vm1, %vm4486_vm0  ;;  %vm4498_vm10 = vcmp.lt.s32.totalorder %v7613_v9, 0 }
 0x2c0   : > { %v7522_v22 = vpop.f32.mrf.mxu0  ;;  %vm4485_vm14 = vcmp.ne.s32.totalorder %v7581_v14, 0  ;;  %vm4495_vm15 = vcmp.lt.s32.totalorder %v7581_v14, 0  ;;  %v4515_v13 = vadd.s32 10, %v7581_v14  ;;  %v4526_v1 = vsel %vm7652_vm8, %v4516_v34, %v7588_v12 }
 0x2c1   : > { %v5814_v18 = vpop.f32.mrf.mxu1  ;;  %vm4484_vm12 = vcmp.ne.s32.totalorder %v7568_v25, 0  ;;  %vm4494_vm13 = vcmp.lt.s32.totalorder %v7568_v25, 0  ;;  %v4514_v7 = vadd.s32 10, %v7568_v25  ;;  %vm7635_vm4 = vmand %vm4495_vm15, %vm4485_vm14  ;;  %vm7730_vm0 = vcmp.lt.s32.totalorder %v4526_v1, 8 }
 0x2c2   : > { %v5832_v59 = vpop.f32.mrf.mxu0  ;;  %vm7623_vm3 = vmand %vm4494_vm13, %vm4484_vm12  ;;  %v4525_v15 = vsel %vm7635_vm4, %v4515_v13, %v7581_v14  ;;  %vm4573_vm12 = vcmask 261120   ;;  %v7693_v14 = vsub.s32 %v7546_v24, %v4446_v33  ;;  %v4008_v13 = vadd.f32 %v7503_v44, %v3855_v52 }
 0x2c3   : > { %v7542_v47 = vpop.f32.mrf.mxu1  ;;  %v4524_v60 = vsel %vm7623_vm3, %v4514_v7, %v7568_v25  ;;  %v7690_v25 = vadd.s32 10, %v7613_v9  ;;  %vm7702_vm13 = vmand %vm4498_vm10, %vm4488_vm9  ;;  %vm7716_vm15 = vcmp.lt.s32.totalorder %v4525_v15, 8  ;;  %v7725_v7 = vadd.s32 72, %v7493_v29 }
 0x2c4   : > { %v7535_v57 = vpop.f32.mrf.mxu0  ;;  %vm7712_vm14 = vcmp.lt.s32.totalorder %v4524_v60, 8  ;;  %vm4489_vm1 = vcmp.ne.s32.totalorder %v7693_v14, 0  ;;  %vm4499_vm3 = vcmp.lt.s32.totalorder %v7693_v14, 0  ;;  %v3856_v44 = vadd.f32 %v7497_v41, %v7471_v16 }
 0x2c5   : > { %v5815_v38 = vpop.f32.mrf.mxu1  ;;  %vm7760_vm4 = vmand %vm4499_vm3, %vm4489_vm1 }
 0x2c6   : > { %v5833_v20 = vpop.f32.mrf.mxu0  ;;  %v7616_v38 = vadd.s32 64, %v7493_v29  ;;  %v7741_v29 = vadd.s32 10, %v7693_v14 }
 0x2c7   : > { %v7554_v56 = vpop.f32.mrf.mxu1  ;;  %v7605_v50 = vmul.u32.u64.low 3435973837, %v7584_v48  ;;  %v7606_v20 = vmul.u32.u64.high 3435973837, %v7584_v48, %v7605_v50 }
 0x2c8   : > { %v7551_v49 = vpop.f32.mrf.mxu0  ;;  %v7667_v63 = vmul.u32.u64.low 3435973837, %v7616_v38  ;;  %v7668_v17 = vmul.u32.u64.high 3435973837, %v7616_v38, %v7667_v63  ;;  %v4529_v31 = vsel %vm7760_vm4, %v7741_v29, %v7693_v14 }
 0x2c9   : > { %v5818_v6 = vpop.f32.mrf.mxu1  ;;  %v4456_v12 = vshrl.u32 %v7606_v20, 3  ;;  %v4527_v20 = vsel %vm7682_vm11, %v7657_v28, %v7598_v23  ;;  %v4528_v23 = vsel %vm7702_vm13, %v7690_v25, %v7613_v9  ;;  %vm7824_vm10 = vcmp.lt.s32.totalorder %v4529_v31, 8 }
 0x2ca   : > { %v5836_v19 = vpop.f32.mrf.mxu0  ;;  %v4467_v9 = vshrl.u32 %v7668_v17, 3  ;;  %v3857_v17 = vadd.f32 %v7506_v2, %v7473_v54  ;;  %vm7768_vm5 = vcmp.lt.s32.totalorder %v4527_v20, 8  ;;  %vm7790_vm6 = vcmp.lt.s32.totalorder %v4528_v23, 8 }
 0x2cb   : > { %v7570_v35 = vpop.f32.mrf.mxu1  ;;  %v4457_v8 = vmul.u32 10, %v4456_v12 }
 0x2cc   : > { %v7564_v36 = vpop.f32.mrf.mxu0  ;;  %v4010_v54 = vadd.f32 %v7522_v22, %v3857_v17  ;;  %v3858_v22 = vadd.f32 %v7515_v42, %v7475_v30 }
 0x2cd   : > { %v5819_v59 = vpop.f32.mrf.mxu1 }
 0x2ce   : > { %v5837_v51 = vpop.f32.mrf.mxu0  ;;  %v4011_v30 = vadd.f32 %v7535_v57, %v3858_v22 }
 0x2cf   : > { %v4127_v18 = vpop.f32.mrf.mxu1 }
 0x2d0   : > { %v7586_v37 = vpop.f32.mrf.mxu0  ;;  %v4166_v62 = vadd.f32 %v4127_v18, %v4006_v45  ;;  %v7776_v45 = vsub.s32 %v7584_v48, %v4457_v8 }
 0x2d1   : > { %v5846_v11 = vpop.f32.mrf.mxu1 }
 0x2d2   : > { %v5840_v43 = vpop.f32.mrf.mxu0  ;;  %vm4500_vm8 = vcmp.lt.s32.totalorder %v7776_v45, 0 }
 0x2d3   : > { %v4130_v3 = vpop.f32.mrf.mxu1 }
 0x2d4   : > { %v7608_v55 = vpop.f32.mrf.mxu0  ;;  %v4167_v50 = vadd.f32 %v4130_v3, %v4007_v0  ;;  %v7750_v63 = vmul.u32.u64.low 3435973837, %v7725_v7  ;;  %v7751_v0 = vmul.u32.u64.high 3435973837, %v7725_v7, %v7750_v63 }
 0x2d5   : > { %v5847_v4 = vpop.f32.mrf.mxu1  ;;  %v3859_v63 = vadd.f32 %v7530_v39, %v7477_v46 }
 0x2d6   : > { %v5841_v19 = vpop.f32.mrf.mxu0  ;;  %v4478_v23 = vshrl.u32 %v7751_v0, 3 }
 0x2d7   : > { %v4135_v43 = vpop.f32.mrf.mxu1  ;;  %v4012_v39 = vadd.f32 %v7551_v49, %v3859_v63 }
 0x2d8   : > { %v4245_v51 = vpop.f32.mrf.mxu0 }
 0x2d9   : > { %v4284_v59 = vadd.f32 %v4245_v51, %v4166_v62  ;;  %v5850_v24 = vpop.f32.mrf.mxu1  ;;  %v4168_v62 = vadd.f32 %v4135_v43, %v4008_v13 }
 0x2da   : > { %v5868_v26 = vpop.f32.mrf.mxu0 }
 0x2db   : > { %v4301_v11 = vadd.f32 %v7662_v21, %v4284_v59  ;;  %v4138_v34 = vpop.f32.mrf.mxu1  ;;  %v4009_v59 = vadd.f32 %v7509_v27, %v3856_v44 }
 0x2dc   : > { %v4248_v32 = vpop.f32.mrf.mxu0 }
 0x2dd   : > { %v5120_v3 = vpack.c.bf16 %v4301_v11, %v4301_v11  ;;  %v4563_v19 = vsel %vm7644_vm7, %v4301_v11, 0.0  ;;  %v4285_v58 = vadd.f32 %v4248_v32, %v4167_v50  ;;  %v5851_v4 = vpop.f32.mrf.mxu1  ;;  %v4169_v52 = vadd.f32 %v4138_v34, %v4009_v59 }
 0x2de   : > { %v5869_v33 = vpop.f32.mrf.mxu0  ;;  %v4601_v28 = vmul.f32 %v4563_v19, %v4563_v19  ;;  %v4574_v18 = vsel %vm4573_vm12, %v4563_v19, 0.0  ;;  %vm4490_vm7 = vcmp.ne.s32.totalorder %v7776_v45, 0 }
 0x2df   : > { %4352 = vst.msk [vmem:[%s7710_s20] sm:$0xf] %vm4351_vm2, %v5120_v3  ;;  %v4302_v6 = vadd.f32 %v7662_v21, %v4285_v58  ;;  %v4143_v26 = vpop.f32.mrf.mxu1  ;;  %vm7815_vm9 = vmand %vm4500_vm8, %vm4490_vm7 }
 0x2e0   : > { %v4253_v51 = vpop.f32.mrf.mxu0  ;;  %v4611_v2 = vsel %vm4573_vm12, %v4601_v28, 0.0  ;;  %v4170_v14 = vadd.f32 %v4143_v26, %v4010_v54 }
 0x2e1   : > { %v5121_v60 = vpack.c.bf16 %v4302_v6, %v4302_v6  ;;  %v4564_v16 = vsel %vm7712_vm14, %v4302_v6, 0.0  ;;  %v4286_v41 = vadd.f32 %v4253_v51, %v4168_v62  ;;  %v5854_v24 = vpop.f32.mrf.mxu1  ;;  %v4468_v62 = vmul.u32 10, %v4467_v9 }
 0x2e2   : > { %v4575_v27 = vsel %vm4573_vm12, %v4564_v16, 0.0  ;;  %v4602_v43 = vmul.f32 %v4564_v16, %v4564_v16  ;;  %v5872_v1 = vpop.f32.mrf.mxu0 }
 0x2e3   : > { %4353 = vst.msk [vmem:[%s7710_s20 + $0x4] sm:$0xf] %vm4351_vm2, %v5121_v60  ;;  %v4576_v50 = vadd.f32 %v4575_v27, %v4574_v18  ;;  %v4303_v11 = vadd.f32 %v7662_v21, %v4286_v41  ;;  %v4146_v34 = vpop.f32.mrf.mxu1  ;;  %v4520_v41 = vadd.s32 10, %v7776_v45  ;;  %v7820_v46 = vsub.s32 %v7616_v38, %v4468_v62 }
 0x2e4   : > { %v4612_v12 = vsel %vm4573_vm12, %v4602_v43, 0.0  ;;  %v4256_v32 = vpop.f32.mrf.mxu0  ;;  %v4171_v15 = vadd.f32 %v4146_v34, %v4011_v30  ;;  %v4479_v1 = vmul.u32 10, %v4478_v23  ;;  %v3860_v38 = vadd.f32 %v7542_v47, %v7479_v53 }
 0x2e5   : > { %v4613_v20 = vadd.f32 %v4612_v12, %v4611_v2  ;;  %v5122_v13 = vpack.c.bf16 %v4303_v11, %v4303_v11  ;;  %v4565_v48 = vsel %vm7716_vm15, %v4303_v11, 0.0  ;;  %v4287_v3 = vadd.f32 %v4256_v32, %v4169_v52  ;;  %v5855_v6 = vpop.f32.mrf.mxu1 }
 0x2e6   : > { %v4577_v19 = vsel %vm4573_vm12, %v4565_v48, 0.0  ;;  %v4603_v58 = vmul.f32 %v4565_v48, %v4565_v48  ;;  %v5873_v33 = vpop.f32.mrf.mxu0  ;;  %v4530_v32 = vsel %vm7815_vm9, %v4520_v41, %v7776_v45  ;;  %vm4491_vm11 = vcmp.ne.s32.totalorder %v7820_v46, 0 }
 0x2e7   : > { %4354 = vst.msk [vmem:[%s7710_s20 + $0x8] sm:$0xf] %vm4351_vm2, %v5122_v13  ;;  %v4578_v29 = vadd.f32 %v4577_v19, %v4576_v50  ;;  %v4304_v40 = vadd.f32 %v7662_v21, %v4287_v3  ;;  %v4151_v60 = vpop.f32.mrf.mxu1  ;;  %v4013_v13 = vadd.f32 %v7564_v36, %v3860_v38  ;;  %vm4501_vm13 = vcmp.lt.s32.totalorder %v7820_v46, 0 }
 0x2e8   : > { %v4614_v42 = vsel %vm4573_vm12, %v4603_v58, 0.0  ;;  %v4261_v8 = vpop.f32.mrf.mxu0  ;;  %v4172_v31 = vadd.f32 %v4151_v60, %v4012_v39  ;;  %v7844_v3 = vsub.s32 %v7725_v7, %v4479_v1  ;;  %v3861_v34 = vadd.f32 %v7554_v56, %v7481_v61  ;;  %vm7863_vm15 = vmand %vm4501_vm13, %vm4491_vm11 }
 0x2e9   : > { %v4615_v28 = vadd.f32 %v4614_v42, %v4613_v20  ;;  %v5123_v4 = vpack.c.bf16 %v4304_v40, %v4304_v40  ;;  %v4566_v51 = vsel %vm7730_vm0, %v4304_v40, 0.0  ;;  %v4288_v9 = vadd.f32 %v4261_v8, %v4170_v14  ;;  %v5858_v27 = vpop.f32.mrf.mxu1 }
 0x2ea   : > { %v4579_v57 = vsel %vm4573_vm12, %v4566_v51, 0.0  ;;  %v4604_v59 = vmul.f32 %v4566_v51, %v4566_v51  ;;  %v5876_v16 = vpop.f32.mrf.mxu0  ;;  %vm7855_vm14 = vcmp.lt.s32.totalorder %v4530_v32, 8  ;;  %v4014_v56 = vadd.f32 %v7586_v37, %v3861_v34 }
 0x2eb   : > { %4355 = vst.msk [vmem:[%s7710_s20 + $0xc] sm:$0xf] %vm4351_vm2, %v5123_v4  ;;  %v4580_v0 = vadd.f32 %v4579_v57, %v4578_v29  ;;  %v4305_v17 = vadd.f32 %v7662_v21, %v4288_v9  ;;  %v4154_v12 = vpop.f32.mrf.mxu1  ;;  %v4521_v29 = vadd.s32 10, %v7820_v46  ;;  %vm4492_vm0 = vcmp.ne.s32.totalorder %v7844_v3, 0 }
 0x2ec   : > { %v4616_v18 = vsel %vm4573_vm12, %v4604_v59, 0.0  ;;  %v4264_v43 = vpop.f32.mrf.mxu0  ;;  %v4173_v40 = vadd.f32 %v4154_v12, %v4013_v13  ;;  %vm4502_vm1 = vcmp.lt.s32.totalorder %v7844_v3, 0  ;;  %v3862_v9 = vadd.f32 %v7570_v35, %v7485_v5 }
 0x2ed   : > { %v4617_v52 = vadd.f32 %v4616_v18, %v4615_v28  ;;  %v5124_v50 = vpack.c.bf16 %v4305_v17, %v4305_v17  ;;  %v4567_v11 = vsel %vm7768_vm5, %v4305_v17, 0.0  ;;  %v4289_v54 = vadd.f32 %v4264_v43, %v4171_v15  ;;  %v5859_v47 = vpop.f32.mrf.mxu1  ;;  %vm7889_vm3 = vmand %vm4502_vm1, %vm4492_vm0 }
 0x2ee   : > { %v4581_v49 = vsel %vm4573_vm12, %v4567_v11, 0.0  ;;  %v4605_v2 = vmul.f32 %v4567_v11, %v4567_v11  ;;  %v5877_v24 = vpop.f32.mrf.mxu0  ;;  %v4531_v60 = vsel %vm7863_vm15, %v4521_v29, %v7820_v46  ;;  %v4015_v5 = vadd.f32 %v7608_v55, %v3862_v9 }
 0x2ef   : > { %4356 = vst.msk [vmem:[%s7710_s20 + $0x10] sm:$0xf] %vm4351_vm2, %v5124_v50  ;;  %v4582_v20 = vadd.f32 %v4581_v49, %v4580_v0  ;;  %v4306_v25 = vadd.f32 %v7662_v21, %v4289_v54  ;;  %v4159_v62 = vpop.f32.mrf.mxu1  ;;  %v4522_v0 = vadd.s32 10, %v7844_v3  ;;  %vm4541_vm4 = vcmp.lt.s32.totalorder %v4531_v60, 8 }
 0x2f0   : > { %v4618_v53 = vsel %vm4573_vm12, %v4605_v2, 0.0  ;;  %v4269_v48 = vpop.f32.mrf.mxu0  ;;  %v4174_v16 = vadd.f32 %v4159_v62, %v4014_v56 }
 0x2f1   : > { %v4619_v45 = vadd.f32 %v4618_v53, %v4617_v52  ;;  %v5125_v22 = vpack.c.bf16 %v4306_v25, %v4306_v25  ;;  %v4568_v19 = vsel %vm7790_vm6, %v4306_v25, 0.0  ;;  %v4290_v58 = vadd.f32 %v4269_v48, %v4172_v31  ;;  %v5862_v6 = vpop.f32.mrf.mxu1 }
 0x2f2   : > { %v4583_v36 = vsel %vm4573_vm12, %v4568_v19, 0.0  ;;  %v4606_v33 = vmul.f32 %v4568_v19, %v4568_v19  ;;  %v5880_v14 = vpop.f32.mrf.mxu0  ;;  %v4532_v54 = vsel %vm7889_vm3, %v4522_v0, %v7844_v3 }
 0x2f3   : > { %4357 = vst.msk [vmem:[%s7710_s20 + $0x14] sm:$0xf] %vm4351_vm2, %v5125_v22  ;;  %v4584_v7 = vadd.f32 %v4583_v36, %v4582_v20  ;;  %v4307_v30 = vadd.f32 %v7662_v21, %v4290_v58  ;;  %v4162_v57 = vpop.f32.mrf.mxu1  ;;  %vm4542_vm5 = vcmp.lt.s32.totalorder %v4532_v54, 8 }
 0x2f4   : > { %v4620_v42 = vsel %vm4573_vm12, %v4606_v33, 0.0  ;;  %v4272_v8 = vpop.f32.mrf.mxu0  ;;  %v4175_v52 = vadd.f32 %v4162_v57, %v4015_v5 }
 0x2f5   : > { %v4621_v23 = vadd.f32 %v4620_v42, %v4619_v45  ;;  %v5126_v28 = vpack.c.bf16 %v4307_v30, %v4307_v30  ;;  %v4569_v4 = vsel %vm7824_vm10, %v4307_v30, 0.0  ;;  %v4291_v51 = vadd.f32 %v4272_v8, %v4173_v40  ;;  %v5863_v17 = vpop.f32.mrf.mxu1 }
 0x2f6   : > { %v4585_v37 = vsel %vm4573_vm12, %v4569_v4, 0.0  ;;  %v4607_v63 = vmul.f32 %v4569_v4, %v4569_v4  ;;  %v5881_v59 = vpop.f32.mrf.mxu0 }
 0x2f7   : > { %4358 = vst.msk [vmem:[%s7710_s20 + $0x18] sm:$0xf] %vm4351_vm2, %v5126_v28  ;;  %v4586_v41 = vadd.f32 %v4585_v37, %v4584_v7  ;;  %v4308_v15 = vadd.f32 %v7662_v21, %v4291_v51 }
 0x2f8   : > { %v4622_v35 = vsel %vm4573_vm12, %v4607_v63, 0.0  ;;  %v4277_v10 = vpop.f32.mrf.mxu0 }
 0x2f9   : > { %v4623_v39 = vadd.f32 %v4622_v35, %v4621_v23  ;;  %v5127_v18 = vpack.c.bf16 %v4308_v15, %v4308_v15  ;;  %v4570_v27 = vsel %vm7855_vm14, %v4308_v15, 0.0  ;;  %v4292_v43 = vadd.f32 %v4277_v10, %v4174_v16 }
 0x2fa   : > { %v4587_v55 = vsel %vm4573_vm12, %v4570_v27, 0.0  ;;  %v4608_v26 = vmul.f32 %v4570_v27, %v4570_v27  ;;  %v5884_v1 = vpop.f32.mrf.mxu0 }
 0x2fb   : > { %4359 = vst.msk [vmem:[%s7710_s20 + $0x1c] sm:$0xf] %vm4351_vm2, %v5127_v18  ;;  %v4588_v50 = vadd.f32 %v4587_v55, %v4586_v41  ;;  %v4309_v11 = vadd.f32 %v7662_v21, %v4292_v43 }
 0x2fc   : > { %v4624_v38 = vsel %vm4573_vm12, %v4608_v26, 0.0  ;;  %v4280_v49 = vpop.f32.mrf.mxu0 }
 0x2fd   : > { %v4625_v2 = vadd.f32 %v4624_v38, %v4623_v39  ;;  %v5128_v12 = vpack.c.bf16 %v4309_v11, %v4309_v11  ;;  %v4571_v24 = vsel %vm4541_vm4, %v4309_v11, 0.0  ;;  %v4293_v32 = vadd.f32 %v4280_v49, %v4175_v52 }
 0x2fe   : > { %v4589_v31 = vsel %vm4573_vm12, %v4571_v24, 0.0  ;;  %v4609_v20 = vmul.f32 %v4571_v24, %v4571_v24  ;;  %v5885_v25 = vpop.f32.mrf.mxu0 }
 0x2ff   : > { %4360 = vst.msk [vmem:[%s7710_s20 + $0x20] sm:$0xf] %vm4351_vm2, %v5128_v12  ;;  %v4590_v13 = vadd.f32 %v4589_v31, %v4588_v50  ;;  %v4310_v53 = vadd.f32 %v7662_v21, %v4293_v32 }
 0x300   : > { %v4626_v47 = vsel %vm4573_vm12, %v4609_v20, 0.0 }
 0x301   : > { %v4627_v48 = vadd.f32 %v4626_v47, %v4625_v2  ;;  %v5129_v3 = vpack.c.bf16 %v4310_v53, %v4310_v53  ;;  %v4572_v45 = vsel %vm4542_vm5, %v4310_v53, 0.0 }
 0x302   : > { %v4591_v22 = vsel %vm4573_vm12, %v4572_v45, 0.0  ;;  %v4610_v19 = vmul.f32 %v4572_v45, %v4572_v45 }
 0x303   : > { %4361 = vst.msk [vmem:[%s7710_s20 + $0x24] sm:$0xf] %vm4351_vm2, %v5129_v3  ;;  %v4592_v58 = vadd.f32 %v4591_v22, %v4590_v13  ;;  %vm4599_vm2 = vcmask 253952  }
 0x304   : > { %v4628_v34 = vsel %vm4573_vm12, %v4610_v19, 0.0 }
 0x305   : > { %v4593_v36 = vrot.slane %v4592_v58, 4  ;;  %v4629_v33 = vadd.f32 %v4628_v34, %v4627_v48 }
 0x307   : > { %v4594_v62 = vadd.f32 %v4593_v36, %v4592_v58  ;;  %v4630_v14 = vrot.slane %v4629_v33, 4 }
 0x309   : > { %v4595_v21 = vrot.slane %v4594_v62, 2  ;;  %v4631_v29 = vadd.f32 %v4630_v14, %v4629_v33 }
 0x30b   : > { %v4596_v40 = vadd.f32 %v4595_v21, %v4594_v62  ;;  %v4632_v7 = vrot.slane %v4631_v29, 2 }
 0x30d   : > { %v4597_v30 = vrot.slane %v4596_v40, 1  ;;  %v4633_v44 = vadd.f32 %v4632_v7, %v4631_v29 }
 0x30f   : > { %v4598_v61 = vadd.f32 %v4597_v30, %v4596_v40  ;;  %v4634_v56 = vrot.slane %v4633_v44, 1 }
 0x311   : > { %4600 = vst.msk [vmem:[%s426_s17] sm:$0x1] %vm4599_vm2, %v4598_v61  ;;  %v4635_v42 = vadd.f32 %v4634_v56, %v4633_v44 }
 0x313   : > { %4636 = vst.msk [vmem:[%s433_s9] sm:$0x1] %vm4599_vm2, %v4635_v42 }
 0x314 PF: > { %s18_s28 = sadd.s32 1, %s6073_s28   ;;  %s7980_s24 = smov %s6065_s26 }
 0x315   : > { %p15_p10 = scmp.ge.s32.totalorder %s18_s28, 18   ;;  %s7981_s25 = smov %s6069_s27 }
 0x316   : > { %s7982_s26 = smov %s7985_s29  ;;  %s7983_s27 = smov %s7989_s30 }
 0x317   :  { %17 = sbr.rel (!%p15_p10) target bundleno = 3 (0x3), region = 126 }

// kernel: down_transition.6
= control target key start
LH: loop header
LB: loop body
LE: loop exit
PB: predicated region body
PF: predicated region fallthrough
CT: control target
= control target key end

     0   :  { %s6709_s24 = smov 0   ;;  %s6711_s25 = smov 0   ;;  %s8603_s0 = inlined_call_operand.vmem [shape: bf16[2,10,110,32], index: 0, kind: input, shape index: {}, may-alias: {0,1,2}]   ;;  %s8604_s1 = inlined_call_operand.vmem [shape: bf16[2,10,110,32], index: 1, kind: input, shape index: {}, may-alias: {0,1,2}]   ;;  %s8605_s2 = inlined_call_operand.vmem [shape: bf16[2,10,110,32], index: 2, kind: input, shape index: {}, may-alias: {0,1,2}]   ;;  %s8606_s3 = inlined_call_operand.vmem [shape: bf16[3,3,3,32,64], index: 3, kind: input, shape index: {}]   ;;  %s8607_s4 = inlined_call_operand.vmem [shape: f32[1,64], index: 4, kind: input, shape index: {}]   ;;  %s8608_s5 = inlined_call_operand.vmem [shape: bf16[2,8,80,64], index: 5, kind: output, shape index: {0}]   ;;  %s8609_s6 = inlined_call_operand.vmem [shape: f32[2,8,1,64], index: 6, kind: output, shape index: {1}]   ;;  %s8610_s7 = inlined_call_operand.vmem [shape: f32[2,8,1,64], index: 7, kind: output, shape index: {2}]  }
   0x1   :  { %s6713_s26 = smov 0   ;;  %s6715_s27 = smov 0  }
   0x2   :  { %s6717_s28 = smov 0  }
   0x3 LB: > { %s27_s29 = sadd.s32 1, %s6657_s26  ;;  %s30_s30 = sadd.s32 1, %s6661_s27  ;;  %s6665_s28 = sphi %s6717_s28, %s18_s28   ;;  %s6661_s27 = sphi %s6715_s27, %s8650_s27   ;;  %s6657_s26 = sphi %s6713_s26, %s8649_s26   ;;  %s6653_s25 = sphi %s6711_s25, %s8648_s25   ;;  %s6649_s24 = sphi %s6709_s24, %s8647_s24  }
   0x4   : > { %p28_p0 = scmp.ge.s32.totalorder %s27_s29, 8  ;;  %p5183_p1 = scmp.ge.s32.totalorder %s6665_s28, 1 }
   0x5   : > { %p306_p2 = scmp.lt.s32.totalorder %s6665_s28, 17 }
   0x6   : > { %s8652_s29 = smov (%p28_p0, %s27_s29), 0  ;;  %s8654_s30 = smov (!%p28_p0, %s30_s30), %s6661_s27 }
   0x7   : > { %p307_p3 = pnand %p5183_p1, %p306_p2  ;;  %p32_p4 = scmp.ge.s32.totalorder %s8654_s30, 2 }
   0x8   : > { %p380_p5 = scmp.lt.s32.totalorder (!%p307_p3), %s6653_s25, 1  ;;  %p382_p6 = scmp.lt.s32.totalorder (!%p307_p3), %s6649_s24, 9 }
   0x9   : > { %s8656_s30 = smov (%p32_p4, %s8654_s30), 0  ;;  %310 = sbr.rel (%p307_p3) target bundleno = 788 (0x314), region = 40 }
   0xa   : > { %s400_s10 = sadd.s32 (!%p307_p3), 2, %s6649_s24  ;;  %p413_p9 = scmp.lt.s32.totalorder (!%p307_p3), %s6649_s24, 7 }
   0xb   : > { %p403_p8 = scmp.lt.s32.totalorder (!%p307_p3), %s400_s10, 9 }
   0xe   : > { %v6494_v0 = vld [vmem:[%s8606_s3 + $0x18] sm:$0xff]   ;;  %v6667_v1 = vmov 0.0   ;;  %v6495_v2 = vld [vmem:[%s8606_s3 + $0x10] sm:$0xff]   ;;  %vm6668_vm0 = vmmov 0   ;;  %s8658_s25 = smov (!%p380_p5, %s6653_s25), 1  ;;  %vm540_vm2 = vcmask 261120  }
   0xf   : > { %5774 = vmatprep.subr.bf16.mxu0 %v6667_v1  ;;  %6422 = vmatprep.subr.bf16.mxu1 %v6667_v1  ;;  %s383_s12 = scalar_select %p382_p6, %s6649_s24, 9  ;;  %vm483_vm1 = vsmask.f32 7424  ;;  %v6500_v18 = vld [vmem:[%s8606_s3 + $0x28] sm:$0xff]   ;;  %v6504_v33 = vld [vmem:[%s8606_s3 + $0x20] sm:$0xff]   ;;  %v6506_v44 = vld [vmem:[%s8606_s3 + $0x38] sm:$0xff]  }
  0x10   : > { %5775 = vmatpush3.bf16.msra.mxu0 %v6494_v0  ;;  %6424 = vmatpush3.bf16.msra.mxu1 %v6494_v0  ;;  %s6760_s13 = smul.u32 140, %s8658_s25  ;;  %v6501_v27 = vld [vmem:[%s8606_s3 + $0x8] sm:$0xff]   ;;  %v6505_v36 = vld [vmem:[%s8606_s3] sm:$0xff]   ;;  %vm733_vm3 = vcmask 1046528   ;;  %v6509_v47 = vld [vmem:[%s8606_s3 + $0x30] sm:$0xff]   ;;  %s8662_s10 = smov (!%p403_p8, %s400_s10), 9 }
  0x11   : > { %5776 = vmatprep.subr.bf16.mxu0 %v6667_v1  ;;  %6423 = vmatprep.subr.bf16.mxu1 %v6667_v1  ;;  %s6426_s14 = smul.u32 14, %s383_s12  ;;  %s389_s12 = sadd.s32 1, %s6649_s24  ;;  %v6508_v49 = vld [vmem:[%s8606_s3 + $0x48] sm:$0xff]   ;;  %v6510_v51 = vld [vmem:[%s8606_s3 + $0x40] sm:$0xff]   ;;  %vm1029_vm4 = vsmask.f32 6400 }
  0x12   : > { %5778 = vmatprep.mubr.msk.bf16.mxu0 %vm6668_vm0, %v6667_v1  ;;  %5790 = vmatprep.mubr.msk.bf16.mxu1 %vm6668_vm0, %v6667_v1  ;;  %p392_p7 = scmp.lt.s32.totalorder %s389_s12, 9  ;;  %vm1202_vm5 = vcmask 1045504   ;;  %vm1498_vm6 = vsmask.f32 5376  ;;  %vm1671_vm7 = vcmask 1044480   ;;  %s8664_s24 = smov (!%p413_p9, %s6649_s24), 7 }
  0x13   : > { %s386_s15 = sadd.s32 %s6760_s13, %s6426_s14 }
  0x14   : > { %5777 = vmatpush3.bf16.msra.mxu0 %v6495_v2  ;;  %6425 = vmatpush3.bf16.msra.mxu1 %v6495_v2  ;;  %s5184_s16 = sshll.u32 %s386_s15, 2  ;;  %s8660_s12 = smov (!%p392_p7, %s389_s12), 9 }
  0x15   : > { %5822 = vmatprep.subr.bf16.mxu0 %v6667_v1  ;;  %5798 = vmatprep.subr.bf16.mxu1 %v6667_v1  ;;  %s6768_s19 = scalar_lea.vmem %s8603_s0, %s5184_s16  ;;  %s6428_s18 = smul.u32 14, %s8660_s12 }
  0x16   : > { %v435_v3 = vld [vmem:[%s6768_s19] sm:$0xf]  ;;  %v6772_v4 = vld [vmem:[%s6768_s19 + $0x4] sm:$0xf]  ;;  %v6778_v6 = vld [vmem:[%s6768_s19 + $0x8] sm:$0xff]   ;;  %s6429_s15 = smul.u32 14, %s8662_s10 }
  0x17   : > { %v6775_v5 = vcombine.low %v435_v3, %v6772_v4  ;;  %v492_v9 = vshll.u32 %v6778_v6, 16  ;;  %v6784_v10 = vld [vmem:[%s6768_s19 + $0x18] sm:$0xff]   ;;  %v6787_v11 = vld [vmem:[%s6768_s19 + $0x20] sm:$0xff]   ;;  %v6790_v12 = vld [vmem:[%s6768_s19 + $0x10] sm:$0xff]   ;;  %v496_v21 = vshrl.u32 %v6778_v6, 16  ;;  %v735_v46 = vrot.slane %v6778_v6, 1  ;;  %s396_s22 = sadd.s32 %s6428_s18, %s6760_s13 }
  0x18   : > { %v508_v15 = vshll.u32 %v6784_v10, 16  ;;  %v512_v16 = vshrl.u32 %v6784_v10, 16  ;;  %v516_v17 = vshll.u32 %v6787_v11, 16  ;;  %v500_v22 = vshll.u32 %v6790_v12, 16  ;;  %v724_v41 = vld [vmem:[%s6768_s19] sm:$0xe]  ;;  %s6907_s16 = sadd.s32 %s6429_s15, %s6760_s13 }
  0x19   : > { %v485_v7 = vshrl.u32 %v6775_v5, 16  ;;  %v487_v8 = vshll.u32 %v6775_v5, 16  ;;  %v494_v14 = vrot.slane %v492_v9, 1  ;;  %v6801_v23 = vld [vmem:[%s6768_s19 + $0x28] ss:$0 sps:$4 sm:$0x11]   ;;  %v5218_v43 = vcombine.low %v724_v41, %v6772_v4 }
  0x1a   : > { %v510_v20 = vrot.slane %v508_v15, 1  ;;  %v518_v24 = vrot.slane %v516_v17, 1  ;;  %v520_v28 = vshrl.u32 %v6787_v11, 16  ;;  %v524_v29 = vshll.u32 %v6801_v23, 16  ;;  %s5185_s9 = sshll.u32 %s396_s22, 2  ;;  %v6903_v61 = vld [vmem:[%s6768_s19 + $0xc] sm:$0xff]  }
  0x1b   : > { %v489_v13 = vrot.slane %v487_v8, 1  ;;  %v498_v31 = vor.u32 %v496_v21, %v494_v14  ;;  %v502_v32 = vrot.slane %v500_v22, 1  ;;  %v504_v38 = vshrl.u32 %v6790_v12, 16  ;;  %s6878_s14 = scalar_lea.vmem %s8604_s1, %s5185_s9  ;;  %v855_v54 = vld [vmem:[%s6768_s19 + $0x4] sm:$0xe]  ;;  %s5186_s17 = sshll.u32 %s6907_s16, 2 }
  0x1c   : > { %v514_v26 = vor.u32 %v512_v16, %v510_v20  ;;  %v522_v34 = vor.u32 %v520_v28, %v518_v24  ;;  %v526_v35 = vrot.slane %v524_v29, 1  ;;  %v734_v45 = vrot.slane %v5218_v43, 1  ;;  %v6891_v56 = vld [vmem:[%s6768_s19 + $0x8] sm:$0xf]  ;;  %s6957_s10 = scalar_lea.vmem %s8605_s2, %s5186_s17  ;;  %v6519_v28 = vld [vmem:[%s8606_s3 + $0x60] sm:$0xff]   ;;  %s6430_s22 = smul.u32 10, %s8664_s24 }
  0x1d   : > { %v490_v19 = vor.u32 %v489_v13, %v485_v7  ;;  %v503_v37 = vsel %vm483_vm1, %v498_v31, %v502_v32  ;;  %v506_v40 = vor.u32 %v504_v38, %v502_v32  ;;  %v737_v50 = vrot.slane %v6790_v12, 1  ;;  %v6931_v13 = vld [vmem:[%s6768_s19 + $0x1c] sm:$0xff]   ;;  %s5188_s17 = sshll.u32 %s8658_s25, 3 }
  0x1e   : > { %v519_v30 = vsel %vm483_vm1, %v514_v26, %v518_v24  ;;  %v527_v39 = vsel %vm483_vm1, %v522_v34, %v526_v35  ;;  %v736_v48 = vsel %vm733_vm3, %v734_v45, %v735_v46  ;;  %v739_v53 = vrot.slane %v6784_v10, 1 }
  0x1f   : > { %v495_v25 = vsel %vm483_vm1, %v490_v19, %v494_v14  ;;  %5791 = vmatmul.mubr.msk.bf16.vlgmr.msra.gmra.mxu1 %vm540_vm2, %v519_v30  ;;  %v511_v42 = vsel %vm483_vm1, %v506_v40, %v510_v20  ;;  %v738_v52 = vsel %vm733_vm3, %v735_v46, %v737_v50  ;;  %v741_v57 = vrot.slane %v6787_v11, 1  ;;  %v6518_v19 = vld [vmem:[%s8606_s3 + $0x50] sm:$0xff]   ;;  %v6515_v20 = vld [vmem:[%s8606_s3 + $0x68] sm:$0xff]  }
  0x20   : > { %5779 = vmatmul.mubr.msk.bf16.vlgmr.msra.gmra.mxu0 %vm540_vm2, %v495_v25  ;;  %5799 = vmatpush3.bf16.msra.mxu1 %v6501_v27  ;;  %v740_v55 = vsel %vm733_vm3, %v737_v50, %v739_v53  ;;  %v5230_v58 = vcombine.low %v855_v54, %v6891_v56  ;;  %v1039_v63 = vshrl.u32 %v6903_v61, 16  ;;  %v1042_v0 = vshll.u32 %v6903_v61, 16 }
  0x21   : > { %5823 = vmatpush3.bf16.msra.mxu0 %v6500_v18  ;;  %5782 = vmatprep.mubr.msk.bf16.mxu0 %vm6668_vm0, %v6667_v1  ;;  %v742_v62 = vsel %vm733_vm3, %v739_v53, %v741_v57  ;;  %v743_v2 = vrot.slane %v6801_v23, 1  ;;  %v900_v4 = vrot.slane %v6903_v61, 1  ;;  %v6948_v23 = vld [vmem:[%s6768_s19 + $0x24] sm:$0xff]   ;;  %v904_v25 = vrot.slane %v6931_v13, 1 }
  0x22   : > { %5824 = vmatprep.subr.bf16.mxu0 %v6667_v1  ;;  %5794 = vmatprep.mubr.msk.bf16.mxu1 %vm6668_vm0, %v6667_v1  ;;  %v1031_v59 = vshrl.u32 %v5230_v58, 16  ;;  %v1034_v60 = vshll.u32 %v5230_v58, 16  ;;  %v899_v3 = vrot.slane %v5230_v58, 1  ;;  %v1041_v7 = vrot.slane %v1039_v63, 1  ;;  %v7018_v63 = vld [vmem:[%s6768_s19 + $0x10] sm:$0xff]  }
  0x23   : > { %5800 = vmatprep.subr.bf16.mxu1 %v6667_v1  ;;  %v1044_v8 = vrot.slane %v1042_v0, 2  ;;  %v744_v9 = vsel %vm733_vm3, %v741_v57, %v743_v2  ;;  %v1057_v26 = vshrl.u32 %v6931_v13, 16  ;;  %v1060_v29 = vshll.u32 %v6931_v13, 16  ;;  %v7007_v57 = vld [vmem:[%s6768_s19 + $0xc] sm:$0xf]  ;;  %v6523_v2 = vld [vmem:[%s8606_s3 + $0x78] sm:$0xff]  }
  0x24   : > { %5801 = vmatpush3.bf16.msra.mxu1 %v6505_v36  ;;  %v1066_v30 = vshrl.u32 %v6948_v23, 16  ;;  %v906_v35 = vrot.slane %v6948_v23, 1 }
  0x25   : > { %5825 = vmatpush3.bf16.msra.mxu0 %v6504_v33  ;;  %5846 = vmatprep.subr.bf16.mxu1 %v6667_v1  ;;  %v1045_v17 = vor.u32 %v1044_v8, %v1041_v7  ;;  %v1059_v32 = vrot.slane %v1057_v26, 1  ;;  %v1062_v33 = vrot.slane %v1060_v29, 2  ;;  %v6526_v7 = vld [vmem:[%s8606_s3 + $0x88] sm:$0xff]   ;;  %v7041_v8 = vld [vmem:[%s6768_s19 + $0x18] sm:$0xff]   ;;  %v1511_v26 = vshll.u32 %v7018_v63, 16 }
  0x26   : > { %5870 = vmatprep.subr.bf16.mxu0 %v6667_v1  ;;  %v1068_v38 = vrot.slane %v1066_v30, 1  ;;  %v907_v45 = vsel %vm733_vm3, %v904_v25, %v906_v35 }
  0x27   : > { %5795 = vmatmul.mubr.msk.bf16.gmra.mxu1 %vm540_vm2, %v527_v39  ;;  %v1069_v39 = vshll.u32 %v6948_v23, 16  ;;  %v1063_v40 = vor.u32 %v1062_v33, %v1059_v32  ;;  %v1513_v33 = vrot.slane %v1511_v26, 3  ;;  %v6539_v26 = vld [vmem:[%s6878_s14] sm:$0xff]  }
  0x28   : > { %5783 = vmatmul.mubr.msk.bf16.gmra.mxu0 %vm540_vm2, %v503_v37  ;;  %5802 = vmatprep.mubr.msk.bf16.mxu1 %vm6668_vm0, %v6667_v1  ;;  %v6520_v37 = vld [vmem:[%s6768_s19 + $0x2c] ss:$0 sps:$4 sm:$0x11]  }
  0x29   : > { %5786 = vmatprep.mubr.msk.bf16.mxu0 %vm6668_vm0, %v6667_v1  ;;  %v1071_v41 = vrot.slane %v1069_v39, 2  ;;  %v1520_v39 = vshll.u32 %v7041_v8, 16 }
  0x2f   : > { %5803 = vmatmul.mubr.msk.bf16.vlgmr.msra.gmra.mxu1 %vm540_vm2, %v6775_v5  ;;  %v1033_v5 = vrot.slane %v1031_v59, 1 }
  0x30   : > { %5787 = vmatmul.mubr.msk.bf16.gmra.mxu0 %vm540_vm2, %v511_v42  ;;  %5847 = vmatpush3.bf16.msra.mxu1 %v6506_v44  ;;  %v6988_v42 = vld [vmem:[%s6768_s19 + $0x2c] ss:$0 sps:$4 sm:$0x33]   ;;  %v908_v44 = vrot.slane %v6520_v37, 1 }
  0x31   : > { %5826 = vmatprep.mubr.msk.bf16.mxu0 %vm6668_vm0, %v6667_v1  ;;  %5806 = vmatprep.mubr.msk.bf16.mxu1 %vm6668_vm0, %v6667_v1  ;;  %v1075_v46 = vshrl.u32 %v6988_v42, 16 }
  0x32   : > { %5848 = vmatprep.subr.bf16.mxu1 %v6667_v1  ;;  %v909_v53 = vsel %vm733_vm3, %v906_v35, %v908_v44  ;;  %v1662_v35 = vld [vmem:[%s6768_s19 + $0x8] sm:$0x8] }
  0x34   : > { %5849 = vmatpush3.bf16.msra.mxu1 %v6509_v47  ;;  %v1078_v47 = vshll.u32 %v6988_v42, 16 }
  0x35   : > { %5894 = vmatprep.subr.bf16.mxu1 %v6667_v1 }
  0x36   : > { %v1080_v50 = vrot.slane %v1078_v47, 2  ;;  %v1673_v47 = vrot.slane %v7018_v63, 3 }
  0x37   : > { %5807 = vmatmul.mubr.msk.bf16.gmra.mxu1 %vm540_vm2, %v6778_v6  ;;  %v1036_v6 = vrot.slane %v1034_v60, 2  ;;  %v1204_v60 = vrot.slane %v6903_v61, 2 }
  0x38   : > { %5827 = vmatmul.mubr.msk.bf16.vlgmr.msra.gmra.mxu0 %vm540_vm2, %v736_v48  ;;  %5810 = vmatprep.mubr.msk.bf16.mxu1 %vm6668_vm0, %v6667_v1  ;;  %v1072_v48 = vor.u32 %v1071_v41, %v1068_v38  ;;  %v1517_v38 = vshrl.u32 %v7041_v8, 16  ;;  %v5300_v41 = vcombine.low %v1662_v35, %v7007_v57 }
  0x39   : > { %5871 = vmatpush3.bf16.msra.mxu0 %v6508_v49  ;;  %5830 = vmatprep.mubr.msk.bf16.mxu0 %vm6668_vm0, %v6667_v1  ;;  %v1037_v16 = vor.u32 %v1036_v6, %v1033_v5  ;;  %v1077_v49 = vrot.slane %v1075_v46, 1  ;;  %v6529_v5 = vld [vmem:[%s8606_s3 + $0x70] sm:$0xff]  }
  0x3a   : > { %5872 = vmatprep.subr.bf16.mxu0 %v6667_v1  ;;  %v1519_v44 = vrot.slane %v1517_v38, 2  ;;  %v1672_v46 = vrot.slane %v5300_v41, 3 }
  0x3b   : > { %v1046_v24 = vsel %vm1029_vm4, %v1037_v16, %v1045_v17  ;;  %v1081_v58 = vor.u32 %v1080_v50, %v1077_v49 }
  0x3d   : > { %5873 = vmatpush3.bf16.msra.mxu0 %v6510_v51  ;;  %v1193_v51 = vld [vmem:[%s6768_s19 + $0x4] sm:$0xc] }
  0x3e   : > { %5918 = vmatprep.subr.bf16.mxu0 %v6667_v1  ;;  %v5259_v54 = vcombine.low %v1193_v51, %v6891_v56  ;;  %v1082_v56 = vsel %vm1029_vm4, %v1072_v48, %v1081_v58  ;;  %v6536_v51 = vld [vmem:[%s8606_s3 + $0x90] sm:$0xff]   ;;  %v1675_v58 = vrot.slane %v7041_v8, 3 }
  0x3f   : > { %5811 = vmatmul.mubr.msk.bf16.gmra.mxu1 %vm540_vm2, %v6790_v12  ;;  %v6926_v12 = vld [vmem:[%s6768_s19 + $0x14] sm:$0xff]  }
  0x40   : > { %5831 = vmatmul.mubr.msk.bf16.gmra.mxu0 %vm540_vm2, %v738_v52  ;;  %5814 = vmatprep.mubr.msk.bf16.mxu1 %vm6668_vm0, %v6667_v1  ;;  %v1048_v14 = vshrl.u32 %v6926_v12, 16  ;;  %v1051_v15 = vshll.u32 %v6926_v12, 16  ;;  %v902_v18 = vrot.slane %v6926_v12, 1  ;;  %v1073_v52 = vsel %vm1029_vm4, %v1063_v40, %v1072_v48 }
  0x41   : > { %5834 = vmatprep.mubr.msk.bf16.mxu0 %vm6668_vm0, %v6667_v1  ;;  %v1203_v59 = vrot.slane %v5259_v54, 2 }
  0x42   : > { %v1050_v21 = vrot.slane %v1048_v14, 1  ;;  %v1053_v22 = vrot.slane %v1051_v15, 2  ;;  %v903_v27 = vsel %vm733_vm3, %v900_v4, %v902_v18  ;;  %v905_v36 = vsel %vm733_vm3, %v902_v18, %v904_v25  ;;  %v7059_v15 = vld [vmem:[%s6768_s19 + $0x20] sm:$0xff]  }
  0x43   : > { %v1205_v0 = vsel %vm1202_vm5, %v1203_v59, %v1204_v60  ;;  %v1508_v25 = vshrl.u32 %v7018_v63, 16  ;;  %v1526_v49 = vshrl.u32 %v7059_v15, 16  ;;  %v1529_v50 = vshll.u32 %v7059_v15, 16  ;;  %v6537_v59 = vld [vmem:[%s8606_s3 + $0xa0] sm:$0xff]  }
  0x44   : > { %v1054_v31 = vor.u32 %v1053_v22, %v1050_v21  ;;  %v1212_v22 = vrot.slane %v6988_v42, 2 }
  0x45   : > { %v1510_v32 = vrot.slane %v1508_v25, 2 }
  0x46   : > { %v1055_v34 = vsel %vm1029_vm4, %v1045_v17, %v1054_v31  ;;  %v1064_v43 = vsel %vm1029_vm4, %v1054_v31, %v1063_v40  ;;  %v1373_v17 = vrot.slane %v7059_v15, 2 }
  0x47   : > { %5815 = vmatmul.mubr.msk.bf16.gmra.mxu1 %vm540_vm2, %v6784_v10  ;;  %v6513_v10 = vld [vmem:[%s8606_s3 + $0x58] sm:$0xff]   ;;  %v1514_v37 = vor.u32 %v1513_v33, %v1510_v32  ;;  %v6544_v33 = vld [vmem:[%s8606_s3 + $0xc8] sm:$0xff]  }
  0x48   : > { %5835 = vmatmul.mubr.msk.bf16.gmra.mxu0 %vm540_vm2, %v740_v55  ;;  %5818 = vmatprep.mubr.msk.bf16.mxu1 %vm6668_vm0, %v6667_v1  ;;  %v1324_v55 = vld [vmem:[%s6768_s19 + $0x8] sm:$0xc] }
  0x49   : > { %5838 = vmatprep.mubr.msk.bf16.mxu0 %vm6668_vm0, %v6667_v1 }
  0x4f   : > { %5819 = vmatmul.mubr.msk.bf16.gmra.mxu1 %vm540_vm2, %v6787_v11  ;;  %v901_v11 = vsel %vm733_vm3, %v899_v3, %v900_v4  ;;  %v1369_v3 = vrot.slane %v7018_v63, 2  ;;  %v1206_v4 = vrot.slane %v6926_v12, 2  ;;  %v6530_v12 = vld [vmem:[%s8606_s3 + $0x80] sm:$0xff]   ;;  %v1676_v63 = vsel %vm1671_vm7, %v1673_v47, %v1675_v58 }
  0x50   : > { %5839 = vmatmul.mubr.msk.bf16.gmra.mxu0 %vm540_vm2, %v742_v62  ;;  %5850 = vmatprep.mubr.msk.bf16.mxu1 %vm6668_vm0, %v6667_v1  ;;  %v5271_v62 = vcombine.low %v1324_v55, %v7007_v57  ;;  %v1528_v55 = vrot.slane %v1526_v49, 2  ;;  %v1531_v57 = vrot.slane %v1529_v50, 3 }
  0x51   : > { %5842 = vmatprep.mubr.msk.bf16.mxu0 %vm6668_vm0, %v6667_v1 }
  0x52   : > { %v1368_v61 = vrot.slane %v5271_v62, 2 }
  0x54   : > { %v1370_v6 = vsel %vm1202_vm5, %v1368_v61, %v1369_v3 }
  0x57   : > { %5851 = vmatmul.mubr.msk.bf16.vlgmr.msra.gmra.mxu1 %vm540_vm2, %v901_v11  ;;  %v1208_v11 = vrot.slane %v6931_v13, 2  ;;  %v1210_v13 = vrot.slane %v6948_v23, 2  ;;  %v1500_v23 = vshrl.u32 %v5271_v62, 16 }
  0x58   : > { %5843 = vmatmul.mubr.msk.bf16.gmra.mxu0 %vm540_vm2, %v744_v9  ;;  %5895 = vmatpush3.bf16.msra.mxu1 %v6513_v10  ;;  %v1207_v9 = vsel %vm1202_vm5, %v1204_v60, %v1206_v4  ;;  %v1371_v10 = vrot.slane %v7041_v8, 2  ;;  %v1532_v60 = vor.u32 %v1531_v57, %v1528_v55 }
  0x59   : > { %5874 = vmatprep.mubr.msk.bf16.mxu0 %vm6668_vm0, %v6667_v1  ;;  %5854 = vmatprep.mubr.msk.bf16.mxu1 %vm6668_vm0, %v6667_v1  ;;  %v1209_v16 = vsel %vm1202_vm5, %v1206_v4, %v1208_v11  ;;  %v1213_v29 = vsel %vm1202_vm5, %v1210_v13, %v1212_v22  ;;  %v1502_v30 = vrot.slane %v1500_v23, 2  ;;  %v1677_v4 = vrot.slane %v7059_v15, 3  ;;  %v7156_v15 = vld [vmem:[%s6878_s14 + $0x4] sm:$0xf] }
  0x5a   : > { %5896 = vmatprep.subr.bf16.mxu1 %v6667_v1  ;;  %v1372_v14 = vsel %vm1202_vm5, %v1369_v3, %v1371_v10  ;;  %v1374_v18 = vsel %vm1202_vm5, %v1371_v10, %v1373_v17  ;;  %v6538_v3 = vld [vmem:[%s6768_s19 + $0x30] ss:$0 sps:$4 sm:$0x77]  }
  0x5b   : > { %v1678_v8 = vsel %vm1671_vm7, %v1675_v58, %v1677_v4 }
  0x5c   : > { %5897 = vmatpush3.bf16.msra.mxu1 %v6518_v19  ;;  %v7073_v19 = vld [vmem:[%s6768_s19 + $0x28] sm:$0xff]  }
  0x5d   : > { %5942 = vmatprep.subr.bf16.mxu1 %v6667_v1  ;;  %v1375_v21 = vrot.slane %v7073_v19, 2 }
  0x5f   : > { %5855 = vmatmul.mubr.msk.bf16.gmra.mxu1 %vm540_vm2, %v903_v27  ;;  %v1376_v27 = vsel %vm1202_vm5, %v1373_v17, %v1375_v21 }
  0x60   : > { %5875 = vmatmul.mubr.msk.bf16.vlgmr.msra.gmra.mxu0 %vm540_vm2, %v1046_v24  ;;  %5858 = vmatprep.mubr.msk.bf16.mxu1 %vm6668_vm0, %v6667_v1  ;;  %v1503_v24 = vshll.u32 %v5271_v62, 16  ;;  %v1538_v62 = vshll.u32 %v7073_v19, 16 }
  0x61   : > { %5919 = vmatpush3.bf16.msra.mxu0 %v6515_v20  ;;  %5878 = vmatprep.mubr.msk.bf16.mxu0 %vm6668_vm0, %v6667_v1  ;;  %v1211_v20 = vsel %vm1202_vm5, %v1208_v11, %v1210_v13  ;;  %v1679_v11 = vrot.slane %v7073_v19, 3 }
  0x62   : > { %5920 = vmatprep.subr.bf16.mxu0 %v6667_v1  ;;  %v1505_v31 = vrot.slane %v1503_v24, 3  ;;  %v1540_v61 = vrot.slane %v1538_v62, 3 }
  0x63   : > { %v1680_v17 = vsel %vm1671_vm7, %v1677_v4, %v1679_v11 }
  0x65   : > { %5921 = vmatpush3.bf16.msra.mxu0 %v6519_v28  ;;  %v6532_v28 = vld [vmem:[%s6768_s19 + $0x30] ss:$0 sps:$4 sm:$0x33]   ;;  %s425_s19 = sadd.s32 %s5188_s17, %s8664_s24 }
  0x66   : > { %5966 = vmatprep.subr.bf16.mxu0 %v6667_v1  ;;  %s426_s20 = scalar_lea.vmem %s8609_s6, %s425_s19 }
  0x67   : > { %5859 = vmatmul.mubr.msk.bf16.gmra.mxu1 %vm540_vm2, %v905_v36  ;;  %v1506_v36 = vor.u32 %v1505_v31, %v1502_v30  ;;  %v7182_v30 = vld [vmem:[%s6878_s14 + $0x10] sm:$0xff]  }
  0x68   : > { %5879 = vmatmul.mubr.msk.bf16.gmra.mxu0 %vm540_vm2, %v1055_v34  ;;  %5862 = vmatprep.mubr.msk.bf16.mxu1 %vm6668_vm0, %v6667_v1  ;;  %v1377_v34 = vrot.slane %v6532_v28, 2  ;;  %v6549_v31 = vld [vmem:[%s8606_s3 + $0xb0] sm:$0xff]   ;;  %v2003_v35 = vshll.u32 %v7182_v30, 16 }
  0x69   : > { %5882 = vmatprep.mubr.msk.bf16.mxu0 %vm6668_vm0, %v6667_v1  ;;  %v1515_v42 = vsel %vm1498_vm6, %v1506_v36, %v1514_v37  ;;  %v6541_v36 = vld [vmem:[%s6878_s14 + $0x8] sm:$0xff]  }
  0x6a   : > { %v1378_v40 = vsel %vm1202_vm5, %v1375_v21, %v1377_v34  ;;  %v2005_v38 = vrot.slane %v2003_v35, 1  ;;  %v6555_v35 = vld [vmem:[%s8606_s3 + $0xd8] sm:$0xff]  }
  0x6f   : > { %5863 = vmatmul.mubr.msk.bf16.gmra.mxu1 %vm540_vm2, %v907_v45  ;;  %v1522_v45 = vrot.slane %v1520_v39, 3  ;;  %v7203_v39 = vld [vmem:[%s6878_s14 + $0x18] sm:$0xff]  }
  0x70   : > { %5883 = vmatmul.mubr.msk.bf16.gmra.mxu0 %vm540_vm2, %v1064_v43  ;;  %5866 = vmatprep.mubr.msk.bf16.mxu1 %vm6668_vm0, %v6667_v1  ;;  %v6533_v43 = vld [vmem:[%s8606_s3 + $0x98] sm:$0xff]  }
  0x71   : > { %5886 = vmatprep.mubr.msk.bf16.mxu0 %vm6668_vm0, %v6667_v1  ;;  %v1523_v48 = vor.u32 %v1522_v45, %v1519_v44  ;;  %v6545_v44 = vld [vmem:[%s6878_s14 + $0x10] sm:$0xff]  }
  0x73   : > { %v1524_v54 = vsel %vm1498_vm6, %v1514_v37, %v1523_v48 }
  0x77   : > { %5867 = vmatmul.mubr.msk.bf16.gmra.mxu1 %vm540_vm2, %v909_v53  ;;  %v6535_v53 = vld [vmem:[%s8606_s3 + $0xa8] sm:$0xff]  }
  0x78   : > { %5887 = vmatmul.mubr.msk.bf16.gmra.mxu0 %vm540_vm2, %v1073_v52  ;;  %5898 = vmatprep.mubr.msk.bf16.mxu1 %vm6668_vm0, %v6667_v1  ;;  %v1674_v52 = vsel %vm1671_vm7, %v1672_v46, %v1673_v47 }
  0x79   : > { %5890 = vmatprep.mubr.msk.bf16.mxu0 %vm6668_vm0, %v6667_v1 }
  0x7f   : > { %5899 = vmatmul.mubr.msk.bf16.vlgmr.msra.gmra.mxu1 %vm540_vm2, %v1205_v0  ;;  %v1533_v0 = vsel %vm1498_vm6, %v1523_v48, %v1532_v60  ;;  %v7221_v48 = vld [vmem:[%s6878_s14 + $0x20] sm:$0xff]  }
  0x80   : > { %5891 = vmatmul.mubr.msk.bf16.gmra.mxu0 %vm540_vm2, %v1082_v56  ;;  %5943 = vmatpush3.bf16.msra.mxu1 %v6523_v2  ;;  %v1535_v56 = vshrl.u32 %v7073_v19, 16  ;;  %v1681_v19 = vrot.slane %v6538_v3, 3  ;;  %v2019_v55 = vshll.u32 %v7221_v48, 16 }
  0x81   : > { %5922 = vmatprep.mubr.msk.bf16.mxu0 %vm6668_vm0, %v6667_v1  ;;  %5902 = vmatprep.mubr.msk.bf16.mxu1 %vm6668_vm0, %v6667_v1 }
  0x82   : > { %5944 = vmatprep.subr.bf16.mxu1 %v6667_v1  ;;  %v1537_v2 = vrot.slane %v1535_v56, 2  ;;  %v1682_v22 = vsel %vm1671_vm7, %v1679_v11, %v1681_v19 }
  0x84   : > { %5945 = vmatpush3.bf16.msra.mxu1 %v6529_v5  ;;  %v1541_v5 = vor.u32 %v1540_v61, %v1537_v2 }
  0x85   : > { %5990 = vmatprep.subr.bf16.mxu1 %v6667_v1 }
  0x87   : > { %5903 = vmatmul.mubr.msk.bf16.gmra.mxu1 %vm540_vm2, %v1207_v9  ;;  %v1542_v9 = vsel %vm1498_vm6, %v1532_v60, %v1541_v5 }
  0x88   : > { %5923 = vmatmul.mubr.msk.bf16.vlgmr.msra.gmra.mxu0 %vm540_vm2, %v1370_v6  ;;  %5906 = vmatprep.mubr.msk.bf16.mxu1 %vm6668_vm0, %v6667_v1  ;;  %v1544_v6 = vshrl.u32 %v6538_v3, 16 }
  0x89   : > { %5967 = vmatpush3.bf16.msra.mxu0 %v6526_v7  ;;  %5926 = vmatprep.mubr.msk.bf16.mxu0 %vm6668_vm0, %v6667_v1  ;;  %v1547_v7 = vshll.u32 %v6538_v3, 16 }
  0x8a   : > { %5968 = vmatprep.subr.bf16.mxu0 %v6667_v1  ;;  %v1546_v10 = vrot.slane %v1544_v6, 2 }
  0x8d   : > { %5969 = vmatpush3.bf16.msra.mxu0 %v6530_v12  ;;  %v1549_v12 = vrot.slane %v1547_v7, 3  ;;  %v2023_v7 = vshrl.u32 %v7221_v48, 16 }
  0x8e   : > { %6014 = vmatprep.subr.bf16.mxu0 %v6667_v1 }
  0x8f   : > { %5907 = vmatmul.mubr.msk.bf16.gmra.mxu1 %vm540_vm2, %v1209_v16  ;;  %v1550_v16 = vor.u32 %v1549_v12, %v1546_v10  ;;  %v6551_v12 = vld [vmem:[%s6878_s14 + $0x20] sm:$0xff]  }
  0x90   : > { %5927 = vmatmul.mubr.msk.bf16.gmra.mxu0 %vm540_vm2, %v1372_v14  ;;  %5910 = vmatprep.mubr.msk.bf16.mxu1 %vm6668_vm0, %v6667_v1  ;;  %v1943_v14 = vld [vmem:[%s6878_s14] sm:$0xf] }
  0x91   : > { %5930 = vmatprep.mubr.msk.bf16.mxu0 %vm6668_vm0, %v6667_v1  ;;  %v5328_v13 = vcombine.low %v1943_v14, %v7156_v15 }
  0x93   : > { %v1990_v21 = vshll.u32 %v5328_v13, 16  ;;  %v1988_v23 = vshrl.u32 %v5328_v13, 16 }
  0x95   : > { %v1992_v24 = vrot.slane %v1990_v21, 1  ;;  %v2271_v21 = vld [vmem:[%s6878_s14 + $0x4] sm:$0xe] }
  0x97   : > { %5911 = vmatmul.mubr.msk.bf16.gmra.mxu1 %vm540_vm2, %v1211_v20  ;;  %v7167_v20 = vld [vmem:[%s6878_s14 + $0x8] sm:$0xff]   ;;  %v1993_v28 = vor.u32 %v1992_v24, %v1988_v23 }
  0x98   : > { %5931 = vmatmul.mubr.msk.bf16.gmra.mxu0 %vm540_vm2, %v1374_v18  ;;  %5914 = vmatprep.mubr.msk.bf16.mxu1 %vm6668_vm0, %v6667_v1  ;;  %v1551_v18 = vsel %vm1498_vm6, %v1541_v5, %v1550_v16  ;;  %v1995_v25 = vshll.u32 %v7167_v20, 16  ;;  %v1999_v34 = vshrl.u32 %v7167_v20, 16  ;;  %v2141_v5 = vld [vmem:[%s6878_s14] sm:$0xe]  ;;  %v2151_v24 = vrot.slane %v7167_v20, 1 }
  0x99   : > { %5934 = vmatprep.mubr.msk.bf16.mxu0 %vm6668_vm0, %v6667_v1  ;;  %v5345_v11 = vcombine.low %v2141_v5, %v7156_v15  ;;  %v2155_v5 = vrot.slane %v7203_v39, 1 }
  0x9b   : > { %v2150_v15 = vrot.slane %v5345_v11, 1 }
  0x9f   : > { %5915 = vmatmul.mubr.msk.bf16.gmra.mxu1 %vm540_vm2, %v1213_v29  ;;  %v1997_v29 = vrot.slane %v1995_v25, 1 }
  0xa0   : > { %5935 = vmatmul.mubr.msk.bf16.gmra.mxu0 %vm540_vm2, %v1376_v27  ;;  %5946 = vmatprep.mubr.msk.bf16.mxu1 %vm6668_vm0, %v6667_v1  ;;  %v6540_v27 = vld [vmem:[%s8606_s3 + $0xb8] sm:$0xff]  }
  0xa1   : > { %5938 = vmatprep.mubr.msk.bf16.mxu0 %vm6668_vm0, %v6667_v1  ;;  %v1998_v32 = vsel %vm483_vm1, %v1993_v28, %v1997_v29  ;;  %v2001_v37 = vor.u32 %v1999_v34, %v1997_v29  ;;  %v7271_v29 = vld [vmem:[%s6878_s14 + $0xc] sm:$0xff]   ;;  %v2152_v34 = vsel %vm733_vm3, %v2150_v15, %v2151_v24 }
  0xa3   : > { %v2006_v41 = vsel %vm483_vm1, %v2001_v37, %v2005_v38 }
  0xa7   : > { %5947 = vmatmul.mubr.msk.bf16.vlgmr.msra.gmra.mxu1 %vm540_vm2, %v1515_v42  ;;  %v2007_v42 = vshrl.u32 %v7182_v30, 16 }
  0xa8   : > { %5939 = vmatmul.mubr.msk.bf16.gmra.mxu0 %vm540_vm2, %v1378_v40  ;;  %5991 = vmatpush3.bf16.msra.mxu1 %v6533_v43  ;;  %v6550_v40 = vld [vmem:[%s8606_s3 + $0xc0] sm:$0xff]   ;;  %v2011_v43 = vshll.u32 %v7203_v39, 16 }
  0xa9   : > { %5970 = vmatprep.mubr.msk.bf16.mxu0 %vm6668_vm0, %v6667_v1  ;;  %5950 = vmatprep.mubr.msk.bf16.mxu1 %vm6668_vm0, %v6667_v1  ;;  %v2009_v46 = vor.u32 %v2007_v42, %v2005_v38 }
  0xaa   : > { %5992 = vmatprep.subr.bf16.mxu1 %v6667_v1  ;;  %v2013_v47 = vrot.slane %v2011_v43, 1 }
  0xac   : > { %5993 = vmatpush3.bf16.msra.mxu1 %v6536_v51 }
  0xad   : > { %6038 = vmatprep.subr.bf16.mxu1 %v6667_v1 }
  0xaf   : > { %5951 = vmatmul.mubr.msk.bf16.gmra.mxu1 %vm540_vm2, %v1524_v54  ;;  %v2015_v54 = vshrl.u32 %v7203_v39, 16 }
  0xb0   : > { %5971 = vmatmul.mubr.msk.bf16.vlgmr.msra.gmra.mxu0 %vm540_vm2, %v1674_v52  ;;  %5954 = vmatprep.mubr.msk.bf16.mxu1 %vm6668_vm0, %v6667_v1 }
  0xb1   : > { %6015 = vmatpush3.bf16.msra.mxu0 %v6535_v53  ;;  %5974 = vmatprep.mubr.msk.bf16.mxu0 %vm6668_vm0, %v6667_v1  ;;  %v2014_v53 = vsel %vm483_vm1, %v2009_v46, %v2013_v47  ;;  %v2017_v62 = vor.u32 %v2015_v54, %v2013_v47 }
  0xb2   : > { %6016 = vmatprep.subr.bf16.mxu0 %v6667_v1 }
  0xb5   : > { %6017 = vmatpush3.bf16.msra.mxu0 %v6537_v59  ;;  %v6547_v59 = vld [vmem:[%s6878_s14 + $0x18] sm:$0xff]  }
  0xb6   : > { %6062 = vmatprep.subr.bf16.mxu0 %v6667_v1 }
  0xb7   : > { %5955 = vmatmul.mubr.msk.bf16.gmra.mxu1 %vm540_vm2, %v1533_v0  ;;  %v7238_v0 = vld [vmem:[%s6878_s14 + $0x28] ss:$0 sps:$4 sm:$0x11]  }
  0xb8   : > { %5975 = vmatmul.mubr.msk.bf16.gmra.mxu0 %vm540_vm2, %v1676_v63  ;;  %5958 = vmatprep.mubr.msk.bf16.mxu1 %vm6668_vm0, %v6667_v1  ;;  %v2021_v63 = vrot.slane %v2019_v55, 1 }
  0xb9   : > { %5978 = vmatprep.mubr.msk.bf16.mxu0 %vm6668_vm0, %v6667_v1 }
  0xba   : > { %v2022_v6 = vsel %vm483_vm1, %v2017_v62, %v2021_v63 }
  0xbf   : > { %5959 = vmatmul.mubr.msk.bf16.gmra.mxu1 %vm540_vm2, %v1542_v9 }
  0xc0   : > { %5979 = vmatmul.mubr.msk.bf16.gmra.mxu0 %vm540_vm2, %v1678_v8  ;;  %5962 = vmatprep.mubr.msk.bf16.mxu1 %vm6668_vm0, %v6667_v1  ;;  %v2027_v8 = vshll.u32 %v7238_v0, 16 }
  0xc1   : > { %5982 = vmatprep.mubr.msk.bf16.mxu0 %vm6668_vm0, %v6667_v1 }
  0xc2   : > { %v2029_v13 = vrot.slane %v2027_v8, 1 }
  0xc7   : > { %5963 = vmatmul.mubr.msk.bf16.gmra.mxu1 %vm540_vm2, %v1551_v18 }
  0xc8   : > { %5983 = vmatmul.mubr.msk.bf16.gmra.mxu0 %vm540_vm2, %v1680_v17  ;;  %5994 = vmatprep.mubr.msk.bf16.mxu1 %vm6668_vm0, %v6667_v1  ;;  %v2025_v17 = vor.u32 %v2023_v7, %v2021_v63  ;;  %v6562_v63 = vld [vmem:[%s8606_s3 + $0xe0] sm:$0xff]  }
  0xc9   : > { %5986 = vmatprep.mubr.msk.bf16.mxu0 %vm6668_vm0, %v6667_v1 }
  0xcf   : > { %5995 = vmatmul.mubr.msk.bf16.vlgmr.msra.gmra.mxu1 %vm540_vm2, %v6539_v26 }
  0xd0   : > { %5987 = vmatmul.mubr.msk.bf16.gmra.mxu0 %vm540_vm2, %v1682_v22  ;;  %6039 = vmatpush3.bf16.msra.mxu1 %v6540_v27  ;;  %v7261_v22 = vld [vmem:[%s6878_s14 + $0x8] sm:$0xf]  ;;  %v2030_v27 = vsel %vm483_vm1, %v2025_v17, %v2029_v13 }
  0xd1   : > { %6018 = vmatprep.mubr.msk.bf16.mxu0 %vm6668_vm0, %v6667_v1  ;;  %5998 = vmatprep.mubr.msk.bf16.mxu1 %vm6668_vm0, %v6667_v1  ;;  %v7268_v28 = vcombine.low %v2271_v21, %v7261_v22 }
  0xd2   : > { %6040 = vmatprep.subr.bf16.mxu1 %v6667_v1 }
  0xd3   : > { %v2315_v38 = vrot.slane %v7268_v28, 1 }
  0xd4   : > { %6041 = vmatpush3.bf16.msra.mxu1 %v6549_v31 }
  0xd5   : > { %6086 = vmatprep.subr.bf16.mxu1 %v6667_v1 }
  0xd7   : > { %5999 = vmatmul.mubr.msk.bf16.gmra.mxu1 %vm540_vm2, %v6541_v36 }
  0xd8   : > { %6019 = vmatmul.mubr.msk.bf16.vlgmr.msra.gmra.mxu0 %vm540_vm2, %v1998_v32  ;;  %6002 = vmatprep.mubr.msk.bf16.mxu1 %vm6668_vm0, %v6667_v1 }
  0xd9   : > { %6063 = vmatpush3.bf16.msra.mxu0 %v6544_v33  ;;  %6022 = vmatprep.mubr.msk.bf16.mxu0 %vm6668_vm0, %v6667_v1 }
  0xda   : > { %6064 = vmatprep.subr.bf16.mxu0 %v6667_v1 }
  0xdd   : > { %6065 = vmatpush3.bf16.msra.mxu0 %v6550_v40  ;;  %v2316_v40 = vrot.slane %v7271_v29, 1 }
  0xde   : > { %6110 = vmatprep.subr.bf16.mxu0 %v6667_v1 }
  0xdf   : > { %v7223_v49 = vpop.f32.mrf.mxu1  ;;  %6003 = vmatmul.mubr.msk.bf16.gmra.mxu1 %vm540_vm2, %v6545_v44  ;;  %v2153_v44 = vrot.slane %v7182_v30, 1 }
  0xe0   : > { %v590_v45 = vpop.f32.mrf.mxu0  ;;  %6023 = vmatmul.mubr.msk.bf16.gmra.mxu0 %vm540_vm2, %v2006_v41  ;;  %6006 = vmatprep.mubr.msk.bf16.mxu1 %vm6668_vm0, %v6667_v1 }
  0xe1   : > { %6026 = vmatprep.mubr.msk.bf16.mxu0 %vm6668_vm0, %v6667_v1  ;;  %v5792_v51 = vpop.f32.mrf.mxu1 }
  0xe2   : > { %v5780_v50 = vpop.f32.mrf.mxu0  ;;  %v2317_v51 = vsel %vm733_vm3, %v2315_v38, %v2316_v40 }
  0xe3   : > { %v7231_v57 = vpop.f32.mrf.mxu1 }
  0xe4   : > { %v593_v52 = vpop.f32.mrf.mxu0 }
  0xe5   : > { %v5793_v60 = vpop.f32.mrf.mxu1 }
  0xe6   : > { %v5781_v58 = vpop.f32.mrf.mxu0 }
  0xe7   : > { %v7240_v2 = vpop.f32.mrf.mxu1  ;;  %6007 = vmatmul.mubr.msk.bf16.gmra.mxu1 %vm540_vm2, %v6547_v59  ;;  %v2154_v58 = vsel %vm733_vm3, %v2151_v24, %v2153_v44  ;;  %v2157_v24 = vrot.slane %v7221_v48, 1 }
  0xe8   : > { %v598_v56 = vpop.f32.mrf.mxu0  ;;  %6027 = vmatmul.mubr.msk.bf16.gmra.mxu0 %vm540_vm2, %v2014_v53  ;;  %6010 = vmatprep.mubr.msk.bf16.mxu1 %vm6668_vm0, %v6667_v1  ;;  %v7299_v53 = vld [vmem:[%s6878_s14 + $0x14] sm:$0xff]  }
  0xe9   : > { %6030 = vmatprep.mubr.msk.bf16.mxu0 %vm6668_vm0, %v6667_v1  ;;  %v5796_v3 = vpop.f32.mrf.mxu1  ;;  %v2318_v62 = vrot.slane %v7299_v53, 1 }
  0xea   : > { %v5784_v61 = vpop.f32.mrf.mxu0 }
  0xeb   : > { %v7249_v9 = vpop.f32.mrf.mxu1 }
  0xec   : > { %v601_v4 = vpop.f32.mrf.mxu0 }
  0xed   : > { %v5797_v14 = vpop.f32.mrf.mxu1 }
  0xee   : > { %v5785_v10 = vpop.f32.mrf.mxu0 }
  0xef   : > { %v685_v18 = vpop.f32.mrf.mxu1  ;;  %6011 = vmatmul.mubr.msk.bf16.gmra.mxu1 %vm540_vm2, %v6551_v12  ;;  %v2319_v10 = vsel %vm733_vm3, %v2316_v40, %v2318_v62  ;;  %v7322_v12 = vld [vmem:[%s6878_s14 + $0x1c] sm:$0xff]  }
  0xf0   : > { %v7253_v16 = vpop.f32.mrf.mxu0  ;;  %6031 = vmatmul.mubr.msk.bf16.gmra.mxu0 %vm540_vm2, %v2022_v6  ;;  %v686_v23 = vadd.f32 %v685_v18, %v590_v45  ;;  %6042 = vmatprep.mubr.msk.bf16.mxu1 %vm6668_vm0, %v6667_v1  ;;  %v6561_v45 = vld [vmem:[%s8606_s3 + $0xd0] sm:$0xff]  }
  0xf1   : > { %6034 = vmatprep.mubr.msk.bf16.mxu0 %vm6668_vm0, %v6667_v1  ;;  %v5804_v25 = vpop.f32.mrf.mxu1 }
  0xf2   : > { %v5788_v19 = vpop.f32.mrf.mxu0 }
  0xf3   : > { %v688_v31 = vpop.f32.mrf.mxu1  ;;  %v2320_v19 = vrot.slane %v7322_v12, 1 }
  0xf4   : > { %v609_v26 = vpop.f32.mrf.mxu0  ;;  %v689_v33 = vadd.f32 %v688_v31, %v593_v52  ;;  %v6558_v52 = vld [vmem:[%s8606_s3 + $0xe8] sm:$0xff]  }
  0xf5   : > { %v5805_v36 = vpop.f32.mrf.mxu1  ;;  %v2321_v31 = vsel %vm733_vm3, %v2318_v62, %v2320_v19 }
  0xf6   : > { %v5789_v32 = vpop.f32.mrf.mxu0  ;;  %v2158_v36 = vsel %vm733_vm3, %v2155_v5, %v2157_v24 }
  0xf7   : > { %v693_v41 = vpop.f32.mrf.mxu1  ;;  %6043 = vmatmul.mubr.msk.bf16.vlgmr.msra.gmra.mxu1 %vm540_vm2, %v2152_v34  ;;  %v7341_v32 = vld [vmem:[%s6878_s14 + $0x24] sm:$0xff]  }
  0xf8   : > { %v806_v20 = vpop.f32.mrf.mxu0  ;;  %6035 = vmatmul.mubr.msk.bf16.gmra.mxu0 %vm540_vm2, %v2030_v27  ;;  %v694_v43 = vadd.f32 %v693_v41, %v598_v56  ;;  %6087 = vmatpush3.bf16.msra.mxu1 %v6555_v35  ;;  %v2322_v48 = vrot.slane %v7341_v32, 1 }
  0xf9   : > { %v7278_v37 = vadd.f32 %v806_v20, %v686_v23  ;;  %6066 = vmatprep.mubr.msk.bf16.mxu0 %vm6668_vm0, %v6667_v1  ;;  %6046 = vmatprep.mubr.msk.bf16.mxu1 %vm6668_vm0, %v6667_v1  ;;  %v5808_v46 = vpop.f32.mrf.mxu1 }
  0xfa   : > { %v5828_v42 = vpop.f32.mrf.mxu0  ;;  %6088 = vmatprep.subr.bf16.mxu1 %v6667_v1  ;;  %v2457_v46 = vshll.u32 %v7271_v29, 16 }
  0xfb   : > { %v696_v54 = vpop.f32.mrf.mxu1  ;;  %v2449_v42 = vshll.u32 %v7268_v28, 16 }
  0xfc   : > { %v809_v47 = vpop.f32.mrf.mxu0  ;;  %v697_v55 = vadd.f32 %v696_v54, %v601_v4  ;;  %6089 = vmatpush3.bf16.msra.mxu1 %v6561_v45  ;;  %v2454_v45 = vshrl.u32 %v7271_v29, 16  ;;  %v2323_v54 = vsel %vm733_vm3, %v2320_v19, %v2322_v48  ;;  %v2459_v62 = vrot.slane %v2457_v46, 2 }
  0xfd   : > { %v7292_v50 = vadd.f32 %v809_v47, %v689_v33  ;;  %v5809_v59 = vpop.f32.mrf.mxu1  ;;  %6134 = vmatprep.subr.bf16.mxu1 %v6667_v1 }
  0xfe   : > { %v5829_v30 = vpop.f32.mrf.mxu0 }
  0xff   : > { %v701_v61 = vpop.f32.mrf.mxu1  ;;  %6047 = vmatmul.mubr.msk.bf16.gmra.mxu1 %vm540_vm2, %v2154_v58  ;;  %v6564_v30 = vld [vmem:[%s6878_s14 + $0x2c] ss:$0 sps:$4 sm:$0x11]  }
 0x100   : > { %v814_v60 = vpop.f32.mrf.mxu0  ;;  %6067 = vmatmul.mubr.msk.bf16.vlgmr.msra.gmra.mxu0 %vm540_vm2, %v2317_v51  ;;  %v702_v4 = vadd.f32 %v701_v61, %v7253_v16  ;;  %6050 = vmatprep.mubr.msk.bf16.mxu1 %vm6668_vm0, %v6667_v1  ;;  %v2156_v16 = vsel %vm733_vm3, %v2153_v44, %v2155_v5  ;;  %v2159_v44 = vrot.slane %v7238_v0, 1 }
 0x101   : > { %v7304_v56 = vadd.f32 %v814_v60, %v694_v43  ;;  %6111 = vmatpush3.bf16.msra.mxu0 %v6558_v52  ;;  %6070 = vmatprep.mubr.msk.bf16.mxu0 %vm6668_vm0, %v6667_v1  ;;  %v5812_v6 = vpop.f32.mrf.mxu1  ;;  %v2456_v60 = vrot.slane %v2454_v45, 1 }
 0x102   : > { %v5832_v3 = vpop.f32.mrf.mxu0  ;;  %6112 = vmatprep.subr.bf16.mxu0 %v6667_v1  ;;  %v2160_v0 = vsel %vm733_vm3, %v2157_v24, %v2159_v44  ;;  %v6567_v44 = vld [vmem:[%s8606_s3 + $0x108] sm:$0xff]  }
 0x103   : > { %v704_v11 = vpop.f32.mrf.mxu1 }
 0x104   : > { %v817_v7 = vpop.f32.mrf.mxu0  ;;  %v705_v17 = vadd.f32 %v704_v11, %v609_v26  ;;  %v2460_v11 = vor.u32 %v2459_v62, %v2456_v60 }
 0x105   : > { %v7318_v8 = vadd.f32 %v817_v7, %v697_v55  ;;  %6113 = vmatpush3.bf16.msra.mxu0 %v6562_v63  ;;  %v5813_v13 = vpop.f32.mrf.mxu1 }
 0x106   : > { %v5833_v14 = vpop.f32.mrf.mxu0  ;;  %6158 = vmatprep.subr.bf16.mxu0 %v6667_v1 }
 0x107   : > { %v709_v21 = vpop.f32.mrf.mxu1  ;;  %6051 = vmatmul.mubr.msk.bf16.gmra.mxu1 %vm540_vm2, %v2156_v16  ;;  %v2463_v14 = vshrl.u32 %v7299_v53, 16 }
 0x108   : > { %v822_v18 = vpop.f32.mrf.mxu0  ;;  %6071 = vmatmul.mubr.msk.bf16.gmra.mxu0 %vm540_vm2, %v2319_v10  ;;  %v710_v15 = vadd.f32 %v709_v21, %v7223_v49  ;;  %6054 = vmatprep.mubr.msk.bf16.mxu1 %vm6668_vm0, %v6667_v1 }
 0x109   : > { %v7327_v39 = vadd.f32 %v822_v18, %v702_v4  ;;  %6074 = vmatprep.mubr.msk.bf16.mxu0 %vm6668_vm0, %v6667_v1  ;;  %v5816_v25 = vpop.f32.mrf.mxu1  ;;  %v2324_v4 = vrot.slane %v6564_v30, 1 }
 0x10a   : > { %v5836_v23 = vpop.f32.mrf.mxu0  ;;  %v6565_v25 = vld [vmem:[%s8606_s3 + $0xf8] sm:$0xff]  }
 0x10b   : > { %v712_v33 = vpop.f32.mrf.mxu1  ;;  %v2325_v19 = vsel %vm733_vm3, %v2322_v48, %v2324_v4 }
 0x10c   : > { %v825_v26 = vpop.f32.mrf.mxu0  ;;  %v713_v35 = vadd.f32 %v712_v33, %v7231_v57  ;;  %v2446_v57 = vshrl.u32 %v7268_v28, 16 }
 0x10d   : > { %v7337_v27 = vadd.f32 %v825_v26, %v705_v17  ;;  %v5817_v49 = vpop.f32.mrf.mxu1  ;;  %v2466_v17 = vshll.u32 %v7299_v53, 16  ;;  %v2465_v26 = vrot.slane %v2463_v14, 1 }
 0x10e   : > { %v5837_v34 = vpop.f32.mrf.mxu0  ;;  %v2448_v58 = vrot.slane %v2446_v57, 1  ;;  %v6568_v57 = vld [vmem:[%s8606_s3 + $0xf0] sm:$0xff]  }
 0x10f   : > { %v717_v40 = vpop.f32.mrf.mxu1  ;;  %6055 = vmatmul.mubr.msk.bf16.gmra.mxu1 %vm540_vm2, %v2158_v36 }
 0x110   : > { %v830_v20 = vpop.f32.mrf.mxu0  ;;  %6075 = vmatmul.mubr.msk.bf16.gmra.mxu0 %vm540_vm2, %v2321_v31  ;;  %v718_v43 = vadd.f32 %v717_v40, %v7240_v2  ;;  %6058 = vmatprep.mubr.msk.bf16.mxu1 %vm6668_vm0, %v6667_v1  ;;  %v2451_v2 = vrot.slane %v2449_v42, 2  ;;  %v2468_v31 = vrot.slane %v2466_v17, 2  ;;  %v2472_v40 = vshrl.u32 %v7322_v12, 16  ;;  %v7435_v17 = vld [vmem:[%s6878_s14 + $0x2c] ss:$0 sps:$4 sm:$0x33]  }
 0x111   : > { %v7346_v38 = vadd.f32 %v830_v20, %v710_v15  ;;  %6078 = vmatprep.mubr.msk.bf16.mxu0 %vm6668_vm0, %v6667_v1  ;;  %v5820_v47 = vpop.f32.mrf.mxu1 }
 0x112   : > { %v5840_v41 = vpop.f32.mrf.mxu0  ;;  %v2452_v7 = vor.u32 %v2451_v2, %v2448_v58  ;;  %v2469_v48 = vor.u32 %v2468_v31, %v2465_v26  ;;  %v2620_v2 = vrot.slane %v7299_v53, 2  ;;  %v2484_v53 = vshll.u32 %v7341_v32, 16 }
 0x113   : > { %v720_v55 = vpop.f32.mrf.mxu1  ;;  %v2475_v41 = vshll.u32 %v7322_v12, 16 }
 0x114   : > { %v833_v51 = vpop.f32.mrf.mxu0  ;;  %v721_v59 = vadd.f32 %v720_v55, %v7249_v9  ;;  %v2608_v9 = vld [vmem:[%s6878_s14 + $0x4] sm:$0xc]  ;;  %v2461_v24 = vsel %vm1029_vm4, %v2452_v7, %v2460_v11  ;;  %v2486_v14 = vrot.slane %v2484_v53, 2 }
 0x115   : > { %v7360_v52 = vadd.f32 %v833_v51, %v713_v35  ;;  %v5821_v63 = vpop.f32.mrf.mxu1  ;;  %v5386_v21 = vcombine.low %v2608_v9, %v7261_v22  ;;  %v2470_v51 = vsel %vm1029_vm4, %v2460_v11, %v2469_v48  ;;  %v2477_v30 = vrot.slane %v2475_v41, 2 }
 0x116   : > { %v5841_v28 = vpop.f32.mrf.mxu0  ;;  %v2481_v63 = vshrl.u32 %v7341_v32, 16  ;;  %v2624_v41 = vrot.slane %v7341_v32, 2 }
 0x117   : > { %v971_v5 = vpop.f32.mrf.mxu1  ;;  %6059 = vmatmul.mubr.msk.bf16.gmra.mxu1 %vm540_vm2, %v2160_v0  ;;  %v2617_v22 = vrot.slane %v5386_v21, 2  ;;  %v2622_v21 = vrot.slane %v7322_v12, 2 }
 0x118   : > { %v838_v61 = vpop.f32.mrf.mxu0  ;;  %6079 = vmatmul.mubr.msk.bf16.gmra.mxu0 %vm540_vm2, %v2323_v54  ;;  %v1010_v10 = vadd.f32 %v971_v5, %v7278_v37  ;;  %6090 = vmatprep.mubr.msk.bf16.mxu1 %vm6668_vm0, %v6667_v1  ;;  %v2474_v54 = vrot.slane %v2472_v40, 1  ;;  %v2483_v11 = vrot.slane %v2481_v63, 1 }
 0x119   : > { %v7367_v3 = vadd.f32 %v838_v61, %v718_v43  ;;  %6082 = vmatprep.mubr.msk.bf16.mxu0 %vm6668_vm0, %v6667_v1  ;;  %v5852_v16 = vpop.f32.mrf.mxu1  ;;  %v2623_v12 = vsel %vm1202_vm5, %v2620_v2, %v2622_v21  ;;  %v2625_v32 = vsel %vm1202_vm5, %v2622_v21, %v2624_v41 }
 0x11a   : > { %v5844_v6 = vpop.f32.mrf.mxu0  ;;  %v2478_v62 = vor.u32 %v2477_v30, %v2474_v54 }
 0x11b   : > { %v974_v23 = vpop.f32.mrf.mxu1 }
 0x11c   : > { %v841_v13 = vpop.f32.mrf.mxu0  ;;  %v1011_v37 = vadd.f32 %v974_v23, %v7292_v50  ;;  %v2618_v50 = vrot.slane %v7271_v29, 2 }
 0x11d   : > { %v7378_v18 = vadd.f32 %v841_v13, %v721_v59  ;;  %v5853_v33 = vpop.f32.mrf.mxu1 }
 0x11e   : > { %v5845_v15 = vpop.f32.mrf.mxu0  ;;  %v2621_v6 = vsel %vm1202_vm5, %v2618_v50, %v2620_v2 }
 0x11f   : > { %v979_v36 = vpop.f32.mrf.mxu1  ;;  %6091 = vmatmul.mubr.msk.bf16.vlgmr.msra.gmra.mxu1 %vm540_vm2, %v2461_v24  ;;  %v2490_v24 = vshrl.u32 %v7435_v17, 16 }
 0x120   : > { %v1144_v34 = vpop.f32.mrf.mxu0  ;;  %6083 = vmatmul.mubr.msk.bf16.gmra.mxu0 %vm540_vm2, %v2325_v19  ;;  %v1012_v20 = vadd.f32 %v979_v36, %v7304_v56  ;;  %6135 = vmatpush3.bf16.msra.mxu1 %v6565_v25  ;;  %v2619_v56 = vsel %vm1202_vm5, %v2617_v22, %v2618_v50  ;;  %v2493_v25 = vshll.u32 %v7435_v17, 16 }
 0x121   : > { %v7388_v35 = vadd.f32 %v1144_v34, %v1010_v10  ;;  %6114 = vmatprep.mubr.msk.bf16.mxu0 %vm6668_vm0, %v6667_v1  ;;  %6094 = vmatprep.mubr.msk.bf16.mxu1 %vm6668_vm0, %v6667_v1  ;;  %v5856_v29 = vpop.f32.mrf.mxu1  ;;  %v2479_v10 = vsel %vm1029_vm4, %v2469_v48, %v2478_v62  ;;  %v2492_v36 = vrot.slane %v2490_v24, 1 }
 0x122   : > { %v5876_v49 = vpop.f32.mrf.mxu0  ;;  %6136 = vmatprep.subr.bf16.mxu1 %v6667_v1 }
 0x123   : > { %v982_v45 = vpop.f32.mrf.mxu1  ;;  %v2495_v49 = vrot.slane %v2493_v25, 2 }
 0x124   : > { %v1147_v42 = vpop.f32.mrf.mxu0  ;;  %v1013_v47 = vadd.f32 %v982_v45, %v7318_v8  ;;  %6137 = vmatpush3.bf16.msra.mxu1 %v6568_v57  ;;  %v6569_v8 = vld [vmem:[%s8606_s3 + $0x100] sm:$0xff]  }
 0x125   : > { %v7403_v43 = vadd.f32 %v1147_v42, %v1011_v37  ;;  %v5857_v55 = vpop.f32.mrf.mxu1  ;;  %6182 = vmatprep.subr.bf16.mxu1 %v6667_v1  ;;  %v2487_v37 = vor.u32 %v2486_v14, %v2483_v11  ;;  %v2496_v42 = vor.u32 %v2495_v49, %v2492_v36  ;;  %v6578_v49 = vld [vmem:[%s8606_s3 + $0x110] sm:$0xff]  }
 0x126   : > { %v5877_v46 = vpop.f32.mrf.mxu0 }
 0x127   : > { %v987_v59 = vpop.f32.mrf.mxu1  ;;  %6095 = vmatmul.mubr.msk.bf16.gmra.mxu1 %vm540_vm2, %v2470_v51 }
 0x128   : > { %v1152_v28 = vpop.f32.mrf.mxu0  ;;  %6115 = vmatmul.mubr.msk.bf16.vlgmr.msra.gmra.mxu0 %vm540_vm2, %v2619_v56  ;;  %v1014_v60 = vadd.f32 %v987_v59, %v7327_v39  ;;  %6098 = vmatprep.mubr.msk.bf16.mxu1 %vm6668_vm0, %v6667_v1  ;;  %v2738_v56 = vld [vmem:[%s6878_s14 + $0x8] sm:$0xc] }
 0x129   : > { %v7413_v58 = vadd.f32 %v1152_v28, %v1012_v20  ;;  %6159 = vmatpush3.bf16.msra.mxu0 %v6567_v44  ;;  %6118 = vmatprep.mubr.msk.bf16.mxu0 %vm6668_vm0, %v6667_v1  ;;  %v5860_v61 = vpop.f32.mrf.mxu1  ;;  %v7466_v44 = vld [vmem:[%s6878_s14 + $0xc] sm:$0xf]  ;;  %v7475_v28 = vld [vmem:[%s6878_s14 + $0x10] sm:$0xff]  }
 0x12a   : > { %v5880_v0 = vpop.f32.mrf.mxu0  ;;  %6160 = vmatprep.subr.bf16.mxu0 %v6667_v1  ;;  %v5398_v30 = vcombine.low %v2738_v56, %v7466_v44  ;;  %v2921_v63 = vshrl.u32 %v7475_v28, 16 }
 0x12b   : > { %v990_v7 = vpop.f32.mrf.mxu1 }
 0x12c   : > { %v1155_v4 = vpop.f32.mrf.mxu0  ;;  %v1015_v39 = vadd.f32 %v990_v7, %v7337_v27  ;;  %v2913_v59 = vshrl.u32 %v5398_v30, 16  ;;  %v2916_v0 = vshll.u32 %v5398_v30, 16  ;;  %v2783_v7 = vrot.slane %v7475_v28, 2 }
 0x12d   : > { %v7428_v5 = vadd.f32 %v1155_v4, %v1013_v47  ;;  %6161 = vmatpush3.bf16.msra.mxu0 %v6569_v8  ;;  %v5861_v16 = vpop.f32.mrf.mxu1 }
 0x12e   : > { %v5881_v9 = vpop.f32.mrf.mxu0  ;;  %6206 = vmatprep.subr.bf16.mxu0 %v6667_v1  ;;  %v2918_v11 = vrot.slane %v2916_v0, 3  ;;  %v2923_v16 = vrot.slane %v2921_v63, 2 }
 0x12f   : > { %v995_v23 = vpop.f32.mrf.mxu1  ;;  %6099 = vmatmul.mubr.msk.bf16.gmra.mxu1 %vm540_vm2, %v2479_v10  ;;  %v2915_v10 = vrot.slane %v2913_v59, 2 }
 0x130   : > { %v1160_v13 = vpop.f32.mrf.mxu0  ;;  %6119 = vmatmul.mubr.msk.bf16.gmra.mxu0 %vm540_vm2, %v2621_v6  ;;  %v1016_v15 = vadd.f32 %v995_v23, %v7346_v38  ;;  %6102 = vmatprep.mubr.msk.bf16.mxu1 %vm6668_vm0, %v6667_v1  ;;  %v2488_v38 = vsel %vm1029_vm4, %v2478_v62, %v2487_v37  ;;  %v2626_v62 = vrot.slane %v7435_v17, 2  ;;  %v2782_v6 = vrot.slane %v5398_v30, 2 }
 0x131   : > { %v7438_v19 = vadd.f32 %v1160_v13, %v1014_v60  ;;  %6122 = vmatprep.mubr.msk.bf16.mxu0 %vm6668_vm0, %v6667_v1  ;;  %v5864_v26 = vpop.f32.mrf.mxu1 }
 0x132   : > { %v5884_v27 = vpop.f32.mrf.mxu0  ;;  %v2627_v17 = vsel %vm1202_vm5, %v2624_v41, %v2626_v62  ;;  %v2919_v26 = vor.u32 %v2918_v11, %v2915_v10  ;;  %v7552_v10 = vld [vmem:[%s6878_s14 + $0x28] sm:$0xff]  }
 0x133   : > { %v998_v34 = vpop.f32.mrf.mxu1  ;;  %v2784_v27 = vsel %vm1202_vm5, %v2782_v6, %v2783_v7 }
 0x134   : > { %v1163_v31 = vpop.f32.mrf.mxu0  ;;  %v1017_v50 = vadd.f32 %v998_v34, %v7360_v52 }
 0x135   : > { %v7449_v33 = vadd.f32 %v1163_v31, %v1015_v39  ;;  %v5865_v20 = vpop.f32.mrf.mxu1 }
 0x136   : > { %v5885_v22 = vpop.f32.mrf.mxu0 }
 0x137   : > { %v1003_v57 = vpop.f32.mrf.mxu1  ;;  %6103 = vmatmul.mubr.msk.bf16.gmra.mxu1 %vm540_vm2, %v2488_v38 }
 0x138   : > { %v1168_v48 = vpop.f32.mrf.mxu0  ;;  %6123 = vmatmul.mubr.msk.bf16.gmra.mxu0 %vm540_vm2, %v2623_v12  ;;  %v1018_v29 = vadd.f32 %v1003_v57, %v7367_v3  ;;  %6106 = vmatprep.mubr.msk.bf16.mxu1 %vm6668_vm0, %v6667_v1  ;;  %v2497_v3 = vsel %vm1029_vm4, %v2487_v37, %v2496_v42  ;;  %v7499_v37 = vld [vmem:[%s6878_s14 + $0x18] sm:$0xff]  }
 0x139   : > { %v7455_v40 = vadd.f32 %v1168_v48, %v1016_v15  ;;  %6126 = vmatprep.mubr.msk.bf16.mxu0 %vm6668_vm0, %v6667_v1  ;;  %v5868_v45 = vpop.f32.mrf.mxu1  ;;  %v6573_v15 = vld [vmem:[%s8606_s3 + $0x118] sm:$0xff]   ;;  %v2933_v34 = vshll.u32 %v7499_v37, 16  ;;  %v2785_v36 = vrot.slane %v7499_v37, 2 }
 0x13a   : > { %v5888_v52 = vpop.f32.mrf.mxu0 }
 0x13b   : > { %v1006_v51 = vpop.f32.mrf.mxu1 }
 0x13c   : > { %v1171_v46 = vpop.f32.mrf.mxu0  ;;  %v1019_v55 = vadd.f32 %v1006_v51, %v7378_v18  ;;  %v2924_v18 = vshll.u32 %v7475_v28, 16 }
 0x13d   : > { %v7468_v47 = vadd.f32 %v1171_v46, %v1017_v50  ;;  %v5869_v2 = vpop.f32.mrf.mxu1  ;;  %v2786_v46 = vsel %vm1202_vm5, %v2783_v7, %v2785_v36 }
 0x13e   : > { %v5889_v54 = vpop.f32.mrf.mxu0  ;;  %v2926_v13 = vrot.slane %v2924_v18, 3  ;;  %v6579_v2 = vld [vmem:[%s8606_s3 + $0x120] sm:$0xff]  }
 0x13f   : > { %v1275_v53 = vpop.f32.mrf.mxu1  ;;  %6107 = vmatmul.mubr.msk.bf16.gmra.mxu1 %vm540_vm2, %v2497_v3 }
 0x140   : > { %v1176_v8 = vpop.f32.mrf.mxu0  ;;  %6127 = vmatmul.mubr.msk.bf16.gmra.mxu0 %vm540_vm2, %v2625_v32  ;;  %v1314_v4 = vadd.f32 %v1275_v53, %v7388_v35  ;;  %6138 = vmatprep.mubr.msk.bf16.mxu1 %vm6668_vm0, %v6667_v1  ;;  %v2927_v12 = vor.u32 %v2926_v13, %v2923_v16  ;;  %v7526_v32 = vld [vmem:[%s6878_s14 + $0x20] sm:$0xff]  }
 0x141   : > { %v7478_v60 = vadd.f32 %v1176_v8, %v1018_v29  ;;  %6130 = vmatprep.mubr.msk.bf16.mxu0 %vm6668_vm0, %v6667_v1  ;;  %v5900_v9 = vpop.f32.mrf.mxu1  ;;  %v2935_v29 = vrot.slane %v2933_v34, 3  ;;  %v2942_v3 = vshll.u32 %v7526_v32, 16  ;;  %v2787_v62 = vrot.slane %v7526_v32, 2 }
 0x142   : > { %v5892_v61 = vpop.f32.mrf.mxu0  ;;  %v2928_v57 = vsel %vm1498_vm6, %v2919_v26, %v2927_v12 }
 0x143   : > { %v1278_v21 = vpop.f32.mrf.mxu1  ;;  %v2944_v6 = vrot.slane %v2942_v3, 3 }
 0x144   : > { %v1179_v39 = vpop.f32.mrf.mxu0  ;;  %v1315_v35 = vadd.f32 %v1278_v21, %v7403_v43  ;;  %v2930_v43 = vshrl.u32 %v7499_v37, 16  ;;  %v2948_v21 = vshrl.u32 %v7552_v10, 16 }
 0x145   : > { %v7490_v14 = vadd.f32 %v1179_v39, %v1019_v55  ;;  %v5901_v24 = vpop.f32.mrf.mxu1  ;;  %v2788_v39 = vsel %vm1202_vm5, %v2785_v36, %v2787_v62 }
 0x146   : > { %v5893_v23 = vpop.f32.mrf.mxu0  ;;  %v2932_v52 = vrot.slane %v2930_v43, 2  ;;  %v2950_v43 = vrot.slane %v2948_v21, 2 }
 0x147   : > { %v1283_v22 = vpop.f32.mrf.mxu1  ;;  %6139 = vmatmul.mubr.msk.bf16.vlgmr.msra.gmra.mxu1 %vm540_vm2, %v2784_v27  ;;  %v2951_v23 = vshll.u32 %v7552_v10, 16 }
 0x148   : > { %v1440_v25 = vpop.f32.mrf.mxu0  ;;  %6131 = vmatmul.mubr.msk.bf16.gmra.mxu0 %vm540_vm2, %v2627_v17  ;;  %v1316_v38 = vadd.f32 %v1283_v22, %v7413_v58  ;;  %6183 = vmatpush3.bf16.msra.mxu1 %v6573_v15  ;;  %v6575_v58 = vld [vmem:[%s8606_s3 + $0x128] sm:$0xff]   ;;  %v2936_v55 = vor.u32 %v2935_v29, %v2932_v52  ;;  %v2789_v15 = vrot.slane %v7552_v10, 2  ;;  %v7570_v22 = vld [vmem:[%s6878_s14 + $0x30] ss:$0 sps:$4 sm:$0x77]  }
 0x149   : > { %v7502_v31 = vadd.f32 %v1440_v25, %v1314_v4  ;;  %6162 = vmatprep.mubr.msk.bf16.mxu0 %vm6668_vm0, %v6667_v1  ;;  %6142 = vmatprep.mubr.msk.bf16.mxu1 %vm6668_vm0, %v6667_v1  ;;  %v5904_v20 = vpop.f32.mrf.mxu1  ;;  %v2953_v34 = vrot.slane %v2951_v23, 3  ;;  %v2957_v52 = vshrl.u32 %v7570_v22, 16  ;;  %v2960_v29 = vshll.u32 %v7570_v22, 16 }
 0x14a   : > { %v5924_v50 = vpop.f32.mrf.mxu0  ;;  %6184 = vmatprep.subr.bf16.mxu1 %v6667_v1  ;;  %v2937_v61 = vsel %vm1498_vm6, %v2927_v12, %v2936_v55 }
 0x14b   : > { %v1286_v42 = vpop.f32.mrf.mxu1  ;;  %v2959_v3 = vrot.slane %v2957_v52, 2 }
 0x14c   : > { %v1443_v48 = vpop.f32.mrf.mxu0  ;;  %v1317_v45 = vadd.f32 %v1286_v42, %v7428_v5  ;;  %6185 = vmatpush3.bf16.msra.mxu1 %v6578_v49  ;;  %v2939_v5 = vshrl.u32 %v7526_v32, 16  ;;  %v6580_v49 = vld [vmem:[%s6878_s14 + $0x30] ss:$0 sps:$4 sm:$0x33]  }
 0x14d   : > { %v7517_v41 = vadd.f32 %v1443_v48, %v1315_v35  ;;  %v5905_v51 = vpop.f32.mrf.mxu1  ;;  %6230 = vmatprep.subr.bf16.mxu1 %v6667_v1 }
 0x14e   : > { %v5925_v56 = vpop.f32.mrf.mxu0  ;;  %v2941_v4 = vrot.slane %v2939_v5, 2 }
 0x14f   : > { %v1291_v8 = vpop.f32.mrf.mxu1  ;;  %6143 = vmatmul.mubr.msk.bf16.gmra.mxu1 %vm540_vm2, %v2786_v46 }
 0x150   : > { %v1448_v54 = vpop.f32.mrf.mxu0  ;;  %6163 = vmatmul.mubr.msk.bf16.vlgmr.msra.gmra.mxu0 %vm540_vm2, %v2928_v57  ;;  %v1318_v0 = vadd.f32 %v1291_v8, %v7438_v19  ;;  %6146 = vmatprep.mubr.msk.bf16.mxu1 %vm6668_vm0, %v6667_v1  ;;  %v2945_v13 = vor.u32 %v2944_v6, %v2941_v4 }
 0x151   : > { %v7530_v30 = vadd.f32 %v1448_v54, %v1316_v38  ;;  %6207 = vmatpush3.bf16.msra.mxu0 %v6575_v58  ;;  %6166 = vmatprep.mubr.msk.bf16.mxu0 %vm6668_vm0, %v6667_v1  ;;  %v5908_v63 = vpop.f32.mrf.mxu1  ;;  %v2954_v58 = vor.u32 %v2953_v34, %v2950_v43  ;;  %v3075_v54 = vld [vmem:[%s6878_s14 + $0x8] sm:$0x8] }
 0x152   : > { %v5928_v59 = vpop.f32.mrf.mxu0  ;;  %6208 = vmatprep.subr.bf16.mxu0 %v6667_v1  ;;  %v2946_v12 = vsel %vm1498_vm6, %v2936_v55, %v2945_v13 }
 0x153   : > { %v1294_v7 = vpop.f32.mrf.mxu1  ;;  %v2955_v5 = vsel %vm1498_vm6, %v2945_v13, %v2954_v58 }
 0x154   : > { %v1451_v18 = vpop.f32.mrf.mxu0  ;;  %v1319_v19 = vadd.f32 %v1294_v7, %v7449_v33 }
 0x155   : > { %v7545_v53 = vadd.f32 %v1451_v18, %v1317_v45  ;;  %6209 = vmatpush3.bf16.msra.mxu0 %v6579_v2  ;;  %v5909_v11 = vpop.f32.mrf.mxu1  ;;  %v2791_v45 = vrot.slane %v6580_v49, 2  ;;  %v2962_v2 = vrot.slane %v2960_v29, 3 }
 0x156   : > { %v5929_v9 = vpop.f32.mrf.mxu0  ;;  %6254 = vmatprep.subr.bf16.mxu0 %v6667_v1 }
 0x157   : > { %v1299_v33 = vpop.f32.mrf.mxu1  ;;  %6147 = vmatmul.mubr.msk.bf16.gmra.mxu1 %vm540_vm2, %v2788_v39  ;;  %v2963_v4 = vor.u32 %v2962_v2, %v2959_v3  ;;  %v3085_v9 = vrot.slane %v7475_v28, 3 }
 0x158   : > { %v1456_v17 = vpop.f32.mrf.mxu0  ;;  %6167 = vmatmul.mubr.msk.bf16.gmra.mxu0 %vm540_vm2, %v2937_v61  ;;  %v1320_v27 = vadd.f32 %v1299_v33, %v7455_v40  ;;  %6150 = vmatprep.mubr.msk.bf16.mxu1 %vm6668_vm0, %v6667_v1  ;;  %v2790_v40 = vsel %vm1202_vm5, %v2787_v62, %v2789_v15  ;;  %v2792_v62 = vsel %vm1202_vm5, %v2789_v15, %v2791_v45 }
 0x159   : > { %v7555_v16 = vadd.f32 %v1456_v17, %v1318_v0  ;;  %6170 = vmatprep.mubr.msk.bf16.mxu0 %vm6668_vm0, %v6667_v1  ;;  %v5912_v24 = vpop.f32.mrf.mxu1  ;;  %v2964_v17 = vsel %vm1498_vm6, %v2954_v58, %v2963_v4  ;;  %v3355_v4 = vld [vmem:[%s6957_s10] sm:$0xf] }
 0x15a   : > { %v5932_v35 = vpop.f32.mrf.mxu0 }
 0x15b   : > { %v1302_v50 = vpop.f32.mrf.mxu1 }
 0x15c   : > { %v1459_v25 = vpop.f32.mrf.mxu0  ;;  %v1321_v36 = vadd.f32 %v1302_v50, %v7468_v47  ;;  %v6584_v50 = vld [vmem:[%s6957_s10] sm:$0xff]  }
 0x15d   : > { %v7566_v26 = vadd.f32 %v1459_v25, %v1319_v19  ;;  %v5913_v20 = vpop.f32.mrf.mxu1  ;;  %v3087_v25 = vrot.slane %v7499_v37, 3 }
 0x15e   : > { %v5933_v38 = vpop.f32.mrf.mxu0 }
 0x15f   : > { %v1307_v42 = vpop.f32.mrf.mxu1  ;;  %6151 = vmatmul.mubr.msk.bf16.gmra.mxu1 %vm540_vm2, %v2790_v40  ;;  %v3088_v37 = vsel %vm1671_vm7, %v3085_v9, %v3087_v25 }
 0x160   : > { %v1464_v48 = vpop.f32.mrf.mxu0  ;;  %6171 = vmatmul.mubr.msk.bf16.gmra.mxu0 %vm540_vm2, %v2946_v12  ;;  %v1322_v56 = vadd.f32 %v1307_v42, %v7478_v60  ;;  %6154 = vmatprep.mubr.msk.bf16.mxu1 %vm6668_vm0, %v6667_v1  ;;  %v5427_v60 = vcombine.low %v3075_v54, %v7466_v44  ;;  %v6588_v12 = vld [vmem:[%s8606_s3 + $0x130] sm:$0xff]  }
 0x161   : > { %v7576_v57 = vadd.f32 %v1464_v48, %v1320_v27  ;;  %6174 = vmatprep.mubr.msk.bf16.mxu0 %vm6668_vm0, %v6667_v1  ;;  %v5916_v46 = vpop.f32.mrf.mxu1 }
 0x162   : > { %v5936_v47 = vpop.f32.mrf.mxu0  ;;  %v3084_v44 = vrot.slane %v5427_v60, 3  ;;  %v6586_v46 = vld [vmem:[%s6957_s10 + $0x8] sm:$0xff]  }
 0x163   : > { %v1310_v8 = vpop.f32.mrf.mxu1  ;;  %v3089_v47 = vrot.slane %v7526_v32, 3 }
 0x164   : > { %v1467_v51 = vpop.f32.mrf.mxu0  ;;  %v1323_v0 = vadd.f32 %v1310_v8, %v7490_v14  ;;  %v3086_v33 = vsel %vm1671_vm7, %v3084_v44, %v3085_v9 }
 0x165   : > { %v7587_v55 = vadd.f32 %v1467_v51, %v1321_v36  ;;  %v5917_v63 = vpop.f32.mrf.mxu1 }
 0x166   : > { %v5937_v59 = vpop.f32.mrf.mxu0 }
 0x167   : > { %v1613_v6 = vpop.f32.mrf.mxu1  ;;  %6155 = vmatmul.mubr.msk.bf16.gmra.mxu1 %vm540_vm2, %v2792_v62 }
 0x168   : > { %v1472_v18 = vpop.f32.mrf.mxu0  ;;  %6175 = vmatmul.mubr.msk.bf16.gmra.mxu0 %vm540_vm2, %v2955_v5  ;;  %v1652_v14 = vadd.f32 %v1613_v6, %v7502_v31  ;;  %6186 = vmatprep.mubr.msk.bf16.mxu1 %vm6668_vm0, %v6667_v1  ;;  %v6583_v31 = vld [vmem:[%s8606_s3 + $0x138] sm:$0xff]   ;;  %v3356_v6 = vld [vmem:[%s6957_s10 + $0x4] sm:$0xf] }
 0x169   : > { %v7594_v61 = vadd.f32 %v1472_v18, %v1322_v56  ;;  %6178 = vmatprep.mubr.msk.bf16.mxu0 %vm6668_vm0, %v6667_v1  ;;  %v5948_v19 = vpop.f32.mrf.mxu1  ;;  %v6587_v18 = vld [vmem:[%s6957_s10 + $0x10] sm:$0xff]  }
 0x16a   : > { %v5940_v7 = vpop.f32.mrf.mxu0 }
 0x16b   : > { %v1616_v13 = vpop.f32.mrf.mxu1 }
 0x16c   : > { %v1475_v39 = vpop.f32.mrf.mxu0  ;;  %v1653_v23 = vadd.f32 %v1616_v13, %v7517_v41 }
 0x16d   : > { %v7603_v11 = vadd.f32 %v1475_v39, %v1323_v0  ;;  %v5949_v35 = vpop.f32.mrf.mxu1 }
 0x16e   : > { %v5941_v21 = vpop.f32.mrf.mxu0 }
 0x16f   : > { %v1621_v15 = vpop.f32.mrf.mxu1  ;;  %6187 = vmatmul.mubr.msk.bf16.vlgmr.msra.gmra.mxu1 %vm540_vm2, %v3086_v33  ;;  %v7682_v33 = vld [vmem:[%s6957_s10 + $0x8] sm:$0xff]  }
 0x170   : > { %v1744_v27 = vpop.f32.mrf.mxu0  ;;  %6179 = vmatmul.mubr.msk.bf16.gmra.mxu0 %vm540_vm2, %v2964_v17  ;;  %v1654_v24 = vadd.f32 %v1621_v15, %v7530_v30  ;;  %6231 = vmatpush3.bf16.msra.mxu1 %v6583_v31  ;;  %v6585_v30 = vld [vmem:[%s8606_s3 + $0x148] sm:$0xff]   ;;  %v6590_v15 = vld [vmem:[%s6957_s10 + $0x18] sm:$0xff]  }
 0x171   : > { %v7612_v28 = vadd.f32 %v1744_v27, %v1652_v14  ;;  %6210 = vmatprep.mubr.msk.bf16.mxu0 %vm6668_vm0, %v6667_v1  ;;  %6190 = vmatprep.mubr.msk.bf16.mxu1 %vm6668_vm0, %v6667_v1  ;;  %v5952_v43 = vpop.f32.mrf.mxu1 }
 0x172   : > { %v5972_v41 = vpop.f32.mrf.mxu0  ;;  %6232 = vmatprep.subr.bf16.mxu1 %v6667_v1 }
 0x173   : > { %v1624_v36 = vpop.f32.mrf.mxu1 }
 0x174   : > { %v1747_v34 = vpop.f32.mrf.mxu0  ;;  %v1655_v49 = vadd.f32 %v1624_v36, %v7545_v53  ;;  %6233 = vmatpush3.bf16.msra.mxu1 %v6588_v12  ;;  %v6589_v53 = vld [vmem:[%s8606_s3 + $0x140] sm:$0xff]  }
 0x175   : > { %v7626_v38 = vadd.f32 %v1747_v34, %v1653_v23  ;;  %v5953_v20 = vpop.f32.mrf.mxu1  ;;  %6278 = vmatprep.subr.bf16.mxu1 %v6667_v1  ;;  %v3093_v23 = vrot.slane %v7570_v22, 3  ;;  %v3407_v34 = vshll.u32 %v7682_v33, 16 }
 0x176   : > { %v5973_v40 = vpop.f32.mrf.mxu0 }
 0x177   : > { %v1629_v52 = vpop.f32.mrf.mxu1  ;;  %6191 = vmatmul.mubr.msk.bf16.gmra.mxu1 %vm540_vm2, %v3088_v37 }
 0x178   : > { %v1752_v48 = vpop.f32.mrf.mxu0  ;;  %6211 = vmatmul.mubr.msk.bf16.vlgmr.msra.gmra.mxu0 %vm540_vm2, %v6584_v50  ;;  %v1656_v42 = vadd.f32 %v1629_v52, %v7555_v16  ;;  %6194 = vmatprep.mubr.msk.bf16.mxu1 %vm6668_vm0, %v6667_v1  ;;  %v3090_v16 = vsel %vm1671_vm7, %v3087_v25, %v3089_v47 }
 0x179   : > { %v7635_v58 = vadd.f32 %v1752_v48, %v1654_v24  ;;  %6255 = vmatpush3.bf16.msra.mxu0 %v6585_v30  ;;  %6214 = vmatprep.mubr.msk.bf16.mxu0 %vm6668_vm0, %v6667_v1  ;;  %v5956_v56 = vpop.f32.mrf.mxu1  ;;  %v3409_v48 = vrot.slane %v3407_v34, 1 }
 0x17a   : > { %v5976_v29 = vpop.f32.mrf.mxu0  ;;  %6256 = vmatprep.subr.bf16.mxu0 %v6667_v1 }
 0x17b   : > { %v1632_v54 = vpop.f32.mrf.mxu1 }
 0x17c   : > { %v1755_v45 = vpop.f32.mrf.mxu0  ;;  %v1657_v3 = vadd.f32 %v1632_v54, %v7566_v26  ;;  %v3091_v26 = vrot.slane %v7552_v10, 3 }
 0x17d   : > { %v7649_v51 = vadd.f32 %v1755_v45, %v1655_v49  ;;  %6257 = vmatpush3.bf16.msra.mxu0 %v6589_v53  ;;  %v5957_v2 = vpop.f32.mrf.mxu1  ;;  %v7701_v53 = vld [vmem:[%s6957_s10 + $0x10] sm:$0xff]  }
 0x17e   : > { %v5977_v5 = vpop.f32.mrf.mxu0  ;;  %6302 = vmatprep.subr.bf16.mxu0 %v6667_v1  ;;  %v3092_v19 = vsel %vm1671_vm7, %v3089_v47, %v3091_v26  ;;  %v3094_v12 = vsel %vm1671_vm7, %v3091_v26, %v3093_v23 }
 0x17f   : > { %v1637_v59 = vpop.f32.mrf.mxu1  ;;  %6195 = vmatmul.mubr.msk.bf16.gmra.mxu1 %vm540_vm2, %v3090_v16  ;;  %v3415_v16 = vshll.u32 %v7701_v53, 16 }
 0x180   : > { %v1760_v8 = vpop.f32.mrf.mxu0  ;;  %6215 = vmatmul.mubr.msk.bf16.gmra.mxu0 %vm540_vm2, %v6586_v46  ;;  %v1658_v62 = vadd.f32 %v1637_v59, %v7576_v57  ;;  %6198 = vmatprep.mubr.msk.bf16.mxu1 %vm6668_vm0, %v6667_v1  ;;  %v5455_v57 = vcombine.low %v3355_v4, %v3356_v6  ;;  %v7724_v4 = vld [vmem:[%s6957_s10 + $0x18] sm:$0xff]  }
 0x181   : > { %v7655_v32 = vadd.f32 %v1760_v8, %v1656_v42  ;;  %6218 = vmatprep.mubr.msk.bf16.mxu0 %vm6668_vm0, %v6667_v1  ;;  %v5960_v60 = vpop.f32.mrf.mxu1  ;;  %v6591_v42 = vld [vmem:[%s6957_s10 + $0x20] sm:$0xff]   ;;  %v3423_v23 = vshll.u32 %v7724_v4, 16 }
 0x182   : > { %v5980_v0 = vpop.f32.mrf.mxu0  ;;  %v3402_v31 = vshll.u32 %v5455_v57, 16  ;;  %v3400_v43 = vshrl.u32 %v5455_v57, 16 }
 0x183   : > { %v1640_v14 = vpop.f32.mrf.mxu1  ;;  %v3563_v0 = vrot.slane %v7682_v33, 1 }
 0x184   : > { %v1763_v63 = vpop.f32.mrf.mxu0  ;;  %v1659_v9 = vadd.f32 %v1640_v14, %v7587_v55 }
 0x185   : > { %v7667_v7 = vadd.f32 %v1763_v63, %v1657_v3  ;;  %v5961_v39 = vpop.f32.mrf.mxu1  ;;  %v3411_v3 = vshrl.u32 %v7682_v33, 16 }
 0x186   : > { %v5981_v44 = vpop.f32.mrf.mxu0 }
 0x187   : > { %v1645_v13 = vpop.f32.mrf.mxu1  ;;  %6199 = vmatmul.mubr.msk.bf16.gmra.mxu1 %vm540_vm2, %v3092_v19  ;;  %v3413_v63 = vor.u32 %v3411_v3, %v3409_v48  ;;  %v6597_v19 = vld [vmem:[%s8606_s3 + $0x168] sm:$0xff]  }
 0x188   : > { %v1768_v17 = vpop.f32.mrf.mxu0  ;;  %6219 = vmatmul.mubr.msk.bf16.gmra.mxu0 %vm540_vm2, %v6587_v18  ;;  %v1660_v55 = vadd.f32 %v1645_v13, %v7594_v61  ;;  %6202 = vmatprep.mubr.msk.bf16.mxu1 %vm6668_vm0, %v6667_v1  ;;  %v3404_v61 = vrot.slane %v3402_v31, 1  ;;  %v3417_v18 = vrot.slane %v3415_v16, 1 }
 0x189   : > { %v7672_v10 = vadd.f32 %v1768_v17, %v1658_v62  ;;  %6222 = vmatprep.mubr.msk.bf16.mxu0 %vm6668_vm0, %v6667_v1  ;;  %v5964_v35 = vpop.f32.mrf.mxu1 }
 0x18a   : > { %v5984_v21 = vpop.f32.mrf.mxu0  ;;  %v3405_v20 = vor.u32 %v3404_v61, %v3400_v43  ;;  %v3418_v13 = vsel %vm483_vm1, %v3413_v63, %v3417_v18  ;;  %v6601_v35 = vld [vmem:[%s8606_s3 + $0x160] sm:$0xff]  }
 0x18b   : > { %v1648_v24 = vpop.f32.mrf.mxu1  ;;  %v3419_v21 = vshrl.u32 %v7701_v53, 16 }
 0x18c   : > { %v1771_v27 = vpop.f32.mrf.mxu0  ;;  %v1661_v22 = vadd.f32 %v1648_v24, %v7603_v11  ;;  %v3553_v11 = vld [vmem:[%s6957_s10] sm:$0xe]  ;;  %v3410_v5 = vsel %vm483_vm1, %v3405_v20, %v3409_v48 }
 0x18d   : > { %v7685_v41 = vadd.f32 %v1771_v27, %v1659_v9  ;;  %v5965_v50 = vpop.f32.mrf.mxu1  ;;  %v5472_v56 = vcombine.low %v3553_v11, %v3356_v6  ;;  %v6600_v6 = vld [vmem:[%s8606_s3 + $0x150] sm:$0xff]   ;;  %v3427_v11 = vshrl.u32 %v7724_v4, 16 }
 0x18e   : > { %v5985_v25 = vpop.f32.mrf.mxu0 }
 0x18f   : > { %v1894_v40 = vpop.f32.mrf.mxu1  ;;  %6203 = vmatmul.mubr.msk.bf16.gmra.mxu1 %vm540_vm2, %v3094_v12  ;;  %v3421_v25 = vor.u32 %v3419_v21, %v3417_v18  ;;  %v3425_v12 = vrot.slane %v3423_v23, 1 }
 0x190   : > { %v1776_v30 = vpop.f32.mrf.mxu0  ;;  %6223 = vmatmul.mubr.msk.bf16.gmra.mxu0 %vm540_vm2, %v6590_v15  ;;  %v1933_v37 = vadd.f32 %v1894_v40, %v7612_v28  ;;  %6234 = vmatprep.mubr.msk.bf16.mxu1 %vm6668_vm0, %v6667_v1  ;;  %v6594_v28 = vld [vmem:[%s8606_s3 + $0x158] sm:$0xff]  }
 0x191   : > { %v7691_v36 = vadd.f32 %v1776_v30, %v1660_v55  ;;  %6226 = vmatprep.mubr.msk.bf16.mxu0 %vm6668_vm0, %v6667_v1  ;;  %v5996_v52 = vpop.f32.mrf.mxu1 }
 0x192   : > { %v5988_v49 = vpop.f32.mrf.mxu0  ;;  %v3567_v52 = vrot.slane %v7724_v4, 1 }
 0x193   : > { %v1897_v45 = vpop.f32.mrf.mxu1  ;;  %v3426_v49 = vsel %vm483_vm1, %v3421_v25, %v3425_v12 }
 0x194   : > { %v1779_v29 = vpop.f32.mrf.mxu0  ;;  %v1934_v54 = vadd.f32 %v1897_v45, %v7626_v38  ;;  %v3562_v38 = vrot.slane %v5472_v56, 1  ;;  %v3429_v56 = vor.u32 %v3427_v11, %v3425_v12 }
 0x195   : > { %v7704_v47 = vadd.f32 %v1779_v29, %v1661_v22  ;;  %v5997_v2 = vpop.f32.mrf.mxu1  ;;  %v7756_v22 = vld [vmem:[%s6957_s10 + $0x20] sm:$0xff]  }
 0x196   : > { %v5989_v46 = vpop.f32.mrf.mxu0  ;;  %v3569_v63 = vrot.slane %v7756_v22, 1 }
 0x197   : > { %v1902_v62 = vpop.f32.mrf.mxu1  ;;  %6235 = vmatmul.mubr.msk.bf16.vlgmr.msra.gmra.mxu1 %vm540_vm2, %v3410_v5  ;;  %v6602_v46 = vld [vmem:[%s6957_s10 + $0x28] ss:$0 sps:$4 sm:$0x11]  }
 0x198   : > { %v2092_v8 = vpop.f32.mrf.mxu0  ;;  %6227 = vmatmul.mubr.msk.bf16.gmra.mxu0 %vm540_vm2, %v6591_v42  ;;  %v1935_v60 = vadd.f32 %v1902_v62, %v7635_v58  ;;  %6279 = vmatpush3.bf16.msra.mxu1 %v6594_v28  ;;  %v3564_v58 = vsel %vm733_vm3, %v3562_v38, %v3563_v0  ;;  %v3571_v25 = vrot.slane %v6602_v46, 1 }
 0x199   : > { %v7714_v59 = vadd.f32 %v2092_v8, %v1933_v37  ;;  %6258 = vmatprep.mubr.msk.bf16.mxu0 %vm6668_vm0, %v6667_v1  ;;  %6238 = vmatprep.mubr.msk.bf16.mxu1 %vm6668_vm0, %v6667_v1  ;;  %v6000_v14 = vpop.f32.mrf.mxu1  ;;  %v3431_v37 = vshll.u32 %v7756_v22, 16 }
 0x19a   : > { %v6020_v26 = vpop.f32.mrf.mxu0  ;;  %6280 = vmatprep.subr.bf16.mxu1 %v6667_v1 }
 0x19b   : > { %v1905_v57 = vpop.f32.mrf.mxu1  ;;  %v3433_v45 = vrot.slane %v3431_v37, 1 }
 0x19c   : > { %v2095_v44 = vpop.f32.mrf.mxu0  ;;  %v1936_v17 = vadd.f32 %v1905_v57, %v7649_v51  ;;  %6281 = vmatpush3.bf16.msra.mxu1 %v6600_v6  ;;  %v3565_v51 = vrot.slane %v7701_v53, 1 }
 0x19d   : > { %v7730_v9 = vadd.f32 %v2095_v44, %v1934_v54  ;;  %v6001_v55 = vpop.f32.mrf.mxu1  ;;  %6326 = vmatprep.subr.bf16.mxu1 %v6667_v1  ;;  %v3434_v38 = vsel %vm483_vm1, %v3429_v56, %v3433_v45  ;;  %v3683_v44 = vld [vmem:[%s6957_s10 + $0x4] sm:$0xe]  ;;  %v6605_v56 = vld [vmem:[%s8606_s3 + $0x178] sm:$0xff]  }
 0x19e   : > { %v6021_v39 = vpop.f32.mrf.mxu0  ;;  %v3566_v50 = vsel %vm733_vm3, %v3563_v0, %v3565_v51  ;;  %v3568_v3 = vsel %vm733_vm3, %v3565_v51, %v3567_v52  ;;  %v3439_v0 = vshll.u32 %v6602_v46, 16 }
 0x19f   : > { %v1910_v27 = vpop.f32.mrf.mxu1  ;;  %6239 = vmatmul.mubr.msk.bf16.gmra.mxu1 %vm540_vm2, %v3418_v13 }
 0x1a0   : > { %v2100_v33 = vpop.f32.mrf.mxu0  ;;  %6259 = vmatmul.mubr.msk.bf16.vlgmr.msra.gmra.mxu0 %vm540_vm2, %v3564_v58  ;;  %v1937_v24 = vadd.f32 %v1910_v27, %v7655_v32  ;;  %6242 = vmatprep.mubr.msk.bf16.mxu1 %vm6668_vm0, %v6667_v1  ;;  %v3441_v14 = vrot.slane %v3439_v0, 1  ;;  %v7795_v58 = vld [vmem:[%s6957_s10 + $0x8] sm:$0xf] }
 0x1a1   : > { %v7742_v31 = vadd.f32 %v2100_v33, %v1935_v60  ;;  %6303 = vmatpush3.bf16.msra.mxu0 %v6597_v19  ;;  %6262 = vmatprep.mubr.msk.bf16.mxu0 %vm6668_vm0, %v6667_v1  ;;  %v6004_v43 = vpop.f32.mrf.mxu1  ;;  %v5484_v23 = vcombine.low %v3683_v44, %v7795_v58  ;;  %v7804_v33 = vld [vmem:[%s6957_s10 + $0xc] sm:$0xff]  }
 0x1a2   : > { %v6024_v15 = vpop.f32.mrf.mxu0  ;;  %6304 = vmatprep.subr.bf16.mxu0 %v6667_v1  ;;  %v3866_v12 = vshrl.u32 %v7804_v33, 16 }
 0x1a3   : > { %v1913_v30 = vpop.f32.mrf.mxu1  ;;  %v3858_v27 = vshrl.u32 %v5484_v23, 16  ;;  %v3861_v15 = vshll.u32 %v5484_v23, 16 }
 0x1a4   : > { %v2103_v61 = vpop.f32.mrf.mxu0  ;;  %v1938_v32 = vadd.f32 %v1913_v30, %v7667_v7  ;;  %v3728_v30 = vrot.slane %v7804_v33, 1 }
 0x1a5   : > { %v7758_v34 = vadd.f32 %v2103_v61, %v1936_v17  ;;  %6305 = vmatpush3.bf16.msra.mxu0 %v6601_v35  ;;  %v6005_v20 = vpop.f32.mrf.mxu1  ;;  %v3570_v17 = vsel %vm733_vm3, %v3567_v52, %v3569_v63  ;;  %v3863_v11 = vrot.slane %v3861_v15, 2 }
 0x1a6   : > { %v6025_v40 = vpop.f32.mrf.mxu0  ;;  %6350 = vmatprep.subr.bf16.mxu0 %v6667_v1  ;;  %v3572_v20 = vsel %vm733_vm3, %v3569_v63, %v3571_v25 }
 0x1a7   : > { %v1918_v29 = vpop.f32.mrf.mxu1  ;;  %6243 = vmatmul.mubr.msk.bf16.gmra.mxu1 %vm540_vm2, %v3426_v49  ;;  %v3860_v49 = vrot.slane %v3858_v27, 1 }
 0x1a8   : > { %v2108_v48 = vpop.f32.mrf.mxu0  ;;  %6263 = vmatmul.mubr.msk.bf16.gmra.mxu0 %vm540_vm2, %v3566_v50  ;;  %v1939_v42 = vadd.f32 %v1918_v29, %v7672_v10  ;;  %6246 = vmatprep.mubr.msk.bf16.mxu1 %vm6668_vm0, %v6667_v1  ;;  %v3435_v10 = vshrl.u32 %v7756_v22, 16  ;;  %v3727_v50 = vrot.slane %v5484_v23, 1 }
 0x1a9   : > { %v7767_v53 = vadd.f32 %v2108_v48, %v1937_v24  ;;  %6266 = vmatprep.mubr.msk.bf16.mxu0 %vm6668_vm0, %v6667_v1  ;;  %v6008_v54 = vpop.f32.mrf.mxu1  ;;  %v3868_v48 = vrot.slane %v3866_v12, 1 }
 0x1aa   : > { %v6028_v7 = vpop.f32.mrf.mxu0  ;;  %v3437_v6 = vor.u32 %v3435_v10, %v3433_v45  ;;  %v7827_v45 = vld [vmem:[%s6957_s10 + $0x14] sm:$0xff]  }
 0x1ab   : > { %v1921_v16 = vpop.f32.mrf.mxu1  ;;  %v3730_v0 = vrot.slane %v7827_v45, 1 }
 0x1ac   : > { %v2111_v5 = vpop.f32.mrf.mxu0  ;;  %v1940_v8 = vadd.f32 %v1921_v16, %v7685_v41  ;;  %v3442_v55 = vsel %vm483_vm1, %v3437_v6, %v3441_v14  ;;  %vm4674_vm1 = vcmask 519168  }
 0x1ad   : > { %v7777_v28 = vadd.f32 %v2111_v5, %v1938_v32  ;;  %v6009_v62 = vpop.f32.mrf.mxu1  ;;  %v3864_v5 = vor.u32 %v3863_v11, %v3860_v49  ;;  %v7880_v49 = vld [vmem:[%s6957_s10 + $0x24] sm:$0xff]  }
 0x1ae   : > { %v6029_v2 = vpop.f32.mrf.mxu0  ;;  %v6610_v62 = vld [vmem:[%s8606_s3 + $0x170] sm:$0xff]  }
 0x1af   : > { %v1926_v18 = vpop.f32.mrf.mxu1  ;;  %6247 = vmatmul.mubr.msk.bf16.gmra.mxu1 %vm540_vm2, %v3434_v38  ;;  %v3878_v2 = vshll.u32 %v7827_v45, 16 }
 0x1b0   : > { %v2116_v26 = vpop.f32.mrf.mxu0  ;;  %6267 = vmatmul.mubr.msk.bf16.gmra.mxu0 %vm540_vm2, %v3568_v3  ;;  %v1941_v4 = vadd.f32 %v1926_v18, %v7691_v36  ;;  %6250 = vmatprep.mubr.msk.bf16.mxu1 %vm6668_vm0, %v6667_v1 }
 0x1b1   : > { %v7784_v60 = vadd.f32 %v2116_v26, %v1939_v42  ;;  %6270 = vmatprep.mubr.msk.bf16.mxu0 %vm6668_vm0, %v6667_v1  ;;  %v6012_v19 = vpop.f32.mrf.mxu1  ;;  %v3729_v42 = vsel %vm733_vm3, %v3727_v50, %v3728_v30  ;;  %v3880_v6 = vrot.slane %v3878_v2, 2 }
 0x1b2   : > { %v6032_v41 = vpop.f32.mrf.mxu0 }
 0x1b3   : > { %v1929_v13 = vpop.f32.mrf.mxu1 }
 0x1b4   : > { %v2119_v57 = vpop.f32.mrf.mxu0  ;;  %v1942_v36 = vadd.f32 %v1929_v13, %v7704_v47  ;;  %v3869_v47 = vshll.u32 %v7804_v33, 16 }
 0x1b5   : > { %v7797_v39 = vadd.f32 %v2119_v57, %v1940_v8  ;;  %v6013_v51 = vpop.f32.mrf.mxu1  ;;  %v3731_v57 = vsel %vm733_vm3, %v3728_v30, %v3730_v0 }
 0x1b6   : > { %v6033_v21 = vpop.f32.mrf.mxu0  ;;  %v3871_v52 = vrot.slane %v3869_v47, 2  ;;  %v6611_v51 = vld [vmem:[%s8606_s3 + $0x180] sm:$0xff]  }
 0x1b7   : > { %v2222_v22 = vpop.f32.mrf.mxu1  ;;  %6251 = vmatmul.mubr.msk.bf16.gmra.mxu1 %vm540_vm2, %v3442_v55 }
 0x1b8   : > { %v2124_v35 = vpop.f32.mrf.mxu0  ;;  %6271 = vmatmul.mubr.msk.bf16.gmra.mxu0 %vm540_vm2, %v3570_v17  ;;  %v2261_v61 = vadd.f32 %v2222_v22, %v7714_v59  ;;  %6282 = vmatprep.mubr.msk.bf16.mxu1 %vm6668_vm0, %v6667_v1  ;;  %v3872_v16 = vor.u32 %v3871_v52, %v3868_v48  ;;  %v7854_v17 = vld [vmem:[%s6957_s10 + $0x1c] sm:$0xff]  }
 0x1b9   : > { %v7807_v24 = vadd.f32 %v2124_v35, %v1941_v4  ;;  %6274 = vmatprep.mubr.msk.bf16.mxu0 %vm6668_vm0, %v6667_v1  ;;  %v6044_v40 = vpop.f32.mrf.mxu1  ;;  %v3887_v55 = vshll.u32 %v7854_v17, 16  ;;  %v3732_v25 = vrot.slane %v7854_v17, 1 }
 0x1ba   : > { %v6036_v43 = vpop.f32.mrf.mxu0  ;;  %v3873_v41 = vsel %vm1029_vm4, %v3864_v5, %v3872_v16 }
 0x1bb   : > { %v2225_v29 = vpop.f32.mrf.mxu1  ;;  %v3889_v50 = vrot.slane %v3887_v55, 2 }
 0x1bc   : > { %v2127_v32 = vpop.f32.mrf.mxu0  ;;  %v2262_v59 = vadd.f32 %v2225_v29, %v7730_v9  ;;  %v3875_v9 = vshrl.u32 %v7827_v45, 16  ;;  %v3893_v29 = vshrl.u32 %v7880_v49, 16 }
 0x1bd   : > { %v7818_v37 = vadd.f32 %v2127_v32, %v1942_v36  ;;  %v6045_v46 = vpop.f32.mrf.mxu1  ;;  %v3733_v32 = vsel %vm733_vm3, %v3730_v0, %v3732_v25 }
 0x1be   : > { %v6037_v7 = vpop.f32.mrf.mxu0  ;;  %v3877_v4 = vrot.slane %v3875_v9, 1  ;;  %v3895_v9 = vrot.slane %v3893_v29, 1 }
 0x1bf   : > { %v2230_v8 = vpop.f32.mrf.mxu1  ;;  %6283 = vmatmul.mubr.msk.bf16.vlgmr.msra.gmra.mxu1 %vm540_vm2, %v3729_v42  ;;  %v3896_v7 = vshll.u32 %v7880_v49, 16 }
 0x1c0   : > { %v2387_v54 = vpop.f32.mrf.mxu0  ;;  %6275 = vmatmul.mubr.msk.bf16.gmra.mxu0 %vm540_vm2, %v3572_v20  ;;  %v2263_v10 = vadd.f32 %v2230_v8, %v7742_v31  ;;  %6327 = vmatpush3.bf16.msra.mxu1 %v6605_v56  ;;  %v6607_v31 = vld [vmem:[%s8606_s3 + $0x188] sm:$0xff]   ;;  %v3881_v36 = vor.u32 %v3880_v6, %v3877_v4  ;;  %v3734_v56 = vrot.slane %v7880_v49, 1 }
 0x1c1   : > { %v7830_v3 = vadd.f32 %v2387_v54, %v2261_v61  ;;  %6306 = vmatprep.mubr.msk.bf16.mxu0 %vm6668_vm0, %v6667_v1  ;;  %6286 = vmatprep.mubr.msk.bf16.mxu1 %vm6668_vm0, %v6667_v1  ;;  %v6048_v26 = vpop.f32.mrf.mxu1  ;;  %v3898_v2 = vrot.slane %v3896_v7, 2  ;;  %v7898_v8 = vld [vmem:[%s6957_s10 + $0x2c] ss:$0 sps:$4 sm:$0x33]  }
 0x1c2   : > { %v6068_v38 = vpop.f32.mrf.mxu0  ;;  %6328 = vmatprep.subr.bf16.mxu1 %v6667_v1  ;;  %v3882_v43 = vsel %vm1029_vm4, %v3872_v16, %v3881_v36  ;;  %v3902_v4 = vshrl.u32 %v7898_v8, 16  ;;  %v3905_v6 = vshll.u32 %v7898_v8, 16 }
 0x1c3   : > { %v2233_v14 = vpop.f32.mrf.mxu1 }
 0x1c4   : > { %v2390_v63 = vpop.f32.mrf.mxu0  ;;  %v2264_v19 = vadd.f32 %v2233_v14, %v7758_v34  ;;  %6329 = vmatpush3.bf16.msra.mxu1 %v6610_v62  ;;  %v3884_v34 = vshrl.u32 %v7854_v17, 16  ;;  %v6612_v62 = vld [vmem:[%s6957_s10 + $0x2c] ss:$0 sps:$4 sm:$0x11]   ;;  %v3904_v55 = vrot.slane %v3902_v4, 1  ;;  %v7972_v4 = vld [vmem:[%s6957_s10 + $0x18] sm:$0xff]  }
 0x1c5   : > { %v7845_v18 = vadd.f32 %v2390_v63, %v2262_v59  ;;  %v6049_v13 = vpop.f32.mrf.mxu1  ;;  %6374 = vmatprep.subr.bf16.mxu1 %v6667_v1 }
 0x1c6   : > { %v6069_v44 = vpop.f32.mrf.mxu0  ;;  %v3886_v61 = vrot.slane %v3884_v34, 1 }
 0x1c7   : > { %v2238_v35 = vpop.f32.mrf.mxu1  ;;  %6287 = vmatmul.mubr.msk.bf16.gmra.mxu1 %vm540_vm2, %v3731_v57 }
 0x1c8   : > { %v2395_v21 = vpop.f32.mrf.mxu0  ;;  %6307 = vmatmul.mubr.msk.bf16.vlgmr.msra.gmra.mxu0 %vm540_vm2, %v3873_v41  ;;  %v2265_v15 = vadd.f32 %v2238_v35, %v7767_v53  ;;  %6290 = vmatprep.mubr.msk.bf16.mxu1 %vm6668_vm0, %v6667_v1  ;;  %v3890_v52 = vor.u32 %v3889_v50, %v3886_v61 }
 0x1c9   : > { %v7858_v23 = vadd.f32 %v2395_v21, %v2263_v10  ;;  %6351 = vmatpush3.bf16.msra.mxu0 %v6607_v31  ;;  %6310 = vmatprep.mubr.msk.bf16.mxu0 %vm6668_vm0, %v6667_v1  ;;  %v6052_v12 = vpop.f32.mrf.mxu1  ;;  %v3899_v31 = vor.u32 %v3898_v2, %v3895_v9  ;;  %v4020_v21 = vld [vmem:[%s6957_s10 + $0x4] sm:$0xc] }
 0x1ca   : > { %v6072_v27 = vpop.f32.mrf.mxu0  ;;  %6352 = vmatprep.subr.bf16.mxu0 %v6667_v1  ;;  %v3891_v16 = vsel %vm1029_vm4, %v3881_v36, %v3890_v52 }
 0x1cb   : > { %v2241_v30 = vpop.f32.mrf.mxu1  ;;  %v3900_v34 = vsel %vm1029_vm4, %v3890_v52, %v3899_v31 }
 0x1cc   : > { %v2398_v47 = vpop.f32.mrf.mxu0  ;;  %v2266_v53 = vadd.f32 %v2241_v30, %v7777_v28 }
 0x1cd   : > { %v7873_v22 = vadd.f32 %v2398_v47, %v2264_v19  ;;  %6353 = vmatpush3.bf16.msra.mxu0 %v6611_v51  ;;  %v6053_v11 = vpop.f32.mrf.mxu1  ;;  %v3736_v19 = vrot.slane %v6612_v62, 1  ;;  %v3907_v51 = vrot.slane %v3905_v6, 2 }
 0x1ce   : > { %v6073_v40 = vpop.f32.mrf.mxu0  ;;  %6398 = vmatprep.subr.bf16.mxu0 %v6667_v1 }
 0x1cf   : > { %v2246_v28 = vpop.f32.mrf.mxu1  ;;  %6291 = vmatmul.mubr.msk.bf16.gmra.mxu1 %vm540_vm2, %v3733_v32  ;;  %v3908_v61 = vor.u32 %v3907_v51, %v3904_v55  ;;  %v7929_v40 = vld [vmem:[%s6957_s10 + $0xc] sm:$0xf]  ;;  %v4030_v32 = vrot.slane %v7804_v33, 2  ;;  %v6615_v33 = vld [vmem:[%s8606_s3 + $0x198] sm:$0xff]   ;;  %v4034_v51 = vrot.slane %v7854_v17, 2 }
 0x1d0   : > { %v2403_v20 = vpop.f32.mrf.mxu0  ;;  %6311 = vmatmul.mubr.msk.bf16.gmra.mxu0 %vm540_vm2, %v3882_v43  ;;  %v2267_v42 = vadd.f32 %v2246_v28, %v7784_v60  ;;  %6294 = vmatprep.mubr.msk.bf16.mxu1 %vm6668_vm0, %v6667_v1  ;;  %v3735_v60 = vsel %vm733_vm3, %v3732_v25, %v3734_v56  ;;  %v5513_v25 = vcombine.low %v4020_v21, %v7795_v58  ;;  %v7942_v28 = vld [vmem:[%s6957_s10 + $0x10] sm:$0xff]  }
 0x1d1   : > { %v7883_v48 = vadd.f32 %v2403_v20, %v2265_v15  ;;  %6314 = vmatprep.mubr.msk.bf16.mxu0 %vm6668_vm0, %v6667_v1  ;;  %v6056_v46 = vpop.f32.mrf.mxu1  ;;  %v3909_v29 = vsel %vm1029_vm4, %v3899_v31, %v3908_v61 }
 0x1d2   : > { %v6076_v59 = vpop.f32.mrf.mxu0 }
 0x1d3   : > { %v2249_v38 = vpop.f32.mrf.mxu1 }
 0x1d4   : > { %v2406_v54 = vpop.f32.mrf.mxu0  ;;  %v2268_v0 = vadd.f32 %v2249_v38, %v7797_v39 }
 0x1d5   : > { %v7894_v5 = vadd.f32 %v2406_v54, %v2266_v53  ;;  %v6057_v26 = vpop.f32.mrf.mxu1  ;;  %v4029_v53 = vrot.slane %v5513_v25, 2  ;;  %v7995_v25 = vld [vmem:[%s6957_s10 + $0x20] sm:$0xff]  }
 0x1d6   : > { %v6077_v10 = vpop.f32.mrf.mxu0 }
 0x1d7   : > { %v2254_v14 = vpop.f32.mrf.mxu1  ;;  %6295 = vmatmul.mubr.msk.bf16.gmra.mxu1 %vm540_vm2, %v3735_v60  ;;  %v6621_v60 = vld [vmem:[%s8606_s3 + $0x190] sm:$0xff]  }
 0x1d8   : > { %v2411_v63 = vpop.f32.mrf.mxu0  ;;  %6315 = vmatmul.mubr.msk.bf16.gmra.mxu0 %vm540_vm2, %v3891_v16  ;;  %v2269_v44 = vadd.f32 %v2254_v14, %v7807_v24  ;;  %6298 = vmatprep.mubr.msk.bf16.mxu1 %vm6668_vm0, %v6667_v1  ;;  %v3737_v24 = vsel %vm733_vm3, %v3734_v56, %v3736_v19  ;;  %v4031_v56 = vsel %vm1202_vm5, %v4029_v53, %v4030_v32 }
 0x1d9   : > { %v7904_v41 = vadd.f32 %v2411_v63, %v2267_v42  ;;  %6318 = vmatprep.mubr.msk.bf16.mxu0 %vm6668_vm0, %v6667_v1  ;;  %v6060_v57 = vpop.f32.mrf.mxu1 }
 0x1da   : > { %v6080_v39 = vpop.f32.mrf.mxu0 }
 0x1db   : > { %v2257_v35 = vpop.f32.mrf.mxu1 }
 0x1dc   : > { %v2414_v13 = vpop.f32.mrf.mxu0  ;;  %v2270_v15 = vadd.f32 %v2257_v35, %v7818_v37  ;;  %v4150_v37 = vld [vmem:[%s6957_s10 + $0x8] sm:$0xc] }
 0x1dd   : > { %v7915_v36 = vadd.f32 %v2414_v13, %v2268_v0  ;;  %v6061_v12 = vpop.f32.mrf.mxu1  ;;  %v7939_v7 = vcombine.low %v4150_v37, %v7929_v40  ;;  %v4032_v0 = vrot.slane %v7827_v45, 2  ;;  %v4197_v13 = vrot.slane %v7972_v4, 2 }
 0x1de   : > { %v6081_v27 = vpop.f32.mrf.mxu0  ;;  %v4199_v37 = vrot.slane %v7995_v25, 2 }
 0x1df   : > { %v2559_v50 = vpop.f32.mrf.mxu1  ;;  %6299 = vmatmul.mubr.msk.bf16.gmra.mxu1 %vm540_vm2, %v3737_v24  ;;  %v4194_v9 = vrot.slane %v7939_v7, 2  ;;  %v4033_v39 = vsel %vm1202_vm5, %v4030_v32, %v4032_v0  ;;  %v4036_v32 = vrot.slane %v7880_v49, 2 }
 0x1e0   : > { %v2419_v47 = vpop.f32.mrf.mxu0  ;;  %6319 = vmatmul.mubr.msk.bf16.gmra.mxu0 %vm540_vm2, %v3900_v34  ;;  %v2598_v58 = vadd.f32 %v2559_v50, %v7830_v3  ;;  %6330 = vmatprep.mubr.msk.bf16.mxu1 %vm6668_vm0, %v6667_v1 }
 0x1e1   : > { %v7922_v43 = vadd.f32 %v2419_v47, %v2269_v44  ;;  %6322 = vmatprep.mubr.msk.bf16.mxu0 %vm6668_vm0, %v6667_v1  ;;  %v6092_v11 = vpop.f32.mrf.mxu1 }
 0x1e2   : > { %v6084_v30 = vpop.f32.mrf.mxu0 }
 0x1e3   : > { %v2562_v59 = vpop.f32.mrf.mxu1 }
 0x1e4   : > { %v2422_v20 = vpop.f32.mrf.mxu0  ;;  %v2599_v3 = vadd.f32 %v2562_v59, %v7845_v18  ;;  %v4195_v18 = vrot.slane %v7942_v28, 2  ;;  %v4200_v59 = vsel %vm1202_vm5, %v4197_v13, %v4199_v37 }
 0x1e5   : > { %v7935_v52 = vadd.f32 %v2422_v20, %v2270_v15  ;;  %v6093_v46 = vpop.f32.mrf.mxu1 }
 0x1e6   : > { %v6085_v42 = vpop.f32.mrf.mxu0  ;;  %v4196_v31 = vsel %vm1202_vm5, %v4194_v9, %v4195_v18  ;;  %v4198_v24 = vsel %vm1202_vm5, %v4195_v18, %v4197_v13  ;;  %v4037_v46 = vsel %vm1202_vm5, %v4034_v51, %v4036_v32 }
 0x1e7   : > { %v2567_v2 = vpop.f32.mrf.mxu1  ;;  %6331 = vmatmul.mubr.msk.bf16.vlgmr.msra.gmra.mxu1 %vm540_vm2, %v4031_v56  ;;  %v8014_v42 = vld [vmem:[%s6957_s10 + $0x28] sm:$0xff]  }
 0x1e8   : > { %v2689_v54 = vpop.f32.mrf.mxu0  ;;  %6323 = vmatmul.mubr.msk.bf16.gmra.mxu0 %vm540_vm2, %v3909_v29  ;;  %v2600_v10 = vadd.f32 %v2567_v2, %v7858_v23  ;;  %6375 = vmatpush3.bf16.msra.mxu1 %v6615_v33  ;;  %v6618_v23 = vld [vmem:[%s8606_s3 + $0x1a8] sm:$0xff]   ;;  %v4201_v49 = vrot.slane %v8014_v42, 2 }
 0x1e9   : > { %v7950_v16 = vadd.f32 %v2689_v54, %v2598_v58  ;;  %6354 = vmatprep.mubr.msk.bf16.mxu0 %vm6668_vm0, %v6667_v1  ;;  %6334 = vmatprep.mubr.msk.bf16.mxu1 %vm6668_vm0, %v6667_v1  ;;  %v6096_v62 = vpop.f32.mrf.mxu1 }
 0x1ea   : > { %v6116_v38 = vpop.f32.mrf.mxu0  ;;  %6376 = vmatprep.subr.bf16.mxu1 %v6667_v1  ;;  %v4336_v62 = vshll.u32 %v7942_v28, 16 }
 0x1eb   : > { %v2570_v6 = vpop.f32.mrf.mxu1  ;;  %v4328_v38 = vshll.u32 %v7939_v7, 16 }
 0x1ec   : > { %v2692_v26 = vpop.f32.mrf.mxu0  ;;  %v2601_v14 = vadd.f32 %v2570_v6, %v7873_v22  ;;  %6377 = vmatpush3.bf16.msra.mxu1 %v6621_v60  ;;  %v6622_v22 = vld [vmem:[%s8606_s3 + $0x1a0] sm:$0xff]   ;;  %v4333_v60 = vshrl.u32 %v7942_v28, 16  ;;  %v4202_v6 = vsel %vm1202_vm5, %v4199_v37, %v4201_v49  ;;  %v4338_v13 = vrot.slane %v4336_v62, 3 }
 0x1ed   : > { %v7965_v63 = vadd.f32 %v2692_v26, %v2599_v3  ;;  %v6097_v44 = vpop.f32.mrf.mxu1 }
 0x1ee   : > { %v6117_v45 = vpop.f32.mrf.mxu0 }
 0x1ef   : > { %v2575_v21 = vpop.f32.mrf.mxu1  ;;  %6335 = vmatmul.mubr.msk.bf16.gmra.mxu1 %vm540_vm2, %v4033_v39  ;;  %v6624_v45 = vld [vmem:[%s6957_s10 + $0x30] ss:$0 sps:$4 sm:$0x33]  }
 0x1f0   : > { %v2697_v19 = vpop.f32.mrf.mxu0  ;;  %6355 = vmatmul.mubr.msk.bf16.vlgmr.msra.gmra.mxu0 %vm540_vm2, %v4196_v31  ;;  %v2602_v55 = vadd.f32 %v2575_v21, %v7883_v48  ;;  %6338 = vmatprep.mubr.msk.bf16.mxu1 %vm6668_vm0, %v6667_v1  ;;  %v4035_v48 = vsel %vm1202_vm5, %v4032_v0, %v4034_v51  ;;  %v4038_v0 = vrot.slane %v7898_v8, 2 }
 0x1f1   : > { %v7977_v57 = vadd.f32 %v2697_v19, %v2600_v10  ;;  %6399 = vmatpush3.bf16.msra.mxu0 %v6618_v23  ;;  %6358 = vmatprep.mubr.msk.bf16.mxu0 %vm6668_vm0, %v6667_v1  ;;  %v6100_v35 = vpop.f32.mrf.mxu1  ;;  %v4335_v19 = vrot.slane %v4333_v60, 2 }
 0x1f2   : > { %v6120_v34 = vpop.f32.mrf.mxu0  ;;  %6400 = vmatprep.subr.bf16.mxu0 %v6667_v1  ;;  %v4039_v8 = vsel %vm1202_vm5, %v4036_v32, %v4038_v0 }
 0x1f3   : > { %v2578_v12 = vpop.f32.mrf.mxu1 }
 0x1f4   : > { %v2700_v27 = vpop.f32.mrf.mxu0  ;;  %v2603_v61 = vadd.f32 %v2578_v12, %v7894_v5  ;;  %v4339_v12 = vor.u32 %v4338_v13, %v4335_v19 }
 0x1f5   : > { %v7991_v15 = vadd.f32 %v2700_v27, %v2601_v14  ;;  %6401 = vmatpush3.bf16.msra.mxu0 %v6622_v22  ;;  %v6101_v50 = vpop.f32.mrf.mxu1 }
 0x1f6   : > { %v6121_v47 = vpop.f32.mrf.mxu0 }
 0x1f7   : > { %v2583_v58 = vpop.f32.mrf.mxu1  ;;  %6339 = vmatmul.mubr.msk.bf16.gmra.mxu1 %vm540_vm2, %v4035_v48  ;;  %v4342_v47 = vshrl.u32 %v7972_v4, 16 }
 0x1f8   : > { %v2705_v30 = vpop.f32.mrf.mxu0  ;;  %6359 = vmatmul.mubr.msk.bf16.gmra.mxu0 %vm540_vm2, %v4198_v24  ;;  %v2604_v5 = vadd.f32 %v2583_v58, %v7904_v41  ;;  %6342 = vmatprep.mubr.msk.bf16.mxu1 %vm6668_vm0, %v6667_v1 }
 0x1f9   : > { %v8000_v17 = vadd.f32 %v2705_v30, %v2602_v55  ;;  %6362 = vmatprep.mubr.msk.bf16.mxu0 %vm6668_vm0, %v6667_v1  ;;  %v6104_v11 = vpop.f32.mrf.mxu1  ;;  %v4203_v55 = vrot.slane %v6624_v45, 2 }
 0x1fa   : > { %v6124_v53 = vpop.f32.mrf.mxu0  ;;  %v4344_v11 = vrot.slane %v4342_v47, 2 }
 0x1fb   : > { %v2586_v3 = vpop.f32.mrf.mxu1  ;;  %v4204_v37 = vsel %vm1202_vm5, %v4201_v49, %v4203_v55  ;;  %v4351_v49 = vshrl.u32 %v7995_v25, 16 }
 0x1fc   : > { %v2708_v20 = vpop.f32.mrf.mxu0  ;;  %v2605_v33 = vadd.f32 %v2586_v3, %v7915_v36  ;;  %v4325_v36 = vshrl.u32 %v7939_v7, 16 }
 0x1fd   : > { %v8010_v29 = vadd.f32 %v2708_v20, %v2603_v61  ;;  %v6105_v41 = vpop.f32.mrf.mxu1  ;;  %v4345_v61 = vshll.u32 %v7972_v4, 16  ;;  %v4353_v62 = vrot.slane %v4351_v49, 2 }
 0x1fe   : > { %v6125_v56 = vpop.f32.mrf.mxu0  ;;  %v4327_v39 = vrot.slane %v4325_v36, 2 }
 0x1ff   : > { %v2591_v18 = vpop.f32.mrf.mxu1  ;;  %6343 = vmatmul.mubr.msk.bf16.gmra.mxu1 %vm540_vm2, %v4037_v46  ;;  %v4347_v20 = vrot.slane %v4345_v61, 3  ;;  %v4501_v61 = vrot.slane %v7995_v25, 3 }
 0x200   : > { %v2713_v54 = vpop.f32.mrf.mxu0  ;;  %6363 = vmatmul.mubr.msk.bf16.gmra.mxu0 %vm540_vm2, %v4200_v59  ;;  %v2606_v10 = vadd.f32 %v2591_v18, %v7922_v43  ;;  %6346 = vmatprep.mubr.msk.bf16.mxu1 %vm6668_vm0, %v6667_v1  ;;  %v4330_v43 = vrot.slane %v4328_v38, 3  ;;  %v4354_v18 = vshll.u32 %v7995_v25, 16 }
 0x201   : > { %v8019_v9 = vadd.f32 %v2713_v54, %v2604_v5  ;;  %6366 = vmatprep.mubr.msk.bf16.mxu0 %vm6668_vm0, %v6667_v1  ;;  %v6108_v26 = vpop.f32.mrf.mxu1  ;;  %v4348_v54 = vor.u32 %v4347_v20, %v4344_v11 }
 0x202   : > { %v6128_v2 = vpop.f32.mrf.mxu0  ;;  %v4331_v27 = vor.u32 %v4330_v43, %v4327_v39  ;;  %v4356_v26 = vrot.slane %v4354_v18, 3 }
 0x203   : > { %v2594_v14 = vpop.f32.mrf.mxu1 }
 0x204   : > { %v2716_v31 = vpop.f32.mrf.mxu0  ;;  %v2607_v44 = vadd.f32 %v2594_v14, %v7935_v52  ;;  %v4487_v52 = vld [vmem:[%s6957_s10 + $0x8] sm:$0x8]  ;;  %v4340_v32 = vsel %vm1498_vm6, %v4331_v27, %v4339_v12  ;;  %v4499_v14 = vrot.slane %v7972_v4, 3  ;;  %v4357_v43 = vor.u32 %v4356_v26, %v4353_v62 }
 0x205   : > { %v8033_v23 = vadd.f32 %v2716_v31, %v2605_v33  ;;  %v6109_v22 = vpop.f32.mrf.mxu1  ;;  %v5554_v58 = vcombine.low %v4487_v52, %v7929_v40  ;;  %v4497_v40 = vrot.slane %v7942_v28, 3  ;;  %v6626_v52 = vld [vmem:[%s6957_s10 + $0x30] ss:$0 sps:$4 sm:$0x77]   ;;  %s6431_s10 = smul.u32 80, %s8658_s25 }
 0x206   : > { %v6129_v7 = vpop.f32.mrf.mxu0  ;;  %v4502_v11 = vsel %vm1671_vm7, %v4499_v14, %v4501_v61 }
 0x207   : > { %v2854_v51 = vpop.f32.mrf.mxu1  ;;  %6347 = vmatmul.mubr.msk.bf16.gmra.mxu1 %vm540_vm2, %v4039_v8  ;;  %v4496_v33 = vrot.slane %v5554_v58, 3  ;;  %v4363_v8 = vshll.u32 %v8014_v42, 16  ;;  %v4500_v4 = vsel %vm1671_vm7, %v4497_v40, %v4499_v14  ;;  %v4369_v58 = vshrl.u32 %v6626_v52, 16  ;;  %s8297_s23 = sadd.s32 %s6431_s10, %s6430_s22  ;;  %s433_s10 = scalar_lea.vmem %s8610_s7, %s425_s19 }
 0x208   : > { %v2721_v21 = vpop.f32.mrf.mxu0  ;;  %6367 = vmatmul.mubr.msk.bf16.gmra.mxu0 %vm540_vm2, %v4202_v6  ;;  %v2893_v24 = vadd.f32 %v2854_v51, %v7950_v16  ;;  %6378 = vmatprep.mubr.msk.bf16.mxu1 %vm6668_vm0, %v6667_v1  ;;  %s5187_s11 = sshll.u32 %s8297_s23, 2 }
 0x209   : > { %v8040_v34 = vadd.f32 %v2721_v21, %v2606_v10  ;;  %6370 = vmatprep.mubr.msk.bf16.mxu0 %vm6668_vm0, %v6667_v1  ;;  %v6140_v48 = vpop.f32.mrf.mxu1  ;;  %v4498_v28 = vsel %vm1671_vm7, %v4496_v33, %v4497_v40  ;;  %v4365_v27 = vrot.slane %v4363_v8, 3  ;;  %v4371_v33 = vrot.slane %v4369_v58, 2  ;;  %s8378_s16 = scalar_lea.vmem %s8608_s5, %s5187_s11 }
 0x20a   : > { %v6132_v35 = vpop.f32.mrf.mxu0 }
 0x20b   : > { %v2857_v53 = vpop.f32.mrf.mxu1 }
 0x20c   : > { %v2724_v50 = vpop.f32.mrf.mxu0  ;;  %v2894_v16 = vadd.f32 %v2857_v53, %v7965_v63  ;;  %v4372_v53 = vshll.u32 %v6626_v52, 16 }
 0x20d   : > { %v8051_v30 = vadd.f32 %v2724_v50, %v2607_v44  ;;  %v6141_v59 = vpop.f32.mrf.mxu1  ;;  %v4360_v44 = vshrl.u32 %v8014_v42, 16 }
 0x20e   : > { %v6133_v5 = vpop.f32.mrf.mxu0 }
 0x20f   : > { %v2862_v46 = vpop.f32.mrf.mxu1  ;;  %6379 = vmatmul.mubr.msk.bf16.vlgmr.msra.gmra.mxu1 %vm540_vm2, %v4340_v32  ;;  %v4362_v35 = vrot.slane %v4360_v44, 2 }
 0x210   : > { %v3026_v3 = vpop.f32.mrf.mxu0  ;;  %6371 = vmatmul.mubr.msk.bf16.gmra.mxu0 %vm540_vm2, %v4204_v37  ;;  %v2895_v41 = vadd.f32 %v2862_v46, %v7977_v57  ;;  %6382 = vmatprep.mubr.msk.bf16.mxu1 %vm6668_vm0, %v6667_v1  ;;  %v4349_v57 = vsel %vm1498_vm6, %v4339_v12, %v4348_v54 }
 0x211   : > { %v8058_v56 = vadd.f32 %v3026_v3, %v2893_v24  ;;  %6402 = vmatprep.mubr.msk.bf16.mxu0 %vm6668_vm0, %v6667_v1  ;;  %v6144_v2 = vpop.f32.mrf.mxu1  ;;  %v4366_v37 = vor.u32 %v4365_v27, %v4362_v35 }
 0x212   : > { %v6164_v63 = vpop.f32.mrf.mxu0 }
 0x213   : > { %v2865_v10 = vpop.f32.mrf.mxu1  ;;  %v4367_v3 = vsel %vm1498_vm6, %v4357_v43, %v4366_v37 }
 0x214   : > { %v3029_v36 = vpop.f32.mrf.mxu0  ;;  %v2896_v60 = vadd.f32 %v2865_v10, %v7991_v15 }
 0x215   : > { %v8069_v38 = vadd.f32 %v3029_v36, %v2894_v16  ;;  %v6145_v31 = vpop.f32.mrf.mxu1 }
 0x216   : > { %v6165_v0 = vpop.f32.mrf.mxu0  ;;  %v4505_v31 = vrot.slane %v6626_v52, 3 }
 0x217   : > { %v2870_v7 = vpop.f32.mrf.mxu1  ;;  %6383 = vmatmul.mubr.msk.bf16.gmra.mxu1 %vm540_vm2, %v4349_v57 }
 0x218   : > { %v3034_v6 = vpop.f32.mrf.mxu0  ;;  %6403 = vmatmul.mubr.msk.bf16.vlgmr.msra.gmra.mxu0 %vm540_vm2, %v4498_v28  ;;  %v2897_v15 = vadd.f32 %v2870_v7, %v8000_v17  ;;  %6386 = vmatprep.mubr.msk.bf16.mxu1 %vm6668_vm0, %v6667_v1  ;;  %v4358_v17 = vsel %vm1498_vm6, %v4348_v54, %v4357_v43 }
 0x219   : > { %v8075_v45 = vadd.f32 %v3034_v6, %v2895_v41  ;;  %6406 = vmatprep.mubr.msk.bf16.mxu0 %vm6668_vm0, %v6667_v1  ;;  %v6148_v19 = vpop.f32.mrf.mxu1  ;;  %v4503_v41 = vrot.slane %v8014_v42, 3 }
 0x21a   : > { %v6168_v39 = vpop.f32.mrf.mxu0 }
 0x21b   : > { %v2873_v21 = vpop.f32.mrf.mxu1  ;;  %v4504_v10 = vsel %vm1671_vm7, %v4501_v61, %v4503_v41  ;;  %v4506_v43 = vsel %vm1671_vm7, %v4503_v41, %v4505_v31 }
 0x21c   : > { %v3037_v13 = vpop.f32.mrf.mxu0  ;;  %v2898_v51 = vadd.f32 %v2873_v21, %v8010_v29 }
 0x21d   : > { %v8086_v22 = vadd.f32 %v3037_v13, %v2896_v60  ;;  %v6149_v24 = vpop.f32.mrf.mxu1 }
 0x21e   : > { %v6169_v55 = vpop.f32.mrf.mxu0 }
 0x21f   : > { %v2878_v48 = vpop.f32.mrf.mxu1  ;;  %6387 = vmatmul.mubr.msk.bf16.gmra.mxu1 %vm540_vm2, %v4358_v17 }
 0x220   : > { %v3042_v12 = vpop.f32.mrf.mxu0  ;;  %6407 = vmatmul.mubr.msk.bf16.gmra.mxu0 %vm540_vm2, %v4500_v4  ;;  %v2899_v50 = vadd.f32 %v2878_v48, %v8019_v9  ;;  %6390 = vmatprep.mubr.msk.bf16.mxu1 %vm6668_vm0, %v6667_v1  ;;  %v4374_v9 = vrot.slane %v4372_v53, 3 }
 0x221   : > { %v8093_v47 = vadd.f32 %v3042_v12, %v2897_v15  ;;  %6410 = vmatprep.mubr.msk.bf16.mxu0 %vm6668_vm0, %v6667_v1  ;;  %v6152_v5 = vpop.f32.mrf.mxu1 }
 0x222   : > { %v6172_v29 = vpop.f32.mrf.mxu0  ;;  %v4375_v18 = vor.u32 %v4374_v9, %v4371_v33 }
 0x223   : > { %v2881_v20 = vpop.f32.mrf.mxu1 }
 0x224   : > { %v3045_v16 = vpop.f32.mrf.mxu0  ;;  %v2900_v59 = vadd.f32 %v2881_v20, %v8033_v23  ;;  %v4376_v42 = vsel %vm1498_vm6, %v4366_v37, %v4375_v18 }
 0x225   : > { %v8102_v32 = vadd.f32 %v3045_v16, %v2898_v51  ;;  %v6153_v40 = vpop.f32.mrf.mxu1 }
 0x226   : > { %v6173_v25 = vpop.f32.mrf.mxu0 }
 0x227   : > { %v2886_v54 = vpop.f32.mrf.mxu1  ;;  %6391 = vmatmul.mubr.msk.bf16.gmra.mxu1 %vm540_vm2, %v4367_v3 }
 0x228   : > { %v3050_v46 = vpop.f32.mrf.mxu0  ;;  %6411 = vmatmul.mubr.msk.bf16.gmra.mxu0 %vm540_vm2, %v4502_v11  ;;  %v2901_v23 = vadd.f32 %v2886_v54, %v8040_v34  ;;  %6394 = vmatprep.mubr.msk.bf16.mxu1 %vm6668_vm0, %v6667_v1 }
 0x229   : > { %v8108_v63 = vadd.f32 %v3050_v46, %v2899_v50  ;;  %6414 = vmatprep.mubr.msk.bf16.mxu0 %vm6668_vm0, %v6667_v1  ;;  %v6156_v2 = vpop.f32.mrf.mxu1 }
 0x22a   : > { %v6176_v49 = vpop.f32.mrf.mxu0 }
 0x22b   : > { %v2889_v0 = vpop.f32.mrf.mxu1 }
 0x22c   : > { %v3053_v36 = vpop.f32.mrf.mxu0  ;;  %v2902_v57 = vadd.f32 %v2889_v0, %v8051_v30 }
 0x22d   : > { %v3072_v28 = vadd.f32 %v3053_v36, %v2900_v59  ;;  %v6157_v62 = vpop.f32.mrf.mxu1 }
 0x22e   : > { %v6177_v60 = vpop.f32.mrf.mxu0 }
 0x22f   : > { %v3156_v6 = vpop.f32.mrf.mxu1  ;;  %6395 = vmatmul.mubr.msk.bf16.gmra.mxu1 %vm540_vm2, %v4376_v42 }
 0x230   : > { %v3058_v26 = vpop.f32.mrf.mxu0  ;;  %6415 = vmatmul.mubr.msk.bf16.gmra.mxu0 %vm540_vm2, %v4504_v10  ;;  %v3195_v7 = vadd.f32 %v3156_v6, %v8058_v56 }
 0x231   : > { %v3073_v34 = vadd.f32 %v3058_v26, %v2901_v23  ;;  %6418 = vmatprep.mubr.msk.bf16.mxu0 %vm6668_vm0, %v6667_v1  ;;  %v6188_v39 = vpop.f32.mrf.mxu1 }
 0x232   : > { %v6180_v14 = vpop.f32.mrf.mxu0 }
 0x233   : > { %v3159_v44 = vpop.f32.mrf.mxu1 }
 0x234   : > { %v3061_v15 = vpop.f32.mrf.mxu0  ;;  %v3196_v19 = vadd.f32 %v3159_v44, %v8069_v38 }
 0x235   : > { %v3074_v30 = vadd.f32 %v3061_v15, %v2902_v57  ;;  %v6189_v13 = vpop.f32.mrf.mxu1 }
 0x236   : > { %v6181_v8 = vpop.f32.mrf.mxu0 }
 0x237   : > { %v3164_v21 = vpop.f32.mrf.mxu1 }
 0x238   : > { %v3306_v4 = vpop.f32.mrf.mxu0  ;;  %6419 = vmatmul.mubr.msk.bf16.gmra.mxu0 %vm540_vm2, %v4506_v43  ;;  %v3197_v51 = vadd.f32 %v3164_v21, %v8075_v45 }
 0x239   : > { %v3345_v1 = vadd.f32 %v3306_v4, %v3195_v7  ;;  %v6192_v17 = vpop.f32.mrf.mxu1 }
 0x23a   : > { %v6212_v55 = vpop.f32.mrf.mxu0 }
 0x23b   : > { %v3167_v27 = vpop.f32.mrf.mxu1 }
 0x23c   : > { %v3309_v56 = vpop.f32.mrf.mxu0  ;;  %v3198_v24 = vadd.f32 %v3167_v27, %v8086_v22 }
 0x23d   : > { %v3346_v35 = vadd.f32 %v3309_v56, %v3196_v19  ;;  %v6193_v12 = vpop.f32.mrf.mxu1 }
 0x23e   : > { %v6213_v52 = vpop.f32.mrf.mxu0 }
 0x23f   : > { %v3172_v38 = vpop.f32.mrf.mxu1 }
 0x240   : > { %v3314_v61 = vpop.f32.mrf.mxu0  ;;  %v3199_v50 = vadd.f32 %v3172_v38, %v8093_v47 }
 0x241   : > { %v3347_v48 = vadd.f32 %v3314_v61, %v3197_v51  ;;  %v6196_v37 = vpop.f32.mrf.mxu1 }
 0x242   : > { %v6216_v29 = vpop.f32.mrf.mxu0 }
 0x243   : > { %v3175_v5 = vpop.f32.mrf.mxu1 }
 0x244   : > { %v3317_v58 = vpop.f32.mrf.mxu0  ;;  %v3200_v45 = vadd.f32 %v3175_v5, %v8102_v32 }
 0x245   : > { %v3348_v53 = vadd.f32 %v3317_v58, %v3198_v24  ;;  %v6197_v11 = vpop.f32.mrf.mxu1 }
 0x246   : > { %v6217_v16 = vpop.f32.mrf.mxu0 }
 0x247   : > { %v3180_v59 = vpop.f32.mrf.mxu1 }
 0x248   : > { %v3322_v20 = vpop.f32.mrf.mxu0  ;;  %v3201_v22 = vadd.f32 %v3180_v59, %v8108_v63 }
 0x249   : > { %v3349_v25 = vadd.f32 %v3322_v20, %v3199_v50  ;;  %v6200_v33 = vpop.f32.mrf.mxu1 }
 0x24a   : > { %v6220_v3 = vpop.f32.mrf.mxu0 }
 0x24b   : > { %v3183_v46 = vpop.f32.mrf.mxu1 }
 0x24c   : > { %v3325_v9 = vpop.f32.mrf.mxu0  ;;  %v3202_v47 = vadd.f32 %v3183_v46, %v3072_v28 }
 0x24d   : > { %v3350_v40 = vadd.f32 %v3325_v9, %v3200_v45  ;;  %v6201_v54 = vpop.f32.mrf.mxu1 }
 0x24e   : > { %v6221_v41 = vpop.f32.mrf.mxu0 }
 0x24f   : > { %v3188_v18 = vpop.f32.mrf.mxu1 }
 0x250   : > { %v3330_v49 = vpop.f32.mrf.mxu0  ;;  %v3203_v36 = vadd.f32 %v3188_v18, %v3073_v34 }
 0x251   : > { %v3351_v23 = vadd.f32 %v3330_v49, %v3201_v22  ;;  %v6204_v32 = vpop.f32.mrf.mxu1 }
 0x252   : > { %v6224_v2 = vpop.f32.mrf.mxu0 }
 0x253   : > { %v3191_v60 = vpop.f32.mrf.mxu1 }
 0x254   : > { %v3333_v10 = vpop.f32.mrf.mxu0  ;;  %v3204_v42 = vadd.f32 %v3191_v60, %v3074_v30 }
 0x255   : > { %v3352_v0 = vadd.f32 %v3333_v10, %v3202_v47  ;;  %v6205_v62 = vpop.f32.mrf.mxu1 }
 0x256   : > { %v6225_v57 = vpop.f32.mrf.mxu0 }
 0x257   : > { %v3504_v31 = vpop.f32.mrf.mxu1 }
 0x258   : > { %v3338_v63 = vpop.f32.mrf.mxu0  ;;  %v3543_v14 = vadd.f32 %v3504_v31, %v3345_v1 }
 0x259   : > { %v3353_v26 = vadd.f32 %v3338_v63, %v3203_v36  ;;  %v6236_v7 = vpop.f32.mrf.mxu1 }
 0x25a   : > { %v6228_v6 = vpop.f32.mrf.mxu0 }
 0x25b   : > { %v3507_v15 = vpop.f32.mrf.mxu1 }
 0x25c   : > { %v3341_v28 = vpop.f32.mrf.mxu0  ;;  %v3544_v44 = vadd.f32 %v3507_v15, %v3346_v35 }
 0x25d   : > { %v3354_v39 = vadd.f32 %v3341_v28, %v3204_v42  ;;  %v6237_v8 = vpop.f32.mrf.mxu1 }
 0x25e   : > { %v6229_v43 = vpop.f32.mrf.mxu0 }
 0x25f   : > { %v3512_v13 = vpop.f32.mrf.mxu1 }
 0x260   : > { %v3634_v34 = vpop.f32.mrf.mxu0  ;;  %v3545_v21 = vadd.f32 %v3512_v13, %v3347_v48 }
 0x261   : > { %v3673_v19 = vadd.f32 %v3634_v34, %v3543_v14  ;;  %v6240_v55 = vpop.f32.mrf.mxu1 }
 0x262   : > { %v6260_v4 = vpop.f32.mrf.mxu0 }
 0x263   : > { %v3515_v17 = vpop.f32.mrf.mxu1 }
 0x264   : > { %v3637_v30 = vpop.f32.mrf.mxu0  ;;  %v3546_v27 = vadd.f32 %v3515_v17, %v3348_v53 }
 0x265   : > { %v3674_v51 = vadd.f32 %v3637_v30, %v3544_v44  ;;  %v6241_v52 = vpop.f32.mrf.mxu1 }
 0x266   : > { %v6261_v56 = vpop.f32.mrf.mxu0 }
 0x267   : > { %v3520_v12 = vpop.f32.mrf.mxu1 }
 0x268   : > { %v3642_v1 = vpop.f32.mrf.mxu0  ;;  %v3547_v38 = vadd.f32 %v3520_v12, %v3349_v25 }
 0x269   : > { %v3675_v24 = vadd.f32 %v3642_v1, %v3545_v21  ;;  %v6244_v29 = vpop.f32.mrf.mxu1 }
 0x26a   : > { %v6264_v61 = vpop.f32.mrf.mxu0 }
 0x26b   : > { %v3523_v37 = vpop.f32.mrf.mxu1 }
 0x26c   : > { %v3645_v35 = vpop.f32.mrf.mxu0  ;;  %v3548_v5 = vadd.f32 %v3523_v37, %v3350_v40 }
 0x26d   : > { %v3676_v50 = vadd.f32 %v3645_v35, %v3546_v27  ;;  %v6245_v16 = vpop.f32.mrf.mxu1 }
 0x26e   : > { %v6265_v58 = vpop.f32.mrf.mxu0 }
 0x26f   : > { %v3528_v11 = vpop.f32.mrf.mxu1 }
 0x270   : > { %v3650_v48 = vpop.f32.mrf.mxu0  ;;  %v3549_v59 = vadd.f32 %v3528_v11, %v3351_v23 }
 0x271   : > { %v3677_v45 = vadd.f32 %v3650_v48, %v3547_v38  ;;  %v6248_v3 = vpop.f32.mrf.mxu1 }
 0x272   : > { %v6268_v20 = vpop.f32.mrf.mxu0 }
 0x273   : > { %v3531_v33 = vpop.f32.mrf.mxu1 }
 0x274   : > { %v3653_v53 = vpop.f32.mrf.mxu0  ;;  %v3550_v46 = vadd.f32 %v3531_v33, %v3352_v0 }
 0x275   : > { %v3678_v22 = vadd.f32 %v3653_v53, %v3548_v5  ;;  %v6249_v41 = vpop.f32.mrf.mxu1 }
 0x276   : > { %v6269_v9 = vpop.f32.mrf.mxu0 }
 0x277   : > { %v3536_v54 = vpop.f32.mrf.mxu1 }
 0x278   : > { %v3658_v25 = vpop.f32.mrf.mxu0  ;;  %v3551_v18 = vadd.f32 %v3536_v54, %v3353_v26 }
 0x279   : > { %v3679_v47 = vadd.f32 %v3658_v25, %v3549_v59  ;;  %v6252_v2 = vpop.f32.mrf.mxu1 }
 0x27a   : > { %v6272_v49 = vpop.f32.mrf.mxu0 }
 0x27b   : > { %v3539_v32 = vpop.f32.mrf.mxu1 }
 0x27c   : > { %v3661_v40 = vpop.f32.mrf.mxu0  ;;  %v3552_v60 = vadd.f32 %v3539_v32, %v3354_v39 }
 0x27d   : > { %v3680_v36 = vadd.f32 %v3661_v40, %v3550_v46  ;;  %v6253_v57 = vpop.f32.mrf.mxu1 }
 0x27e   : > { %v6273_v10 = vpop.f32.mrf.mxu0 }
 0x27f   : > { %v3799_v62 = vpop.f32.mrf.mxu1 }
 0x280   : > { %v3666_v23 = vpop.f32.mrf.mxu0  ;;  %v3838_v31 = vadd.f32 %v3799_v62, %v3673_v19 }
 0x281   : > { %v3681_v42 = vadd.f32 %v3666_v23, %v3551_v18  ;;  %v6284_v6 = vpop.f32.mrf.mxu1 }
 0x282   : > { %v6276_v63 = vpop.f32.mrf.mxu0  ;;  %v4685_v6 = vlaneseq }
 0x283   : > { %v3802_v7 = vpop.f32.mrf.mxu1 }
 0x284   : > { %v3669_v0 = vpop.f32.mrf.mxu0  ;;  %v3839_v15 = vadd.f32 %v3802_v7, %v3674_v51 }
 0x285   : > { %v3682_v14 = vadd.f32 %v3669_v0, %v3552_v60  ;;  %v6285_v43 = vpop.f32.mrf.mxu1 }
 0x286   : > { %v6277_v28 = vpop.f32.mrf.mxu0 }
 0x287   : > { %v3807_v8 = vpop.f32.mrf.mxu1 }
 0x288   : > { %v3971_v26 = vpop.f32.mrf.mxu0  ;;  %v3840_v13 = vadd.f32 %v3807_v8, %v3675_v24 }
 0x289   : > { %v8133_v44 = vadd.f32 %v3971_v26, %v3838_v31  ;;  %v6288_v39 = vpop.f32.mrf.mxu1 }
 0x28a   : > { %v6308_v34 = vpop.f32.mrf.mxu0 }
 0x28b   : > { %v3810_v55 = vpop.f32.mrf.mxu1 }
 0x28c   : > { %v3974_v4 = vpop.f32.mrf.mxu0  ;;  %v3841_v19 = vadd.f32 %v3810_v55, %v3676_v50 }
 0x28d   : > { %v8135_v21 = vadd.f32 %v3974_v4, %v3839_v15  ;;  %v6289_v17 = vpop.f32.mrf.mxu1  ;;  %v8161_v15 = vshrl.u32 %v4685_v6, 7 }
 0x28e   : > { %v6309_v30 = vpop.f32.mrf.mxu0 }
 0x28f   : > { %v3815_v52 = vpop.f32.mrf.mxu1  ;;  %v4687_v30 = vadd.s32 8, %v8161_v15 }
 0x290   : > { %v3979_v56 = vpop.f32.mrf.mxu0  ;;  %v3842_v1 = vadd.f32 %v3815_v52, %v3677_v45 }
 0x291   : > { %v8137_v27 = vadd.f32 %v3979_v56, %v3840_v13  ;;  %v6292_v12 = vpop.f32.mrf.mxu1  ;;  %v8168_v13 = vmul.u32.u64.low 3435973837, %v8161_v15  ;;  %v8169_v39 = vmul.u32.u64.high 3435973837, %v8161_v15, %v8168_v13  ;;  %v4688_v56 = vadd.s32 16, %v8161_v15 }
 0x292   : > { %v6312_v51 = vpop.f32.mrf.mxu0 }
 0x293   : > { %v3818_v29 = vpop.f32.mrf.mxu1 }
 0x294   : > { %v3982_v61 = vpop.f32.mrf.mxu0  ;;  %v3843_v35 = vadd.f32 %v3818_v29, %v3678_v22 }
 0x295   : > { %v8139_v38 = vadd.f32 %v3982_v61, %v3841_v19  ;;  %v6293_v37 = vpop.f32.mrf.mxu1  ;;  %v8180_v12 = vmul.u32.u64.low 3435973837, %v4687_v30  ;;  %v8181_v61 = vmul.u32.u64.high 3435973837, %v4687_v30, %v8180_v12 }
 0x296   : > { %v6313_v24 = vpop.f32.mrf.mxu0 }
 0x297   : > { %v3823_v16 = vpop.f32.mrf.mxu1 }
 0x298   : > { %v3987_v58 = vpop.f32.mrf.mxu0  ;;  %v3844_v48 = vadd.f32 %v3823_v16, %v3679_v47  ;;  %v4702_v16 = vshrl.u32 %v8169_v39, 3 }
 0x299   : > { %v8141_v5 = vadd.f32 %v3987_v58, %v3842_v1  ;;  %v6296_v11 = vpop.f32.mrf.mxu1  ;;  %v4689_v1 = vadd.s32 24, %v8161_v15  ;;  %v4690_v58 = vadd.s32 32, %v8161_v15 }
 0x29a   : > { %v6316_v50 = vpop.f32.mrf.mxu0 }
 0x29b   : > { %v3826_v3 = vpop.f32.mrf.mxu1 }
 0x29c   : > { %v3990_v20 = vpop.f32.mrf.mxu0  ;;  %v3845_v53 = vadd.f32 %v3826_v3, %v3680_v36  ;;  %v8196_v3 = vadd.s32 40, %v8161_v15 }
 0x29d   : > { %v8143_v59 = vadd.f32 %v3990_v20, %v3843_v35  ;;  %v6297_v33 = vpop.f32.mrf.mxu1  ;;  %v8185_v35 = vmul.u32.u64.low 3435973837, %v4688_v56  ;;  %v8186_v37 = vmul.u32.u64.high 3435973837, %v4688_v56, %v8185_v35 }
 0x29e   : > { %v6317_v45 = vpop.f32.mrf.mxu0  ;;  %v8192_v11 = vmul.u32.u64.low 3435973837, %v4689_v1  ;;  %v8193_v20 = vmul.u32.u64.high 3435973837, %v4689_v1, %v8192_v11 }
 0x29f   : > { %v3831_v41 = vpop.f32.mrf.mxu1 }
 0x2a0   : > { %v3995_v9 = vpop.f32.mrf.mxu0  ;;  %v3846_v25 = vadd.f32 %v3831_v41, %v3681_v42  ;;  %v4703_v41 = vmul.u32 10, %v4702_v16 }
 0x2a1   : > { %v8145_v46 = vadd.f32 %v3995_v9, %v3844_v48  ;;  %v6300_v54 = vpop.f32.mrf.mxu1  ;;  %v8200_v33 = vmul.u32.u64.low 3435973837, %v4690_v58  ;;  %v8201_v9 = vmul.u32.u64.high 3435973837, %v4690_v58, %v8200_v33 }
 0x2a2   : > { %v6320_v22 = vpop.f32.mrf.mxu0 }
 0x2a3   : > { %v3834_v2 = vpop.f32.mrf.mxu1 }
 0x2a4   : > { %v3998_v49 = vpop.f32.mrf.mxu0  ;;  %v3847_v40 = vadd.f32 %v3834_v2, %v3682_v14  ;;  %v4713_v2 = vshrl.u32 %v8181_v61, 3 }
 0x2a5   : > { %v8147_v18 = vadd.f32 %v3998_v49, %v3845_v53  ;;  %v6301_v32 = vpop.f32.mrf.mxu1  ;;  %v8206_v54 = vmul.u32.u64.low 3435973837, %v8196_v3  ;;  %v8207_v49 = vmul.u32.u64.high 3435973837, %v8196_v3, %v8206_v54 }
 0x2a6   : > { %v6321_v47 = vpop.f32.mrf.mxu0  ;;  %v4724_v32 = vshrl.u32 %v8186_v37, 3  ;;  %v4714_v6 = vmul.u32 10, %v4713_v2 }
 0x2a7   : > { %v8151_v57 = vpop.f32.mrf.mxu1  ;;  %v4757_v12 = vshrl.u32 %v8207_v49, 3 }
 0x2a8   : > { %v4003_v10 = vpop.f32.mrf.mxu0  ;;  %v4140_v49 = vadd.f32 %v8151_v57, %v8133_v44 }
 0x2a9   : > { %v8149_v60 = vadd.f32 %v4003_v10, %v3846_v25  ;;  %v6332_v23 = vpop.f32.mrf.mxu1  ;;  %v8214_v10 = vadd.s32 48, %v8161_v15 }
 0x2aa   : > { %v6324_v36 = vpop.f32.mrf.mxu0 }
 0x2ab   : > { %v8155_v31 = vpop.f32.mrf.mxu1  ;;  %v8217_v36 = vsub.s32 %v8161_v15, %v4703_v41  ;;  %v8227_v13 = vmul.u32.u64.low 3435973837, %v8214_v10  ;;  %v8228_v39 = vmul.u32.u64.high 3435973837, %v8214_v10, %v8227_v13 }
 0x2ac   : > { %v4006_v62 = vpop.f32.mrf.mxu0  ;;  %v4141_v13 = vadd.f32 %v8155_v31, %v8135_v21  ;;  %v8330_v21 = vld [vmem:[%s8607_s4] ss:$0 sm:$0xff] }
 0x2ad   : > { %v8153_v63 = vadd.f32 %v4006_v62, %v3847_v40  ;;  %v6333_v0 = vpop.f32.mrf.mxu1  ;;  %vm4806_vm8 = vcmp.ne.s32.totalorder %v8217_v36, 0  ;;  %vm4816_vm9 = vcmp.lt.s32.totalorder %v8217_v36, 0  ;;  %v4836_v61 = vadd.s32 10, %v8217_v36 }
 0x2ae   : > { %v6325_v42 = vpop.f32.mrf.mxu0  ;;  %vm8245_vm10 = vmand %vm4816_vm9, %vm4806_vm8 }
 0x2af   : > { %v8159_v28 = vpop.f32.mrf.mxu1  ;;  %v4735_v42 = vshrl.u32 %v8193_v20, 3  ;;  %v8252_v20 = vadd.s32 56, %v8161_v15  ;;  %v4846_v41 = vsel %vm8245_vm10, %v4836_v61, %v8217_v36 }
 0x2b0   : > { %v8157_v7 = vpop.f32.mrf.mxu0  ;;  %vm8312_vm6 = vcmp.lt.s32.totalorder %v4846_v41, 8 }
 0x2b1   : > { %v6336_v43 = vpop.f32.mrf.mxu1  ;;  %v4305_v44 = vadd.f32 %v8157_v7, %v4140_v49  ;;  %v4142_v49 = vadd.f32 %v8159_v28, %v8137_v27 }
 0x2b2   : > { %v6356_v14 = vpop.f32.mrf.mxu0  ;;  %v4725_v43 = vmul.u32 10, %v4724_v32 }
 0x2b3   : > { %v8165_v8 = vpop.f32.mrf.mxu1 }
 0x2b4   : > { %v8163_v26 = vpop.f32.mrf.mxu0 }
 0x2b5   : > { %v6337_v4 = vpop.f32.mrf.mxu1 }
 0x2b6   : > { %v6357_v34 = vpop.f32.mrf.mxu0 }
 0x2b7   : > { %v8174_v19 = vpop.f32.mrf.mxu1  ;;  %v4746_v34 = vshrl.u32 %v8201_v9, 3  ;;  %v4758_v9 = vmul.u32 10, %v4757_v12 }
 0x2b8   : > { %v8171_v55 = vpop.f32.mrf.mxu0 }
 0x2b9   : > { %v6340_v52 = vpop.f32.mrf.mxu1  ;;  %v4747_v11 = vmul.u32 10, %v4746_v34 }
 0x2ba   : > { %v6360_v17 = vpop.f32.mrf.mxu0  ;;  %v4736_v52 = vmul.u32 10, %v4735_v42 }
 0x2bb   : > { %v8183_v29 = vpop.f32.mrf.mxu1  ;;  %v8266_v54 = vsub.s32 %v4690_v58, %v4747_v11  ;;  %v8281_v58 = vsub.s32 %v8196_v3, %v4758_v9  ;;  %v4306_v11 = vadd.f32 %v8163_v26, %v4141_v13 }
 0x2bc   : > { %v8177_v51 = vpop.f32.mrf.mxu0  ;;  %v8256_v33 = vsub.s32 %v4689_v1, %v4736_v52  ;;  %v4768_v1 = vshrl.u32 %v8228_v39, 3 }
 0x2bd   : > { %v6341_v50 = vpop.f32.mrf.mxu1  ;;  %vm4810_vm4 = vcmp.ne.s32.totalorder %v8266_v54, 0  ;;  %vm4820_vm5 = vcmp.lt.s32.totalorder %v8266_v54, 0  ;;  %v8325_v12 = vadd.s32 10, %v8266_v54  ;;  %vm4811_vm8 = vcmp.ne.s32.totalorder %v8281_v58, 0 }
 0x2be   : > { %v6361_v24 = vpop.f32.mrf.mxu0  ;;  %v8249_v50 = vsub.s32 %v4688_v56, %v4725_v43  ;;  %vm4809_vm15 = vcmp.ne.s32.totalorder %v8256_v33, 0  ;;  %vm4819_vm0 = vcmp.lt.s32.totalorder %v8256_v33, 0  ;;  %v4839_v43 = vadd.s32 10, %v8256_v33  ;;  %vm8350_vm10 = vmand %vm4820_vm5, %vm4810_vm4 }
 0x2bf   : > { %v8198_v45 = vpop.f32.mrf.mxu1  ;;  %v8236_v24 = vsub.s32 %v4687_v30, %v4714_v6  ;;  %v4769_v34 = vmul.u32 10, %v4768_v1  ;;  %vm8320_vm7 = vmand %vm4819_vm0, %vm4809_vm15  ;;  %vm4821_vm9 = vcmp.lt.s32.totalorder %v8281_v58, 0 }
 0x2c0   : > { %v8190_v48 = vpop.f32.mrf.mxu0  ;;  %vm4808_vm13 = vcmp.ne.s32.totalorder %v8249_v50, 0  ;;  %vm4818_vm14 = vcmp.lt.s32.totalorder %v8249_v50, 0  ;;  %v4838_v6 = vadd.s32 10, %v8249_v50  ;;  %v4849_v1 = vsel %vm8320_vm7, %v4839_v43, %v8256_v33 }
 0x2c1   : > { %v6344_v22 = vpop.f32.mrf.mxu1  ;;  %vm4807_vm11 = vcmp.ne.s32.totalorder %v8236_v24, 0  ;;  %vm4817_vm12 = vcmp.lt.s32.totalorder %v8236_v24, 0  ;;  %v4837_v42 = vadd.s32 10, %v8236_v24  ;;  %vm8303_vm3 = vmand %vm4818_vm14, %vm4808_vm13  ;;  %vm8398_vm15 = vcmp.lt.s32.totalorder %v4849_v1, 8 }
 0x2c2   : > { %v6364_v53 = vpop.f32.mrf.mxu0  ;;  %vm8291_vm2 = vmand %vm4817_vm12, %vm4807_vm11  ;;  %v4848_v41 = vsel %vm8303_vm3, %v4838_v6, %v8249_v50  ;;  %vm4896_vm11 = vcmask 523264   ;;  %v8361_v50 = vsub.s32 %v8214_v10, %v4769_v34  ;;  %v4307_v6 = vadd.f32 %v8171_v55, %v4142_v49 }
 0x2c3   : > { %v8210_v47 = vpop.f32.mrf.mxu1  ;;  %v4847_v9 = vsel %vm8291_vm2, %v4837_v42, %v8236_v24  ;;  %v8358_v24 = vadd.s32 10, %v8281_v58  ;;  %vm8370_vm12 = vmand %vm4821_vm9, %vm4811_vm8  ;;  %vm8384_vm14 = vcmp.lt.s32.totalorder %v4848_v41, 8  ;;  %v8393_v42 = vadd.s32 72, %v8161_v15 }
 0x2c4   : > { %v8203_v25 = vpop.f32.mrf.mxu0  ;;  %vm8380_vm13 = vcmp.lt.s32.totalorder %v4847_v9, 8  ;;  %vm4812_vm0 = vcmp.ne.s32.totalorder %v8361_v50, 0  ;;  %vm4822_vm2 = vcmp.lt.s32.totalorder %v8361_v50, 0  ;;  %v4143_v55 = vadd.f32 %v8165_v8, %v8139_v38 }
 0x2c5   : > { %v6345_v23 = vpop.f32.mrf.mxu1  ;;  %vm8428_vm3 = vmand %vm4822_vm2, %vm4812_vm0 }
 0x2c6   : > { %v6365_v40 = vpop.f32.mrf.mxu0  ;;  %v8284_v23 = vadd.s32 64, %v8161_v15  ;;  %v8409_v15 = vadd.s32 10, %v8361_v50 }
 0x2c7   : > { %v8222_v0 = vpop.f32.mrf.mxu1  ;;  %v8273_v2 = vmul.u32.u64.low 3435973837, %v8252_v20  ;;  %v8274_v40 = vmul.u32.u64.high 3435973837, %v8252_v20, %v8273_v2 }
 0x2c8   : > { %v8219_v62 = vpop.f32.mrf.mxu0  ;;  %v8335_v31 = vmul.u32.u64.low 3435973837, %v8284_v23  ;;  %v8336_v16 = vmul.u32.u64.high 3435973837, %v8284_v23, %v8335_v31  ;;  %v4852_v28 = vsel %vm8428_vm3, %v8409_v15, %v8361_v50 }
 0x2c9   : > { %v6348_v4 = vpop.f32.mrf.mxu1  ;;  %v4779_v33 = vshrl.u32 %v8274_v40, 3  ;;  %v4850_v40 = vsel %vm8350_vm10, %v8325_v12, %v8266_v54  ;;  %v4851_v54 = vsel %vm8370_vm12, %v8358_v24, %v8281_v58  ;;  %vm8492_vm9 = vcmp.lt.s32.totalorder %v4852_v28, 8 }
 0x2ca   : > { %v6368_v14 = vpop.f32.mrf.mxu0  ;;  %v4790_v58 = vshrl.u32 %v8336_v16, 3  ;;  %v4144_v16 = vadd.f32 %v8174_v19, %v8141_v5  ;;  %vm8436_vm4 = vcmp.lt.s32.totalorder %v4850_v40, 8  ;;  %vm8458_vm5 = vcmp.lt.s32.totalorder %v4851_v54, 8 }
 0x2cb   : > { %v8238_v35 = vpop.f32.mrf.mxu1  ;;  %v4780_v52 = vmul.u32 10, %v4779_v33 }
 0x2cc   : > { %v8232_v17 = vpop.f32.mrf.mxu0  ;;  %v4309_v5 = vadd.f32 %v8190_v48, %v4144_v16  ;;  %v4145_v48 = vadd.f32 %v8183_v29, %v8143_v59 }
 0x2cd   : > { %v6349_v53 = vpop.f32.mrf.mxu1 }
 0x2ce   : > { %v6369_v37 = vpop.f32.mrf.mxu0  ;;  %v4310_v59 = vadd.f32 %v8203_v25, %v4145_v48 }
 0x2cf   : > { %v4438_v22 = vpop.f32.mrf.mxu1 }
 0x2d0   : > { %v8254_v30 = vpop.f32.mrf.mxu0  ;;  %v4477_v39 = vadd.f32 %v4438_v22, %v4305_v44  ;;  %v8444_v44 = vsub.s32 %v8252_v20, %v4780_v52 }
 0x2d1   : > { %v6380_v32 = vpop.f32.mrf.mxu1 }
 0x2d2   : > { %v6372_v56 = vpop.f32.mrf.mxu0  ;;  %vm4823_vm7 = vcmp.lt.s32.totalorder %v8444_v44, 0 }
 0x2d3   : > { %v4441_v3 = vpop.f32.mrf.mxu1 }
 0x2d4   : > { %v8276_v36 = vpop.f32.mrf.mxu0  ;;  %v4478_v2 = vadd.f32 %v4441_v3, %v4306_v11  ;;  %v8418_v31 = vmul.u32.u64.low 3435973837, %v8393_v42  ;;  %v8419_v11 = vmul.u32.u64.high 3435973837, %v8393_v42, %v8418_v31 }
 0x2d5   : > { %v6381_v61 = vpop.f32.mrf.mxu1  ;;  %v4146_v31 = vadd.f32 %v8198_v45, %v8145_v46 }
 0x2d6   : > { %v6373_v14 = vpop.f32.mrf.mxu0  ;;  %v4801_v54 = vshrl.u32 %v8419_v11, 3 }
 0x2d7   : > { %v4446_v56 = vpop.f32.mrf.mxu1  ;;  %v4311_v45 = vadd.f32 %v8219_v62, %v4146_v31 }
 0x2d8   : > { %v4568_v37 = vpop.f32.mrf.mxu0 }
 0x2d9   : > { %v4607_v53 = vadd.f32 %v4568_v37, %v4477_v39  ;;  %v6384_v10 = vpop.f32.mrf.mxu1  ;;  %v4479_v39 = vadd.f32 %v4446_v56, %v4307_v6 }
 0x2da   : > { %v6404_v26 = vpop.f32.mrf.mxu0 }
 0x2db   : > { %v4624_v32 = vadd.f32 %v8330_v21, %v4607_v53  ;;  %v4449_v43 = vpop.f32.mrf.mxu1  ;;  %v4308_v53 = vadd.f32 %v8177_v51, %v4143_v55 }
 0x2dc   : > { %v4571_v27 = vpop.f32.mrf.mxu0 }
 0x2dd   : > { %v5575_v3 = vpack.c.bf16 %v4624_v32, %v4624_v32  ;;  %v4886_v14 = vsel %vm8312_vm6, %v4624_v32, 0.0  ;;  %v4608_v7 = vadd.f32 %v4571_v27, %v4478_v2  ;;  %v6385_v61 = vpop.f32.mrf.mxu1  ;;  %v4480_v49 = vadd.f32 %v4449_v43, %v4308_v53 }
 0x2de   : > { %v6405_v34 = vpop.f32.mrf.mxu0  ;;  %v4924_v12 = vmul.f32 %v4886_v14, %v4886_v14  ;;  %v4897_v22 = vsel %vm4896_vm11, %v4886_v14, 0.0  ;;  %vm4813_vm6 = vcmp.ne.s32.totalorder %v8444_v44, 0 }
 0x2df   : > { %4675 = vst.msk [vmem:[%s8378_s16] sm:$0xf] %vm4674_vm1, %v5575_v3  ;;  %v4625_v4 = vadd.f32 %v8330_v21, %v4608_v7  ;;  %v4454_v26 = vpop.f32.mrf.mxu1  ;;  %vm8483_vm8 = vmand %vm4823_vm7, %vm4813_vm6 }
 0x2e0   : > { %v4576_v37 = vpop.f32.mrf.mxu0  ;;  %v4934_v19 = vsel %vm4896_vm11, %v4924_v12, 0.0  ;;  %v4481_v50 = vadd.f32 %v4454_v26, %v4309_v5 }
 0x2e1   : > { %v5576_v9 = vpack.c.bf16 %v4625_v4, %v4625_v4  ;;  %v4887_v38 = vsel %vm8380_vm13, %v4625_v4, 0.0  ;;  %v4609_v8 = vadd.f32 %v4576_v37, %v4479_v39  ;;  %v6388_v10 = vpop.f32.mrf.mxu1  ;;  %v4791_v39 = vmul.u32 10, %v4790_v58 }
 0x2e2   : > { %v4898_v51 = vsel %vm4896_vm11, %v4887_v38, 0.0  ;;  %v4925_v56 = vmul.f32 %v4887_v38, %v4887_v38  ;;  %v6408_v1 = vpop.f32.mrf.mxu0 }
 0x2e3   : > { %4676 = vst.msk [vmem:[%s8378_s16 + $0x4] sm:$0xf] %vm4674_vm1, %v5576_v9  ;;  %v4899_v2 = vadd.f32 %v4898_v51, %v4897_v22  ;;  %v4626_v32 = vadd.f32 %v8330_v21, %v4609_v8  ;;  %v4457_v43 = vpop.f32.mrf.mxu1  ;;  %v4843_v8 = vadd.s32 10, %v8444_v44  ;;  %v8488_v46 = vsub.s32 %v8284_v23, %v4791_v39 }
 0x2e4   : > { %v4935_v33 = vsel %vm4896_vm11, %v4925_v56, 0.0  ;;  %v4579_v27 = vpop.f32.mrf.mxu0  ;;  %v4482_v41 = vadd.f32 %v4457_v43, %v4310_v59  ;;  %v4802_v1 = vmul.u32 10, %v4801_v54  ;;  %v4147_v23 = vadd.f32 %v8210_v47, %v8147_v18 }
 0x2e5   : > { %v4936_v40 = vadd.f32 %v4935_v33, %v4934_v19  ;;  %v5577_v6 = vpack.c.bf16 %v4626_v32, %v4626_v32  ;;  %v4888_v20 = vsel %vm8384_vm14, %v4626_v32, 0.0  ;;  %v4610_v3 = vadd.f32 %v4579_v27, %v4480_v49  ;;  %v6389_v4 = vpop.f32.mrf.mxu1 }
 0x2e6   : > { %v4900_v14 = vsel %vm4896_vm11, %v4888_v20, 0.0  ;;  %v4926_v7 = vmul.f32 %v4888_v20, %v4888_v20  ;;  %v6409_v34 = vpop.f32.mrf.mxu0  ;;  %v4853_v27 = vsel %vm8483_vm8, %v4843_v8, %v8444_v44  ;;  %vm4814_vm10 = vcmp.ne.s32.totalorder %v8488_v46, 0 }
 0x2e7   : > { %4677 = vst.msk [vmem:[%s8378_s16 + $0x8] sm:$0xf] %vm4674_vm1, %v5577_v6  ;;  %v4901_v15 = vadd.f32 %v4900_v14, %v4899_v2  ;;  %v4627_v57 = vadd.f32 %v8330_v21, %v4610_v3  ;;  %v4462_v9 = vpop.f32.mrf.mxu1  ;;  %v4312_v6 = vadd.f32 %v8232_v17, %v4147_v23  ;;  %vm4824_vm12 = vcmp.lt.s32.totalorder %v8488_v46, 0 }
 0x2e8   : > { %v4937_v29 = vsel %vm4896_vm11, %v4926_v7, 0.0  ;;  %v4584_v52 = vpop.f32.mrf.mxu0  ;;  %v4483_v28 = vadd.f32 %v4462_v9, %v4311_v45  ;;  %v8512_v3 = vsub.s32 %v8393_v42, %v4802_v1  ;;  %v4148_v43 = vadd.f32 %v8222_v0, %v8149_v60  ;;  %vm8531_vm14 = vmand %vm4824_vm12, %vm4814_vm10 }
 0x2e9   : > { %v4938_v12 = vadd.f32 %v4937_v29, %v4936_v40  ;;  %v5578_v61 = vpack.c.bf16 %v4627_v57, %v4627_v57  ;;  %v4889_v37 = vsel %vm8398_vm15, %v4627_v57, 0.0  ;;  %v4611_v58 = vadd.f32 %v4584_v52, %v4481_v50  ;;  %v6392_v51 = vpop.f32.mrf.mxu1 }
 0x2ea   : > { %v4902_v25 = vsel %vm4896_vm11, %v4889_v37, 0.0  ;;  %v4927_v53 = vmul.f32 %v4889_v37, %v4889_v37  ;;  %v6412_v38 = vpop.f32.mrf.mxu0  ;;  %vm8523_vm13 = vcmp.lt.s32.totalorder %v4853_v27, 8  ;;  %v4313_v0 = vadd.f32 %v8254_v30, %v4148_v43 }
 0x2eb   : > { %4678 = vst.msk [vmem:[%s8378_s16 + $0xc] sm:$0xf] %vm4674_vm1, %v5578_v61  ;;  %v4903_v11 = vadd.f32 %v4902_v25, %v4901_v15  ;;  %v4628_v16 = vadd.f32 %v8330_v21, %v4611_v58  ;;  %v4465_v33 = vpop.f32.mrf.mxu1  ;;  %v4844_v15 = vadd.s32 10, %v8488_v46  ;;  %vm4815_vm15 = vcmp.ne.s32.totalorder %v8512_v3, 0 }
 0x2ec   : > { %v4939_v22 = vsel %vm4896_vm11, %v4927_v53, 0.0  ;;  %v4587_v56 = vpop.f32.mrf.mxu0  ;;  %v4484_v57 = vadd.f32 %v4465_v33, %v4312_v6  ;;  %vm4825_vm0 = vcmp.lt.s32.totalorder %v8512_v3, 0  ;;  %v4149_v58 = vadd.f32 %v8238_v35, %v8153_v63 }
 0x2ed   : > { %v4940_v49 = vadd.f32 %v4939_v22, %v4938_v12  ;;  %v5579_v2 = vpack.c.bf16 %v4628_v16, %v4628_v16  ;;  %v4890_v32 = vsel %vm8436_vm4, %v4628_v16, 0.0  ;;  %v4612_v5 = vadd.f32 %v4587_v56, %v4482_v41  ;;  %v6393_v47 = vpop.f32.mrf.mxu1  ;;  %vm8557_vm2 = vmand %vm4825_vm0, %vm4815_vm15 }
 0x2ee   : > { %v4904_v62 = vsel %vm4896_vm11, %v4890_v32, 0.0  ;;  %v4928_v19 = vmul.f32 %v4890_v32, %v4890_v32  ;;  %v6413_v10 = vpop.f32.mrf.mxu0  ;;  %v4854_v9 = vsel %vm8531_vm14, %v4844_v15, %v8488_v46  ;;  %v4314_v63 = vadd.f32 %v8276_v36, %v4149_v58 }
 0x2ef   : > { %4679 = vst.msk [vmem:[%s8378_s16 + $0x10] sm:$0xf] %vm4674_vm1, %v5579_v2  ;;  %v4905_v40 = vadd.f32 %v4904_v62, %v4903_v11  ;;  %v4629_v24 = vadd.f32 %v8330_v21, %v4612_v5  ;;  %v4470_v39 = vpop.f32.mrf.mxu1  ;;  %v4845_v11 = vadd.s32 10, %v8512_v3  ;;  %vm4864_vm3 = vcmp.lt.s32.totalorder %v4854_v9, 8 }
 0x2f0   : > { %v4941_v18 = vsel %vm4896_vm11, %v4928_v19, 0.0  ;;  %v4592_v20 = vpop.f32.mrf.mxu0  ;;  %v4485_v38 = vadd.f32 %v4470_v39, %v4313_v0 }
 0x2f1   : > { %v4942_v44 = vadd.f32 %v4941_v18, %v4940_v49  ;;  %v5580_v48 = vpack.c.bf16 %v4629_v24, %v4629_v24  ;;  %v4891_v14 = vsel %vm8458_vm5, %v4629_v24, 0.0  ;;  %v4613_v7 = vadd.f32 %v4592_v20, %v4483_v28  ;;  %v6396_v4 = vpop.f32.mrf.mxu1 }
 0x2f2   : > { %v4906_v17 = vsel %vm4896_vm11, %v4891_v14, 0.0  ;;  %v4929_v34 = vmul.f32 %v4891_v14, %v4891_v14  ;;  %v6416_v50 = vpop.f32.mrf.mxu0  ;;  %v4855_v5 = vsel %vm8557_vm2, %v4845_v11, %v8512_v3 }
 0x2f3   : > { %4680 = vst.msk [vmem:[%s8378_s16 + $0x14] sm:$0xf] %vm4674_vm1, %v5580_v48  ;;  %v4907_v42 = vadd.f32 %v4906_v17, %v4905_v40  ;;  %v4630_v59 = vadd.f32 %v8330_v21, %v4613_v7  ;;  %v4473_v25 = vpop.f32.mrf.mxu1  ;;  %vm4865_vm4 = vcmp.lt.s32.totalorder %v4855_v5, 8 }
 0x2f4   : > { %v4943_v29 = vsel %vm4896_vm11, %v4929_v34, 0.0  ;;  %v4595_v52 = vpop.f32.mrf.mxu0  ;;  %v4486_v49 = vadd.f32 %v4473_v25, %v4314_v63 }
 0x2f5   : > { %v4944_v54 = vadd.f32 %v4943_v29, %v4942_v44  ;;  %v5581_v12 = vpack.c.bf16 %v4630_v59, %v4630_v59  ;;  %v4892_v61 = vsel %vm8492_vm9, %v4630_v59, 0.0  ;;  %v4614_v37 = vadd.f32 %v4595_v52, %v4484_v57  ;;  %v6397_v16 = vpop.f32.mrf.mxu1 }
 0x2f6   : > { %v4908_v30 = vsel %vm4896_vm11, %v4892_v61, 0.0  ;;  %v4930_v31 = vmul.f32 %v4892_v61, %v4892_v61  ;;  %v6417_v53 = vpop.f32.mrf.mxu0 }
 0x2f7   : > { %4681 = vst.msk [vmem:[%s8378_s16 + $0x18] sm:$0xf] %vm4674_vm1, %v5581_v12  ;;  %v4909_v8 = vadd.f32 %v4908_v30, %v4907_v42  ;;  %v4631_v41 = vadd.f32 %v8330_v21, %v4614_v37 }
 0x2f8   : > { %v4945_v35 = vsel %vm4896_vm11, %v4930_v31, 0.0  ;;  %v4600_v13 = vpop.f32.mrf.mxu0 }
 0x2f9   : > { %v4946_v45 = vadd.f32 %v4945_v35, %v4944_v54  ;;  %v5582_v22 = vpack.c.bf16 %v4631_v41, %v4631_v41  ;;  %v4893_v51 = vsel %vm8523_vm13, %v4631_v41, 0.0  ;;  %v4615_v56 = vadd.f32 %v4600_v13, %v4485_v38 }
 0x2fa   : > { %v4910_v36 = vsel %vm4896_vm11, %v4893_v51, 0.0  ;;  %v4931_v26 = vmul.f32 %v4893_v51, %v4893_v51  ;;  %v6420_v1 = vpop.f32.mrf.mxu0 }
 0x2fb   : > { %4682 = vst.msk [vmem:[%s8378_s16 + $0x1c] sm:$0xf] %vm4674_vm1, %v5582_v22  ;;  %v4911_v2 = vadd.f32 %v4910_v36, %v4909_v8  ;;  %v4632_v32 = vadd.f32 %v8330_v21, %v4615_v56 }
 0x2fc   : > { %v4947_v23 = vsel %vm4896_vm11, %v4931_v26, 0.0  ;;  %v4603_v62 = vpop.f32.mrf.mxu0 }
 0x2fd   : > { %v4948_v19 = vadd.f32 %v4947_v23, %v4946_v45  ;;  %v5583_v33 = vpack.c.bf16 %v4632_v32, %v4632_v32  ;;  %v4894_v10 = vsel %vm4864_vm3, %v4632_v32, 0.0  ;;  %v4616_v27 = vadd.f32 %v4603_v62, %v4486_v49 }
 0x2fe   : > { %v4912_v28 = vsel %vm4896_vm11, %v4894_v10, 0.0  ;;  %v4932_v40 = vmul.f32 %v4894_v10, %v4894_v10  ;;  %v6421_v24 = vpop.f32.mrf.mxu0 }
 0x2ff   : > { %4683 = vst.msk [vmem:[%s8378_s16 + $0x20] sm:$0xf] %vm4674_vm1, %v5583_v33  ;;  %v4913_v6 = vadd.f32 %v4912_v28, %v4911_v2  ;;  %v4633_v18 = vadd.f32 %v8330_v21, %v4616_v27 }
 0x300   : > { %v4949_v47 = vsel %vm4896_vm11, %v4932_v40, 0.0 }
 0x301   : > { %v4950_v20 = vadd.f32 %v4949_v47, %v4948_v19  ;;  %v5584_v3 = vpack.c.bf16 %v4633_v18, %v4633_v18  ;;  %v4895_v44 = vsel %vm4865_vm4, %v4633_v18, 0.0 }
 0x302   : > { %v4914_v48 = vsel %vm4896_vm11, %v4895_v44, 0.0  ;;  %v4933_v14 = vmul.f32 %v4895_v44, %v4895_v44 }
 0x303   : > { %4684 = vst.msk [vmem:[%s8378_s16 + $0x24] sm:$0xf] %vm4674_vm1, %v5584_v3  ;;  %v4915_v7 = vadd.f32 %v4914_v48, %v4913_v6  ;;  %vm4922_vm1 = vcmask 516096  }
 0x304   : > { %v4951_v43 = vsel %vm4896_vm11, %v4933_v14, 0.0 }
 0x305   : > { %v4916_v17 = vrot.slane %v4915_v7, 4  ;;  %v4952_v34 = vadd.f32 %v4951_v43, %v4950_v20 }
 0x307   : > { %v4917_v39 = vadd.f32 %v4916_v17, %v4915_v7  ;;  %v4953_v50 = vrot.slane %v4952_v34, 4 }
 0x309   : > { %v4918_v21 = vrot.slane %v4917_v39, 2  ;;  %v4954_v15 = vadd.f32 %v4953_v50, %v4952_v34 }
 0x30b   : > { %v4919_v57 = vadd.f32 %v4918_v21, %v4917_v39  ;;  %v4955_v42 = vrot.slane %v4954_v15, 2 }
 0x30d   : > { %v4920_v59 = vrot.slane %v4919_v57, 1  ;;  %v4956_v55 = vadd.f32 %v4955_v42, %v4954_v15 }
 0x30f   : > { %v4921_v60 = vadd.f32 %v4920_v59, %v4919_v57  ;;  %v4957_v0 = vrot.slane %v4956_v55, 1 }
 0x311   : > { %4923 = vst.msk [vmem:[%s426_s20] sm:$0x1] %vm4922_vm1, %v4921_v60  ;;  %v4958_v29 = vadd.f32 %v4957_v0, %v4956_v55 }
 0x313   : > { %4959 = vst.msk [vmem:[%s433_s10] sm:$0x1] %vm4922_vm1, %v4958_v29 }
 0x314 PF: > { %s18_s28 = sadd.s32 1, %s6665_s28   ;;  %s8647_s24 = smov %s6657_s26 }
 0x315   : > { %p15_p10 = scmp.ge.s32.totalorder %s18_s28, 18   ;;  %s8648_s25 = smov %s6661_s27 }
 0x316   : > { %s8649_s26 = smov %s8652_s29  ;;  %s8650_s27 = smov %s8656_s30 }
 0x317   :  { %17 = sbr.rel (!%p15_p10) target bundleno = 3 (0x3), region = 126 }

</bundles_post_ra>
